<compile_context>
chip_gen: v5e
topology: v5e:2x2
jax: 0.10.0
libtpu: 0.0.40
codegen_flags: <defaults>
</compile_context>

<pallas_src>
import math
from functools import partial

import jax
import jax.numpy as jnp
from jax.experimental import pallas as pl
from jax.experimental.pallas import tpu as pltpu

_BN_EPS = 1e-5

LAYERS_CONFIG = [(3, 16), (16, 32), (32, 48), (48, 64), (64, 80),
                 (80, 96), (96, 112), (112, 128), (128, 144)]
_OUT_F = LAYERS_CONFIG[-1][1]          # 144


def _round_up(v, m):
    return ((v + m - 1) // m) * m


# Row offset of each layer's weight inside the packed bf16 buffer.  Offsets are
# multiples of 16 so static slices stay aligned to bf16 sublane tiles.
_W_OFFSETS = []
_off = 0
for _in_f, _ in LAYERS_CONFIG:
    _W_OFFSETS.append(_off)
    _off += _round_up(_in_f, 16)
_W_ROWS = _off                          # 592


def _encoder_kernel(x_ref, adj_ref, pool_ref, w_ref, o_ref):
    """Fused 9-layer GCN encoder over one block of GB independent graphs.

    x_ref:    (1, GB*N, 3)       f32   node features (graphs stacked on rows)
    adj_ref:  (1, GB*N, GB*N)    bf16  block-diagonal row-normalized adjacency
    pool_ref: (GB*N, GB*N)       bf16  block-diagonal per-graph mean matrix
    w_ref:    (_W_ROWS, 144)     bf16  all nine weights, row-packed
    o_ref:    (1, GB*N, 144)     f32   encoder output
    """
    adj = adj_ref[0]                         # bf16, reused across all layers
    pool = pool_ref[...]                     # bf16 per-graph averaging matrix
    h = x_ref[0].astype(jnp.float32)         # activations carried in f32
    n_layers = len(LAYERS_CONFIG)

    for i, (in_f, out_f) in enumerate(LAYERS_CONFIG):      # static unroll
        off = _W_OFFSETS[i]
        w = w_ref[off:off + in_f, :out_f]    # bf16 (in_f, out_f), static slice

        # aggregate-then-project: (adj @ h) @ W  ==  adj @ (h @ W).
        # bf16 MXU operands, f32 accumulation; both matmuls see M = GB*N rows.
        agg = jnp.dot(adj, h.astype(jnp.bfloat16),
                      preferred_element_type=jnp.float32)
        h = jnp.dot(agg.astype(jnp.bfloat16), w,
                    preferred_element_type=jnp.float32)

        if i < n_layers - 1:
            # BatchNorm1d(affine=False) per graph + ReLU.  Per-graph mean and
            # E[x^2] via the block-diagonal pooling matrix on the MXU (which
            # has slack between the dependent layer dots), so no cross-sublane
            # XLU reductions are needed; rsqrt on the EUP; normalize fused
            # with the ReLU.
            hb = h.astype(jnp.bfloat16)
            mean = jnp.dot(pool, hb, preferred_element_type=jnp.float32)
            ex2 = jnp.dot(pool, (h * h).astype(jnp.bfloat16),
                          preferred_element_type=jnp.float32)
            var = jnp.maximum(ex2 - mean * mean, 0.0)
            scale = jax.lax.rsqrt(var + _BN_EPS)
            h = jnp.maximum((h - mean) * scale, 0.0)

    o_ref[0] = h.astype(o_ref.dtype)


def init_encoder_params(key):
    """Matches GCNLayer.reset_parameters: W ~ U(-std, std), std = 1/sqrt(out)."""
    params = []
    for (in_f, out_f) in LAYERS_CONFIG:
        key, sub = jax.random.split(key)
        std = 1.0 / math.sqrt(out_f)
        w = jax.random.uniform(sub, (in_f, out_f), dtype=jnp.float32,
                               minval=-std, maxval=std)
        params.append(w)
    return params


def pack_weights(params):
    """Pack the 9 weight matrices into one lane-dense bf16 (592, 144) buffer."""
    packed = jnp.zeros((_W_ROWS, _OUT_F), jnp.bfloat16)
    for (in_f, out_f), off, w in zip(LAYERS_CONFIG, _W_OFFSETS, params):
        packed = packed.at[off:off + in_f, :out_f].set(w.astype(jnp.bfloat16))
    return packed


@partial(jax.jit, static_argnames=("graphs_per_block",))
def encoder_forward(x, adj, w_packed, *, graphs_per_block=8):
    """Batched encoder forward.

    x:   (B, N, 3) float32 node features (B independent graphs)
    adj: (B, N, N) dense row-normalized adjacency, one per graph
    Returns (B, N, 144); graph b's slice equals the original single-graph
    Encoder.forward(x[b], adj[b]) (per-graph BatchNorm statistics).
    """
    b, n, in_f = x.shape
    gb = graphs_per_block
    assert b % gb == 0, "batch must be divisible by graphs_per_block"
    s = b // gb
    gbn = gb * n                                # keep ~128-256 for MXU rows

    x = x.astype(jnp.float32)
    x_r = x.reshape(s, gbn, in_f)

    # Block-diagonal adjacency per graph-block (bf16 to halve DMA + feed MXU).
    adj_r = adj.astype(jnp.float32).reshape(s, gb, n, n)
    eye = jnp.eye(gb, dtype=jnp.float32)
    adj_bd = (adj_r[:, :, None, :, :] * eye[None, :, :, None, None])
    adj_bd = adj_bd.transpose(0, 1, 3, 2, 4).reshape(s, gbn, gbn)
    adj_bd = adj_bd.astype(jnp.bfloat16)

    # Block-diagonal per-graph mean-pooling matrix (1/N within a graph).
    pool = jnp.kron(jnp.eye(gb, dtype=jnp.float32),
                    jnp.full((n, n), 1.0 / n, dtype=jnp.float32))
    pool = pool.astype(jnp.bfloat16)

    # Advisory cost estimate (actual kernel work).
    flops = 0
    for fi, fo in LAYERS_CONFIG:
        flops += 2 * gbn * gbn * fi            # block-diag aggregation
        flops += 2 * gbn * fi * fo             # projection
    for fi, fo in LAYERS_CONFIG[:-1]:
        flops += 2 * 2 * gbn * gbn * fo        # two BN pooling matmuls
    flops *= s
    transcendentals = s * gbn * sum(fo for _, fo in LAYERS_CONFIG[:-1])
    bytes_accessed = (4 * x.size + 2 * adj_bd.size + 2 * pool.size
                      + 2 * w_packed.size + 4 * b * n * _OUT_F)

    out = pl.pallas_call(
        _encoder_kernel,
        out_shape=jax.ShapeDtypeStruct((s, gbn, _OUT_F), jnp.float32),
        grid=(s,),
        in_specs=[
            pl.BlockSpec((1, gbn, in_f), lambda g: (g, 0, 0)),
            pl.BlockSpec((1, gbn, gbn), lambda g: (g, 0, 0)),
            # same block every step -> pooling matrix / weights stay resident
            pl.BlockSpec((gbn, gbn), lambda g: (0, 0)),
            pl.BlockSpec((_W_ROWS, _OUT_F), lambda g: (0, 0)),
        ],
        out_specs=pl.BlockSpec((1, gbn, _OUT_F), lambda g: (g, 0, 0)),
        compiler_params=pltpu.CompilerParams(
            dimension_semantics=("parallel",)),      # shards over v7x's 2 TCs
        cost_estimate=pl.CostEstimate(flops=flops,
                                      transcendentals=transcendentals,
                                      bytes_accessed=bytes_accessed),
    )(x_r, adj_bd, pool, w_packed)

    return out.reshape(b, n, _OUT_F)


if __name__ == "__main__":
    key = jax.random.PRNGKey(0)
    k_x, k_adj, k_params = jax.random.split(key, 3)

    B, N = 16, 16                   # 16 independent graphs of 16 nodes each
    x = jax.random.normal(k_x, (B, N, 3), dtype=jnp.float32)

    # deterministic dense "adjacency": random symmetric with self-loops,
    # row-normalized, one per graph (forward semantics don't depend on how
    # adj was built).
    a = (jax.random.uniform(k_adj, (B, N, N)) > 0.7).astype(jnp.float32)
    a = jnp.maximum(a, jnp.swapaxes(a, -1, -2)) + jnp.eye(N, dtype=jnp.float32)
    adj = a / jnp.sum(a, axis=-1, keepdims=True)

    params = init_encoder_params(k_params)
    w_packed = pack_weights(params)

    out = encoder_forward(x, adj, w_packed, graphs_per_block=8)
    out = jax.block_until_ready(out)
    assert out.shape == (B, N, 144), out.shape
    assert bool(jnp.all(jnp.isfinite(out))), "non-finite output"
    print("KERNEL_OK")
</pallas_src>

<mosaic_0001>
module attributes {stable_mosaic.version = 11 : i64} {
  func.func @_encoder_kernel(%arg0: i32, %arg1: memref<1x128x3xf32, #tpu.memory_space<vmem>>, %arg2: memref<1x128x128xbf16, #tpu.memory_space<vmem>>, %arg3: memref<128x128xbf16, #tpu.memory_space<vmem>>, %arg4: memref<592x144xbf16, #tpu.memory_space<vmem>>, %arg5: memref<1x128x144xf32, #tpu.memory_space<vmem>>) attributes {dimension_semantics = [#tpu.dimension_semantics<parallel>], iteration_bounds = array<i64: 2>, scalar_prefetch = 0 : i64, scratch_operands = 0 : i64, tpu.core_type = #tpu.core_type<tc>, window_params = [{transform_indices = @transform_0, window_bounds = array<i64: 1, 128, 3>}, {transform_indices = @transform_1, window_bounds = array<i64: 1, 128, 128>}, {pipeline_mode = #tpu.pipeline_mode<synchronous>, transform_indices = @transform_2, window_bounds = array<i64: 128, 128>}, {pipeline_mode = #tpu.pipeline_mode<synchronous>, transform_indices = @transform_3, window_bounds = array<i64: 592, 144>}, {transform_indices = @transform_4, window_bounds = array<i64: 1, 128, 144>}]} {
    %c0 = arith.constant 0 : index
    %c0_0 = arith.constant 0 : index
    %c0_1 = arith.constant 0 : index
    %0 = vector.load %arg2[%c0, %c0_0, %c0_1] : memref<1x128x128xbf16, #tpu.memory_space<vmem>>, vector<1x128x128xbf16>
    %1 = vector.shape_cast %0 : vector<1x128x128xbf16> to vector<128x128xbf16>
    %c0_2 = arith.constant 0 : index
    %c0_3 = arith.constant 0 : index
    %2 = vector.load %arg3[%c0_2, %c0_3] : memref<128x128xbf16, #tpu.memory_space<vmem>>, vector<128x128xbf16>
    %c0_4 = arith.constant 0 : index
    %c0_5 = arith.constant 0 : index
    %c0_6 = arith.constant 0 : index
    %3 = vector.load %arg1[%c0_4, %c0_5, %c0_6] : memref<1x128x3xf32, #tpu.memory_space<vmem>>, vector<1x128x3xf32>
    %4 = vector.shape_cast %3 : vector<1x128x3xf32> to vector<128x3xf32>
    %c0_7 = arith.constant 0 : index
    %c0_8 = arith.constant 0 : index
    %5 = vector.load %arg4[%c0_7, %c0_8] : memref<592x144xbf16, #tpu.memory_space<vmem>>, vector<3x16xbf16>
    %6 = arith.truncf %4 : vector<128x3xf32> to vector<128x3xbf16>
    %cst = arith.constant dense<0.000000e+00> : vector<128x3xf32>
    %7 = tpu.matmul %1, %6, %cst {dimension_numbers = #tpu.dot_dimension_numbers<[1], [0], [0], [1], [0, 0, 1, 1], [], []>} : vector<128x128xbf16>, vector<128x3xbf16>, vector<128x3xf32> -> vector<128x3xf32>
    %8 = arith.truncf %7 : vector<128x3xf32> to vector<128x3xbf16>
    %cst_9 = arith.constant dense<0.000000e+00> : vector<128x16xf32>
    %9 = tpu.matmul %8, %5, %cst_9 {dimension_numbers = #tpu.dot_dimension_numbers<[1], [0], [0], [1], [0, 0, 1, 1], [], []>} : vector<128x3xbf16>, vector<3x16xbf16>, vector<128x16xf32> -> vector<128x16xf32>
    %10 = arith.truncf %9 : vector<128x16xf32> to vector<128x16xbf16>
    %cst_10 = arith.constant dense<0.000000e+00> : vector<128x16xf32>
    %11 = tpu.matmul %2, %10, %cst_10 {dimension_numbers = #tpu.dot_dimension_numbers<[1], [0], [0], [1], [0, 0, 1, 1], [], []>} : vector<128x128xbf16>, vector<128x16xbf16>, vector<128x16xf32> -> vector<128x16xf32>
    %12 = arith.mulf %9, %9 : vector<128x16xf32>
    %13 = arith.truncf %12 : vector<128x16xf32> to vector<128x16xbf16>
    %cst_11 = arith.constant dense<0.000000e+00> : vector<128x16xf32>
    %14 = tpu.matmul %2, %13, %cst_11 {dimension_numbers = #tpu.dot_dimension_numbers<[1], [0], [0], [1], [0, 0, 1, 1], [], []>} : vector<128x128xbf16>, vector<128x16xbf16>, vector<128x16xf32> -> vector<128x16xf32>
    %15 = arith.mulf %11, %11 : vector<128x16xf32>
    %16 = arith.subf %14, %15 : vector<128x16xf32>
    %cst_12 = arith.constant 0.000000e+00 : f32
    %17 = vector.broadcast %cst_12 : f32 to vector<128x16xf32>
    %18 = arith.maximumf %16, %17 : vector<128x16xf32>
    %cst_13 = arith.constant 9.99999974E-6 : f32
    %19 = vector.broadcast %cst_13 : f32 to vector<128x16xf32>
    %20 = arith.addf %18, %19 : vector<128x16xf32>
    %21 = math.rsqrt %20 : vector<128x16xf32>
    %22 = arith.subf %9, %11 : vector<128x16xf32>
    %23 = arith.mulf %22, %21 : vector<128x16xf32>
    %cst_14 = arith.constant 0.000000e+00 : f32
    %24 = vector.broadcast %cst_14 : f32 to vector<128x16xf32>
    %25 = arith.maximumf %23, %24 : vector<128x16xf32>
    %c16 = arith.constant 16 : index
    %c0_15 = arith.constant 0 : index
    %26 = vector.load %arg4[%c16, %c0_15] : memref<592x144xbf16, #tpu.memory_space<vmem>>, vector<16x32xbf16>
    %27 = arith.truncf %25 : vector<128x16xf32> to vector<128x16xbf16>
    %cst_16 = arith.constant dense<0.000000e+00> : vector<128x16xf32>
    %28 = tpu.matmul %1, %27, %cst_16 {dimension_numbers = #tpu.dot_dimension_numbers<[1], [0], [0], [1], [0, 0, 1, 1], [], []>} : vector<128x128xbf16>, vector<128x16xbf16>, vector<128x16xf32> -> vector<128x16xf32>
    %29 = arith.truncf %28 : vector<128x16xf32> to vector<128x16xbf16>
    %cst_17 = arith.constant dense<0.000000e+00> : vector<128x32xf32>
    %30 = tpu.matmul %29, %26, %cst_17 {dimension_numbers = #tpu.dot_dimension_numbers<[1], [0], [0], [1], [0, 0, 1, 1], [], []>} : vector<128x16xbf16>, vector<16x32xbf16>, vector<128x32xf32> -> vector<128x32xf32>
    %31 = arith.truncf %30 : vector<128x32xf32> to vector<128x32xbf16>
    %cst_18 = arith.constant dense<0.000000e+00> : vector<128x32xf32>
    %32 = tpu.matmul %2, %31, %cst_18 {dimension_numbers = #tpu.dot_dimension_numbers<[1], [0], [0], [1], [0, 0, 1, 1], [], []>} : vector<128x128xbf16>, vector<128x32xbf16>, vector<128x32xf32> -> vector<128x32xf32>
    %33 = arith.mulf %30, %30 : vector<128x32xf32>
    %34 = arith.truncf %33 : vector<128x32xf32> to vector<128x32xbf16>
    %cst_19 = arith.constant dense<0.000000e+00> : vector<128x32xf32>
    %35 = tpu.matmul %2, %34, %cst_19 {dimension_numbers = #tpu.dot_dimension_numbers<[1], [0], [0], [1], [0, 0, 1, 1], [], []>} : vector<128x128xbf16>, vector<128x32xbf16>, vector<128x32xf32> -> vector<128x32xf32>
    %36 = arith.mulf %32, %32 : vector<128x32xf32>
    %37 = arith.subf %35, %36 : vector<128x32xf32>
    %cst_20 = arith.constant 0.000000e+00 : f32
    %38 = vector.broadcast %cst_20 : f32 to vector<128x32xf32>
    %39 = arith.maximumf %37, %38 : vector<128x32xf32>
    %cst_21 = arith.constant 9.99999974E-6 : f32
    %40 = vector.broadcast %cst_21 : f32 to vector<128x32xf32>
    %41 = arith.addf %39, %40 : vector<128x32xf32>
    %42 = math.rsqrt %41 : vector<128x32xf32>
    %43 = arith.subf %30, %32 : vector<128x32xf32>
    %44 = arith.mulf %43, %42 : vector<128x32xf32>
    %cst_22 = arith.constant 0.000000e+00 : f32
    %45 = vector.broadcast %cst_22 : f32 to vector<128x32xf32>
    %46 = arith.maximumf %44, %45 : vector<128x32xf32>
    %c32 = arith.constant 32 : index
    %c0_23 = arith.constant 0 : index
    %47 = vector.load %arg4[%c32, %c0_23] : memref<592x144xbf16, #tpu.memory_space<vmem>>, vector<32x48xbf16>
    %48 = arith.truncf %46 : vector<128x32xf32> to vector<128x32xbf16>
    %cst_24 = arith.constant dense<0.000000e+00> : vector<128x32xf32>
    %49 = tpu.matmul %1, %48, %cst_24 {dimension_numbers = #tpu.dot_dimension_numbers<[1], [0], [0], [1], [0, 0, 1, 1], [], []>} : vector<128x128xbf16>, vector<128x32xbf16>, vector<128x32xf32> -> vector<128x32xf32>
    %50 = arith.truncf %49 : vector<128x32xf32> to vector<128x32xbf16>
    %cst_25 = arith.constant dense<0.000000e+00> : vector<128x48xf32>
    %51 = tpu.matmul %50, %47, %cst_25 {dimension_numbers = #tpu.dot_dimension_numbers<[1], [0], [0], [1], [0, 0, 1, 1], [], []>} : vector<128x32xbf16>, vector<32x48xbf16>, vector<128x48xf32> -> vector<128x48xf32>
    %52 = arith.truncf %51 : vector<128x48xf32> to vector<128x48xbf16>
    %cst_26 = arith.constant dense<0.000000e+00> : vector<128x48xf32>
    %53 = tpu.matmul %2, %52, %cst_26 {dimension_numbers = #tpu.dot_dimension_numbers<[1], [0], [0], [1], [0, 0, 1, 1], [], []>} : vector<128x128xbf16>, vector<128x48xbf16>, vector<128x48xf32> -> vector<128x48xf32>
    %54 = arith.mulf %51, %51 : vector<128x48xf32>
    %55 = arith.truncf %54 : vector<128x48xf32> to vector<128x48xbf16>
    %cst_27 = arith.constant dense<0.000000e+00> : vector<128x48xf32>
    %56 = tpu.matmul %2, %55, %cst_27 {dimension_numbers = #tpu.dot_dimension_numbers<[1], [0], [0], [1], [0, 0, 1, 1], [], []>} : vector<128x128xbf16>, vector<128x48xbf16>, vector<128x48xf32> -> vector<128x48xf32>
    %57 = arith.mulf %53, %53 : vector<128x48xf32>
    %58 = arith.subf %56, %57 : vector<128x48xf32>
    %cst_28 = arith.constant 0.000000e+00 : f32
    %59 = vector.broadcast %cst_28 : f32 to vector<128x48xf32>
    %60 = arith.maximumf %58, %59 : vector<128x48xf32>
    %cst_29 = arith.constant 9.99999974E-6 : f32
    %61 = vector.broadcast %cst_29 : f32 to vector<128x48xf32>
    %62 = arith.addf %60, %61 : vector<128x48xf32>
    %63 = math.rsqrt %62 : vector<128x48xf32>
    %64 = arith.subf %51, %53 : vector<128x48xf32>
    %65 = arith.mulf %64, %63 : vector<128x48xf32>
    %cst_30 = arith.constant 0.000000e+00 : f32
    %66 = vector.broadcast %cst_30 : f32 to vector<128x48xf32>
    %67 = arith.maximumf %65, %66 : vector<128x48xf32>
    %c64 = arith.constant 64 : index
    %c0_31 = arith.constant 0 : index
    %68 = vector.load %arg4[%c64, %c0_31] : memref<592x144xbf16, #tpu.memory_space<vmem>>, vector<48x64xbf16>
    %69 = arith.truncf %67 : vector<128x48xf32> to vector<128x48xbf16>
    %cst_32 = arith.constant dense<0.000000e+00> : vector<128x48xf32>
    %70 = tpu.matmul %1, %69, %cst_32 {dimension_numbers = #tpu.dot_dimension_numbers<[1], [0], [0], [1], [0, 0, 1, 1], [], []>} : vector<128x128xbf16>, vector<128x48xbf16>, vector<128x48xf32> -> vector<128x48xf32>
    %71 = arith.truncf %70 : vector<128x48xf32> to vector<128x48xbf16>
    %cst_33 = arith.constant dense<0.000000e+00> : vector<128x64xf32>
    %72 = tpu.matmul %71, %68, %cst_33 {dimension_numbers = #tpu.dot_dimension_numbers<[1], [0], [0], [1], [0, 0, 1, 1], [], []>} : vector<128x48xbf16>, vector<48x64xbf16>, vector<128x64xf32> -> vector<128x64xf32>
    %73 = arith.truncf %72 : vector<128x64xf32> to vector<128x64xbf16>
    %cst_34 = arith.constant dense<0.000000e+00> : vector<128x64xf32>
    %74 = tpu.matmul %2, %73, %cst_34 {dimension_numbers = #tpu.dot_dimension_numbers<[1], [0], [0], [1], [0, 0, 1, 1], [], []>} : vector<128x128xbf16>, vector<128x64xbf16>, vector<128x64xf32> -> vector<128x64xf32>
    %75 = arith.mulf %72, %72 : vector<128x64xf32>
    %76 = arith.truncf %75 : vector<128x64xf32> to vector<128x64xbf16>
    %cst_35 = arith.constant dense<0.000000e+00> : vector<128x64xf32>
    %77 = tpu.matmul %2, %76, %cst_35 {dimension_numbers = #tpu.dot_dimension_numbers<[1], [0], [0], [1], [0, 0, 1, 1], [], []>} : vector<128x128xbf16>, vector<128x64xbf16>, vector<128x64xf32> -> vector<128x64xf32>
    %78 = arith.mulf %74, %74 : vector<128x64xf32>
    %79 = arith.subf %77, %78 : vector<128x64xf32>
    %cst_36 = arith.constant 0.000000e+00 : f32
    %80 = vector.broadcast %cst_36 : f32 to vector<128x64xf32>
    %81 = arith.maximumf %79, %80 : vector<128x64xf32>
    %cst_37 = arith.constant 9.99999974E-6 : f32
    %82 = vector.broadcast %cst_37 : f32 to vector<128x64xf32>
    %83 = arith.addf %81, %82 : vector<128x64xf32>
    %84 = math.rsqrt %83 : vector<128x64xf32>
    %85 = arith.subf %72, %74 : vector<128x64xf32>
    %86 = arith.mulf %85, %84 : vector<128x64xf32>
    %cst_38 = arith.constant 0.000000e+00 : f32
    %87 = vector.broadcast %cst_38 : f32 to vector<128x64xf32>
    %88 = arith.maximumf %86, %87 : vector<128x64xf32>
    %c112 = arith.constant 112 : index
    %c0_39 = arith.constant 0 : index
    %89 = vector.load %arg4[%c112, %c0_39] : memref<592x144xbf16, #tpu.memory_space<vmem>>, vector<64x80xbf16>
    %90 = arith.truncf %88 : vector<128x64xf32> to vector<128x64xbf16>
    %cst_40 = arith.constant dense<0.000000e+00> : vector<128x64xf32>
    %91 = tpu.matmul %1, %90, %cst_40 {dimension_numbers = #tpu.dot_dimension_numbers<[1], [0], [0], [1], [0, 0, 1, 1], [], []>} : vector<128x128xbf16>, vector<128x64xbf16>, vector<128x64xf32> -> vector<128x64xf32>
    %92 = arith.truncf %91 : vector<128x64xf32> to vector<128x64xbf16>
    %cst_41 = arith.constant dense<0.000000e+00> : vector<128x80xf32>
    %93 = tpu.matmul %92, %89, %cst_41 {dimension_numbers = #tpu.dot_dimension_numbers<[1], [0], [0], [1], [0, 0, 1, 1], [], []>} : vector<128x64xbf16>, vector<64x80xbf16>, vector<128x80xf32> -> vector<128x80xf32>
    %94 = arith.truncf %93 : vector<128x80xf32> to vector<128x80xbf16>
    %cst_42 = arith.constant dense<0.000000e+00> : vector<128x80xf32>
    %95 = tpu.matmul %2, %94, %cst_42 {dimension_numbers = #tpu.dot_dimension_numbers<[1], [0], [0], [1], [0, 0, 1, 1], [], []>} : vector<128x128xbf16>, vector<128x80xbf16>, vector<128x80xf32> -> vector<128x80xf32>
    %96 = arith.mulf %93, %93 : vector<128x80xf32>
    %97 = arith.truncf %96 : vector<128x80xf32> to vector<128x80xbf16>
    %cst_43 = arith.constant dense<0.000000e+00> : vector<128x80xf32>
    %98 = tpu.matmul %2, %97, %cst_43 {dimension_numbers = #tpu.dot_dimension_numbers<[1], [0], [0], [1], [0, 0, 1, 1], [], []>} : vector<128x128xbf16>, vector<128x80xbf16>, vector<128x80xf32> -> vector<128x80xf32>
    %99 = arith.mulf %95, %95 : vector<128x80xf32>
    %100 = arith.subf %98, %99 : vector<128x80xf32>
    %cst_44 = arith.constant 0.000000e+00 : f32
    %101 = vector.broadcast %cst_44 : f32 to vector<128x80xf32>
    %102 = arith.maximumf %100, %101 : vector<128x80xf32>
    %cst_45 = arith.constant 9.99999974E-6 : f32
    %103 = vector.broadcast %cst_45 : f32 to vector<128x80xf32>
    %104 = arith.addf %102, %103 : vector<128x80xf32>
    %105 = math.rsqrt %104 : vector<128x80xf32>
    %106 = arith.subf %93, %95 : vector<128x80xf32>
    %107 = arith.mulf %106, %105 : vector<128x80xf32>
    %cst_46 = arith.constant 0.000000e+00 : f32
    %108 = vector.broadcast %cst_46 : f32 to vector<128x80xf32>
    %109 = arith.maximumf %107, %108 : vector<128x80xf32>
    %c176 = arith.constant 176 : index
    %c0_47 = arith.constant 0 : index
    %110 = vector.load %arg4[%c176, %c0_47] : memref<592x144xbf16, #tpu.memory_space<vmem>>, vector<80x96xbf16>
    %111 = arith.truncf %109 : vector<128x80xf32> to vector<128x80xbf16>
    %cst_48 = arith.constant dense<0.000000e+00> : vector<128x80xf32>
    %112 = tpu.matmul %1, %111, %cst_48 {dimension_numbers = #tpu.dot_dimension_numbers<[1], [0], [0], [1], [0, 0, 1, 1], [], []>} : vector<128x128xbf16>, vector<128x80xbf16>, vector<128x80xf32> -> vector<128x80xf32>
    %113 = arith.truncf %112 : vector<128x80xf32> to vector<128x80xbf16>
    %cst_49 = arith.constant dense<0.000000e+00> : vector<128x96xf32>
    %114 = tpu.matmul %113, %110, %cst_49 {dimension_numbers = #tpu.dot_dimension_numbers<[1], [0], [0], [1], [0, 0, 1, 1], [], []>} : vector<128x80xbf16>, vector<80x96xbf16>, vector<128x96xf32> -> vector<128x96xf32>
    %115 = arith.truncf %114 : vector<128x96xf32> to vector<128x96xbf16>
    %cst_50 = arith.constant dense<0.000000e+00> : vector<128x96xf32>
    %116 = tpu.matmul %2, %115, %cst_50 {dimension_numbers = #tpu.dot_dimension_numbers<[1], [0], [0], [1], [0, 0, 1, 1], [], []>} : vector<128x128xbf16>, vector<128x96xbf16>, vector<128x96xf32> -> vector<128x96xf32>
    %117 = arith.mulf %114, %114 : vector<128x96xf32>
    %118 = arith.truncf %117 : vector<128x96xf32> to vector<128x96xbf16>
    %cst_51 = arith.constant dense<0.000000e+00> : vector<128x96xf32>
    %119 = tpu.matmul %2, %118, %cst_51 {dimension_numbers = #tpu.dot_dimension_numbers<[1], [0], [0], [1], [0, 0, 1, 1], [], []>} : vector<128x128xbf16>, vector<128x96xbf16>, vector<128x96xf32> -> vector<128x96xf32>
    %120 = arith.mulf %116, %116 : vector<128x96xf32>
    %121 = arith.subf %119, %120 : vector<128x96xf32>
    %cst_52 = arith.constant 0.000000e+00 : f32
    %122 = vector.broadcast %cst_52 : f32 to vector<128x96xf32>
    %123 = arith.maximumf %121, %122 : vector<128x96xf32>
    %cst_53 = arith.constant 9.99999974E-6 : f32
    %124 = vector.broadcast %cst_53 : f32 to vector<128x96xf32>
    %125 = arith.addf %123, %124 : vector<128x96xf32>
    %126 = math.rsqrt %125 : vector<128x96xf32>
    %127 = arith.subf %114, %116 : vector<128x96xf32>
    %128 = arith.mulf %127, %126 : vector<128x96xf32>
    %cst_54 = arith.constant 0.000000e+00 : f32
    %129 = vector.broadcast %cst_54 : f32 to vector<128x96xf32>
    %130 = arith.maximumf %128, %129 : vector<128x96xf32>
    %c256 = arith.constant 256 : index
    %c0_55 = arith.constant 0 : index
    %131 = vector.load %arg4[%c256, %c0_55] : memref<592x144xbf16, #tpu.memory_space<vmem>>, vector<96x112xbf16>
    %132 = arith.truncf %130 : vector<128x96xf32> to vector<128x96xbf16>
    %cst_56 = arith.constant dense<0.000000e+00> : vector<128x96xf32>
    %133 = tpu.matmul %1, %132, %cst_56 {dimension_numbers = #tpu.dot_dimension_numbers<[1], [0], [0], [1], [0, 0, 1, 1], [], []>} : vector<128x128xbf16>, vector<128x96xbf16>, vector<128x96xf32> -> vector<128x96xf32>
    %134 = arith.truncf %133 : vector<128x96xf32> to vector<128x96xbf16>
    %cst_57 = arith.constant dense<0.000000e+00> : vector<128x112xf32>
    %135 = tpu.matmul %134, %131, %cst_57 {dimension_numbers = #tpu.dot_dimension_numbers<[1], [0], [0], [1], [0, 0, 1, 1], [], []>} : vector<128x96xbf16>, vector<96x112xbf16>, vector<128x112xf32> -> vector<128x112xf32>
    %136 = arith.truncf %135 : vector<128x112xf32> to vector<128x112xbf16>
    %cst_58 = arith.constant dense<0.000000e+00> : vector<128x112xf32>
    %137 = tpu.matmul %2, %136, %cst_58 {dimension_numbers = #tpu.dot_dimension_numbers<[1], [0], [0], [1], [0, 0, 1, 1], [], []>} : vector<128x128xbf16>, vector<128x112xbf16>, vector<128x112xf32> -> vector<128x112xf32>
    %138 = arith.mulf %135, %135 : vector<128x112xf32>
    %139 = arith.truncf %138 : vector<128x112xf32> to vector<128x112xbf16>
    %cst_59 = arith.constant dense<0.000000e+00> : vector<128x112xf32>
    %140 = tpu.matmul %2, %139, %cst_59 {dimension_numbers = #tpu.dot_dimension_numbers<[1], [0], [0], [1], [0, 0, 1, 1], [], []>} : vector<128x128xbf16>, vector<128x112xbf16>, vector<128x112xf32> -> vector<128x112xf32>
    %141 = arith.mulf %137, %137 : vector<128x112xf32>
    %142 = arith.subf %140, %141 : vector<128x112xf32>
    %cst_60 = arith.constant 0.000000e+00 : f32
    %143 = vector.broadcast %cst_60 : f32 to vector<128x112xf32>
    %144 = arith.maximumf %142, %143 : vector<128x112xf32>
    %cst_61 = arith.constant 9.99999974E-6 : f32
    %145 = vector.broadcast %cst_61 : f32 to vector<128x112xf32>
    %146 = arith.addf %144, %145 : vector<128x112xf32>
    %147 = math.rsqrt %146 : vector<128x112xf32>
    %148 = arith.subf %135, %137 : vector<128x112xf32>
    %149 = arith.mulf %148, %147 : vector<128x112xf32>
    %cst_62 = arith.constant 0.000000e+00 : f32
    %150 = vector.broadcast %cst_62 : f32 to vector<128x112xf32>
    %151 = arith.maximumf %149, %150 : vector<128x112xf32>
    %c352 = arith.constant 352 : index
    %c0_63 = arith.constant 0 : index
    %152 = vector.load %arg4[%c352, %c0_63] : memref<592x144xbf16, #tpu.memory_space<vmem>>, vector<112x128xbf16>
    %153 = arith.truncf %151 : vector<128x112xf32> to vector<128x112xbf16>
    %cst_64 = arith.constant dense<0.000000e+00> : vector<128x112xf32>
    %154 = tpu.matmul %1, %153, %cst_64 {dimension_numbers = #tpu.dot_dimension_numbers<[1], [0], [0], [1], [0, 0, 1, 1], [], []>} : vector<128x128xbf16>, vector<128x112xbf16>, vector<128x112xf32> -> vector<128x112xf32>
    %155 = arith.truncf %154 : vector<128x112xf32> to vector<128x112xbf16>
    %cst_65 = arith.constant dense<0.000000e+00> : vector<128x128xf32>
    %156 = tpu.matmul %155, %152, %cst_65 {dimension_numbers = #tpu.dot_dimension_numbers<[1], [0], [0], [1], [0, 0, 1, 1], [], []>} : vector<128x112xbf16>, vector<112x128xbf16>, vector<128x128xf32> -> vector<128x128xf32>
    %157 = arith.truncf %156 : vector<128x128xf32> to vector<128x128xbf16>
    %cst_66 = arith.constant dense<0.000000e+00> : vector<128x128xf32>
    %158 = tpu.matmul %2, %157, %cst_66 {dimension_numbers = #tpu.dot_dimension_numbers<[1], [0], [0], [1], [0, 0, 1, 1], [], []>} : vector<128x128xbf16>, vector<128x128xbf16>, vector<128x128xf32> -> vector<128x128xf32>
    %159 = arith.mulf %156, %156 : vector<128x128xf32>
    %160 = arith.truncf %159 : vector<128x128xf32> to vector<128x128xbf16>
    %cst_67 = arith.constant dense<0.000000e+00> : vector<128x128xf32>
    %161 = tpu.matmul %2, %160, %cst_67 {dimension_numbers = #tpu.dot_dimension_numbers<[1], [0], [0], [1], [0, 0, 1, 1], [], []>} : vector<128x128xbf16>, vector<128x128xbf16>, vector<128x128xf32> -> vector<128x128xf32>
    %162 = arith.mulf %158, %158 : vector<128x128xf32>
    %163 = arith.subf %161, %162 : vector<128x128xf32>
    %cst_68 = arith.constant 0.000000e+00 : f32
    %164 = vector.broadcast %cst_68 : f32 to vector<128x128xf32>
    %165 = arith.maximumf %163, %164 : vector<128x128xf32>
    %cst_69 = arith.constant 9.99999974E-6 : f32
    %166 = vector.broadcast %cst_69 : f32 to vector<128x128xf32>
    %167 = arith.addf %165, %166 : vector<128x128xf32>
    %168 = math.rsqrt %167 : vector<128x128xf32>
    %169 = arith.subf %156, %158 : vector<128x128xf32>
    %170 = arith.mulf %169, %168 : vector<128x128xf32>
    %cst_70 = arith.constant 0.000000e+00 : f32
    %171 = vector.broadcast %cst_70 : f32 to vector<128x128xf32>
    %172 = arith.maximumf %170, %171 : vector<128x128xf32>
    %c464 = arith.constant 464 : index
    %c0_71 = arith.constant 0 : index
    %173 = vector.load %arg4[%c464, %c0_71] : memref<592x144xbf16, #tpu.memory_space<vmem>>, vector<128x144xbf16>
    %174 = arith.truncf %172 : vector<128x128xf32> to vector<128x128xbf16>
    %cst_72 = arith.constant dense<0.000000e+00> : vector<128x128xf32>
    %175 = tpu.matmul %1, %174, %cst_72 {dimension_numbers = #tpu.dot_dimension_numbers<[1], [0], [0], [1], [0, 0, 1, 1], [], []>} : vector<128x128xbf16>, vector<128x128xbf16>, vector<128x128xf32> -> vector<128x128xf32>
    %176 = arith.truncf %175 : vector<128x128xf32> to vector<128x128xbf16>
    %cst_73 = arith.constant dense<0.000000e+00> : vector<128x144xf32>
    %177 = tpu.matmul %176, %173, %cst_73 {dimension_numbers = #tpu.dot_dimension_numbers<[1], [0], [0], [1], [0, 0, 1, 1], [], []>} : vector<128x128xbf16>, vector<128x144xbf16>, vector<128x144xf32> -> vector<128x144xf32>
    %c0_74 = arith.constant 0 : index
    %c0_75 = arith.constant 0 : index
    %c0_76 = arith.constant 0 : index
    %178 = vector.load %arg5[%c0_74, %c0_75, %c0_76] : memref<1x128x144xf32, #tpu.memory_space<vmem>>, vector<1x128x144xf32>
    %179 = vector.shape_cast %178 : vector<1x128x144xf32> to vector<128x144xf32>
    %180 = vector.shape_cast %177 : vector<128x144xf32> to vector<1x128x144xf32>
    tpu.vector_store %arg5[%c0_74, %c0_75, %c0_76], %180 {strides = array<i32>} : memref<1x128x144xf32, #tpu.memory_space<vmem>>, vector<1x128x144xf32>,
    return
  }
  func.func @transform_0(%arg0: i32) -> (i32, i32, i32) {
    %c0_i32 = arith.constant 0 : i32
    %c0_i32_0 = arith.constant 0 : i32
    %c0_i32_1 = arith.constant 0 : i32
    return %arg0, %c0_i32, %c0_i32_0 : i32, i32, i32
  }
  func.func @transform_1(%arg0: i32) -> (i32, i32, i32) {
    %c0_i32 = arith.constant 0 : i32
    %c0_i32_0 = arith.constant 0 : i32
    %c0_i32_1 = arith.constant 0 : i32
    return %arg0, %c0_i32, %c0_i32_0 : i32, i32, i32
  }
  func.func @transform_2(%arg0: i32) -> (i32, i32) {
    %c0_i32 = arith.constant 0 : i32
    %c0_i32_0 = arith.constant 0 : i32
    %c0_i32_1 = arith.constant 0 : i32
    return %c0_i32, %c0_i32_0 : i32, i32
  }
  func.func @transform_3(%arg0: i32) -> (i32, i32) {
    %c0_i32 = arith.constant 0 : i32
    %c0_i32_0 = arith.constant 0 : i32
    %c0_i32_1 = arith.constant 0 : i32
    return %c0_i32, %c0_i32_0 : i32, i32
  }
  func.func @transform_4(%arg0: i32) -> (i32, i32, i32) {
    %c0_i32 = arith.constant 0 : i32
    %c0_i32_0 = arith.constant 0 : i32
    %c0_i32_1 = arith.constant 0 : i32
    return %arg0, %c0_i32, %c0_i32_0 : i32, i32, i32
  }
}

</mosaic_0001>

<bundles_post_ra>
// kernel: encoder_forward.1
= control target key start
LH: loop header
LB: loop body
LE: loop exit
PB: predicated region body
PF: predicated region fallthrough
CT: control target
= control target key end

     0   :  { %9 = vsyncpa [#allocation3], 0  ;;  %s9747_s0 = inlined_call_operand.vmem [shape: f32[2,128,3], index: 0, kind: input, shape index: {}]   ;;  %s9748_s1 = inlined_call_operand.vmem [shape: bf16[2,128,128], index: 1, kind: input, shape index: {}]   ;;  %s9749_s2 = inlined_call_operand.vmem [shape: bf16[128,128], index: 2, kind: input, shape index: {}]   ;;  %s9750_s3 = inlined_call_operand.vmem [shape: bf16[592,144], index: 3, kind: input, shape index: {}]   ;;  %s9751_s4 = inlined_call_operand.hbm [shape: f32[2,128,144], index: 4, kind: output, shape index: {}]  }
   0x1   :  { %11 = vsyncpa [#allocation3 + $0x1], 0  ;;  %s6145_s15 = smov 0   ;;  %s6147_s16 = smov 0  }
   0x2   :  { %s6149_s17 = smov 0   ;;  %s6151_s18 = smov 0  }
   0x3 LB: > { %s6166_s19 = sadd.s32 4294967295, %s6115_s18   ;;  %s5302_s20 = sadd.s32 4294967294, %s6115_s18   ;;  %s6115_s18 = sphi %s6151_s18, %s10177_s18   ;;  %s6111_s17 = sphi %s6149_s17, %s10176_s17   ;;  %s6107_s16 = sphi %s6147_s16, %s10175_s16   ;;  %s6103_s15 = sphi %s6145_s15, %s10174_s15  }
   0x4   : > { %s6170_s21 = sadd.s32 1, %s6115_s18   ;;  %s118_s22 = sadd.s32 1, %s6111_s17 }
   0x5   : > { %s115_s23 = ssub.s32 %s6115_s18, %s6170_s21  ;;  %p128_p0 = scmp.ne.s32.totalorder %s6111_s17, %s6107_s16 }
   0x6   : > { %p116_p1 = scmp.eq.s32.totalorder %s115_s23, 0  ;;  %p129_p2 = scmp.eq.s32.totalorder %s6166_s19, 1 }
   0x7   : > { %p134_p3 = scmp.ne.s32.totalorder %s6107_s16, %s6103_s15  ;;  %p135_p4 = scmp.eq.s32.totalorder %s5302_s20, 1 }
   0x8   : > { %s6181_s24 = scalar_select %p116_p1, %s6111_s17, %s118_s22  }
   0x9   : > { %p6183_p5 = por %p129_p2, %p128_p0  ;;  %p6187_p6 = por %p135_p4, %p134_p3 }
   0xa   : > { %p5305_p7 = scmp.ge.s32.totalorder %s6115_s18, 1  ;;  %p175_p8 = scmp.lt.s32.totalorder %s6115_s18, 3 }
   0xc   : > { %p176_p9 = pnand %p5305_p7, %p175_p8 }
   0xe   : > { %179 = sbr.rel (%p176_p9) target bundleno = 6321 (0x18b1), region = 36 }
  0x13   : > { %p206_p10 = scmp.lt.s32.totalorder %s6166_s19, 1  ;;  %vm404_vm0 = vcmask 1040384   ;;  %vm405_vm1 = vcmask 1041408   ;;  %v6117_v32 = vmov 65535   ;;  %v265_v34 = vld [vmem:[%s9750_s3] sm:$0x3] }
  0x14   : > { %v406_v33 = vsel %vm404_vm0, 4294967295, %v6117_v32  ;;  %vm379_vm2 = vcmask 23552   ;;  %s5682_s14 = sshll.u32 %s6166_s19, 8  ;;  %s6073_s7 = scalar_lea.hbm %s9751_s4, 512 }
  0x15   : > { %s6195_s27 = scalar_select %p206_p10, %s6166_s19, 1  ;;  %v407_v35 = vsel %vm405_vm1, %v406_v33, 0  ;;  %v6325_v33 = vld [vmem:[%s9749_s2] sm:$0xff] }
  0x16   : > { %v409_v36 = vand.u32 %v407_v35, %v265_v34  ;;  %9877 = vst [vmem:[#allocation15_spill] sm:$0xff] %v6325_v33  ;;  %v6330_v34 = vld [vmem:[%s9749_s2 + $0x30] sm:$0xff]  ;;  %s5224_s23 = scalar_lea.hbm %s9751_s4, %s5682_s14 }
  0x17   : > { %s5620_s28 = sshll.u32 %s6195_s27, 7  ;;  %s5621_s6 = sshll.u32 %s6195_s27, 6  ;;  %9878 = vst [vmem:[#allocation16_spill] sm:$0xff] %v6330_v34 }
  0x18   : > { %s6201_s5 = scalar_lea.vmem %s9747_s0, %s5620_s28  ;;  %s6223_s9 = scalar_lea.vmem %s9748_s1, %s5621_s6  ;;  %418 = vmatpush.bf16.msra.mxu1 %v409_v36 }
  0x19   : > { %v263_v0 = vld [vmem:[%s6201_s5 + $0x70] sm:$0xff]  ;;  %v264_v1 = vld [vmem:[%s6201_s5 + $0x78] sm:$0xff]  ;;  %v261_v2 = vld [vmem:[%s6201_s5 + $0x60] sm:$0xff]  ;;  %s5227_s28 = sshll.u32 %s5224_s23, 4  ;;  %s5228_s28 = int_to_ptr.hbm [resolvable:$true] %s5227_s28 }
  0x1a   : > { %v273_v3 = vpack.c.bf16 %v264_v1, %v263_v0  ;;  %v262_v4 = vld [vmem:[%s6201_s5 + $0x68] sm:$0xff]  ;;  %v259_v6 = vld [vmem:[%s6201_s5 + $0x50] sm:$0xff]  ;;  %v260_v7 = vld [vmem:[%s6201_s5 + $0x58] sm:$0xff]  ;;  %s6067_s19 = sshra.s32 %s5228_s28, 4  ;;  %s6068_s19 = int_to_ptr.hbm [resolvable:$true] %s6067_s19 }
  0x1b   : > { %v272_v5 = vpack.c.bf16 %v262_v4, %v261_v2  ;;  %v271_v8 = vpack.c.bf16 %v260_v7, %v259_v6  ;;  %v257_v9 = vld [vmem:[%s6201_s5 + $0x40] sm:$0xff]  ;;  %v258_v10 = vld [vmem:[%s6201_s5 + $0x48] sm:$0xff]  ;;  %v255_v12 = vld [vmem:[%s6201_s5 + $0x30] sm:$0xff]  ;;  %s6069_s30 = scalar_lea.hbm %s6068_s19, 256  ;;  %p6074_p0 = scmp.lt.s32.totalorder %s6068_s19, %s9751_s4 }
  0x1c   : > { %322 = vmatpush.bf16.msra.mxu0 %v273_v3  ;;  %5683 = vmatpush.bf16.msra.mxu3 %v273_v3  ;;  %v270_v11 = vpack.c.bf16 %v258_v10, %v257_v9  ;;  %v256_v13 = vld [vmem:[%s6201_s5 + $0x38] sm:$0xff]  ;;  %v253_v15 = vld [vmem:[%s6201_s5 + $0x20] sm:$0xff]  ;;  %v254_v16 = vld [vmem:[%s6201_s5 + $0x28] sm:$0xff]  ;;  %p6070_p11 = scmp.ne.s32.totalorder %s6068_s19, %s6069_s30  ;;  %p6075_p1 = scmp.lt.s32.totalorder %s6073_s7, %s6069_s30 }
  0x1d   : > { %v269_v14 = vpack.c.bf16 %v256_v13, %v255_v12  ;;  %v268_v17 = vpack.c.bf16 %v254_v16, %v253_v15  ;;  %v251_v18 = vld [vmem:[%s6201_s5 + $0x10] sm:$0xff]  ;;  %v252_v19 = vld [vmem:[%s6201_s5 + $0x18] sm:$0xff]  ;;  %v249_v21 = vld [vmem:[%s6201_s5] sm:$0xff] }
  0x1e   : > { %v267_v20 = vpack.c.bf16 %v252_v19, %v251_v18  ;;  %v250_v22 = vld [vmem:[%s6201_s5 + $0x8] sm:$0xff]  ;;  %v6226_v24 = vld [vmem:[%s6223_s9] sm:$0xff]  ;;  %v6234_v26 = vld [vmem:[%s6223_s9 + $0x10] sm:$0xff]  ;;  %p6071_p12 = pnand %p6070_p11, %p6183_p5  ;;  %p6076_p2 = por %p6075_p1, %p6074_p0 }
  0x1f   : > { %v266_v23 = vpack.c.bf16 %v250_v22, %v249_v21  ;;  %9867 = vst [vmem:[#allocation5_spill] sm:$0xff] %v6226_v24  ;;  %v6230_v25 = vld [vmem:[%s6223_s9 + $0x8] sm:$0xff]  ;;  %v6238_v27 = vld [vmem:[%s6223_s9 + $0x18] sm:$0xff]  ;;  %v6242_v28 = vld [vmem:[%s6223_s9 + $0x30] sm:$0xff] }
  0x20   : > { %323 = vmatpush.bf16.msra.mxu0 %v272_v5  ;;  %5684 = vmatpush.bf16.msra.mxu3 %v272_v5  ;;  %9868 = vst [vmem:[#allocation6_spill] sm:$0xff] %v6230_v25  ;;  %v6246_v29 = vld [vmem:[%s6223_s9 + $0x20] sm:$0xff]  ;;  %v6249_v30 = vld [vmem:[%s6223_s9 + $0x38] sm:$0xff]  ;;  %v6254_v31 = vld [vmem:[%s6223_s9 + $0x28] sm:$0xff]  ;;  %p6072_p13 = pneg %p6071_p12 }
  0x21   : > { %9869 = vst [vmem:[#allocation7_spill] sm:$0xff] %v6234_v26 }
  0x22   : > { %9870 = vst [vmem:[#allocation8_spill] sm:$0xff] %v6238_v27  ;;  %p6077_p3 = pnand %p6076_p2, %p6072_p13 }
  0x23   : > { %9871 = vst [vmem:[#allocation9_spill] sm:$0xff] %v6242_v28 }
  0x24   : > { %324 = vmatpush.bf16.msra.mxu0 %v271_v8  ;;  %5685 = vmatpush.bf16.msra.mxu3 %v271_v8  ;;  %9872 = vst [vmem:[#allocation10_spill] sm:$0xff] %v6246_v29 }
  0x25   : > { %9873 = vst [vmem:[#allocation11_spill] sm:$0xff] %v6249_v30 }
  0x26   : > { %9874 = vst [vmem:[#allocation12_spill] sm:$0xff] %v6254_v31 }
  0x28   : > { %325 = vmatpush.bf16.msra.mxu0 %v270_v11  ;;  %5686 = vmatpush.bf16.msra.mxu3 %v270_v11 }
  0x2c   : > { %326 = vmatpush.bf16.msra.mxu0 %v269_v14  ;;  %5687 = vmatpush.bf16.msra.mxu3 %v269_v14 }
  0x30   : > { %327 = vmatpush.bf16.msra.mxu0 %v268_v17  ;;  %5688 = vmatpush.bf16.msra.mxu3 %v268_v17 }
  0x34   : > { %328 = vmatpush.bf16.msra.mxu0 %v267_v20  ;;  %5689 = vmatpush.bf16.msra.mxu3 %v267_v20 }
  0x38   : > { %329 = vmatpush.bf16.msra.mxu0 %v266_v23  ;;  %5690 = vmatpush.bf16.msra.mxu3 %v266_v23 }
  0x3b   : > { %330 = vmatmul.bf16.vlgmr.msra.gmra.mxu0 %v6226_v24  ;;  %360 = vmatmul.bf16.vlgmr.msra.gmra.mxu3 %v6242_v28 }
  0x4b   : > { %335 = vmatmul.bf16.gmra.mxu0 %v6230_v25  ;;  %365 = vmatmul.bf16.gmra.mxu3 %v6249_v30 }
  0x5b   : > { %340 = vmatmul.bf16.gmra.mxu0 %v6234_v26 }
  0x6b   : > { %345 = vmatmul.bf16.gmra.mxu0 %v6238_v27 }
  0x7b   : > { %350 = vmatmul.bf16.gmra.mxu0 %v6246_v29 }
  0x8b   : > { %355 = vmatmul.bf16.gmra.mxu0 %v6254_v31 }
  0xb8   : > { %v331_v37 = vpop.f32.mrf.mxu0 }
  0xbe   : > { %v361_v54 = vpop.f32.mrf.mxu3 }
  0xc0   : > { %v333_v38 = vpop.f32.mrf.mxu0 }
  0xc1   : > { %v371_v39 = vpack.c.bf16 %v333_v38, %v331_v37 }
  0xc3   : > { %5343 = vmatmul.msk.bf16.vlgmr.msra.gmra.mxu1 %vm379_vm2, %v371_v39 }
  0xc6   : > { %v363_v56 = vpop.f32.mrf.mxu3 }
  0xc7   : > { %v377_v57 = vpack.c.bf16 %v363_v56, %v361_v54 }
  0xc8   : > { %v336_v40 = vpop.f32.mrf.mxu0 }
  0xce   : > { %v366_v58 = vpop.f32.mrf.mxu3 }
  0xd0   : > { %v338_v41 = vpop.f32.mrf.mxu0 }
  0xd1   : > { %v372_v42 = vpack.c.bf16 %v338_v41, %v336_v40 }
  0xd3   : > { %5344 = vmatmul.msk.bf16.gmra.mxu1 %vm379_vm2, %v372_v42 }
  0xd6   : > { %v368_v59 = vpop.f32.mrf.mxu3 }
  0xd7   : > { %v378_v60 = vpack.c.bf16 %v368_v59, %v366_v58  ;;  %v6382_v58 = vld [vmem:[%s9749_s2 + $0x18] sm:$0xff]  ;;  %v6389_v59 = vld [vmem:[%s9749_s2 + $0x20] sm:$0xff] }
  0xd8   : > { %v341_v43 = vpop.f32.mrf.mxu0  ;;  %9882 = vst [vmem:[#allocation20_spill] sm:$0xff] %v6382_v58 }
  0xd9   : > { %9883 = vst [vmem:[#allocation21_spill] sm:$0xff] %v6389_v59 }
  0xe0   : > { %v343_v44 = vpop.f32.mrf.mxu0 }
  0xe1   : > { %v373_v45 = vpack.c.bf16 %v343_v44, %v341_v43 }
  0xe3   : > { %5345 = vmatmul.msk.bf16.gmra.mxu1 %vm379_vm2, %v373_v45 }
  0xe8   : > { %v346_v46 = vpop.f32.mrf.mxu0 }
  0xf0   : > { %v348_v47 = vpop.f32.mrf.mxu0 }
  0xf1   : > { %v374_v48 = vpack.c.bf16 %v348_v47, %v346_v46  ;;  %v6353_v47 = vld [vmem:[%s9749_s2 + $0x8] sm:$0xff] }
  0xf2   : > { %9879 = vst [vmem:[#allocation17_spill] sm:$0xff] %v6353_v47 }
  0xf3   : > { %5346 = vmatmul.msk.bf16.gmra.mxu1 %vm379_vm2, %v374_v48  ;;  %v6358_v48 = vld [vmem:[%s9749_s2 + $0x38] sm:$0xff] }
  0xf4   : > { %9880 = vst [vmem:[#allocation18_spill] sm:$0xff] %v6358_v48 }
  0xf8   : > { %v351_v49 = vpop.f32.mrf.mxu0 }
 0x100   : > { %v353_v50 = vpop.f32.mrf.mxu0 }
 0x101   : > { %v375_v51 = vpack.c.bf16 %v353_v50, %v351_v49 }
 0x103   : > { %5347 = vmatmul.msk.bf16.gmra.mxu1 %vm379_vm2, %v375_v51 }
 0x108   : > { %v356_v52 = vpop.f32.mrf.mxu0 }
 0x110   : > { %v358_v53 = vpop.f32.mrf.mxu0 }
 0x111   : > { %v376_v55 = vpack.c.bf16 %v358_v53, %v356_v52 }
 0x113   : > { %5348 = vmatmul.msk.bf16.gmra.mxu1 %vm379_vm2, %v376_v55 }
 0x123   : > { %5349 = vmatmul.msk.bf16.gmra.mxu1 %vm379_vm2, %v377_v57  ;;  %v6375_v57 = vld [vmem:[%s9749_s2 + $0x10] sm:$0xff] }
 0x124   : > { %9881 = vst [vmem:[#allocation19_spill] sm:$0xff] %v6375_v57 }
 0x133   : > { %5350 = vmatmul.msk.bf16.gmra.mxu1 %vm379_vm2, %v378_v60  ;;  %v6396_v60 = vld [vmem:[%s9749_s2 + $0x28] sm:$0xff] }
 0x134   : > { %9884 = vst [vmem:[#allocation22_spill] sm:$0xff] %v6396_v60 }
 0x140   : > { %v6268_v61 = vpop.f32.mrf.mxu1 }
 0x141   : > { %v565_v55 = vmul.f32 %v6268_v61, %v6268_v61 }
 0x148   : > { %v6270_v62 = vpop.f32.mrf.mxu1 }
 0x149   : > { %9875 = vst [vmem:[#allocation13_spill] sm:$0xff] %v6270_v62  ;;  %v460_v22 = vpack.c.bf16 %v6270_v62, %v6268_v61  ;;  %v566_v53 = vmul.f32 %v6270_v62, %v6270_v62 }
 0x14b   : > { %v581_v56 = vpack.c.bf16 %v566_v53, %v565_v55 }
 0x150   : > { %v6272_v63 = vpop.f32.mrf.mxu1 }
 0x151   : > { %v567_v52 = vmul.f32 %v6272_v63, %v6272_v63 }
 0x158   : > { %v6274_v0 = vpop.f32.mrf.mxu1 }
 0x159   : > { %9876 = vst [vmem:[#allocation14_spill] sm:$0xff] %v6274_v0  ;;  %v461_v19 = vpack.c.bf16 %v6274_v0, %v6272_v63  ;;  %v568_v50 = vmul.f32 %v6274_v0, %v6274_v0 }
 0x15b   : > { %v582_v54 = vpack.c.bf16 %v568_v50, %v567_v52 }
 0x160   : > { %v6276_v1 = vpop.f32.mrf.mxu1 }
 0x161   : > { %v569_v49 = vmul.f32 %v6276_v1, %v6276_v1 }
 0x168   : > { %v6278_v2 = vpop.f32.mrf.mxu1 }
 0x169   : > { %v462_v18 = vpack.c.bf16 %v6278_v2, %v6276_v1  ;;  %v570_v45 = vmul.f32 %v6278_v2, %v6278_v2 }
 0x16b   : > { %v583_v51 = vpack.c.bf16 %v570_v45, %v569_v49 }
 0x170   : > { %v6280_v3 = vpop.f32.mrf.mxu1 }
 0x171   : > { %v571_v44 = vmul.f32 %v6280_v3, %v6280_v3 }
 0x178   : > { %v6282_v4 = vpop.f32.mrf.mxu1 }
 0x179   : > { %v463_v17 = vpack.c.bf16 %v6282_v4, %v6280_v3  ;;  %v572_v42 = vmul.f32 %v6282_v4, %v6282_v4 }
 0x17b   : > { %v584_v46 = vpack.c.bf16 %v572_v42, %v571_v44 }
 0x180   : > { %v6284_v5 = vpop.f32.mrf.mxu1 }
 0x181   : > { %v573_v41 = vmul.f32 %v6284_v5, %v6284_v5 }
 0x188   : > { %v6286_v6 = vpop.f32.mrf.mxu1 }
 0x189   : > { %v464_v16 = vpack.c.bf16 %v6286_v6, %v6284_v5  ;;  %v574_v39 = vmul.f32 %v6286_v6, %v6286_v6 }
 0x18b   : > { %v585_v43 = vpack.c.bf16 %v574_v39, %v573_v41 }
 0x190   : > { %v6288_v7 = vpop.f32.mrf.mxu1 }
 0x191   : > { %v575_v38 = vmul.f32 %v6288_v7, %v6288_v7 }
 0x198   : > { %v6290_v8 = vpop.f32.mrf.mxu1 }
 0x199   : > { %v465_v15 = vpack.c.bf16 %v6290_v8, %v6288_v7  ;;  %v576_v36 = vmul.f32 %v6290_v8, %v6290_v8 }
 0x19b   : > { %v586_v40 = vpack.c.bf16 %v576_v36, %v575_v38 }
 0x1a0   : > { %v6292_v9 = vpop.f32.mrf.mxu1 }
 0x1a1   : > { %v577_v35 = vmul.f32 %v6292_v9, %v6292_v9 }
 0x1a8   : > { %v6294_v10 = vpop.f32.mrf.mxu1 }
 0x1a9   : > { %v466_v14 = vpack.c.bf16 %v6294_v10, %v6292_v9  ;;  %v578_v23 = vmul.f32 %v6294_v10, %v6294_v10 }
 0x1ab   : > { %v587_v37 = vpack.c.bf16 %v578_v23, %v577_v35 }
 0x1b0   : > { %v6296_v11 = vpop.f32.mrf.mxu1 }
 0x1b1   : > { %v579_v21 = vmul.f32 %v6296_v11, %v6296_v11 }
 0x1b8   : > { %v6298_v12 = vpop.f32.mrf.mxu1 }
 0x1b9   : > { %v467_v13 = vpack.c.bf16 %v6298_v12, %v6296_v11  ;;  %v580_v20 = vmul.f32 %v6298_v12, %v6298_v12 }
 0x1bb   : > { %516 = vmatpush.bf16.msra.mxu2 %v467_v13  ;;  %5691 = vmatpush.bf16.msrb.mxu3 %v467_v13  ;;  %v588_v32 = vpack.c.bf16 %v580_v20, %v579_v21 }
 0x1bf   : > { %517 = vmatpush.bf16.msra.mxu2 %v466_v14  ;;  %5692 = vmatpush.bf16.msrb.mxu3 %v466_v14 }
 0x1c3   : > { %518 = vmatpush.bf16.msra.mxu2 %v465_v15  ;;  %5693 = vmatpush.bf16.msrb.mxu3 %v465_v15 }
 0x1c7   : > { %519 = vmatpush.bf16.msra.mxu2 %v464_v16  ;;  %5694 = vmatpush.bf16.msrb.mxu3 %v464_v16 }
 0x1cb   : > { %520 = vmatpush.bf16.msra.mxu2 %v463_v17  ;;  %5695 = vmatpush.bf16.msrb.mxu3 %v463_v17 }
 0x1cf   : > { %521 = vmatpush.bf16.msra.mxu2 %v462_v18  ;;  %5696 = vmatpush.bf16.msrb.mxu3 %v462_v18 }
 0x1d3   : > { %522 = vmatpush.bf16.msra.mxu2 %v461_v19  ;;  %5697 = vmatpush.bf16.msrb.mxu3 %v461_v19 }
 0x1d7   : > { %523 = vmatpush.bf16.msra.mxu2 %v460_v22  ;;  %5698 = vmatpush.bf16.msrb.mxu3 %v460_v22 }
 0x1da   : > { %524 = vmatmul.bf16.vlgmr.msra.gmra.mxu2 %v6325_v33  ;;  %554 = vmatmul.bf16.vlgmr.msrb.gmra.mxu3 %v6330_v34 }
 0x1db   : > { %589 = vmatpush.bf16.msra.mxu3 %v588_v32 }
 0x1df   : > { %590 = vmatpush.bf16.msra.mxu3 %v587_v37 }
 0x1e3   : > { %591 = vmatpush.bf16.msra.mxu3 %v586_v40 }
 0x1e7   : > { %592 = vmatpush.bf16.msra.mxu3 %v585_v43 }
 0x1ea   : > { %529 = vmatmul.bf16.gmra.mxu2 %v6353_v47  ;;  %559 = vmatmul.bf16.gmra.mxu3 %v6358_v48 }
 0x1eb   : > { %593 = vmatpush.bf16.msra.mxu3 %v584_v46 }
 0x1ef   : > { %594 = vmatpush.bf16.msra.mxu3 %v583_v51 }
 0x1f3   : > { %595 = vmatpush.bf16.msra.mxu3 %v582_v54 }
 0x1f7   : > { %596 = vmatpush.bf16.msra.mxu3 %v581_v56 }
 0x1fa   : > { %534 = vmatmul.bf16.gmra.mxu2 %v6375_v57  ;;  %597 = vmatmul.bf16.vlgmr.msra.gmra.mxu3 %v6325_v33 }
 0x20a   : > { %539 = vmatmul.bf16.gmra.mxu2 %v6382_v58  ;;  %602 = vmatmul.bf16.gmra.mxu3 %v6353_v47 }
 0x21a   : > { %544 = vmatmul.bf16.gmra.mxu2 %v6389_v59  ;;  %607 = vmatmul.bf16.gmra.mxu3 %v6375_v57 }
 0x22a   : > { %549 = vmatmul.bf16.gmra.mxu2 %v6396_v60  ;;  %612 = vmatmul.bf16.gmra.mxu3 %v6382_v58 }
 0x23a   : > { %617 = vmatmul.bf16.gmra.mxu3 %v6389_v59 }
 0x24a   : > { %622 = vmatmul.bf16.gmra.mxu3 %v6396_v60 }
 0x25a   : > { %627 = vmatmul.bf16.gmra.mxu3 %v6330_v34 }
 0x25d   : > { %v6403_v13 = vpop.f32.mrf.mxu3  ;;  %v525_v15 = vpop.f32.mrf.mxu2 }
 0x25e   : > { %v638_v19 = vmul.f32 %v525_v15, %v525_v15  ;;  %v862_v50 = vsub.f32 %v6268_v61, %v525_v15 }
 0x265   : > { %v6405_v14 = vpop.f32.mrf.mxu3  ;;  %v6412_v18 = vpop.f32.mrf.mxu2 }
 0x266   : > { %9885 = vst [vmem:[#allocation23_spill] sm:$0xff] %v6412_v18 }
 0x26a   : > { %632 = vmatmul.bf16.gmra.mxu3 %v6358_v48 }
 0x26d   : > { %v6408_v16 = vpop.f32.mrf.mxu3  ;;  %v530_v23 = vpop.f32.mrf.mxu2 }
 0x26e   : > { %v640_v37 = vmul.f32 %v530_v23, %v530_v23 }
 0x275   : > { %v6410_v17 = vpop.f32.mrf.mxu3  ;;  %v6416_v38 = vpop.f32.mrf.mxu2 }
 0x276   : > { %9886 = vst [vmem:[#allocation24_spill] sm:$0xff] %v6416_v38 }
 0x27d   : > { %v598_v20 = vpop.f32.mrf.mxu3  ;;  %v535_v51 = vpop.f32.mrf.mxu2 }
 0x27e   : > { %v654_v21 = vsub.f32 %v598_v20, %v638_v19  ;;  %v642_v56 = vmul.f32 %v535_v51, %v535_v51 }
 0x280   : > { %v670_v22 = vmax.f32 %v654_v21, 0.0 }
 0x282   : > { %v686_v32 = vadd.f32 1e-05, %v670_v22 }
 0x284   : > { %5741 = vrsqrt.f32 %v686_v32  ;;  %vm708_vm4 = vweird.f32 %v686_v32 }
 0x285   : > { %v6414_v35 = vpop.f32.mrf.mxu3 }
 0x28a   : > { %v5742_v36 = vpop.eup %5741 }
 0x28b   : > { %v703_v39 = vmul.f32 %v5742_v36, %v686_v32  ;;  %vm709_vm3 = vweird.f32 %v5742_v36 }
 0x28c   : > { %vm710_vm5 = vmor %vm708_vm4, %vm709_vm3 }
 0x28d   : > { %v704_v40 = vmul.f32 %v5742_v36, %v703_v39  ;;  %v603_v41 = vpop.f32.mrf.mxu3 }
 0x28e   : > { %v656_v42 = vsub.f32 %v603_v41, %v640_v37  ;;  %v6423_v37 = vpop.f32.mrf.mxu2  ;;  %v864_v41 = vsub.f32 %v6272_v63, %v530_v23  ;;  %v866_v23 = vsub.f32 %v6276_v1, %v535_v51 }
 0x28f   : > { %v705_v43 = vmul.f32 0.5, %v704_v40  ;;  %v643_v59 = vmul.f32 %v6423_v37, %v6423_v37 }
 0x290   : > { %v672_v44 = vmax.f32 %v656_v42, 0.0 }
 0x291   : > { %v706_v45 = vsub.f32 1.5, %v705_v43 }
 0x292   : > { %v688_v46 = vadd.f32 1e-05, %v672_v44 }
 0x293   : > { %v707_v49 = vmul.f32 %v5742_v36, %v706_v45 }
 0x294   : > { %5743 = vrsqrt.f32 %v688_v46  ;;  %vm728_vm7 = vweird.f32 %v688_v46 }
 0x295   : > { %v6419_v52 = vpop.f32.mrf.mxu3  ;;  %v711_v53 = vsel %vm710_vm5, %v5742_v36, %v707_v49 }
 0x296   : > { %v6421_v54 = vmul.f32 %v862_v50, %v711_v53  ;;  %v540_v44 = vpop.f32.mrf.mxu2 }
 0x297   : > { %v644_v49 = vmul.f32 %v540_v44, %v540_v44  ;;  %v868_v51 = vsub.f32 %v6280_v3, %v540_v44  ;;  %v650_v3 = vmul.f32 %v6403_v13, %v6403_v13  ;;  %v641_v44 = vmul.f32 %v6416_v38, %v6416_v38 }
 0x298   : > { %9887 = vst [vmem:[#allocation25_spill] sm:$0xff] %v6421_v54 }
 0x29a   : > { %v5744_v55 = vpop.eup %5743 }
 0x29b   : > { %v723_v19 = vmul.f32 %v5744_v55, %v688_v46  ;;  %vm729_vm6 = vweird.f32 %v5744_v55 }
 0x29c   : > { %vm730_vm8 = vmor %vm728_vm7, %vm729_vm6 }
 0x29d   : > { %v724_v20 = vmul.f32 %v5744_v55, %v723_v19  ;;  %v608_v21 = vpop.f32.mrf.mxu3 }
 0x29e   : > { %v658_v22 = vsub.f32 %v608_v21, %v642_v56 }
 0x29f   : > { %v725_v32 = vmul.f32 0.5, %v724_v20 }
 0x2a0   : > { %v674_v39 = vmax.f32 %v658_v22, 0.0 }
 0x2a1   : > { %v726_v40 = vsub.f32 1.5, %v725_v32 }
 0x2a2   : > { %v690_v61 = vadd.f32 1e-05, %v674_v39 }
 0x2a3   : > { %v727_v15 = vmul.f32 %v5744_v55, %v726_v40  ;;  %v6435_v40 = vpop.f32.mrf.mxu2 }
 0x2a4   : > { %5745 = vrsqrt.f32 %v690_v61  ;;  %vm748_vm10 = vweird.f32 %v690_v61 }
 0x2a5   : > { %v6426_v36 = vpop.f32.mrf.mxu3  ;;  %v731_v42 = vsel %vm730_vm8, %v5744_v55, %v727_v15 }
 0x2a6   : > { %v6428_v43 = vmul.f32 %v864_v41, %v731_v42 }
 0x2a8   : > { %9888 = vst [vmem:[#allocation26_spill] sm:$0xff] %v6428_v43  ;;  %v877_v43 = vsub.f32 %v6298_v12, %v6410_v17 }
 0x2aa   : > { %v5746_v45 = vpop.eup %5745 }
 0x2ab   : > { %v743_v50 = vmul.f32 %v5746_v45, %v690_v61  ;;  %vm749_vm9 = vweird.f32 %v5746_v45  ;;  %v6437_v61 = vpop.f32.mrf.mxu2 }
 0x2ac   : > { %vm750_vm11 = vmor %vm748_vm10, %vm749_vm9  ;;  %v646_v34 = vmul.f32 %v6437_v61, %v6437_v61 }
 0x2ad   : > { %v744_v53 = vmul.f32 %v5746_v45, %v743_v50  ;;  %v613_v56 = vpop.f32.mrf.mxu3 }
 0x2ae   : > { %v660_v19 = vsub.f32 %v613_v56, %v644_v49 }
 0x2af   : > { %v745_v20 = vmul.f32 0.5, %v744_v53 }
 0x2b0   : > { %v676_v21 = vmax.f32 %v660_v19, 0.0 }
 0x2b1   : > { %v746_v46 = vsub.f32 1.5, %v745_v20 }
 0x2b2   : > { %v692_v22 = vadd.f32 1e-05, %v676_v21 }
 0x2b3   : > { %v747_v63 = vmul.f32 %v5746_v45, %v746_v46  ;;  %v6442_v20 = vpop.f32.mrf.mxu2 }
 0x2b4   : > { %5747 = vrsqrt.f32 %v692_v22  ;;  %vm768_vm13 = vweird.f32 %v692_v22 }
 0x2b5   : > { %v6431_v55 = vpop.f32.mrf.mxu3  ;;  %v751_v32 = vsel %vm750_vm11, %v5746_v45, %v747_v63 }
 0x2b6   : > { %v6433_v39 = vmul.f32 %v866_v23, %v751_v32 }
 0x2b8   : > { %9889 = vst [vmem:[#allocation27_spill] sm:$0xff] %v6433_v39 }
 0x2ba   : > { %v5748_v15 = vpop.eup %5747 }
 0x2bb   : > { %v763_v41 = vmul.f32 %v5748_v15, %v692_v22  ;;  %vm769_vm12 = vweird.f32 %v5748_v15  ;;  %v6444_v63 = vpop.f32.mrf.mxu2 }
 0x2bc   : > { %vm770_vm14 = vmor %vm768_vm13, %vm769_vm12 }
 0x2bd   : > { %v764_v42 = vmul.f32 %v5748_v15, %v763_v41  ;;  %v618_v49 = vpop.f32.mrf.mxu3  ;;  %v651_v41 = vmul.f32 %v6405_v14, %v6405_v14 }
 0x2bf   : > { %v765_v50 = vmul.f32 0.5, %v764_v42 }
 0x2c1   : > { %v766_v53 = vsub.f32 1.5, %v765_v50  ;;  %v647_v50 = vmul.f32 %v6442_v20, %v6442_v20 }
 0x2c3   : > { %v767_v1 = vmul.f32 %v5748_v15, %v766_v53  ;;  %v6446_v32 = vpop.f32.mrf.mxu2 }
 0x2c4   : > { %v649_v22 = vmul.f32 %v6446_v32, %v6446_v32 }
 0x2c5   : > { %v620_v56 = vpop.f32.mrf.mxu3  ;;  %v771_v45 = vsel %vm770_vm14, %v5748_v15, %v767_v1  ;;  %v648_v15 = vmul.f32 %v6444_v63, %v6444_v63 }
 0x2c6   : > { %v6440_v19 = vmul.f32 %v868_v51, %v771_v45  ;;  %v639_v51 = vmul.f32 %v6412_v18, %v6412_v18  ;;  %v657_v45 = vsub.f32 %v6419_v52, %v641_v44  ;;  %v662_v52 = vsub.f32 %v618_v49, %v646_v34 }
 0x2c8   : > { %9890 = vst [vmem:[#allocation28_spill] sm:$0xff] %v6440_v19  ;;  %v655_v57 = vsub.f32 %v6414_v35, %v639_v51  ;;  %v673_v47 = vmax.f32 %v657_v45, 0.0  ;;  %v653_v45 = vmul.f32 %v6410_v17, %v6410_v17 }
 0x2ca   : > { %v6480_v35 = vadd.f32 1e-05, %v673_v47 }
 0x2cd   : > { %v623_v21 = vpop.f32.mrf.mxu3 }
 0x2ce   : > { %v664_v60 = vsub.f32 %v623_v21, %v648_v15  ;;  %v652_v21 = vmul.f32 %v6408_v16, %v6408_v16  ;;  %v659_v15 = vsub.f32 %v6426_v36, %v643_v59 }
 0x2d0   : > { %v680_v44 = vmax.f32 %v664_v60, 0.0  ;;  %v678_v60 = vmax.f32 %v662_v52, 0.0 }
 0x2d2   : > { %v6483_v49 = vadd.f32 1e-05, %v680_v44 }
 0x2d5   : > { %v625_v46 = vpop.f32.mrf.mxu3 }
 0x2d6   : > { %v665_v53 = vsub.f32 %v625_v46, %v649_v22  ;;  %v663_v46 = vsub.f32 %v620_v56, %v647_v50  ;;  %v671_v50 = vmax.f32 %v655_v57, 0.0  ;;  %v6494_v57 = vadd.f32 1e-05, %v678_v60 }
 0x2d8   : > { %v681_v22 = vmax.f32 %v665_v53, 0.0  ;;  %v675_v53 = vmax.f32 %v659_v15, 0.0 }
 0x2dd   : > { %v628_v23 = vpop.f32.mrf.mxu3 }
 0x2de   : > { %v666_v42 = vsub.f32 %v628_v23, %v650_v3  ;;  %v645_v3 = vmul.f32 %v6435_v40, %v6435_v40 }
 0x2e0   : > { %v682_v58 = vmax.f32 %v666_v42, 0.0  ;;  %v679_v42 = vmax.f32 %v663_v46, 0.0 }
 0x2e2   : > { %v6486_v36 = vadd.f32 1e-05, %v679_v42 }
 0x2e5   : > { %v630_v1 = vpop.f32.mrf.mxu3 }
 0x2e6   : > { %v667_v48 = vsub.f32 %v630_v1, %v651_v41  ;;  %v6475_v41 = vadd.f32 1e-05, %v682_v58  ;;  %v6478_v1 = vadd.f32 1e-05, %v681_v22 }
 0x2e8   : > { %v683_v23 = vmax.f32 %v667_v48, 0.0  ;;  %v661_v48 = vsub.f32 %v6431_v55, %v645_v3  ;;  %v6489_v55 = vadd.f32 1e-05, %v671_v50  ;;  %vm828_vm6 = vweird.f32 %v6475_v41 }
 0x2e9   : > { %vm818_vm13 = vweird.f32 %v6478_v1 }
 0x2ea   : > { %v6470_v33 = vadd.f32 1e-05, %v683_v23  ;;  %v677_v59 = vmax.f32 %v661_v48, 0.0  ;;  %9891 = vst [vmem:[#allocation29_spill] sm:$0xff] %v6489_v55  ;;  %v6501_v23 = vadd.f32 1e-05, %v675_v53 }
 0x2ec   : > { %5749 = vrsqrt.f32 %v6470_v33  ;;  %v6504_v3 = vadd.f32 1e-05, %v677_v59  ;;  %vm838_vm3 = vweird.f32 %v6470_v33 }
 0x2ed   : > { %v633_v56 = vpop.f32.mrf.mxu3  ;;  %5751 = vrsqrt.f32 %v6475_v41 }
 0x2ee   : > { %v668_v34 = vsub.f32 %v633_v56, %v652_v21  ;;  %5753 = vrsqrt.f32 %v6478_v1 }
 0x2ef   : > { %5755 = vrsqrt.f32 %v6480_v35 }
 0x2f0   : > { %v684_v58 = vmax.f32 %v668_v34, 0.0  ;;  %5757 = vrsqrt.f32 %v6483_v49 }
 0x2f2   : > { %v6492_v47 = vadd.f32 1e-05, %v684_v58  ;;  %v6497_v51 = vpop.eup %5749 }
 0x2f3   : > { %v6507_v22 = vpop.eup %5751  ;;  %v833_v21 = vmul.f32 %v6497_v51, %v6470_v33  ;;  %vm839_vm1 = vweird.f32 %v6497_v51  ;;  %v867_v33 = vsub.f32 %v6278_v2, %v6423_v37  ;;  %v9910_v37 = vld [vmem:[#allocation29_spill] sm:$0xff] }
 0x2f4   : > { %5759 = vrsqrt.f32 %v6492_v47  ;;  %v6510_v44 = vpop.eup %5753  ;;  %v823_v56 = vmul.f32 %v6507_v22, %v6475_v41  ;;  %vm848_vm0 = vweird.f32 %v6492_v47  ;;  %vm829_vm2 = vweird.f32 %v6507_v22  ;;  %vm6598_vm7 = vmor %vm838_vm3, %vm839_vm1 }
 0x2f5   : > { %5761 = vrsqrt.f32 %v6486_v36  ;;  %v635_v46 = vpop.f32.mrf.mxu3  ;;  %v6515_v15 = vpop.eup %5755  ;;  %v813_v34 = vmul.f32 %v6510_v44, %v6478_v1  ;;  %v834_v58 = vmul.f32 %v6497_v51, %v833_v21  ;;  %vm819_vm8 = vweird.f32 %v6510_v44  ;;  %vm6603_vm9 = vmor %vm828_vm6, %vm829_vm2 }
 0x2f6   : > { %5763 = vrsqrt.f32 %v6489_v55  ;;  %v669_v52 = vsub.f32 %v635_v46, %v653_v45  ;;  %v6518_v42 = vpop.eup %5757  ;;  %v733_v46 = vmul.f32 %v6515_v15, %v6480_v35  ;;  %v872_v41 = vsub.f32 %v6288_v7, %v6444_v63  ;;  %vm6623_vm14 = vmor %vm818_vm13, %vm819_vm8 }
 0x2f7   : > { %5765 = vrsqrt.f32 %v6494_v57  ;;  %v814_v29 = vmul.f32 %v6510_v44, %v813_v34  ;;  %v835_v26 = vmul.f32 0.5, %v834_v58  ;;  %v875_v34 = vsub.f32 %v6294_v10, %v6405_v14 }
 0x2f8   : > { %5767 = vrsqrt.f32 %v6501_v23  ;;  %v685_v48 = vmax.f32 %v669_v52, 0.0  ;;  %v803_v52 = vmul.f32 %v6518_v42, %v6483_v49  ;;  %v734_v54 = vmul.f32 %v6515_v15, %v733_v46 }
 0x2f9   : > { %5769 = vrsqrt.f32 %v6504_v3  ;;  %v836_v19 = vsub.f32 1.5, %v835_v26  ;;  %vm809_vm11 = vweird.f32 %v6518_v42  ;;  %vm798_vm3 = vweird.f32 %v6486_v36 }
 0x2fa   : > { %v6523_v50 = vpop.eup %5759  ;;  %v6527_v60 = vadd.f32 1e-05, %v685_v48  ;;  %v824_v48 = vmul.f32 %v6507_v22, %v823_v56  ;;  %v6575_v14 = vmul.f32 0.5, %v734_v54  ;;  %vm778_vm8 = vweird.f32 %v6504_v3 }
 0x2fb   : > { %v6529_v53 = vpop.eup %5761  ;;  %v843_v59 = vmul.f32 %v6523_v50, %v6492_v47  ;;  %vm849_vm15 = vweird.f32 %v6523_v50  ;;  %v837_v17 = vmul.f32 %v6497_v51, %v836_v19  ;;  %vm739_vm13 = vweird.f32 %v6515_v15 }
 0x2fc   : > { %v6534_v45 = vpop.eup %5763  ;;  %5771 = vrsqrt.f32 %v6527_v60  ;;  %v793_v31 = vmul.f32 %v6529_v53, %v6486_v36  ;;  %v825_v39 = vmul.f32 0.5, %v824_v48  ;;  %vm6589_vm4 = vmor %vm848_vm0, %vm849_vm15  ;;  %vm858_vm10 = vweird.f32 %v6527_v60 }
 0x2fd   : > { %v6541_v30 = vpop.eup %5765  ;;  %v844_v28 = vmul.f32 %v6523_v50, %v843_v59  ;;  %v713_v24 = vmul.f32 %v6534_v45, %v6489_v55  ;;  %v804_v59 = vmul.f32 %v6518_v42, %v803_v52  ;;  %v815_v55 = vmul.f32 0.5, %v814_v29 }
 0x2fe   : > { %v6545_v21 = vpop.eup %5767  ;;  %v783_v56 = vmul.f32 %v6541_v30, %v6494_v57  ;;  %v794_v18 = vmul.f32 %v6529_v53, %v793_v31  ;;  %v876_v52 = vsub.f32 %v6296_v11, %v6408_v16  ;;  %v826_v38 = vsub.f32 1.5, %v825_v39 }
 0x2ff   : > { %v6550_v27 = vpop.eup %5769  ;;  %v845_v25 = vmul.f32 0.5, %v844_v28  ;;  %v753_v28 = vmul.f32 %v6545_v21, %v6501_v23  ;;  %v805_v0 = vmul.f32 0.5, %v804_v59  ;;  %v816_v16 = vsub.f32 1.5, %v815_v55 }
 0x300   : > { %v773_v46 = vmul.f32 %v6550_v27, %v6504_v3  ;;  %v784_v48 = vmul.f32 %v6541_v30, %v783_v56  ;;  %v795_v12 = vmul.f32 0.5, %v794_v18  ;;  %v827_v19 = vmul.f32 %v6507_v22, %v826_v38 }
 0x301   : > { %v846_v62 = vsub.f32 1.5, %v845_v25  ;;  %v6573_v25 = vmul.f32 %v6534_v45, %v713_v24  ;;  %v754_v11 = vmul.f32 %v6545_v21, %v753_v28  ;;  %v806_v39 = vsub.f32 1.5, %v805_v0 }
 0x302   : > { %v5772_v58 = vpop.eup %5771  ;;  %v774_v26 = vmul.f32 %v6550_v27, %v773_v46  ;;  %v785_v54 = vmul.f32 0.5, %v784_v48  ;;  %v796_v0 = vsub.f32 1.5, %v795_v12  ;;  %v841_v38 = vsel %vm6598_vm7, %v6497_v51, %v837_v17 }
 0x303   : > { %v853_v10 = vmul.f32 %v5772_v58, %v6527_v60  ;;  %v847_v31 = vmul.f32 %v6523_v50, %v846_v62  ;;  %vm859_vm5 = vweird.f32 %v5772_v58  ;;  %v817_v59 = vmul.f32 %v6510_v44, %v816_v16 }
 0x304   : > { %v775_v47 = vmul.f32 0.5, %v774_v26  ;;  %v786_v28 = vsub.f32 1.5, %v785_v54  ;;  %vm860_vm12 = vmor %vm858_vm10, %vm859_vm5  ;;  %v831_v60 = vsel %vm6603_vm9, %v6507_v22, %v827_v19  ;;  %v807_v51 = vmul.f32 %v6518_v42, %v806_v39 }
 0x305   : > { %v854_v29 = vmul.f32 %v5772_v58, %v853_v10  ;;  %v851_v55 = vsel %vm6589_vm4, %v6523_v50, %v847_v31  ;;  %v755_v48 = vmul.f32 0.5, %v754_v11  ;;  %v891_v26 = vmul.f32 %v875_v34, %v841_v38 }
 0x306   : > { %v892_v46 = vmul.f32 %v876_v52, %v851_v55  ;;  %vm808_vm15 = vweird.f32 %v6483_v49  ;;  %v821_v63 = vsel %vm6623_vm14, %v6510_v44, %v817_v59  ;;  %v797_v1 = vmul.f32 %v6529_v53, %v796_v0  ;;  %v9908_v59 = vld [vmem:[#allocation14_spill] sm:$0xff] }
 0x307   : > { %v855_v24 = vmul.f32 0.5, %v854_v29  ;;  %v776_v29 = vsub.f32 1.5, %v775_v47  ;;  %vm799_vm0 = vweird.f32 %v6529_v53  ;;  %vm6637_vm1 = vmor %vm808_vm15, %vm809_vm11  ;;  %v9902_v49 = vsub.f32 %v6292_v9, %v6403_v13 }
 0x308   : > { %v908_v34 = vmax.f32 %v892_v46, 0.0  ;;  %vm789_vm2 = vweird.f32 %v6541_v30  ;;  %v756_v44 = vsub.f32 1.5, %v755_v48  ;;  %v907_v12 = vmax.f32 %v891_v26, 0.0  ;;  %vm6650_vm4 = vmor %vm798_vm3, %vm799_vm0 }
 0x309   : > { %v856_v18 = vsub.f32 1.5, %v855_v24  ;;  %v890_v52 = vmul.f32 %v9902_v49, %v831_v60  ;;  %vm788_vm5 = vweird.f32 %v6494_v57  ;;  %v801_v9 = vsel %vm6650_vm4, %v6529_v53, %v797_v1  ;;  %v9914_v1 = vld [vmem:[#allocation26_spill] sm:$0xff]  ;;  %v5385_v24 = vld [vmem:[%s9750_s3 + $0x10] sm:$0xf] }
 0x30a   : > { %v777_v13 = vmul.f32 %v6550_v27, %v776_v29  ;;  %vm779_vm6 = vweird.f32 %v6550_v27  ;;  %v871_v36 = vsub.f32 %v6286_v6, %v6442_v20  ;;  %vm6662_vm7 = vmor %vm788_vm5, %vm789_vm2  ;;  %v715_v57 = vmul.f32 0.5, %v6573_v25  ;;  %v9913_v29 = vld [vmem:[#allocation27_spill] sm:$0xff] }
 0x30b   : > { %v857_v50 = vmul.f32 %v5772_v58, %v856_v18  ;;  %v906_v17 = vmax.f32 %v890_v52, 0.0  ;;  %v870_v39 = vsub.f32 %v6284_v5, %v6437_v61  ;;  %vm780_vm9 = vmor %vm778_vm8, %vm779_vm6  ;;  %v736_v18 = vsub.f32 1.5, %v6575_v14 }
 0x30c   : > { %v887_v20 = vmul.f32 %v871_v36, %v801_v9  ;;  %v781_v55 = vsel %vm780_vm9, %v6550_v27, %v777_v13  ;;  %v757_v19 = vmul.f32 %v6545_v21, %v756_v44  ;;  %vm759_vm10 = vweird.f32 %v6545_v21  ;;  %v9919_v44 = vld [vmem:[#allocation8_spill] sm:$0xff]  ;;  %v9923_v36 = vld [vmem:[#allocation11_spill] sm:$0xff] }
 0x30d   : > { %v861_v10 = vsel %vm860_vm12, %v5772_v58, %v857_v50  ;;  %v918_v62 = vpack.c.bf16 %v907_v12, %v906_v17  ;;  %v869_v3 = vsub.f32 %v6282_v4, %v6435_v40  ;;  %vm758_vm11 = vweird.f32 %v6501_v23  ;;  %v9921_v12 = vld [vmem:[#allocation12_spill] sm:$0xff] }
 0x30e   : > { %v893_v31 = vmul.f32 %v877_v43, %v861_v10  ;;  %v873_v43 = vsub.f32 %v6290_v8, %v6446_v32  ;;  %v811_v8 = vsel %vm6637_vm1, %v6518_v42, %v807_v51  ;;  %v787_v32 = vmul.f32 %v6541_v30, %v786_v28  ;;  %vm760_vm12 = vmor %vm758_vm11, %vm759_vm10  ;;  %v9909_v28 = vld [vmem:[#allocation28_spill] sm:$0xff]  ;;  %v9911_v51 = vld [vmem:[#allocation23_spill] sm:$0xff] }
 0x30f   : > { %v888_v54 = vmul.f32 %v872_v41, %v811_v8  ;;  %v903_v61 = vmax.f32 %v887_v20, 0.0  ;;  %v885_v47 = vmul.f32 %v869_v3, %v781_v55  ;;  %v716_v0 = vsub.f32 1.5, %v715_v57  ;;  %v9917_v8 = vld [vmem:[#allocation6_spill] sm:$0xff]  ;;  %v5638_v9 = vld [vmem:[%s9750_s3 + $0x14] sm:$0xf0] }
 0x310   : > { %v909_v58 = vmax.f32 %v893_v31, 0.0  ;;  %v889_v16 = vmul.f32 %v873_v43, %v821_v63  ;;  %v791_v53 = vsel %vm6662_vm7, %v6541_v30, %v787_v32  ;;  %v761_v14 = vsel %vm760_vm12, %v6545_v21, %v757_v19  ;;  %v9907_v21 = vld [vmem:[#allocation24_spill] sm:$0xff]  ;;  %v9918_v32 = vld [vmem:[#allocation7_spill] sm:$0xff] }
 0x311   : > { %v904_v30 = vmax.f32 %v888_v54, 0.0  ;;  %v886_v25 = vmul.f32 %v870_v39, %v791_v53  ;;  %v737_v27 = vmul.f32 %v6515_v15, %v736_v18  ;;  %vm738_vm14 = vweird.f32 %v6480_v35 }
 0x312   : > { %v919_v11 = vpack.c.bf16 %v909_v58, %v908_v34  ;;  %v905_v6 = vmax.f32 %v889_v16, 0.0  ;;  %v901_v23 = vmax.f32 %v885_v47, 0.0  ;;  %v883_v56 = vmul.f32 %v867_v33, %v761_v14  ;;  %vm740_vm15 = vmor %vm738_vm14, %vm739_vm13  ;;  %v9915_v58 = vld [vmem:[#allocation25_spill] sm:$0xff] }
 0x313   : > { %v902_v4 = vmax.f32 %v886_v25, 0.0  ;;  %v741_v50 = vsel %vm740_vm15, %v6515_v15, %v737_v27  ;;  %v717_v38 = vmul.f32 %v6534_v45, %v716_v0  ;;  %vm719_vm0 = vweird.f32 %v6534_v45  ;;  %v9912_v15 = vld [vmem:[#allocation13_spill] sm:$0xff] }
 0x314   : > { %920 = vmatpush.bf16.msrb.mxu1 %v919_v11  ;;  %v917_v5 = vpack.c.bf16 %v905_v6, %v904_v30  ;;  %v865_v41 = vsub.f32 %v9908_v59, %v9907_v21  ;;  %v900_v2 = vmax.f32 %v9909_v28, 0.0  ;;  %vm718_vm1 = vweird.f32 %v9910_v37  ;;  %v9920_v11 = vld [vmem:[#allocation10_spill] sm:$0xff]  ;;  %v9922_v16 = vld [vmem:[#allocation9_spill] sm:$0xff] }
 0x315   : > { %v916_v40 = vpack.c.bf16 %v903_v61, %v902_v4  ;;  %v899_v35 = vmax.f32 %v883_v56, 0.0  ;;  %vm720_vm2 = vmor %vm718_vm1, %vm719_vm0  ;;  %v863_v48 = vsub.f32 %v9912_v15, %v9911_v51  ;;  %v898_v31 = vmax.f32 %v9913_v29, 0.0 }
 0x316   : > { %v915_v46 = vpack.c.bf16 %v901_v23, %v900_v2  ;;  %v881_v10 = vmul.f32 %v865_v41, %v741_v50  ;;  %v721_v60 = vsel %vm720_vm2, %v6534_v45, %v717_v38  ;;  %v896_v43 = vmax.f32 %v9914_v1, 0.0  ;;  %v9916_v45 = vld [vmem:[#allocation5_spill] sm:$0xff] }
 0x317   : > { %v914_v26 = vpack.c.bf16 %v899_v35, %v898_v31  ;;  %v879_v63 = vmul.f32 %v863_v48, %v721_v60  ;;  %v894_v49 = vmax.f32 %v9915_v58, 0.0  ;;  %v5386_v13 = vor.u32 %v5638_v9, %v5385_v24 }
 0x318   : > { %921 = vmatpush.bf16.msrb.mxu1 %v918_v62  ;;  %v897_v7 = vmax.f32 %v881_v10, 0.0  ;;  %vm983_vm3 = vcmask 130048  }
 0x319   : > { %v895_v34 = vmax.f32 %v879_v63, 0.0  ;;  %1015 = vmatpush.bf16.msrb.mxu0 %v5386_v13 }
 0x31a   : > { %v913_v22 = vpack.c.bf16 %v897_v7, %v896_v43 }
 0x31b   : > { %v912_v52 = vpack.c.bf16 %v895_v34, %v894_v49 }
 0x31c   : > { %922 = vmatpush.bf16.msrb.mxu1 %v917_v5 }
 0x320   : > { %923 = vmatpush.bf16.msrb.mxu1 %v916_v40 }
 0x324   : > { %924 = vmatpush.bf16.msrb.mxu1 %v915_v46 }
 0x328   : > { %925 = vmatpush.bf16.msrb.mxu1 %v914_v26 }
 0x32c   : > { %926 = vmatpush.bf16.msrb.mxu1 %v913_v22 }
 0x330   : > { %927 = vmatpush.bf16.msrb.mxu1 %v912_v52 }
 0x333   : > { %928 = vmatmul.bf16.vlgmr.msrb.gmra.mxu1 %v9916_v45 }
 0x343   : > { %933 = vmatmul.bf16.gmra.mxu1 %v9917_v8 }
 0x353   : > { %938 = vmatmul.bf16.gmra.mxu1 %v9918_v32 }
 0x363   : > { %943 = vmatmul.bf16.gmra.mxu1 %v9919_v44 }
 0x373   : > { %948 = vmatmul.bf16.gmra.mxu1 %v9920_v11 }
 0x383   : > { %953 = vmatmul.bf16.gmra.mxu1 %v9921_v12 }
 0x393   : > { %958 = vmatmul.bf16.gmra.mxu1 %v9922_v16 }
 0x3a3   : > { %963 = vmatmul.bf16.gmra.mxu1 %v9923_v36 }
 0x3b0   : > { %v929_v42 = vpop.f32.mrf.mxu1 }
 0x3b8   : > { %v931_v17 = vpop.f32.mrf.mxu1 }
 0x3b9   : > { %v969_v54 = vpack.c.bf16 %v931_v17, %v929_v42 }
 0x3bb   : > { %5387 = vmatmul.msk.bf16.vlgmr.msrb.gmra.mxu0 %vm983_vm3, %v969_v54 }
 0x3c0   : > { %v934_v57 = vpop.f32.mrf.mxu1 }
 0x3c8   : > { %v936_v53 = vpop.f32.mrf.mxu1 }
 0x3c9   : > { %v970_v39 = vpack.c.bf16 %v936_v53, %v934_v57 }
 0x3cb   : > { %5388 = vmatmul.msk.bf16.gmra.mxu0 %vm983_vm3, %v970_v39 }
 0x3d0   : > { %v939_v62 = vpop.f32.mrf.mxu1 }
 0x3d8   : > { %v941_v6 = vpop.f32.mrf.mxu1 }
 0x3d9   : > { %v971_v20 = vpack.c.bf16 %v941_v6, %v939_v62 }
 0x3db   : > { %5389 = vmatmul.msk.bf16.gmra.mxu0 %vm983_vm3, %v971_v20  ;;  %v9925_v20 = vld [vmem:[#allocation15_spill] sm:$0xff] }
 0x3e0   : > { %v944_v18 = vpop.f32.mrf.mxu1 }
 0x3e8   : > { %v946_v55 = vpop.f32.mrf.mxu1 }
 0x3e9   : > { %v972_v19 = vpack.c.bf16 %v946_v55, %v944_v18  ;;  %v9926_v18 = vld [vmem:[#allocation17_spill] sm:$0xff]  ;;  %v9927_v55 = vld [vmem:[#allocation19_spill] sm:$0xff] }
 0x3eb   : > { %5390 = vmatmul.msk.bf16.gmra.mxu0 %vm983_vm3, %v972_v19  ;;  %v9928_v19 = vld [vmem:[#allocation20_spill] sm:$0xff] }
 0x3f0   : > { %v949_v3 = vpop.f32.mrf.mxu1 }
 0x3f8   : > { %v951_v30 = vpop.f32.mrf.mxu1 }
 0x3f9   : > { %v973_v25 = vpack.c.bf16 %v951_v30, %v949_v3  ;;  %v9929_v3 = vld [vmem:[#allocation21_spill] sm:$0xff]  ;;  %v9930_v30 = vld [vmem:[#allocation22_spill] sm:$0xff] }
 0x3fb   : > { %5391 = vmatmul.msk.bf16.gmra.mxu0 %vm983_vm3, %v973_v25  ;;  %v9931_v25 = vld [vmem:[#allocation16_spill] sm:$0xff] }
 0x400   : > { %v954_v5 = vpop.f32.mrf.mxu1 }
 0x408   : > { %v956_v61 = vpop.f32.mrf.mxu1 }
 0x409   : > { %v974_v47 = vpack.c.bf16 %v956_v61, %v954_v5  ;;  %v9932_v5 = vld [vmem:[#allocation18_spill] sm:$0xff] }
 0x40b   : > { %5392 = vmatmul.msk.bf16.gmra.mxu0 %vm983_vm3, %v974_v47 }
 0x410   : > { %v959_v0 = vpop.f32.mrf.mxu1 }
 0x418   : > { %v961_v14 = vpop.f32.mrf.mxu1 }
 0x419   : > { %v975_v27 = vpack.c.bf16 %v961_v14, %v959_v0 }
 0x41b   : > { %5393 = vmatmul.msk.bf16.gmra.mxu0 %vm983_vm3, %v975_v27 }
 0x420   : > { %v964_v33 = vpop.f32.mrf.mxu1 }
 0x428   : > { %v966_v4 = vpop.f32.mrf.mxu1 }
 0x429   : > { %v976_v40 = vpack.c.bf16 %v966_v4, %v964_v33 }
 0x42b   : > { %5394 = vmatmul.msk.bf16.gmra.mxu0 %vm983_vm3, %v976_v40 }
 0x438   : > { %v6721_v23 = vpop.f32.mrf.mxu0 }
 0x439   : > { %v1114_v39 = vmul.f32 %v6721_v23, %v6721_v23 }
 0x440   : > { %v6723_v56 = vpop.f32.mrf.mxu0 }
 0x441   : > { %9924 = vst [vmem:[#allocation24_spill] sm:$0xff] %v6723_v56  ;;  %v1115_v57 = vmul.f32 %v6723_v56, %v6723_v56  ;;  %v1057_v62 = vpack.c.bf16 %v6723_v56, %v6721_v23 }
 0x443   : > { %v1130_v6 = vpack.c.bf16 %v1115_v57, %v1114_v39 }
 0x448   : > { %v6725_v50 = vpop.f32.mrf.mxu0 }
 0x449   : > { %v1116_v17 = vmul.f32 %v6725_v50, %v6725_v50 }
 0x450   : > { %v6727_v38 = vpop.f32.mrf.mxu0 }
 0x451   : > { %v1117_v36 = vmul.f32 %v6727_v38, %v6727_v38  ;;  %v1058_v54 = vpack.c.bf16 %v6727_v38, %v6725_v50 }
 0x453   : > { %v1131_v53 = vpack.c.bf16 %v1117_v36, %v1116_v17 }
 0x458   : > { %v6729_v21 = vpop.f32.mrf.mxu0 }
 0x459   : > { %v1118_v9 = vmul.f32 %v6729_v21, %v6729_v21 }
 0x460   : > { %v6731_v59 = vpop.f32.mrf.mxu0 }
 0x461   : > { %v1119_v16 = vmul.f32 %v6731_v59, %v6731_v59  ;;  %v1059_v13 = vpack.c.bf16 %v6731_v59, %v6729_v21 }
 0x463   : > { %v1132_v42 = vpack.c.bf16 %v1119_v16, %v1118_v9 }
 0x468   : > { %v6733_v41 = vpop.f32.mrf.mxu0 }
 0x469   : > { %v1120_v11 = vmul.f32 %v6733_v41, %v6733_v41 }
 0x470   : > { %v6735_v28 = vpop.f32.mrf.mxu0 }
 0x471   : > { %v1121_v32 = vmul.f32 %v6735_v28, %v6735_v28  ;;  %v1060_v12 = vpack.c.bf16 %v6735_v28, %v6733_v41 }
 0x473   : > { %v1133_v24 = vpack.c.bf16 %v1121_v32, %v1120_v11 }
 0x478   : > { %v6737_v2 = vpop.f32.mrf.mxu0 }
 0x479   : > { %v1122_v45 = vmul.f32 %v6737_v2, %v6737_v2 }
 0x480   : > { %v6739_v37 = vpop.f32.mrf.mxu0 }
 0x481   : > { %v1123_v49 = vmul.f32 %v6739_v37, %v6739_v37  ;;  %v1061_v8 = vpack.c.bf16 %v6739_v37, %v6737_v2 }
 0x483   : > { %v1134_v44 = vpack.c.bf16 %v1123_v49, %v1122_v45 }
 0x488   : > { %v6741_v46 = vpop.f32.mrf.mxu0 }
 0x489   : > { %v1124_v34 = vmul.f32 %v6741_v46, %v6741_v46 }
 0x490   : > { %v6743_v35 = vpop.f32.mrf.mxu0 }
 0x491   : > { %v1125_v43 = vmul.f32 %v6743_v35, %v6743_v35  ;;  %v1062_v58 = vpack.c.bf16 %v6743_v35, %v6741_v46 }
 0x493   : > { %v1135_v52 = vpack.c.bf16 %v1125_v43, %v1124_v34 }
 0x498   : > { %v6745_v10 = vpop.f32.mrf.mxu0 }
 0x499   : > { %v1126_v63 = vmul.f32 %v6745_v10, %v6745_v10 }
 0x4a0   : > { %v6747_v60 = vpop.f32.mrf.mxu0 }
 0x4a1   : > { %v1127_v26 = vmul.f32 %v6747_v60, %v6747_v60  ;;  %v1063_v1 = vpack.c.bf16 %v6747_v60, %v6745_v10 }
 0x4a3   : > { %v1136_v22 = vpack.c.bf16 %v1127_v26, %v1126_v63 }
 0x4a8   : > { %v6749_v51 = vpop.f32.mrf.mxu0 }
 0x4a9   : > { %v1128_v48 = vmul.f32 %v6749_v51, %v6749_v51 }
 0x4b0   : > { %v6751_v15 = vpop.f32.mrf.mxu0 }
 0x4b1   : > { %v1129_v29 = vmul.f32 %v6751_v15, %v6751_v15  ;;  %v1064_v31 = vpack.c.bf16 %v6751_v15, %v6749_v51 }
 0x4b3   : > { %1065 = vmatpush.bf16.msrb.mxu2 %v1064_v31  ;;  %v1137_v7 = vpack.c.bf16 %v1129_v29, %v1128_v48 }
 0x4b5   : > { %1138 = vmatpush.bf16.msrb.mxu3 %v1137_v7 }
 0x4b7   : > { %1066 = vmatpush.bf16.msrb.mxu2 %v1063_v1 }
 0x4b9   : > { %1139 = vmatpush.bf16.msrb.mxu3 %v1136_v22 }
 0x4bb   : > { %1067 = vmatpush.bf16.msrb.mxu2 %v1062_v58 }
 0x4bd   : > { %1140 = vmatpush.bf16.msrb.mxu3 %v1135_v52 }
 0x4bf   : > { %1068 = vmatpush.bf16.msrb.mxu2 %v1061_v8 }
 0x4c1   : > { %1141 = vmatpush.bf16.msrb.mxu3 %v1134_v44 }
 0x4c3   : > { %1069 = vmatpush.bf16.msrb.mxu2 %v1060_v12 }
 0x4c5   : > { %1142 = vmatpush.bf16.msrb.mxu3 %v1133_v24 }
 0x4c7   : > { %1070 = vmatpush.bf16.msrb.mxu2 %v1059_v13 }
 0x4c9   : > { %1143 = vmatpush.bf16.msrb.mxu3 %v1132_v42 }
 0x4cb   : > { %1071 = vmatpush.bf16.msrb.mxu2 %v1058_v54 }
 0x4cd   : > { %1144 = vmatpush.bf16.msrb.mxu3 %v1131_v53 }
 0x4cf   : > { %1072 = vmatpush.bf16.msrb.mxu2 %v1057_v62 }
 0x4d1   : > { %1145 = vmatpush.bf16.msrb.mxu3 %v1130_v6 }
 0x4d2   : > { %1073 = vmatmul.bf16.vlgmr.msrb.gmra.mxu2 %v9925_v20 }
 0x4d4   : > { %1146 = vmatmul.bf16.vlgmr.msrb.gmra.mxu3 %v9925_v20 }
 0x4e2   : > { %1078 = vmatmul.bf16.gmra.mxu2 %v9926_v18 }
 0x4e4   : > { %1151 = vmatmul.bf16.gmra.mxu3 %v9926_v18 }
 0x4f2   : > { %1083 = vmatmul.bf16.gmra.mxu2 %v9927_v55 }
 0x4f4   : > { %1156 = vmatmul.bf16.gmra.mxu3 %v9927_v55 }
 0x502   : > { %1088 = vmatmul.bf16.gmra.mxu2 %v9928_v19 }
 0x504   : > { %1161 = vmatmul.bf16.gmra.mxu3 %v9928_v19 }
 0x512   : > { %1093 = vmatmul.bf16.gmra.mxu2 %v9929_v3 }
 0x514   : > { %1166 = vmatmul.bf16.gmra.mxu3 %v9929_v3 }
 0x522   : > { %1098 = vmatmul.bf16.gmra.mxu2 %v9930_v30 }
 0x524   : > { %1171 = vmatmul.bf16.gmra.mxu3 %v9930_v30 }
 0x532   : > { %1103 = vmatmul.bf16.gmra.mxu2 %v9931_v25 }
 0x534   : > { %1176 = vmatmul.bf16.gmra.mxu3 %v9931_v25 }
 0x542   : > { %1108 = vmatmul.bf16.gmra.mxu2 %v9932_v5 }
 0x544   : > { %1181 = vmatmul.bf16.gmra.mxu3 %v9932_v5 }
 0x555   : > { %v1074_v61 = vpop.f32.mrf.mxu2 }
 0x556   : > { %v1187_v47 = vmul.f32 %v1074_v61, %v1074_v61  ;;  %v1411_v45 = vsub.f32 %v6721_v23, %v1074_v61 }
 0x557   : > { %v1147_v0 = vpop.f32.mrf.mxu3 }
 0x558   : > { %v1203_v14 = vsub.f32 %v1147_v0, %v1187_v47 }
 0x55a   : > { %v1219_v27 = vmax.f32 %v1203_v14, 0.0 }
 0x55c   : > { %v1235_v33 = vadd.f32 1e-05, %v1219_v27 }
 0x55d   : > { %v6817_v4 = vpop.f32.mrf.mxu2 }
 0x55e   : > { %9933 = vst [vmem:[#allocation14_spill] sm:$0xff] %v6817_v4  ;;  %5773 = vrsqrt.f32 %v1235_v33  ;;  %vm1257_vm5 = vweird.f32 %v1235_v33 }
 0x55f   : > { %v6819_v40 = vpop.f32.mrf.mxu3 }
 0x564   : > { %v5774_v48 = vpop.eup %5773 }
 0x565   : > { %v1252_v29 = vmul.f32 %v5774_v48, %v1235_v33  ;;  %v1079_v31 = vpop.f32.mrf.mxu2  ;;  %vm1258_vm4 = vweird.f32 %v5774_v48 }
 0x566   : > { %v1189_v26 = vmul.f32 %v1079_v31, %v1079_v31  ;;  %vm1259_vm6 = vmor %vm1257_vm5, %vm1258_vm4  ;;  %v1413_v39 = vsub.f32 %v6725_v50, %v1079_v31 }
 0x567   : > { %v1253_v7 = vmul.f32 %v5774_v48, %v1252_v29  ;;  %v1152_v63 = vpop.f32.mrf.mxu3 }
 0x568   : > { %v1205_v1 = vsub.f32 %v1152_v63, %v1189_v26 }
 0x569   : > { %v1254_v43 = vmul.f32 0.5, %v1253_v7 }
 0x56a   : > { %v1221_v22 = vmax.f32 %v1205_v1, 0.0 }
 0x56b   : > { %v1255_v34 = vsub.f32 1.5, %v1254_v43 }
 0x56c   : > { %v1237_v58 = vadd.f32 1e-05, %v1221_v22 }
 0x56d   : > { %v1256_v49 = vmul.f32 %v5774_v48, %v1255_v34  ;;  %v6821_v52 = vpop.f32.mrf.mxu2 }
 0x56e   : > { %5775 = vrsqrt.f32 %v1237_v58  ;;  %vm1277_vm8 = vweird.f32 %v1237_v58 }
 0x56f   : > { %v6824_v8 = vpop.f32.mrf.mxu3  ;;  %v1260_v32 = vsel %vm1259_vm6, %v5774_v48, %v1256_v49 }
 0x570   : > { %v6826_v44 = vmul.f32 %v1411_v45, %v1260_v32 }
 0x572   : > { %9934 = vst [vmem:[#allocation28_spill] sm:$0xff] %v6826_v44 }
 0x574   : > { %v5776_v11 = vpop.eup %5775 }
 0x575   : > { %v1272_v12 = vmul.f32 %v5776_v11, %v1237_v58  ;;  %v1084_v16 = vpop.f32.mrf.mxu2  ;;  %vm1278_vm7 = vweird.f32 %v5776_v11 }
 0x576   : > { %v1191_v24 = vmul.f32 %v1084_v16, %v1084_v16  ;;  %vm1279_vm9 = vmor %vm1277_vm8, %vm1278_vm7  ;;  %v1415_v33 = vsub.f32 %v6729_v21, %v1084_v16 }
 0x577   : > { %v1273_v9 = vmul.f32 %v5776_v11, %v1272_v12  ;;  %v1157_v13 = vpop.f32.mrf.mxu3 }
 0x578   : > { %v1207_v36 = vsub.f32 %v1157_v13, %v1191_v24 }
 0x579   : > { %v1274_v42 = vmul.f32 0.5, %v1273_v9 }
 0x57a   : > { %v1223_v17 = vmax.f32 %v1207_v36, 0.0 }
 0x57b   : > { %v1275_v54 = vsub.f32 1.5, %v1274_v42 }
 0x57c   : > { %v1239_v57 = vadd.f32 1e-05, %v1223_v17 }
 0x57d   : > { %v1276_v23 = vmul.f32 %v5776_v11, %v1275_v54  ;;  %v6828_v53 = vpop.f32.mrf.mxu2 }
 0x57e   : > { %5777 = vrsqrt.f32 %v1239_v57  ;;  %vm1297_vm11 = vweird.f32 %v1239_v57 }
 0x57f   : > { %v6831_v62 = vpop.f32.mrf.mxu3  ;;  %v1280_v6 = vsel %vm1279_vm9, %v5776_v11, %v1276_v23 }
 0x580   : > { %v6833_v20 = vmul.f32 %v1413_v39, %v1280_v6 }
 0x582   : > { %9935 = vst [vmem:[#allocation29_spill] sm:$0xff] %v6833_v20 }
 0x584   : > { %v5778_v18 = vpop.eup %5777 }
 0x585   : > { %v1292_v55 = vmul.f32 %v5778_v18, %v1239_v57  ;;  %v1089_v19 = vpop.f32.mrf.mxu2  ;;  %vm1298_vm10 = vweird.f32 %v5778_v18 }
 0x586   : > { %v1193_v3 = vmul.f32 %v1089_v19, %v1089_v19  ;;  %vm1299_vm12 = vmor %vm1297_vm11, %vm1298_vm10  ;;  %v1417_v12 = vsub.f32 %v6733_v41, %v1089_v19 }
 0x587   : > { %v1293_v30 = vmul.f32 %v5778_v18, %v1292_v55  ;;  %v1162_v25 = vpop.f32.mrf.mxu3 }
 0x588   : > { %v1209_v5 = vsub.f32 %v1162_v25, %v1193_v3 }
 0x589   : > { %v1294_v61 = vmul.f32 0.5, %v1293_v30 }
 0x58a   : > { %v1225_v47 = vmax.f32 %v1209_v5, 0.0 }
 0x58b   : > { %v1295_v0 = vsub.f32 1.5, %v1294_v61  ;;  %v1192_v61 = vmul.f32 %v6828_v53, %v6828_v53 }
 0x58c   : > { %v1241_v14 = vadd.f32 1e-05, %v1225_v47 }
 0x58d   : > { %v1296_v50 = vmul.f32 %v5778_v18, %v1295_v0  ;;  %v6835_v27 = vpop.f32.mrf.mxu2 }
 0x58e   : > { %5779 = vrsqrt.f32 %v1241_v14  ;;  %vm1317_vm14 = vweird.f32 %v1241_v14 }
 0x58f   : > { %v6838_v48 = vpop.f32.mrf.mxu3  ;;  %v1300_v29 = vsel %vm1299_vm12, %v5778_v18, %v1296_v50 }
 0x590   : > { %v6840_v31 = vmul.f32 %v1415_v33, %v1300_v29 }
 0x592   : > { %9936 = vst [vmem:[#allocation23_spill] sm:$0xff] %v6840_v31 }
 0x594   : > { %v5780_v26 = vpop.eup %5779 }
 0x595   : > { %v1312_v7 = vmul.f32 %v5780_v26, %v1241_v14  ;;  %v1094_v63 = vpop.f32.mrf.mxu2  ;;  %vm1318_vm13 = vweird.f32 %v5780_v26 }
 0x596   : > { %v1195_v1 = vmul.f32 %v1094_v63, %v1094_v63  ;;  %vm1319_vm15 = vmor %vm1317_vm14, %vm1318_vm13  ;;  %v1419_v41 = vsub.f32 %v6737_v2, %v1094_v63  ;;  %v1194_v63 = vmul.f32 %v6835_v27, %v6835_v27 }
 0x597   : > { %v1313_v43 = vmul.f32 %v5780_v26, %v1312_v7  ;;  %v1167_v22 = vpop.f32.mrf.mxu3 }
 0x598   : > { %v1211_v34 = vsub.f32 %v1167_v22, %v1195_v1 }
 0x599   : > { %v1314_v58 = vmul.f32 0.5, %v1313_v43 }
 0x59a   : > { %v1227_v49 = vmax.f32 %v1211_v34, 0.0  ;;  %v1190_v34 = vmul.f32 %v6821_v52, %v6821_v52 }
 0x59b   : > { %v1315_v45 = vsub.f32 1.5, %v1314_v58 }
 0x59c   : > { %v1243_v32 = vadd.f32 1e-05, %v1227_v49 }
 0x59d   : > { %v1316_v21 = vmul.f32 %v5780_v26, %v1315_v45  ;;  %v6842_v11 = vpop.f32.mrf.mxu2 }
 0x59e   : > { %5781 = vrsqrt.f32 %v1243_v32  ;;  %vm1337_vm1 = vweird.f32 %v1243_v32  ;;  %v1196_v50 = vmul.f32 %v6842_v11, %v6842_v11 }
 0x59f   : > { %v1169_v16 = vpop.f32.mrf.mxu3  ;;  %v1320_v24 = vsel %vm1319_vm15, %v5780_v26, %v1316_v21  ;;  %v1208_v26 = vsub.f32 %v6831_v62, %v1192_v61  ;;  %v1188_v21 = vmul.f32 %v6817_v4, %v6817_v4  ;;  %v1210_v62 = vsub.f32 %v6838_v48, %v1194_v63 }
 0x5a0   : > { %v6845_v9 = vmul.f32 %v1417_v12, %v1320_v24  ;;  %v1212_v58 = vsub.f32 %v1169_v16, %v1196_v50 }
 0x5a1   : > { %v1224_v45 = vmax.f32 %v1208_v26, 0.0  ;;  %v1204_v48 = vsub.f32 %v6819_v40, %v1188_v21 }
 0x5a2   : > { %9937 = vst [vmem:[#allocation13_spill] sm:$0xff] %v6845_v9  ;;  %v1228_v16 = vmax.f32 %v1212_v58, 0.0 }
 0x5a4   : > { %v5782_v13 = vpop.eup %5781 }
 0x5a5   : > { %v1332_v36 = vmul.f32 %v5782_v13, %v1243_v32  ;;  %v6847_v42 = vpop.f32.mrf.mxu2  ;;  %vm1338_vm0 = vweird.f32 %v5782_v13 }
 0x5a6   : > { %vm1339_vm2 = vmor %vm1337_vm1, %vm1338_vm0  ;;  %v1197_v2 = vmul.f32 %v6847_v42, %v6847_v42 }
 0x5a7   : > { %v1333_v17 = vmul.f32 %v5782_v13, %v1332_v36  ;;  %v1172_v54 = vpop.f32.mrf.mxu3 }
 0x5a8   : > { %v1213_v1 = vsub.f32 %v1172_v54, %v1197_v2 }
 0x5a9   : > { %v1334_v57 = vmul.f32 0.5, %v1333_v17  ;;  %v1206_v17 = vsub.f32 %v6824_v8, %v1190_v34 }
 0x5aa   : > { %v1229_v12 = vmax.f32 %v1213_v1, 0.0 }
 0x5ab   : > { %v1335_v23 = vsub.f32 1.5, %v1334_v57 }
 0x5ad   : > { %v1336_v39 = vmul.f32 %v5782_v13, %v1335_v23  ;;  %v6849_v6 = vpop.f32.mrf.mxu2  ;;  %v6889_v23 = vadd.f32 1e-05, %v1224_v45 }
 0x5ae   : > { %v1198_v5 = vmul.f32 %v6849_v6, %v6849_v6 }
 0x5af   : > { %v1174_v18 = vpop.f32.mrf.mxu3  ;;  %v1340_v55 = vsel %vm1339_vm2, %v5782_v13, %v1336_v39 }
 0x5b0   : > { %v6852_v19 = vmul.f32 %v1419_v41, %v1340_v55  ;;  %v1214_v33 = vsub.f32 %v1174_v18, %v1198_v5  ;;  %v1226_v41 = vmax.f32 %v1210_v62, 0.0  ;;  %v6893_v18 = vadd.f32 1e-05, %v1229_v12 }
 0x5b1   : > { %v1220_v5 = vmax.f32 %v1204_v48, 0.0 }
 0x5b2   : > { %v1230_v49 = vmax.f32 %v1214_v33, 0.0  ;;  %v6902_v61 = vadd.f32 1e-05, %v1226_v41 }
 0x5b4   : > { %v6887_v54 = vadd.f32 1e-05, %v1230_v49 }
 0x5b5   : > { %v6854_v3 = vpop.f32.mrf.mxu2 }
 0x5b6   : > { %v1199_v25 = vmul.f32 %v6854_v3, %v6854_v3  ;;  %vm1367_vm2 = vweird.f32 %v6887_v54 }
 0x5b7   : > { %v1177_v30 = vpop.f32.mrf.mxu3 }
 0x5b8   : > { %v1215_v0 = vsub.f32 %v1177_v30, %v1199_v25  ;;  %v1222_v30 = vmax.f32 %v1206_v17, 0.0  ;;  %v6896_v25 = vadd.f32 1e-05, %v1228_v16 }
 0x5ba   : > { %v1231_v43 = vmax.f32 %v1215_v0, 0.0 }
 0x5bc   : > { %v6882_v13 = vadd.f32 1e-05, %v1231_v43 }
 0x5bd   : > { %v6864_v47 = vpop.f32.mrf.mxu2 }
 0x5be   : > { %v1200_v14 = vmul.f32 %v6864_v47, %v6864_v47  ;;  %vm1377_vm12 = vweird.f32 %v6882_v13 }
 0x5bf   : > { %v1179_v29 = vpop.f32.mrf.mxu3 }
 0x5c0   : > { %v1216_v7 = vsub.f32 %v1179_v29, %v1200_v14  ;;  %v6912_v14 = vadd.f32 1e-05, %v1222_v30 }
 0x5c2   : > { %v1232_v22 = vmax.f32 %v1216_v7, 0.0  ;;  %v6919_v7 = vadd.f32 1e-05, %v1220_v5 }
 0x5c4   : > { %v6875_v32 = vadd.f32 1e-05, %v1232_v22 }
 0x5c5   : > { %v6880_v24 = vpop.f32.mrf.mxu2 }
 0x5c6   : > { %v1201_v36 = vmul.f32 %v6880_v24, %v6880_v24  ;;  %5783 = vrsqrt.f32 %v6875_v32  ;;  %vm1387_vm8 = vweird.f32 %v6875_v32 }
 0x5c7   : > { %v1182_v57 = vpop.f32.mrf.mxu3  ;;  %5785 = vrsqrt.f32 %v6882_v13 }
 0x5c8   : > { %v1217_v39 = vsub.f32 %v1182_v57, %v1201_v36  ;;  %5787 = vrsqrt.f32 %v6887_v54 }
 0x5c9   : > { %5789 = vrsqrt.f32 %v6889_v23 }
 0x5ca   : > { %v1233_v55 = vmax.f32 %v1217_v39, 0.0  ;;  %5791 = vrsqrt.f32 %v6893_v18 }
 0x5cc   : > { %v6900_v8 = vadd.f32 1e-05, %v1233_v55  ;;  %v6907_v2 = vpop.eup %5783 }
 0x5cd   : > { %v6905_v40 = vpop.f32.mrf.mxu2  ;;  %v6915_v33 = vpop.eup %5785  ;;  %v1382_v63 = vmul.f32 %v6907_v2, %v6875_v32  ;;  %vm1388_vm5 = vweird.f32 %v6907_v2  ;;  %v1425_v32 = vsub.f32 %v6749_v51, %v6880_v24 }
 0x5ce   : > { %5793 = vrsqrt.f32 %v6900_v8  ;;  %v1202_v0 = vmul.f32 %v6905_v40, %v6905_v40  ;;  %v6917_v26 = vpop.eup %5787  ;;  %v1372_v34 = vmul.f32 %v6915_v33, %v6882_v13  ;;  %vm1397_vm6 = vweird.f32 %v6900_v8  ;;  %vm6992_vm13 = vmor %vm1387_vm8, %vm1388_vm5 }
 0x5cf   : > { %5795 = vrsqrt.f32 %v6896_v25  ;;  %v1184_v50 = vpop.f32.mrf.mxu3  ;;  %v6924_v1 = vpop.eup %5789  ;;  %v1362_v49 = vmul.f32 %v6917_v26, %v6887_v54  ;;  %v1383_v62 = vmul.f32 %v6907_v2, %v1382_v63  ;;  %vm1378_vm7 = vweird.f32 %v6915_v33 }
 0x5d0   : > { %v1218_v29 = vsub.f32 %v1184_v50, %v1202_v0  ;;  %5797 = vrsqrt.f32 %v6902_v61  ;;  %v6926_v22 = vpop.eup %5791  ;;  %v1373_v16 = vmul.f32 %v6915_v33, %v1372_v34  ;;  %v1302_v39 = vmul.f32 %v6924_v1, %v6889_v23  ;;  %vm6998_vm14 = vmor %vm1377_vm12, %vm1378_vm7 }
 0x5d1   : > { %5799 = vrsqrt.f32 %v6912_v14  ;;  %v1352_v36 = vmul.f32 %v6926_v22, %v6893_v18  ;;  %v1363_v41 = vmul.f32 %v6917_v26, %v1362_v49  ;;  %v1384_v30 = vmul.f32 0.5, %v1383_v62 }
 0x5d2   : > { %v1234_v43 = vmax.f32 %v1218_v29, 0.0  ;;  %5801 = vrsqrt.f32 %v6919_v7  ;;  %v1374_v63 = vmul.f32 0.5, %v1373_v16  ;;  %v1303_v44 = vmul.f32 %v6924_v1, %v1302_v39 }
 0x5d3   : > { %v1353_v50 = vmul.f32 %v6926_v22, %v1352_v36  ;;  %v1364_v20 = vmul.f32 0.5, %v1363_v41  ;;  %v1385_v62 = vsub.f32 1.5, %v1384_v30  ;;  %vm1368_vm11 = vweird.f32 %v6917_v26 }
 0x5d4   : > { %v6931_v58 = vpop.eup %5793  ;;  %v6935_v45 = vadd.f32 1e-05, %v1234_v43  ;;  %v1375_v16 = vsub.f32 1.5, %v1374_v63  ;;  %v6973_v9 = vmul.f32 0.5, %v1303_v44  ;;  %vm1358_vm0 = vweird.f32 %v6926_v22 }
 0x5d5   : > { %v6937_v21 = vpop.eup %5795  ;;  %v1392_v12 = vmul.f32 %v6931_v58, %v6900_v8  ;;  %v1354_v56 = vmul.f32 0.5, %v1353_v50  ;;  %vm1398_vm4 = vweird.f32 %v6931_v58  ;;  %v1365_v41 = vsub.f32 1.5, %v1364_v20 }
 0x5d6   : > { %5803 = vrsqrt.f32 %v6935_v45  ;;  %v6946_v17 = vpop.eup %5797  ;;  %v1342_v48 = vmul.f32 %v6937_v21, %v6896_v25  ;;  %vm6980_vm9 = vmor %vm1397_vm6, %vm1398_vm4  ;;  %v1376_v44 = vmul.f32 %v6915_v33, %v1375_v16  ;;  %vm1407_vm15 = vweird.f32 %v6935_v45 }
 0x5d7   : > { %v1393_v57 = vmul.f32 %v6931_v58, %v1392_v12  ;;  %v6955_v55 = vpop.eup %5799  ;;  %v1322_v0 = vmul.f32 %v6946_v17, %v6902_v61  ;;  %v1355_v63 = vsub.f32 1.5, %v1354_v56  ;;  %v1426_v51 = vsub.f32 %v6751_v15, %v6905_v40  ;;  %vm7019_vm4 = vmor %vm1367_vm2, %vm1368_vm11 }
 0x5d8   : > { %v6960_v29 = vpop.eup %5801  ;;  %v1282_v12 = vmul.f32 %v6955_v55, %v6912_v14  ;;  %v1343_v49 = vmul.f32 %v6937_v21, %v1342_v48  ;;  %vm1348_vm5 = vweird.f32 %v6937_v21  ;;  %vm1357_vm6 = vweird.f32 %v6893_v18 }
 0x5d9   : > { %v1394_v5 = vmul.f32 0.5, %v1393_v57  ;;  %v1262_v31 = vmul.f32 %v6960_v29, %v6919_v7  ;;  %v1323_v36 = vmul.f32 %v6946_v17, %v1322_v0  ;;  %v1386_v0 = vmul.f32 %v6907_v2, %v1385_v62  ;;  %vm7033_vm7 = vmor %vm1357_vm6, %vm1358_vm0 }
 0x5da   : > { %v1283_v39 = vmul.f32 %v6955_v55, %v1282_v12  ;;  %v1344_v48 = vmul.f32 0.5, %v1343_v49  ;;  %v1366_v49 = vmul.f32 %v6917_v26, %v1365_v41  ;;  %v1424_v62 = vsub.f32 %v6747_v60, %v6864_v47  ;;  %v7116_v41 = vld [vmem:[%s6223_s9 + $0x30] sm:$0xff] }
 0x5db   : > { %v1395_v43 = vsub.f32 1.5, %v1394_v5  ;;  %v1324_v50 = vmul.f32 0.5, %v1323_v36  ;;  %v1390_v13 = vsel %vm6992_vm13, %v6907_v2, %v1386_v0  ;;  %v1380_v2 = vsel %vm6998_vm14, %v6915_v33, %v1376_v44  ;;  %v7090_v33 = vld [vmem:[%s6223_s9 + $0x8] sm:$0xff]  ;;  %9962 = vst [vmem:[#allocation8_spill] sm:$0xff] %v7116_v41 }
 0x5dc   : > { %v5804_v34 = vpop.eup %5803  ;;  %v1423_v60 = vsub.f32 %v6745_v10, %v6854_v3  ;;  %v1440_v47 = vmul.f32 %v1424_v62, %v1390_v13  ;;  %v1370_v54 = vsel %vm7019_vm4, %v6917_v26, %v1366_v49  ;;  %v1422_v10 = vsub.f32 %v6743_v35, %v6849_v6  ;;  %9957 = vst [vmem:[#allocation26_spill] sm:$0xff] %v7090_v33 }
 0x5dd   : > { %v1402_v57 = vmul.f32 %v5804_v34, %v6935_v45  ;;  %v1396_v5 = vmul.f32 %v6931_v58, %v1395_v43  ;;  %vm1408_vm10 = vweird.f32 %v5804_v34  ;;  %v1325_v36 = vsub.f32 1.5, %v1324_v50 }
 0x5de   : > { %vm1409_vm1 = vmor %vm1407_vm15, %vm1408_vm10  ;;  %v1263_v18 = vmul.f32 %v6960_v29, %v1262_v31  ;;  %vm1347_vm8 = vweird.f32 %v6896_v25  ;;  %v1456_v6 = vmax.f32 %v1440_v47, 0.0  ;;  %v1438_v0 = vmul.f32 %v1422_v10, %v1370_v54  ;;  %v7094_v10 = vld [vmem:[%s6223_s9 + $0x10] sm:$0xff] }
 0x5df   : > { %v1403_v4 = vmul.f32 %v5804_v34, %v1402_v57  ;;  %v1400_v20 = vsel %vm6980_vm9, %v6931_v58, %v1396_v5  ;;  %v1356_v57 = vmul.f32 %v6926_v22, %v1355_v63  ;;  %v1439_v5 = vmul.f32 %v1423_v60, %v1380_v2  ;;  %vm7044_vm9 = vmor %vm1347_vm8, %vm1348_vm5  ;;  %9958 = vst [vmem:[#allocation25_spill] sm:$0xff] %v7094_v10 }
 0x5e0   : > { %v1441_v24 = vmul.f32 %v1425_v32, %v1400_v20  ;;  %v1305_v50 = vsub.f32 1.5, %v6973_v9  ;;  %vm1328_vm10 = vweird.f32 %v6946_v17  ;;  %v1326_v25 = vmul.f32 %v6946_v17, %v1325_v36 }
 0x5e1   : > { %v1404_v30 = vmul.f32 0.5, %v1403_v4  ;;  %v1345_v4 = vsub.f32 1.5, %v1344_v48  ;;  %v1284_v48 = vmul.f32 0.5, %v1283_v39  ;;  %v1360_v26 = vsel %vm7033_vm7, %v6926_v22, %v1356_v57  ;;  %v9952_v57 = vld [vmem:[#allocation24_spill] sm:$0xff] }
 0x5e2   : > { %v1457_v3 = vmax.f32 %v1441_v24, 0.0  ;;  %v1420_v22 = vsub.f32 %v6739_v37, %v6842_v11  ;;  %v1455_v39 = vmax.f32 %v1439_v5, 0.0  ;;  %vm1327_vm11 = vweird.f32 %v6902_v61  ;;  %v9951_v24 = vld [vmem:[#allocation14_spill] sm:$0xff]  ;;  %v5401_v5 = vld [vmem:[%s9750_s3 + $0x30] sm:$0xf] }
 0x5e3   : > { %v1405_v8 = vsub.f32 1.5, %v1404_v30  ;;  %v1346_v40 = vmul.f32 %v6937_v21, %v1345_v4  ;;  %v1421_v30 = vsub.f32 %v6741_v46, %v6847_v42  ;;  %v1264_v46 = vmul.f32 0.5, %v1263_v18  ;;  %vm1329_vm12 = vmor %vm1327_vm11, %vm1328_vm10  ;;  %v5640_v18 = vld [vmem:[%s9750_s3 + $0x34] sm:$0xf0] }
 0x5e4   : > { %v1469_v42 = vpack.c.bf16 %v1456_v6, %v1455_v39  ;;  %v1454_v9 = vmax.f32 %v1438_v0, 0.0  ;;  %v1285_v44 = vsub.f32 1.5, %v1284_v48  ;;  %vm1308_vm13 = vweird.f32 %v6924_v1  ;;  %v7126_v0 = vld [vmem:[%s6223_s9 + $0x38] sm:$0xff] }
 0x5e5   : > { %v1406_v58 = vmul.f32 %v5804_v34, %v1405_v8  ;;  %v1350_v31 = vsel %vm7044_vm9, %v6937_v21, %v1346_v40  ;;  %v1437_v63 = vmul.f32 %v1421_v30, %v1360_v26  ;;  %v1330_v21 = vsel %vm1329_vm12, %v6946_v17, %v1326_v25  ;;  %v7086_v40 = vld [vmem:[%s6223_s9] sm:$0xff]  ;;  %v7112_v26 = vld [vmem:[%s6223_s9 + $0x28] sm:$0xff]  ;;  %9963 = vst [vmem:[#allocation10_spill] sm:$0xff] %v7126_v0 }
 0x5e6   : > { %v1436_v43 = vmul.f32 %v1420_v22, %v1350_v31  ;;  %v1306_v20 = vmul.f32 %v6924_v1, %v1305_v50  ;;  %v1418_v37 = vsub.f32 %v6735_v28, %v6835_v27  ;;  %vm1307_vm14 = vweird.f32 %v6889_v23  ;;  %9956 = vst [vmem:[#allocation27_spill] sm:$0xff] %v7086_v40  ;;  %v5397_v30 = vld [vmem:[%s9750_s3 + $0x20] sm:$0xf] }
 0x5e7   : > { %v1410_v45 = vsel %vm1409_vm1, %v5804_v34, %v1406_v58  ;;  %v1453_v11 = vmax.f32 %v1437_v63, 0.0  ;;  %vm1309_vm15 = vmor %vm1307_vm14, %vm1308_vm13  ;;  %v1265_v56 = vsub.f32 1.5, %v1264_v46  ;;  %vm1288_vm0 = vweird.f32 %v6955_v55  ;;  %9961 = vst [vmem:[#allocation7_spill] sm:$0xff] %v7112_v26 }
 0x5e8   : > { %v1442_v15 = vmul.f32 %v1426_v51, %v1410_v45  ;;  %v1452_v8 = vmax.f32 %v1436_v43, 0.0  ;;  %v1434_v4 = vmul.f32 %v1418_v37, %v1330_v21  ;;  %v1310_v32 = vsel %vm1309_vm15, %v6924_v1, %v1306_v20  ;;  %v9953_v45 = vld [vmem:[#allocation23_spill] sm:$0xff] }
 0x5e9   : > { %v1468_v61 = vpack.c.bf16 %v1454_v9, %v1453_v11  ;;  %v1286_v17 = vmul.f32 %v6955_v55, %v1285_v44  ;;  %v1416_v12 = vsub.f32 %v6731_v59, %v6828_v53  ;;  %v1451_v28 = vmax.f32 %v6852_v19, 0.0  ;;  %v9950_v59 = vld [vmem:[#allocation13_spill] sm:$0xff] }
 0x5ea   : > { %v1458_v34 = vmax.f32 %v1442_v15, 0.0  ;;  %vm1287_vm1 = vweird.f32 %v6912_v14  ;;  %v1450_v23 = vmax.f32 %v1434_v4, 0.0  ;;  %vm1268_vm4 = vweird.f32 %v6960_v29 }
 0x5eb   : > { %vm1289_vm2 = vmor %vm1287_vm1, %vm1288_vm0  ;;  %v1467_v27 = vpack.c.bf16 %v1452_v8, %v1451_v28  ;;  %v1432_v58 = vmul.f32 %v1416_v12, %v1310_v32  ;;  %v1266_v1 = vmul.f32 %v6960_v29, %v1265_v56  ;;  %v1414_v49 = vsub.f32 %v6727_v38, %v6821_v52 }
 0x5ec   : > { %v1470_v35 = vpack.c.bf16 %v1458_v34, %v1457_v3  ;;  %v1290_v13 = vsel %vm1289_vm2, %v6955_v55, %v1286_v17  ;;  %v1449_v53 = vmax.f32 %v9950_v59, 0.0  ;;  %vm1267_vm5 = vweird.f32 %v6919_v7  ;;  %v9954_v7 = vld [vmem:[#allocation29_spill] sm:$0xff]  ;;  %v7098_v3 = vld [vmem:[%s6223_s9 + $0x18] sm:$0xff] }
 0x5ed   : > { %vm1269_vm6 = vmor %vm1267_vm5, %vm1268_vm4  ;;  %v1448_v14 = vmax.f32 %v1432_v58, 0.0  ;;  %v1430_v62 = vmul.f32 %v1414_v49, %v1290_v13  ;;  %v1412_v55 = vsub.f32 %v9952_v57, %v9951_v24  ;;  %v1447_v2 = vmax.f32 %v9953_v45, 0.0  ;;  %9959 = vst [vmem:[#allocation5_spill] sm:$0xff] %v7098_v3  ;;  %v7102_v34 = vld [vmem:[%s6223_s9 + $0x20] sm:$0xff] }
 0x5ee   : > { %1471 = vmatpush.bf16.msra.mxu1 %v1470_v35  ;;  %v1466_v19 = vpack.c.bf16 %v1450_v23, %v1449_v53  ;;  %v1270_v51 = vsel %vm1269_vm6, %v6960_v29, %v1266_v1  ;;  %v1445_v16 = vmax.f32 %v9954_v7, 0.0  ;;  %v9955_v29 = vld [vmem:[#allocation28_spill] sm:$0xff]  ;;  %9960 = vst [vmem:[#allocation6_spill] sm:$0xff] %v7102_v34  ;;  %v5402_v48 = vor.u32 %v5640_v18, %v5401_v5  ;;  %v5639_v35 = vld [vmem:[%s9750_s3 + $0x24] sm:$0xf0] }
 0x5ef   : > { %v1465_v38 = vpack.c.bf16 %v1448_v14, %v1447_v2  ;;  %v1446_v52 = vmax.f32 %v1430_v62, 0.0  ;;  %v1428_v36 = vmul.f32 %v1412_v55, %v1270_v51  ;;  %v1443_v47 = vmax.f32 %v9955_v29, 0.0 }
 0x5f0   : > { %1571 = vmatpush.bf16.msra.mxu0 %v5402_v48  ;;  %v5398_v6 = vor.u32 %v5639_v35, %v5397_v30  ;;  %vm1540_vm7 = vcmask 261120  }
 0x5f1   : > { %v1464_v60 = vpack.c.bf16 %v1446_v52, %v1445_v16  ;;  %v1444_v15 = vmax.f32 %v1428_v36, 0.0 }
 0x5f2   : > { %1472 = vmatpush.bf16.msra.mxu1 %v1469_v42 }
 0x5f3   : > { %v1463_v54 = vpack.c.bf16 %v1444_v15, %v1443_v47 }
 0x5f4   : > { %1572 = vmatpush.bf16.msra.mxu0 %v5398_v6 }
 0x5f6   : > { %1473 = vmatpush.bf16.msra.mxu1 %v1468_v61 }
 0x5fa   : > { %1474 = vmatpush.bf16.msra.mxu1 %v1467_v27 }
 0x5fe   : > { %1475 = vmatpush.bf16.msra.mxu1 %v1466_v19 }
 0x602   : > { %1476 = vmatpush.bf16.msra.mxu1 %v1465_v38 }
 0x606   : > { %1477 = vmatpush.bf16.msra.mxu1 %v1464_v60 }
 0x60a   : > { %1478 = vmatpush.bf16.msra.mxu1 %v1463_v54 }
 0x60d   : > { %1479 = vmatmul.bf16.vlgmr.msra.gmra.mxu1 %v7086_v40 }
 0x61d   : > { %1484 = vmatmul.bf16.gmra.mxu1 %v7090_v33 }
 0x62d   : > { %1489 = vmatmul.bf16.gmra.mxu1 %v7094_v10 }
 0x63d   : > { %1494 = vmatmul.bf16.gmra.mxu1 %v7098_v3 }
 0x64d   : > { %1499 = vmatmul.bf16.gmra.mxu1 %v7102_v34 }
 0x65d   : > { %1504 = vmatmul.bf16.gmra.mxu1 %v7112_v26 }
 0x66d   : > { %1509 = vmatmul.bf16.gmra.mxu1 %v7116_v41 }
 0x67d   : > { %1514 = vmatmul.bf16.gmra.mxu1 %v7126_v0 }
 0x68a   : > { %v1480_v50 = vpop.f32.mrf.mxu1 }
 0x692   : > { %v1482_v31 = vpop.f32.mrf.mxu1 }
 0x693   : > { %v1520_v25 = vpack.c.bf16 %v1482_v31, %v1480_v50 }
 0x695   : > { %5403 = vmatmul.msk.bf16.vlgmr.msra.gmra.mxu0 %vm1540_vm7, %v1520_v25 }
 0x69a   : > { %v1485_v22 = vpop.f32.mrf.mxu1 }
 0x6a2   : > { %v1487_v39 = vpop.f32.mrf.mxu1 }
 0x6a3   : > { %v1521_v63 = vpack.c.bf16 %v1487_v39, %v1485_v22 }
 0x6a5   : > { %5404 = vmatmul.msk.bf16.gmra.mxu0 %vm1540_vm7, %v1521_v63 }
 0x6aa   : > { %v1490_v46 = vpop.f32.mrf.mxu1 }
 0x6b2   : > { %v1492_v42 = vpop.f32.mrf.mxu1 }
 0x6b3   : > { %v1522_v9 = vpack.c.bf16 %v1492_v42, %v1490_v46 }
 0x6b5   : > { %5405 = vmatmul.msk.bf16.gmra.mxu0 %vm1540_vm7, %v1522_v9 }
 0x6ba   : > { %v1495_v43 = vpop.f32.mrf.mxu1 }
 0x6c2   : > { %v1497_v44 = vpop.f32.mrf.mxu1 }
 0x6c3   : > { %v1523_v21 = vpack.c.bf16 %v1497_v44, %v1495_v43 }
 0x6c5   : > { %5406 = vmatmul.msk.bf16.gmra.mxu0 %vm1540_vm7, %v1523_v21 }
 0x6ca   : > { %v1500_v20 = vpop.f32.mrf.mxu1 }
 0x6d2   : > { %v1502_v37 = vpop.f32.mrf.mxu1 }
 0x6d3   : > { %v1524_v11 = vpack.c.bf16 %v1502_v37, %v1500_v20 }
 0x6d5   : > { %5407 = vmatmul.msk.bf16.gmra.mxu0 %vm1540_vm7, %v1524_v11 }
 0x6da   : > { %v1505_v61 = vpop.f32.mrf.mxu1 }
 0x6e2   : > { %v1507_v8 = vpop.f32.mrf.mxu1 }
 0x6e3   : > { %v1525_v4 = vpack.c.bf16 %v1507_v8, %v1505_v61  ;;  %v7220_v8 = vld [vmem:[%s9749_s2] sm:$0xff] }
 0x6e4   : > { %9965 = vst [vmem:[#allocation9_spill] sm:$0xff] %v7220_v8 }
 0x6e5   : > { %5408 = vmatmul.msk.bf16.gmra.mxu0 %vm1540_vm7, %v1525_v4  ;;  %v7227_v4 = vld [vmem:[%s9749_s2 + $0x8] sm:$0xff] }
 0x6e6   : > { %9966 = vst [vmem:[#allocation11_spill] sm:$0xff] %v7227_v4 }
 0x6ea   : > { %v1510_v56 = vpop.f32.mrf.mxu1 }
 0x6f2   : > { %v1512_v32 = vpop.f32.mrf.mxu1 }
 0x6f3   : > { %v1526_v17 = vpack.c.bf16 %v1512_v32, %v1510_v56  ;;  %v7234_v56 = vld [vmem:[%s9749_s2 + $0x10] sm:$0xff]  ;;  %v7241_v32 = vld [vmem:[%s9749_s2 + $0x18] sm:$0xff] }
 0x6f4   : > { %9967 = vst [vmem:[#allocation15_spill] sm:$0xff] %v7234_v56 }
 0x6f5   : > { %5409 = vmatmul.msk.bf16.gmra.mxu0 %vm1540_vm7, %v1526_v17  ;;  %9968 = vst [vmem:[#allocation17_spill] sm:$0xff] %v7241_v32  ;;  %v7248_v17 = vld [vmem:[%s9749_s2 + $0x20] sm:$0xff] }
 0x6f6   : > { %9969 = vst [vmem:[#allocation19_spill] sm:$0xff] %v7248_v17 }
 0x6fa   : > { %v1515_v12 = vpop.f32.mrf.mxu1 }
 0x702   : > { %v1517_v28 = vpop.f32.mrf.mxu1 }
 0x703   : > { %v1527_v27 = vpack.c.bf16 %v1517_v28, %v1515_v12  ;;  %v7255_v12 = vld [vmem:[%s9749_s2 + $0x28] sm:$0xff]  ;;  %v7262_v28 = vld [vmem:[%s9749_s2 + $0x30] sm:$0xff] }
 0x704   : > { %9970 = vst [vmem:[#allocation20_spill] sm:$0xff] %v7255_v12 }
 0x705   : > { %5410 = vmatmul.msk.bf16.gmra.mxu0 %vm1540_vm7, %v1527_v27  ;;  %9971 = vst [vmem:[#allocation21_spill] sm:$0xff] %v7262_v28  ;;  %v7269_v27 = vld [vmem:[%s9749_s2 + $0x38] sm:$0xff] }
 0x706   : > { %9972 = vst [vmem:[#allocation22_spill] sm:$0xff] %v7269_v27 }
 0x712   : > { %v7137_v23 = vpop.f32.mrf.mxu0 }
 0x713   : > { %v1671_v37 = vmul.f32 %v7137_v23, %v7137_v23 }
 0x71a   : > { %v7139_v58 = vpop.f32.mrf.mxu0 }
 0x71b   : > { %9964 = vst [vmem:[#allocation12_spill] sm:$0xff] %v7139_v58  ;;  %v1672_v21 = vmul.f32 %v7139_v58, %v7139_v58  ;;  %v1614_v11 = vpack.c.bf16 %v7139_v58, %v7137_v23 }
 0x71d   : > { %v1687_v61 = vpack.c.bf16 %v1672_v21, %v1671_v37 }
 0x722   : > { %v7141_v13 = vpop.f32.mrf.mxu0 }
 0x723   : > { %v1673_v43 = vmul.f32 %v7141_v13, %v7141_v13 }
 0x72a   : > { %v7143_v1 = vpop.f32.mrf.mxu0 }
 0x72b   : > { %v1674_v42 = vmul.f32 %v7143_v1, %v7143_v1  ;;  %v1615_v44 = vpack.c.bf16 %v7143_v1, %v7141_v13 }
 0x72d   : > { %v1688_v20 = vpack.c.bf16 %v1674_v42, %v1673_v43 }
 0x732   : > { %v7145_v49 = vpop.f32.mrf.mxu0 }
 0x733   : > { %v1675_v63 = vmul.f32 %v7145_v49, %v7145_v49 }
 0x73a   : > { %v7147_v59 = vpop.f32.mrf.mxu0 }
 0x73b   : > { %v1676_v22 = vmul.f32 %v7147_v59, %v7147_v59  ;;  %v1616_v46 = vpack.c.bf16 %v7147_v59, %v7145_v49 }
 0x73d   : > { %v1689_v9 = vpack.c.bf16 %v1676_v22, %v1675_v63 }
 0x742   : > { %v7149_v53 = vpop.f32.mrf.mxu0 }
 0x743   : > { %v1677_v31 = vmul.f32 %v7149_v53, %v7149_v53 }
 0x74a   : > { %v7151_v19 = vpop.f32.mrf.mxu0 }
 0x74b   : > { %v1678_v6 = vmul.f32 %v7151_v19, %v7151_v19  ;;  %v1617_v25 = vpack.c.bf16 %v7151_v19, %v7149_v53 }
 0x74d   : > { %v1690_v39 = vpack.c.bf16 %v1678_v6, %v1677_v31 }
 0x752   : > { %v7153_v14 = vpop.f32.mrf.mxu0 }
 0x753   : > { %v1679_v30 = vmul.f32 %v7153_v14, %v7153_v14 }
 0x75a   : > { %v7155_v62 = vpop.f32.mrf.mxu0 }
 0x75b   : > { %v1680_v18 = vmul.f32 %v7155_v62, %v7155_v62  ;;  %v1618_v35 = vpack.c.bf16 %v7155_v62, %v7153_v14 }
 0x75d   : > { %v1691_v50 = vpack.c.bf16 %v1680_v18, %v1679_v30 }
 0x762   : > { %v7157_v51 = vpop.f32.mrf.mxu0 }
 0x763   : > { %v1681_v54 = vmul.f32 %v7157_v51, %v7157_v51 }
 0x76a   : > { %v7159_v24 = vpop.f32.mrf.mxu0 }
 0x76b   : > { %v1682_v29 = vmul.f32 %v7159_v24, %v7159_v24  ;;  %v1619_v5 = vpack.c.bf16 %v7159_v24, %v7157_v51 }
 0x76d   : > { %v1692_v48 = vpack.c.bf16 %v1682_v29, %v1681_v54 }
 0x772   : > { %v7161_v57 = vpop.f32.mrf.mxu0 }
 0x773   : > { %v1683_v60 = vmul.f32 %v7161_v57, %v7161_v57 }
 0x77a   : > { %v7163_v55 = vpop.f32.mrf.mxu0 }
 0x77b   : > { %v1684_v7 = vmul.f32 %v7163_v55, %v7163_v55  ;;  %v1620_v15 = vpack.c.bf16 %v7163_v55, %v7161_v57 }
 0x77d   : > { %v1693_v47 = vpack.c.bf16 %v1684_v7, %v1683_v60 }
 0x782   : > { %v7165_v45 = vpop.f32.mrf.mxu0 }
 0x783   : > { %v1685_v38 = vmul.f32 %v7165_v45, %v7165_v45 }
 0x78a   : > { %v7167_v2 = vpop.f32.mrf.mxu0 }
 0x78b   : > { %v1621_v52 = vpack.c.bf16 %v7167_v2, %v7165_v45  ;;  %v1686_v36 = vmul.f32 %v7167_v2, %v7167_v2 }
 0x78d   : > { %1622 = vmatpush.bf16.msra.mxu2 %v1621_v52  ;;  %v1694_v16 = vpack.c.bf16 %v1686_v36, %v1685_v38 }
 0x78f   : > { %1695 = vmatpush.bf16.msra.mxu3 %v1694_v16 }
 0x791   : > { %1623 = vmatpush.bf16.msra.mxu2 %v1620_v15 }
 0x793   : > { %1696 = vmatpush.bf16.msra.mxu3 %v1693_v47 }
 0x795   : > { %1624 = vmatpush.bf16.msra.mxu2 %v1619_v5 }
 0x797   : > { %1697 = vmatpush.bf16.msra.mxu3 %v1692_v48 }
 0x799   : > { %1625 = vmatpush.bf16.msra.mxu2 %v1618_v35 }
 0x79b   : > { %1698 = vmatpush.bf16.msra.mxu3 %v1691_v50 }
 0x79d   : > { %1626 = vmatpush.bf16.msra.mxu2 %v1617_v25 }
 0x79f   : > { %1699 = vmatpush.bf16.msra.mxu3 %v1690_v39 }
 0x7a1   : > { %1627 = vmatpush.bf16.msra.mxu2 %v1616_v46 }
 0x7a3   : > { %1700 = vmatpush.bf16.msra.mxu3 %v1689_v9 }
 0x7a5   : > { %1628 = vmatpush.bf16.msra.mxu2 %v1615_v44 }
 0x7a7   : > { %1701 = vmatpush.bf16.msra.mxu3 %v1688_v20 }
 0x7a9   : > { %1629 = vmatpush.bf16.msra.mxu2 %v1614_v11 }
 0x7ab   : > { %1702 = vmatpush.bf16.msra.mxu3 %v1687_v61 }
 0x7ac   : > { %1630 = vmatmul.bf16.vlgmr.msra.gmra.mxu2 %v7220_v8 }
 0x7ae   : > { %1703 = vmatmul.bf16.vlgmr.msra.gmra.mxu3 %v7220_v8 }
 0x7bc   : > { %1635 = vmatmul.bf16.gmra.mxu2 %v7227_v4 }
 0x7be   : > { %1708 = vmatmul.bf16.gmra.mxu3 %v7227_v4 }
 0x7cc   : > { %1640 = vmatmul.bf16.gmra.mxu2 %v7234_v56 }
 0x7ce   : > { %1713 = vmatmul.bf16.gmra.mxu3 %v7234_v56 }
 0x7dc   : > { %1645 = vmatmul.bf16.gmra.mxu2 %v7241_v32 }
 0x7de   : > { %1718 = vmatmul.bf16.gmra.mxu3 %v7241_v32 }
 0x7ec   : > { %1650 = vmatmul.bf16.gmra.mxu2 %v7248_v17 }
 0x7ee   : > { %1723 = vmatmul.bf16.gmra.mxu3 %v7248_v17 }
 0x7fc   : > { %1655 = vmatmul.bf16.gmra.mxu2 %v7255_v12 }
 0x7fe   : > { %1728 = vmatmul.bf16.gmra.mxu3 %v7255_v12 }
 0x80c   : > { %1660 = vmatmul.bf16.gmra.mxu2 %v7262_v28 }
 0x80e   : > { %1733 = vmatmul.bf16.gmra.mxu3 %v7262_v28 }
 0x81c   : > { %1665 = vmatmul.bf16.gmra.mxu2 %v7269_v27 }
 0x81e   : > { %1738 = vmatmul.bf16.gmra.mxu3 %v7269_v27 }
 0x82f   : > { %v1631_v38 = vpop.f32.mrf.mxu2 }
 0x830   : > { %v1744_v52 = vmul.f32 %v1631_v38, %v1631_v38  ;;  %v1968_v63 = vsub.f32 %v7137_v23, %v1631_v38 }
 0x831   : > { %v1704_v36 = vpop.f32.mrf.mxu3 }
 0x832   : > { %v1760_v7 = vsub.f32 %v1704_v36, %v1744_v52 }
 0x834   : > { %v1776_v16 = vmax.f32 %v1760_v7, 0.0 }
 0x836   : > { %v1792_v60 = vadd.f32 1e-05, %v1776_v16 }
 0x837   : > { %v7273_v15 = vpop.f32.mrf.mxu2 }
 0x838   : > { %9973 = vst [vmem:[#allocation16_spill] sm:$0xff] %v7273_v15  ;;  %5805 = vrsqrt.f32 %v1792_v60  ;;  %vm1814_vm9 = vweird.f32 %v1792_v60 }
 0x839   : > { %v7275_v29 = vpop.f32.mrf.mxu3 }
 0x83e   : > { %v5806_v47 = vpop.eup %5805 }
 0x83f   : > { %v1809_v54 = vmul.f32 %v5806_v47, %v1792_v60  ;;  %v1636_v5 = vpop.f32.mrf.mxu2  ;;  %vm1815_vm8 = vweird.f32 %v5806_v47 }
 0x840   : > { %v1746_v18 = vmul.f32 %v1636_v5, %v1636_v5  ;;  %vm1816_vm10 = vmor %vm1814_vm9, %vm1815_vm8  ;;  %v1970_v60 = vsub.f32 %v7141_v13, %v1636_v5 }
 0x841   : > { %v1810_v48 = vmul.f32 %v5806_v47, %v1809_v54  ;;  %v1709_v30 = vpop.f32.mrf.mxu3 }
 0x842   : > { %v1762_v35 = vsub.f32 %v1709_v30, %v1746_v18 }
 0x843   : > { %v1811_v6 = vmul.f32 0.5, %v1810_v48 }
 0x844   : > { %v1778_v50 = vmax.f32 %v1762_v35, 0.0 }
 0x845   : > { %v1812_v31 = vsub.f32 1.5, %v1811_v6 }
 0x846   : > { %v1794_v25 = vadd.f32 1e-05, %v1778_v50 }
 0x847   : > { %v1813_v22 = vmul.f32 %v5806_v47, %v1812_v31  ;;  %v7277_v39 = vpop.f32.mrf.mxu2 }
 0x848   : > { %5807 = vrsqrt.f32 %v1794_v25  ;;  %vm1834_vm12 = vweird.f32 %v1794_v25 }
 0x849   : > { %v7280_v46 = vpop.f32.mrf.mxu3  ;;  %v1817_v42 = vsel %vm1816_vm10, %v5806_v47, %v1813_v22 }
 0x84a   : > { %v7282_v9 = vmul.f32 %v1968_v63, %v1817_v42 }
 0x84c   : > { %9974 = vst [vmem:[#allocation18_spill] sm:$0xff] %v7282_v9 }
 0x84e   : > { %v5808_v43 = vpop.eup %5807 }
 0x84f   : > { %v1829_v44 = vmul.f32 %v5808_v43, %v1794_v25  ;;  %v1641_v21 = vpop.f32.mrf.mxu2  ;;  %vm1835_vm11 = vweird.f32 %v5808_v43 }
 0x850   : > { %v1748_v20 = vmul.f32 %v1641_v21, %v1641_v21  ;;  %vm1836_vm13 = vmor %vm1834_vm12, %vm1835_vm11 }
 0x851   : > { %v1830_v37 = vmul.f32 %v5808_v43, %v1829_v44  ;;  %v1714_v11 = vpop.f32.mrf.mxu3 }
 0x852   : > { %v1764_v61 = vsub.f32 %v1714_v11, %v1748_v20 }
 0x853   : > { %v1831_v52 = vmul.f32 0.5, %v1830_v37 }
 0x854   : > { %v1780_v36 = vmax.f32 %v1764_v61, 0.0 }
 0x855   : > { %v1832_v7 = vsub.f32 1.5, %v1831_v52 }
 0x856   : > { %v1796_v16 = vadd.f32 1e-05, %v1780_v36 }
 0x857   : > { %v1833_v23 = vmul.f32 %v5808_v43, %v1832_v7  ;;  %v7284_v38 = vpop.f32.mrf.mxu2 }
 0x858   : > { %5809 = vrsqrt.f32 %v1796_v16  ;;  %vm1854_vm15 = vweird.f32 %v1796_v16 }
 0x859   : > { %v7287_v47 = vpop.f32.mrf.mxu3  ;;  %v1837_v54 = vsel %vm1836_vm13, %v5808_v43, %v1833_v23  ;;  %v1972_v43 = vsub.f32 %v7145_v49, %v1641_v21 }
 0x85a   : > { %v7289_v18 = vmul.f32 %v1970_v60, %v1837_v54 }
 0x85c   : > { %9975 = vst [vmem:[#allocation13_spill] sm:$0xff] %v7289_v18 }
 0x85e   : > { %v5810_v48 = vpop.eup %5809 }
 0x85f   : > { %v1849_v30 = vmul.f32 %v5810_v48, %v1796_v16  ;;  %v1646_v35 = vpop.f32.mrf.mxu2  ;;  %vm1855_vm14 = vweird.f32 %v5810_v48 }
 0x860   : > { %v1750_v6 = vmul.f32 %v1646_v35, %v1646_v35  ;;  %vm1856_vm0 = vmor %vm1854_vm15, %vm1855_vm14 }
 0x861   : > { %v1850_v50 = vmul.f32 %v5810_v48, %v1849_v30  ;;  %v1719_v31 = vpop.f32.mrf.mxu3 }
 0x862   : > { %v1766_v22 = vsub.f32 %v1719_v31, %v1750_v6 }
 0x863   : > { %v1851_v63 = vmul.f32 0.5, %v1850_v50 }
 0x864   : > { %v1782_v25 = vmax.f32 %v1766_v22, 0.0 }
 0x865   : > { %v1852_v42 = vsub.f32 1.5, %v1851_v63 }
 0x866   : > { %v1798_v44 = vadd.f32 1e-05, %v1782_v25 }
 0x867   : > { %v1853_v13 = vmul.f32 %v5810_v48, %v1852_v42  ;;  %v7291_v5 = vpop.f32.mrf.mxu2 }
 0x868   : > { %5811 = vrsqrt.f32 %v1798_v44  ;;  %vm1874_vm2 = vweird.f32 %v1798_v44 }
 0x869   : > { %v7294_v20 = vpop.f32.mrf.mxu3  ;;  %v1857_v37 = vsel %vm1856_vm0, %v5810_v48, %v1853_v13  ;;  %v1974_v48 = vsub.f32 %v7149_v53, %v1646_v35 }
 0x86a   : > { %v7296_v11 = vmul.f32 %v1972_v43, %v1857_v37 }
 0x86c   : > { %9976 = vst [vmem:[#allocation14_spill] sm:$0xff] %v7296_v11 }
 0x86e   : > { %v5812_v61 = vpop.eup %5811 }
 0x86f   : > { %v1869_v52 = vmul.f32 %v5812_v61, %v1798_v44  ;;  %v1651_v36 = vpop.f32.mrf.mxu2  ;;  %vm1875_vm1 = vweird.f32 %v5812_v61 }
 0x870   : > { %v1752_v7 = vmul.f32 %v1651_v36, %v1651_v36  ;;  %vm1876_vm4 = vmor %vm1874_vm2, %vm1875_vm1  ;;  %v1976_v53 = vsub.f32 %v7153_v14, %v1651_v36 }
 0x871   : > { %v1870_v23 = vmul.f32 %v5812_v61, %v1869_v52  ;;  %v1724_v60 = vpop.f32.mrf.mxu3 }
 0x872   : > { %v1768_v54 = vsub.f32 %v1724_v60, %v1752_v7 }
 0x873   : > { %v1871_v30 = vmul.f32 0.5, %v1870_v23 }
 0x874   : > { %v1784_v16 = vmax.f32 %v1768_v54, 0.0 }
 0x875   : > { %v1872_v6 = vsub.f32 1.5, %v1871_v30 }
 0x876   : > { %v1800_v50 = vadd.f32 1e-05, %v1784_v16 }
 0x877   : > { %v1873_v49 = vmul.f32 %v5812_v61, %v1872_v6  ;;  %v7298_v21 = vpop.f32.mrf.mxu2 }
 0x878   : > { %5813 = vrsqrt.f32 %v1800_v50  ;;  %vm1894_vm6 = vweird.f32 %v1800_v50 }
 0x879   : > { %v1726_v31 = vpop.f32.mrf.mxu3  ;;  %v1877_v22 = vsel %vm1876_vm4, %v5812_v61, %v1873_v49 }
 0x87a   : > { %v7301_v63 = vmul.f32 %v1974_v48, %v1877_v22  ;;  %v1753_v22 = vmul.f32 %v7298_v21, %v7298_v21 }
 0x87c   : > { %9977 = vst [vmem:[#allocation24_spill] sm:$0xff] %v7301_v63 }
 0x87e   : > { %v5814_v25 = vpop.eup %5813 }
 0x87f   : > { %v1889_v42 = vmul.f32 %v5814_v25, %v1800_v50  ;;  %v7303_v13 = vpop.f32.mrf.mxu2  ;;  %vm1895_vm5 = vweird.f32 %v5814_v25  ;;  %v1749_v50 = vmul.f32 %v7284_v38, %v7284_v38 }
 0x880   : > { %vm1896_vm7 = vmor %vm1894_vm6, %vm1895_vm5  ;;  %v1754_v14 = vmul.f32 %v7303_v13, %v7303_v13 }
 0x881   : > { %v1890_v43 = vmul.f32 %v5814_v25, %v1889_v42  ;;  %v1729_v37 = vpop.f32.mrf.mxu3 }
 0x883   : > { %v1891_v52 = vmul.f32 0.5, %v1890_v43  ;;  %v1765_v43 = vsub.f32 %v7287_v47, %v1749_v50 }
 0x885   : > { %v1892_v7 = vsub.f32 1.5, %v1891_v52  ;;  %v1781_v28 = vmax.f32 %v1765_v43, 0.0 }
 0x887   : > { %v1893_v44 = vmul.f32 %v5814_v25, %v1892_v7  ;;  %v7305_v23 = vpop.f32.mrf.mxu2  ;;  %v1751_v7 = vmul.f32 %v7291_v5, %v7291_v5 }
 0x888   : > { %v1755_v6 = vmul.f32 %v7305_v23, %v7305_v23 }
 0x889   : > { %v1731_v35 = vpop.f32.mrf.mxu3  ;;  %v1897_v61 = vsel %vm1896_vm7, %v5814_v25, %v1893_v44  ;;  %v1770_v44 = vsub.f32 %v1729_v37, %v1754_v14  ;;  %v1767_v47 = vsub.f32 %v7294_v20, %v1751_v7 }
 0x88a   : > { %v7308_v60 = vmul.f32 %v1976_v53, %v1897_v61  ;;  %v1771_v25 = vsub.f32 %v1731_v35, %v1755_v6  ;;  %v1745_v35 = vmul.f32 %v7273_v15, %v7273_v15 }
 0x88b   : > { %v1786_v6 = vmax.f32 %v1770_v44, 0.0  ;;  %v1783_v43 = vmax.f32 %v1767_v47, 0.0 }
 0x88c   : > { %v1787_v27 = vmax.f32 %v1771_v25, 0.0  ;;  %v7345_v25 = vadd.f32 1e-05, %v1781_v28  ;;  %v1761_v20 = vsub.f32 %v7275_v29, %v1745_v35 }
 0x88f   : > { %v7310_v54 = vpop.f32.mrf.mxu2 }
 0x890   : > { %v1756_v16 = vmul.f32 %v7310_v54, %v7310_v54 }
 0x891   : > { %v1734_v30 = vpop.f32.mrf.mxu3 }
 0x892   : > { %v1772_v49 = vsub.f32 %v1734_v30, %v1756_v16  ;;  %v1747_v30 = vmul.f32 %v7277_v39, %v7277_v39  ;;  %v1769_v16 = vsub.f32 %v1726_v31, %v1753_v22 }
 0x894   : > { %v1788_v53 = vmax.f32 %v1772_v49, 0.0  ;;  %v1763_v14 = vsub.f32 %v7280_v46, %v1747_v30  ;;  %v1785_v31 = vmax.f32 %v1769_v16, 0.0  ;;  %v7343_v49 = vadd.f32 1e-05, %v1787_v27 }
 0x895   : > { %v1777_v27 = vmax.f32 %v1761_v20, 0.0  ;;  %v7358_v46 = vadd.f32 1e-05, %v1783_v43 }
 0x896   : > { %v1779_v44 = vmax.f32 %v1763_v14, 0.0  ;;  %vm1924_vm7 = vweird.f32 %v7343_v49 }
 0x897   : > { %v7320_v36 = vpop.f32.mrf.mxu2  ;;  %v7375_v14 = vadd.f32 1e-05, %v1777_v27 }
 0x898   : > { %v1757_v48 = vmul.f32 %v7320_v36, %v7320_v36  ;;  %v7368_v16 = vadd.f32 1e-05, %v1779_v44 }
 0x899   : > { %v1736_v42 = vpop.f32.mrf.mxu3 }
 0x89a   : > { %v1773_v52 = vsub.f32 %v1736_v42, %v1757_v48  ;;  %v7338_v48 = vadd.f32 1e-05, %v1788_v53  ;;  %v7352_v53 = vadd.f32 1e-05, %v1785_v31 }
 0x89c   : > { %v1789_v61 = vmax.f32 %v1773_v52, 0.0  ;;  %v7349_v52 = vadd.f32 1e-05, %v1786_v6  ;;  %vm1934_vm0 = vweird.f32 %v7338_v48 }
 0x89e   : > { %v7331_v12 = vadd.f32 1e-05, %v1789_v61 }
 0x89f   : > { %v7336_v50 = vpop.f32.mrf.mxu2 }
 0x8a0   : > { %v1758_v37 = vmul.f32 %v7336_v50, %v7336_v50  ;;  %5815 = vrsqrt.f32 %v7331_v12  ;;  %vm1944_vm12 = vweird.f32 %v7331_v12 }
 0x8a1   : > { %v1739_v22 = vpop.f32.mrf.mxu3  ;;  %5817 = vrsqrt.f32 %v7338_v48 }
 0x8a2   : > { %v1774_v42 = vsub.f32 %v1739_v22, %v1758_v37  ;;  %5819 = vrsqrt.f32 %v7343_v49 }
 0x8a3   : > { %5821 = vrsqrt.f32 %v7345_v25 }
 0x8a4   : > { %v1790_v7 = vmax.f32 %v1774_v42, 0.0  ;;  %5823 = vrsqrt.f32 %v7349_v52 }
 0x8a6   : > { %v7356_v28 = vadd.f32 1e-05, %v1790_v7  ;;  %v7363_v61 = vpop.eup %5815 }
 0x8a7   : > { %v7361_v29 = vpop.f32.mrf.mxu2  ;;  %v7371_v47 = vpop.eup %5817  ;;  %v1939_v31 = vmul.f32 %v7363_v61, %v7331_v12  ;;  %vm1945_vm9 = vweird.f32 %v7363_v61  ;;  %v1982_v12 = vsub.f32 %v7165_v45, %v7336_v50 }
 0x8a8   : > { %5825 = vrsqrt.f32 %v7356_v28  ;;  %v1759_v30 = vmul.f32 %v7361_v29, %v7361_v29  ;;  %v7373_v37 = vpop.eup %5819  ;;  %v1929_v43 = vmul.f32 %v7371_v47, %v7338_v48  ;;  %vm1954_vm10 = vweird.f32 %v7356_v28  ;;  %vm7448_vm1 = vmor %vm1944_vm12, %vm1945_vm9 }
 0x8a9   : > { %5827 = vrsqrt.f32 %v7352_v53  ;;  %v1741_v35 = vpop.f32.mrf.mxu3  ;;  %v7380_v22 = vpop.eup %5821  ;;  %v1919_v44 = vmul.f32 %v7373_v37, %v7343_v49  ;;  %vm1935_vm11 = vweird.f32 %v7371_v47  ;;  %vm1925_vm15 = vweird.f32 %v7373_v37 }
 0x8aa   : > { %v1775_v6 = vsub.f32 %v1741_v35, %v1759_v30  ;;  %5829 = vrsqrt.f32 %v7358_v46  ;;  %v7382_v20 = vpop.eup %5823  ;;  %v1940_v35 = vmul.f32 %v7363_v61, %v1939_v31  ;;  %v1930_v56 = vmul.f32 %v7371_v47, %v1929_v43  ;;  %vm7454_vm2 = vmor %vm1934_vm0, %vm1935_vm11 }
 0x8ab   : > { %5831 = vrsqrt.f32 %v7368_v16  ;;  %v1909_v17 = vmul.f32 %v7382_v20, %v7349_v52  ;;  %v1859_v4 = vmul.f32 %v7380_v22, %v7345_v25  ;;  %v1920_v8 = vmul.f32 %v7373_v37, %v1919_v44 }
 0x8ac   : > { %v1791_v42 = vmax.f32 %v1775_v6, 0.0  ;;  %5833 = vrsqrt.f32 %v7375_v14  ;;  %v1941_v41 = vmul.f32 0.5, %v1940_v35  ;;  %vm1915_vm5 = vweird.f32 %v7382_v20 }
 0x8ad   : > { %v1910_v3 = vmul.f32 %v7382_v20, %v1909_v17  ;;  %v1860_v9 = vmul.f32 %v7380_v22, %v1859_v4  ;;  %v1921_v18 = vmul.f32 0.5, %v1920_v8  ;;  %v1983_v45 = vsub.f32 %v7167_v2, %v7361_v29  ;;  %v9997_v29 = vld [vmem:[#allocation26_spill] sm:$0xff] }
 0x8ae   : > { %v7387_v7 = vpop.eup %5825  ;;  %v7391_v27 = vadd.f32 1e-05, %v1791_v42  ;;  %v1942_v35 = vsub.f32 1.5, %v1941_v41  ;;  %vm1904_vm12 = vweird.f32 %v7352_v53 }
 0x8af   : > { %v7393_v30 = vpop.eup %5827  ;;  %v1949_v6 = vmul.f32 %v7387_v7, %v7356_v28  ;;  %v1911_v58 = vmul.f32 0.5, %v1910_v3  ;;  %vm1955_vm8 = vweird.f32 %v7387_v7  ;;  %v7429_v63 = vmul.f32 0.5, %v1860_v9 }
 0x8b0   : > { %5835 = vrsqrt.f32 %v7391_v27  ;;  %v7402_v32 = vpop.eup %5829  ;;  %v1899_v31 = vmul.f32 %v7393_v30, %v7352_v53  ;;  %v1922_v41 = vsub.f32 1.5, %v1921_v18  ;;  %vm7436_vm13 = vmor %vm1954_vm10, %vm1955_vm8  ;;  %vm1964_vm4 = vweird.f32 %v7391_v27 }
 0x8b1   : > { %v1950_v42 = vmul.f32 %v7387_v7, %v1949_v6  ;;  %v7411_v0 = vpop.eup %5831  ;;  %v1879_v34 = vmul.f32 %v7402_v32, %v7358_v46  ;;  %v1931_v6 = vmul.f32 0.5, %v1930_v56  ;;  %vm7475_vm8 = vmor %vm1924_vm7, %vm1925_vm15  ;;  %vm1905_vm9 = vweird.f32 %v7393_v30 }
 0x8b2   : > { %v7416_v43 = vpop.eup %5833  ;;  %v1839_v40 = vmul.f32 %v7411_v0, %v7368_v16  ;;  %v1900_v44 = vmul.f32 %v7393_v30, %v1899_v31  ;;  %vm1914_vm10 = vweird.f32 %v7349_v52  ;;  %vm1884_vm15 = vweird.f32 %v7358_v46 }
 0x8b3   : > { %v1951_v26 = vmul.f32 0.5, %v1950_v42  ;;  %v1819_v11 = vmul.f32 %v7416_v43, %v7375_v14  ;;  %v1880_v17 = vmul.f32 %v7402_v32, %v1879_v34  ;;  %v1932_v56 = vsub.f32 1.5, %v1931_v6  ;;  %vm7489_vm11 = vmor %vm1914_vm10, %vm1915_vm5 }
 0x8b4   : > { %v1840_v4 = vmul.f32 %v7411_v0, %v1839_v40  ;;  %v1901_v8 = vmul.f32 0.5, %v1900_v44  ;;  %v1943_v34 = vmul.f32 %v7363_v61, %v1942_v35  ;;  %v1912_v6 = vsub.f32 1.5, %v1911_v58 }
 0x8b5   : > { %v1952_v10 = vsub.f32 1.5, %v1951_v26  ;;  %v1881_v3 = vmul.f32 0.5, %v1880_v17  ;;  %v1933_v40 = vmul.f32 %v7371_v47, %v1932_v56  ;;  %v1923_v44 = vmul.f32 %v7373_v37, %v1922_v41  ;;  %v5417_v41 = vld [vmem:[%s9750_s3 + $0x50] sm:$0xf] }
 0x8b6   : > { %v5836_v33 = vpop.eup %5835  ;;  %v1947_v48 = vsel %vm7448_vm1, %v7363_v61, %v1943_v34  ;;  %v1981_v35 = vsub.f32 %v7163_v55, %v7320_v36  ;;  %v1980_v55 = vsub.f32 %v7161_v57, %v7310_v54  ;;  %v1979_v57 = vsub.f32 %v7159_v24, %v7305_v23 }
 0x8b7   : > { %v1959_v42 = vmul.f32 %v5836_v33, %v7391_v27  ;;  %v1953_v26 = vmul.f32 %v7387_v7, %v1952_v10  ;;  %vm1965_vm14 = vweird.f32 %v5836_v33  ;;  %v1937_v61 = vsel %vm7454_vm2, %v7371_v47, %v1933_v40 }
 0x8b8   : > { %vm1966_vm6 = vmor %vm1964_vm4, %vm1965_vm14  ;;  %v1882_v17 = vsub.f32 1.5, %v1881_v3  ;;  %v1997_v36 = vmul.f32 %v1981_v35, %v1947_v48  ;;  %v1820_v52 = vmul.f32 %v7416_v43, %v1819_v11  ;;  %v1862_v3 = vsub.f32 1.5, %v7429_v63 }
 0x8b9   : > { %v1960_v15 = vmul.f32 %v5836_v33, %v1959_v42  ;;  %v1957_v9 = vsel %vm7436_vm13, %v7387_v7, %v1953_v26  ;;  %v1913_v42 = vmul.f32 %v7382_v20, %v1912_v6  ;;  %v1996_v26 = vmul.f32 %v1980_v55, %v1937_v61  ;;  %vm7500_vm13 = vmor %vm1904_vm12, %vm1905_vm9 }
 0x8ba   : > { %v1998_v50 = vmul.f32 %v1982_v12, %v1957_v9  ;;  %v2013_v23 = vmax.f32 %v1997_v36, 0.0  ;;  %vm1885_vm14 = vweird.f32 %v7402_v32  ;;  %v1883_v53 = vmul.f32 %v7402_v32, %v1882_v17  ;;  %v9995_v36 = vld [vmem:[#allocation18_spill] sm:$0xff] }
 0x8bb   : > { %v1961_v31 = vmul.f32 0.5, %v1960_v15  ;;  %v1902_v15 = vsub.f32 1.5, %v1901_v8  ;;  %v1841_v8 = vmul.f32 0.5, %v1840_v4  ;;  %v2012_v4 = vmax.f32 %v1996_v26, 0.0  ;;  %vm1886_vm0 = vmor %vm1884_vm15, %vm1885_vm14  ;;  %v5421_v26 = vld [vmem:[%s9750_s3 + $0x60] sm:$0xf] }
 0x8bc   : > { %v2014_v54 = vmax.f32 %v1998_v50, 0.0  ;;  %vm1865_vm1 = vweird.f32 %v7380_v22  ;;  %v1863_v9 = vmul.f32 %v7380_v22, %v1862_v3  ;;  %vm1864_vm2 = vweird.f32 %v7345_v25  ;;  %v9991_v50 = vld [vmem:[#allocation16_spill] sm:$0xff]  ;;  %v5641_v3 = vld [vmem:[%s9750_s3 + $0x44] sm:$0xf0] }
 0x8bd   : > { %v1962_v18 = vsub.f32 1.5, %v1961_v31  ;;  %v1903_v49 = vmul.f32 %v7393_v30, %v1902_v15  ;;  %v1978_v31 = vsub.f32 %v7157_v51, %v7303_v13  ;;  %v1821_v51 = vmul.f32 0.5, %v1820_v52  ;;  %vm1866_vm4 = vmor %vm1864_vm2, %vm1865_vm1  ;;  %v5643_v52 = vld [vmem:[%s9750_s3 + $0x64] sm:$0xf0] }
 0x8be   : > { %v2028_v13 = vpack.c.bf16 %v2013_v23, %v2012_v4  ;;  %v1842_v40 = vsub.f32 1.5, %v1841_v8  ;;  %vm1845_vm5 = vweird.f32 %v7411_v0  ;;  %v1867_v12 = vsel %vm1866_vm4, %v7380_v22, %v1863_v9  ;;  %v10002_v23 = vld [vmem:[#allocation8_spill] sm:$0xff] }
 0x8bf   : > { %v1963_v7 = vmul.f32 %v5836_v33, %v1962_v18  ;;  %v1907_v11 = vsel %vm7500_vm13, %v7393_v30, %v1903_v49  ;;  %v1887_v30 = vsel %vm1886_vm0, %v7402_v32, %v1883_v53  ;;  %v1822_v58 = vsub.f32 1.5, %v1821_v51  ;;  %v10003_v53 = vld [vmem:[#allocation10_spill] sm:$0xff] }
 0x8c0   : > { %v1843_v32 = vmul.f32 %v7411_v0, %v1842_v40  ;;  %v1973_v28 = vsub.f32 %v7147_v59, %v7284_v38  ;;  %v9990_v59 = vld [vmem:[#allocation24_spill] sm:$0xff]  ;;  %vm1824_vm9 = vweird.f32 %v7375_v14  ;;  %v5422_v8 = vor.u32 %v5643_v52, %v5421_v26 }
 0x8c1   : > { %v1967_v27 = vsel %vm1966_vm6, %v5836_v33, %v1963_v7  ;;  %v1927_v33 = vsel %vm7475_vm8, %v7373_v37, %v1923_v44  ;;  %v1917_v37 = vsel %vm7489_vm11, %v7382_v20, %v1913_v42  ;;  %v1977_v20 = vsub.f32 %v7155_v62, %v7298_v21  ;;  %v9992_v42 = vld [vmem:[#allocation12_spill] sm:$0xff] }
 0x8c2   : > { %v1999_v2 = vmul.f32 %v1983_v45, %v1967_v27  ;;  %v1995_v34 = vmul.f32 %v1979_v57, %v1927_v33  ;;  %v1994_v6 = vmul.f32 %v1978_v31, %v1917_v37  ;;  %v1975_v62 = vsub.f32 %v7151_v19, %v7291_v5  ;;  %v9998_v57 = vld [vmem:[#allocation25_spill] sm:$0xff]  ;;  %2135 = vmatpush.bf16.msrb.mxu0 %v5422_v8  ;;  %v10001_v37 = vld [vmem:[#allocation7_spill] sm:$0xff]  ;;  %v5642_v31 = vld [vmem:[%s9750_s3 + $0x54] sm:$0xf0] }
 0x8c3   : > { %v1993_v10 = vmul.f32 %v1977_v20, %v1907_v11  ;;  %v2008_v19 = vmax.f32 %v7308_v60, 0.0  ;;  %vm1844_vm6 = vweird.f32 %v7368_v16  ;;  %v1989_v7 = vmul.f32 %v1973_v28, %v1867_v12 }
 0x8c4   : > { %v2015_v47 = vmax.f32 %v1999_v2, 0.0  ;;  %v2011_v63 = vmax.f32 %v1995_v34, 0.0  ;;  %v2010_v21 = vmax.f32 %v1994_v6, 0.0  ;;  %v1991_v15 = vmul.f32 %v1975_v62, %v1887_v30  ;;  %vm1846_vm7 = vmor %vm1844_vm6, %vm1845_vm5  ;;  %v5413_v34 = vld [vmem:[%s9750_s3 + $0x40] sm:$0xf] }
 0x8c5   : > { %v2009_v18 = vmax.f32 %v1993_v10, 0.0  ;;  %vm1825_vm8 = vweird.f32 %v7416_v43  ;;  %v1847_v48 = vsel %vm1846_vm7, %v7411_v0, %v1843_v32  ;;  %v1823_v22 = vmul.f32 %v7416_v43, %v1822_v58  ;;  %v9993_v0 = vld [vmem:[#allocation14_spill] sm:$0xff] }
 0x8c6   : > { %v2029_v24 = vpack.c.bf16 %v2015_v47, %v2014_v54  ;;  %v2027_v46 = vpack.c.bf16 %v2011_v63, %v2010_v21  ;;  %v2007_v25 = vmax.f32 %v1991_v15, 0.0  ;;  %v1971_v44 = vsub.f32 %v7143_v1, %v7277_v39  ;;  %vm1826_vm10 = vmor %vm1824_vm9, %vm1825_vm8  ;;  %v9994_v39 = vld [vmem:[#allocation13_spill] sm:$0xff]  ;;  %v10000_v47 = vld [vmem:[#allocation6_spill] sm:$0xff] }
 0x8c7   : > { %v2026_v5 = vpack.c.bf16 %v2009_v18, %v2008_v19  ;;  %v2006_v38 = vmax.f32 %v9990_v59, 0.0  ;;  %v2005_v16 = vmax.f32 %v1989_v7, 0.0  ;;  %v1827_v45 = vsel %vm1826_vm10, %v7416_v43, %v1823_v22  ;;  %v9996_v43 = vld [vmem:[#allocation27_spill] sm:$0xff]  ;;  %v9999_v54 = vld [vmem:[#allocation5_spill] sm:$0xff] }
 0x8c8   : > { %2030 = vmatpush.bf16.msrb.mxu1 %v2029_v24  ;;  %v1987_v35 = vmul.f32 %v1971_v44, %v1847_v48  ;;  %v1969_v27 = vsub.f32 %v9992_v42, %v9991_v50  ;;  %v2004_v61 = vmax.f32 %v9993_v0, 0.0  ;;  %v2002_v55 = vmax.f32 %v9994_v39, 0.0 }
 0x8c9   : > { %v2025_v60 = vpack.c.bf16 %v2007_v25, %v2006_v38  ;;  %v2000_v33 = vmax.f32 %v9995_v36, 0.0  ;;  %v5418_v24 = vor.u32 %v5642_v31, %v5417_v41  ;;  %v5414_v11 = vor.u32 %v5641_v3, %v5413_v34 }
 0x8ca   : > { %v2024_v17 = vpack.c.bf16 %v2005_v16, %v2004_v61  ;;  %v2003_v56 = vmax.f32 %v1987_v35, 0.0  ;;  %v1985_v1 = vmul.f32 %v1969_v27, %v1827_v45  ;;  %vm2105_vm11 = vcmask 392192  }
 0x8cb   : > { %2136 = vmatpush.bf16.msrb.mxu0 %v5418_v24 }
 0x8cc   : > { %2031 = vmatpush.bf16.msrb.mxu1 %v2028_v13  ;;  %v2023_v2 = vpack.c.bf16 %v2003_v56, %v2002_v55  ;;  %v2001_v14 = vmax.f32 %v1985_v1, 0.0 }
 0x8ce   : > { %v2022_v49 = vpack.c.bf16 %v2001_v14, %v2000_v33 }
 0x8cf   : > { %2137 = vmatpush.bf16.msrb.mxu0 %v5414_v11 }
 0x8d0   : > { %2032 = vmatpush.bf16.msrb.mxu1 %v2027_v46 }
 0x8d4   : > { %2033 = vmatpush.bf16.msrb.mxu1 %v2026_v5 }
 0x8d8   : > { %2034 = vmatpush.bf16.msrb.mxu1 %v2025_v60 }
 0x8dc   : > { %2035 = vmatpush.bf16.msrb.mxu1 %v2024_v17 }
 0x8e0   : > { %2036 = vmatpush.bf16.msrb.mxu1 %v2023_v2 }
 0x8e4   : > { %2037 = vmatpush.bf16.msrb.mxu1 %v2022_v49 }
 0x8e7   : > { %2038 = vmatmul.bf16.vlgmr.msrb.gmra.mxu1 %v9996_v43 }
 0x8f7   : > { %2043 = vmatmul.bf16.gmra.mxu1 %v9997_v29 }
 0x907   : > { %2048 = vmatmul.bf16.gmra.mxu1 %v9998_v57 }
 0x917   : > { %2053 = vmatmul.bf16.gmra.mxu1 %v9999_v54 }
 0x927   : > { %2058 = vmatmul.bf16.gmra.mxu1 %v10000_v47 }
 0x937   : > { %2063 = vmatmul.bf16.gmra.mxu1 %v10001_v37 }
 0x947   : > { %2068 = vmatmul.bf16.gmra.mxu1 %v10002_v23 }
 0x957   : > { %2073 = vmatmul.bf16.gmra.mxu1 %v10003_v53 }
 0x964   : > { %v2039_v20 = vpop.f32.mrf.mxu1 }
 0x96c   : > { %v2041_v4 = vpop.f32.mrf.mxu1 }
 0x96d   : > { %v2079_v6 = vpack.c.bf16 %v2041_v4, %v2039_v20 }
 0x96f   : > { %5423 = vmatmul.msk.bf16.vlgmr.msrb.gmra.mxu0 %vm2105_vm11, %v2079_v6 }
 0x974   : > { %v2044_v51 = vpop.f32.mrf.mxu1 }
 0x97c   : > { %v2046_v13 = vpop.f32.mrf.mxu1 }
 0x97d   : > { %v2080_v63 = vpack.c.bf16 %v2046_v13, %v2044_v51 }
 0x97f   : > { %5424 = vmatmul.msk.bf16.gmra.mxu0 %vm2105_vm11, %v2080_v63 }
 0x984   : > { %v2049_v10 = vpop.f32.mrf.mxu1 }
 0x98c   : > { %v2051_v40 = vpop.f32.mrf.mxu1 }
 0x98d   : > { %v2081_v30 = vpack.c.bf16 %v2051_v40, %v2049_v10 }
 0x98f   : > { %5425 = vmatmul.msk.bf16.gmra.mxu0 %vm2105_vm11, %v2081_v30  ;;  %v10005_v30 = vld [vmem:[#allocation9_spill] sm:$0xff] }
 0x994   : > { %v2054_v9 = vpop.f32.mrf.mxu1 }
 0x99c   : > { %v2056_v62 = vpop.f32.mrf.mxu1 }
 0x99d   : > { %v2082_v21 = vpack.c.bf16 %v2056_v62, %v2054_v9  ;;  %v10006_v9 = vld [vmem:[#allocation11_spill] sm:$0xff] }
 0x99e   : > { %v10007_v62 = vld [vmem:[#allocation15_spill] sm:$0xff] }
 0x99f   : > { %5426 = vmatmul.msk.bf16.gmra.mxu0 %vm2105_vm11, %v2082_v21  ;;  %v10008_v21 = vld [vmem:[#allocation17_spill] sm:$0xff] }
 0x9a4   : > { %v2059_v46 = vpop.f32.mrf.mxu1 }
 0x9ac   : > { %v2061_v18 = vpop.f32.mrf.mxu1 }
 0x9ad   : > { %v2083_v15 = vpack.c.bf16 %v2061_v18, %v2059_v46  ;;  %v10009_v46 = vld [vmem:[#allocation19_spill] sm:$0xff]  ;;  %v10010_v18 = vld [vmem:[#allocation20_spill] sm:$0xff] }
 0x9af   : > { %5427 = vmatmul.msk.bf16.gmra.mxu0 %vm2105_vm11, %v2083_v15  ;;  %v10011_v15 = vld [vmem:[#allocation21_spill] sm:$0xff] }
 0x9b4   : > { %v2064_v58 = vpop.f32.mrf.mxu1 }
 0x9bc   : > { %v2066_v12 = vpop.f32.mrf.mxu1 }
 0x9bd   : > { %v2084_v32 = vpack.c.bf16 %v2066_v12, %v2064_v58  ;;  %v10012_v58 = vld [vmem:[#allocation22_spill] sm:$0xff] }
 0x9bf   : > { %5428 = vmatmul.msk.bf16.gmra.mxu0 %vm2105_vm11, %v2084_v32 }
 0x9c4   : > { %v2069_v28 = vpop.f32.mrf.mxu1 }
 0x9cc   : > { %v2071_v19 = vpop.f32.mrf.mxu1 }
 0x9cd   : > { %v2085_v5 = vpack.c.bf16 %v2071_v19, %v2069_v28 }
 0x9cf   : > { %5429 = vmatmul.msk.bf16.gmra.mxu0 %vm2105_vm11, %v2085_v5 }
 0x9d4   : > { %v2074_v25 = vpop.f32.mrf.mxu1 }
 0x9dc   : > { %v2076_v7 = vpop.f32.mrf.mxu1 }
 0x9dd   : > { %v2086_v48 = vpack.c.bf16 %v2076_v7, %v2074_v25 }
 0x9df   : > { %5430 = vmatmul.msk.bf16.gmra.mxu0 %vm2105_vm11, %v2086_v48 }
 0x9ec   : > { %v7575_v22 = vpop.f32.mrf.mxu0 }
 0x9ed   : > { %v2236_v63 = vmul.f32 %v7575_v22, %v7575_v22 }
 0x9f4   : > { %v7577_v44 = vpop.f32.mrf.mxu0 }
 0x9f5   : > { %10004 = vst [vmem:[#allocation23_spill] sm:$0xff] %v7577_v44  ;;  %v2237_v51 = vmul.f32 %v7577_v44, %v7577_v44  ;;  %v2179_v10 = vpack.c.bf16 %v7577_v44, %v7575_v22 }
 0x9f7   : > { %v2252_v40 = vpack.c.bf16 %v2237_v51, %v2236_v63 }
 0x9fc   : > { %v7579_v59 = vpop.f32.mrf.mxu0 }
 0x9fd   : > { %v2238_v4 = vmul.f32 %v7579_v59, %v7579_v59 }
 0xa04   : > { %v7581_v38 = vpop.f32.mrf.mxu0 }
 0xa05   : > { %v2239_v53 = vmul.f32 %v7581_v38, %v7581_v38  ;;  %v2180_v6 = vpack.c.bf16 %v7581_v38, %v7579_v59 }
 0xa07   : > { %v2253_v13 = vpack.c.bf16 %v2239_v53, %v2238_v4 }
 0xa0c   : > { %v7583_v60 = vpop.f32.mrf.mxu0 }
 0xa0d   : > { %v2240_v3 = vmul.f32 %v7583_v60, %v7583_v60 }
 0xa14   : > { %v7585_v16 = vpop.f32.mrf.mxu0 }
 0xa15   : > { %v2241_v23 = vmul.f32 %v7585_v16, %v7585_v16  ;;  %v2181_v11 = vpack.c.bf16 %v7585_v16, %v7583_v60 }
 0xa17   : > { %v2254_v20 = vpack.c.bf16 %v2241_v23, %v2240_v3 }
 0xa1c   : > { %v7587_v35 = vpop.f32.mrf.mxu0 }
 0xa1d   : > { %v2242_v31 = vmul.f32 %v7587_v35, %v7587_v35 }
 0xa24   : > { %v7589_v45 = vpop.f32.mrf.mxu0 }
 0xa25   : > { %v2243_v37 = vmul.f32 %v7589_v45, %v7589_v45  ;;  %v2182_v24 = vpack.c.bf16 %v7589_v45, %v7587_v35 }
 0xa27   : > { %v2255_v34 = vpack.c.bf16 %v2243_v37, %v2242_v31 }
 0xa2c   : > { %v7591_v50 = vpop.f32.mrf.mxu0 }
 0xa2d   : > { %v2244_v52 = vmul.f32 %v7591_v50, %v7591_v50 }
 0xa34   : > { %v7593_v42 = vpop.f32.mrf.mxu0 }
 0xa35   : > { %v2245_v47 = vmul.f32 %v7593_v42, %v7593_v42  ;;  %v2183_v8 = vpack.c.bf16 %v7593_v42, %v7591_v50 }
 0xa37   : > { %v2256_v41 = vpack.c.bf16 %v2245_v47, %v2244_v52 }
 0xa3c   : > { %v7595_v27 = vpop.f32.mrf.mxu0 }
 0xa3d   : > { %v2246_v57 = vmul.f32 %v7595_v27, %v7595_v27 }
 0xa44   : > { %v7597_v0 = vpop.f32.mrf.mxu0 }
 0xa45   : > { %v2247_v43 = vmul.f32 %v7597_v0, %v7597_v0  ;;  %v2184_v54 = vpack.c.bf16 %v7597_v0, %v7595_v27 }
 0xa47   : > { %v2257_v26 = vpack.c.bf16 %v2247_v43, %v2246_v57 }
 0xa4c   : > { %v7599_v61 = vpop.f32.mrf.mxu0 }
 0xa4d   : > { %v2248_v33 = vmul.f32 %v7599_v61, %v7599_v61 }
 0xa54   : > { %v7601_v17 = vpop.f32.mrf.mxu0 }
 0xa55   : > { %v2249_v14 = vmul.f32 %v7601_v17, %v7601_v17  ;;  %v2185_v49 = vpack.c.bf16 %v7601_v17, %v7599_v61 }
 0xa57   : > { %v2258_v29 = vpack.c.bf16 %v2249_v14, %v2248_v33 }
 0xa5c   : > { %v7603_v56 = vpop.f32.mrf.mxu0 }
 0xa5d   : > { %v2250_v39 = vmul.f32 %v7603_v56, %v7603_v56 }
 0xa64   : > { %v7605_v1 = vpop.f32.mrf.mxu0 }
 0xa65   : > { %v2186_v55 = vpack.c.bf16 %v7605_v1, %v7603_v56  ;;  %v2251_v2 = vmul.f32 %v7605_v1, %v7605_v1 }
 0xa67   : > { %2187 = vmatpush.bf16.msrb.mxu2 %v2186_v55  ;;  %v2259_v36 = vpack.c.bf16 %v2251_v2, %v2250_v39 }
 0xa69   : > { %2260 = vmatpush.bf16.msrb.mxu3 %v2259_v36 }
 0xa6b   : > { %2188 = vmatpush.bf16.msrb.mxu2 %v2185_v49 }
 0xa6d   : > { %2261 = vmatpush.bf16.msrb.mxu3 %v2258_v29 }
 0xa6f   : > { %2189 = vmatpush.bf16.msrb.mxu2 %v2184_v54 }
 0xa71   : > { %2262 = vmatpush.bf16.msrb.mxu3 %v2257_v26 }
 0xa73   : > { %2190 = vmatpush.bf16.msrb.mxu2 %v2183_v8 }
 0xa75   : > { %2263 = vmatpush.bf16.msrb.mxu3 %v2256_v41 }
 0xa77   : > { %2191 = vmatpush.bf16.msrb.mxu2 %v2182_v24 }
 0xa79   : > { %2264 = vmatpush.bf16.msrb.mxu3 %v2255_v34 }
 0xa7b   : > { %2192 = vmatpush.bf16.msrb.mxu2 %v2181_v11 }
 0xa7d   : > { %2265 = vmatpush.bf16.msrb.mxu3 %v2254_v20 }
 0xa7f   : > { %2193 = vmatpush.bf16.msrb.mxu2 %v2180_v6 }
 0xa81   : > { %2266 = vmatpush.bf16.msrb.mxu3 %v2253_v13 }
 0xa83   : > { %2194 = vmatpush.bf16.msrb.mxu2 %v2179_v10 }
 0xa85   : > { %2267 = vmatpush.bf16.msrb.mxu3 %v2252_v40 }
 0xa86   : > { %2195 = vmatmul.bf16.vlgmr.msrb.gmra.mxu2 %v10005_v30 }
 0xa88   : > { %2268 = vmatmul.bf16.vlgmr.msrb.gmra.mxu3 %v10005_v30 }
 0xa96   : > { %2200 = vmatmul.bf16.gmra.mxu2 %v10006_v9 }
 0xa98   : > { %2273 = vmatmul.bf16.gmra.mxu3 %v10006_v9 }
 0xaa6   : > { %2205 = vmatmul.bf16.gmra.mxu2 %v10007_v62 }
 0xaa8   : > { %2278 = vmatmul.bf16.gmra.mxu3 %v10007_v62 }
 0xab6   : > { %2210 = vmatmul.bf16.gmra.mxu2 %v10008_v21 }
 0xab8   : > { %2283 = vmatmul.bf16.gmra.mxu3 %v10008_v21 }
 0xac6   : > { %2215 = vmatmul.bf16.gmra.mxu2 %v10009_v46 }
 0xac8   : > { %2288 = vmatmul.bf16.gmra.mxu3 %v10009_v46 }
 0xad6   : > { %2220 = vmatmul.bf16.gmra.mxu2 %v10010_v18 }
 0xad8   : > { %2293 = vmatmul.bf16.gmra.mxu3 %v10010_v18 }
 0xae6   : > { %2225 = vmatmul.bf16.gmra.mxu2 %v10011_v15 }
 0xae8   : > { %2298 = vmatmul.bf16.gmra.mxu3 %v10011_v15 }
 0xaf6   : > { %2230 = vmatmul.bf16.gmra.mxu2 %v10012_v58 }
 0xaf8   : > { %2303 = vmatmul.bf16.gmra.mxu3 %v10012_v58 }
 0xb09   : > { %v2196_v12 = vpop.f32.mrf.mxu2 }
 0xb0a   : > { %v2309_v32 = vmul.f32 %v2196_v12, %v2196_v12  ;;  %v2533_v52 = vsub.f32 %v7575_v22, %v2196_v12 }
 0xb0b   : > { %v2269_v28 = vpop.f32.mrf.mxu3 }
 0xb0c   : > { %v2325_v19 = vsub.f32 %v2269_v28, %v2309_v32 }
 0xb0e   : > { %v2341_v5 = vmax.f32 %v2325_v19, 0.0 }
 0xb10   : > { %v2357_v25 = vadd.f32 1e-05, %v2341_v5 }
 0xb11   : > { %v7671_v7 = vpop.f32.mrf.mxu2 }
 0xb12   : > { %10013 = vst [vmem:[#allocation29_spill] sm:$0xff] %v7671_v7  ;;  %5837 = vrsqrt.f32 %v2357_v25  ;;  %vm2379_vm13 = vweird.f32 %v2357_v25 }
 0xb13   : > { %v7673_v48 = vpop.f32.mrf.mxu3 }
 0xb18   : > { %v5838_v39 = vpop.eup %5837 }
 0xb19   : > { %v2374_v55 = vmul.f32 %v5838_v39, %v2357_v25  ;;  %v2201_v2 = vpop.f32.mrf.mxu2  ;;  %vm2380_vm12 = vweird.f32 %v5838_v39 }
 0xb1a   : > { %v2311_v14 = vmul.f32 %v2201_v2, %v2201_v2  ;;  %vm2381_vm14 = vmor %vm2379_vm13, %vm2380_vm12  ;;  %v2535_v63 = vsub.f32 %v7579_v59, %v2201_v2 }
 0xb1b   : > { %v2375_v36 = vmul.f32 %v5838_v39, %v2374_v55  ;;  %v2274_v33 = vpop.f32.mrf.mxu3 }
 0xb1c   : > { %v2327_v49 = vsub.f32 %v2274_v33, %v2311_v14 }
 0xb1d   : > { %v2376_v43 = vmul.f32 0.5, %v2375_v36 }
 0xb1e   : > { %v2343_v29 = vmax.f32 %v2327_v49, 0.0 }
 0xb1f   : > { %v2377_v57 = vsub.f32 1.5, %v2376_v43 }
 0xb20   : > { %v2359_v54 = vadd.f32 1e-05, %v2343_v29 }
 0xb21   : > { %v2378_v47 = vmul.f32 %v5838_v39, %v2377_v57  ;;  %v7675_v26 = vpop.f32.mrf.mxu2 }
 0xb22   : > { %5839 = vrsqrt.f32 %v2359_v54  ;;  %vm2399_vm0 = vweird.f32 %v2359_v54 }
 0xb23   : > { %v7678_v8 = vpop.f32.mrf.mxu3  ;;  %v2382_v37 = vsel %vm2381_vm14, %v5838_v39, %v2378_v47 }
 0xb24   : > { %v7680_v41 = vmul.f32 %v2533_v52, %v2382_v37 }
 0xb26   : > { %10014 = vst [vmem:[#allocation28_spill] sm:$0xff] %v7680_v41 }
 0xb28   : > { %v5840_v31 = vpop.eup %5839 }
 0xb29   : > { %v2394_v24 = vmul.f32 %v5840_v31, %v2359_v54  ;;  %v2206_v23 = vpop.f32.mrf.mxu2  ;;  %vm2400_vm15 = vweird.f32 %v5840_v31 }
 0xb2a   : > { %v2313_v34 = vmul.f32 %v2206_v23, %v2206_v23  ;;  %vm2401_vm1 = vmor %vm2399_vm0, %vm2400_vm15  ;;  %v2537_v25 = vsub.f32 %v7583_v60, %v2206_v23 }
 0xb2b   : > { %v2395_v3 = vmul.f32 %v5840_v31, %v2394_v24  ;;  %v2279_v11 = vpop.f32.mrf.mxu3 }
 0xb2c   : > { %v2329_v53 = vsub.f32 %v2279_v11, %v2313_v34 }
 0xb2d   : > { %v2396_v20 = vmul.f32 0.5, %v2395_v3 }
 0xb2e   : > { %v2345_v4 = vmax.f32 %v2329_v53, 0.0 }
 0xb2f   : > { %v2397_v6 = vsub.f32 1.5, %v2396_v20 }
 0xb30   : > { %v2361_v51 = vadd.f32 1e-05, %v2345_v4 }
 0xb31   : > { %v2398_v22 = vmul.f32 %v5840_v31, %v2397_v6  ;;  %v7682_v13 = vpop.f32.mrf.mxu2 }
 0xb32   : > { %5841 = vrsqrt.f32 %v2361_v51  ;;  %vm2419_vm4 = vweird.f32 %v2361_v51 }
 0xb33   : > { %v7685_v10 = vpop.f32.mrf.mxu3  ;;  %v2402_v40 = vsel %vm2401_vm1, %v5840_v31, %v2398_v22 }
 0xb34   : > { %v7687_v30 = vmul.f32 %v2535_v63, %v2402_v40 }
 0xb36   : > { %10015 = vst [vmem:[#allocation24_spill] sm:$0xff] %v7687_v30 }
 0xb38   : > { %v5842_v9 = vpop.eup %5841 }
 0xb39   : > { %v2414_v62 = vmul.f32 %v5842_v9, %v2361_v51  ;;  %v2211_v21 = vpop.f32.mrf.mxu2  ;;  %vm2420_vm2 = vweird.f32 %v5842_v9 }
 0xb3a   : > { %v2315_v46 = vmul.f32 %v2211_v21, %v2211_v21  ;;  %vm2421_vm5 = vmor %vm2419_vm4, %vm2420_vm2  ;;  %v2539_v24 = vsub.f32 %v7587_v35, %v2211_v21 }
 0xb3b   : > { %v2415_v18 = vmul.f32 %v5842_v9, %v2414_v62  ;;  %v2284_v15 = vpop.f32.mrf.mxu3 }
 0xb3c   : > { %v2331_v58 = vsub.f32 %v2284_v15, %v2315_v46 }
 0xb3d   : > { %v2416_v12 = vmul.f32 0.5, %v2415_v18 }
 0xb3e   : > { %v2347_v32 = vmax.f32 %v2331_v58, 0.0 }
 0xb3f   : > { %v2417_v28 = vsub.f32 1.5, %v2416_v12  ;;  %v2314_v12 = vmul.f32 %v7682_v13, %v7682_v13 }
 0xb40   : > { %v2363_v19 = vadd.f32 1e-05, %v2347_v32 }
 0xb41   : > { %v2418_v59 = vmul.f32 %v5842_v9, %v2417_v28  ;;  %v7689_v5 = vpop.f32.mrf.mxu2 }
 0xb42   : > { %5843 = vrsqrt.f32 %v2363_v19  ;;  %vm2439_vm7 = vweird.f32 %v2363_v19 }
 0xb43   : > { %v7692_v39 = vpop.f32.mrf.mxu3  ;;  %v2422_v55 = vsel %vm2421_vm5, %v5842_v9, %v2418_v59 }
 0xb44   : > { %v7694_v2 = vmul.f32 %v2537_v25, %v2422_v55 }
 0xb46   : > { %10016 = vst [vmem:[#allocation16_spill] sm:$0xff] %v7694_v2 }
 0xb48   : > { %v5844_v14 = vpop.eup %5843 }
 0xb49   : > { %v2434_v36 = vmul.f32 %v5844_v14, %v2363_v19  ;;  %v2216_v33 = vpop.f32.mrf.mxu2  ;;  %vm2440_vm6 = vweird.f32 %v5844_v14 }
 0xb4a   : > { %v2317_v49 = vmul.f32 %v2216_v33, %v2216_v33  ;;  %vm2441_vm8 = vmor %vm2439_vm7, %vm2440_vm6  ;;  %v2541_v35 = vsub.f32 %v7591_v50, %v2216_v33  ;;  %v2316_v33 = vmul.f32 %v7689_v5, %v7689_v5 }
 0xb4b   : > { %v2435_v43 = vmul.f32 %v5844_v14, %v2434_v36  ;;  %v2289_v29 = vpop.f32.mrf.mxu3 }
 0xb4c   : > { %v2333_v57 = vsub.f32 %v2289_v29, %v2317_v49 }
 0xb4d   : > { %v2436_v54 = vmul.f32 0.5, %v2435_v43 }
 0xb4e   : > { %v2349_v47 = vmax.f32 %v2333_v57, 0.0  ;;  %v2312_v57 = vmul.f32 %v7675_v26, %v7675_v26 }
 0xb4f   : > { %v2437_v52 = vsub.f32 1.5, %v2436_v54 }
 0xb50   : > { %v2365_v37 = vadd.f32 1e-05, %v2349_v47 }
 0xb51   : > { %v2438_v60 = vmul.f32 %v5844_v14, %v2437_v52  ;;  %v7696_v31 = vpop.f32.mrf.mxu2 }
 0xb52   : > { %5845 = vrsqrt.f32 %v2365_v37  ;;  %vm2459_vm10 = vweird.f32 %v2365_v37  ;;  %v2318_v59 = vmul.f32 %v7696_v31, %v7696_v31 }
 0xb53   : > { %v2291_v23 = vpop.f32.mrf.mxu3  ;;  %v2442_v34 = vsel %vm2441_vm8, %v5844_v14, %v2438_v60  ;;  %v2330_v14 = vsub.f32 %v7685_v10, %v2314_v12  ;;  %v2310_v60 = vmul.f32 %v7671_v7, %v7671_v7  ;;  %v2332_v10 = vsub.f32 %v7692_v39, %v2316_v33 }
 0xb54   : > { %v7699_v3 = vmul.f32 %v2539_v24, %v2442_v34  ;;  %v2334_v54 = vsub.f32 %v2291_v23, %v2318_v59 }
 0xb55   : > { %v2346_v52 = vmax.f32 %v2330_v14, 0.0  ;;  %v2326_v39 = vsub.f32 %v7673_v48, %v2310_v60 }
 0xb56   : > { %10017 = vst [vmem:[#allocation12_spill] sm:$0xff] %v7699_v3  ;;  %v2350_v23 = vmax.f32 %v2334_v54, 0.0 }
 0xb58   : > { %v5846_v11 = vpop.eup %5845 }
 0xb59   : > { %v2454_v53 = vmul.f32 %v5846_v11, %v2365_v37  ;;  %v7701_v20 = vpop.f32.mrf.mxu2  ;;  %vm2460_vm9 = vweird.f32 %v5846_v11 }
 0xb5a   : > { %vm2461_vm11 = vmor %vm2459_vm10, %vm2460_vm9  ;;  %v2319_v50 = vmul.f32 %v7701_v20, %v7701_v20 }
 0xb5b   : > { %v2455_v4 = vmul.f32 %v5846_v11, %v2454_v53  ;;  %v2294_v6 = vpop.f32.mrf.mxu3 }
 0xb5c   : > { %v2335_v49 = vsub.f32 %v2294_v6, %v2319_v50 }
 0xb5d   : > { %v2456_v51 = vmul.f32 0.5, %v2455_v4  ;;  %v2328_v4 = vsub.f32 %v7678_v8, %v2312_v57 }
 0xb5e   : > { %v2351_v24 = vmax.f32 %v2335_v49, 0.0 }
 0xb5f   : > { %v2457_v22 = vsub.f32 1.5, %v2456_v51 }
 0xb61   : > { %v2458_v63 = vmul.f32 %v5846_v11, %v2457_v22  ;;  %v7703_v40 = vpop.f32.mrf.mxu2  ;;  %v7743_v22 = vadd.f32 1e-05, %v2346_v52 }
 0xb62   : > { %v2320_v58 = vmul.f32 %v7703_v40, %v7703_v40 }
 0xb63   : > { %v2296_v9 = vpop.f32.mrf.mxu3  ;;  %v2462_v62 = vsel %vm2461_vm11, %v5846_v11, %v2458_v63 }
 0xb64   : > { %v7706_v21 = vmul.f32 %v2541_v35, %v2462_v62  ;;  %v2336_v25 = vsub.f32 %v2296_v9, %v2320_v58  ;;  %v2348_v35 = vmax.f32 %v2332_v10, 0.0  ;;  %v7747_v9 = vadd.f32 1e-05, %v2351_v24 }
 0xb65   : > { %v2342_v58 = vmax.f32 %v2326_v39, 0.0 }
 0xb66   : > { %v2352_v47 = vmax.f32 %v2336_v25, 0.0  ;;  %v7756_v12 = vadd.f32 1e-05, %v2348_v35 }
 0xb68   : > { %v7741_v6 = vadd.f32 1e-05, %v2352_v47 }
 0xb69   : > { %v7708_v46 = vpop.f32.mrf.mxu2 }
 0xb6a   : > { %v2321_v15 = vmul.f32 %v7708_v46, %v7708_v46  ;;  %vm2489_vm11 = vweird.f32 %v7741_v6 }
 0xb6b   : > { %v2299_v18 = vpop.f32.mrf.mxu3 }
 0xb6c   : > { %v2337_v28 = vsub.f32 %v2299_v18, %v2321_v15  ;;  %v2344_v18 = vmax.f32 %v2328_v4, 0.0  ;;  %v7750_v15 = vadd.f32 1e-05, %v2350_v23 }
 0xb6e   : > { %v2353_v43 = vmax.f32 %v2337_v28, 0.0 }
 0xb70   : > { %v7736_v11 = vadd.f32 1e-05, %v2353_v43 }
 0xb71   : > { %v7718_v32 = vpop.f32.mrf.mxu2 }
 0xb72   : > { %v2322_v19 = vmul.f32 %v7718_v32, %v7718_v32  ;;  %vm2499_vm5 = vweird.f32 %v7736_v11 }
 0xb73   : > { %v2301_v55 = vpop.f32.mrf.mxu3 }
 0xb74   : > { %v2338_v36 = vsub.f32 %v2301_v55, %v2322_v19  ;;  %v7766_v19 = vadd.f32 1e-05, %v2344_v18 }
 0xb76   : > { %v2354_v29 = vmax.f32 %v2338_v36, 0.0  ;;  %v7773_v36 = vadd.f32 1e-05, %v2342_v58 }
 0xb78   : > { %v7729_v37 = vadd.f32 1e-05, %v2354_v29 }
 0xb79   : > { %v7734_v34 = vpop.f32.mrf.mxu2 }
 0xb7a   : > { %v2323_v53 = vmul.f32 %v7734_v34, %v7734_v34  ;;  %5847 = vrsqrt.f32 %v7729_v37  ;;  %vm2509_vm0 = vweird.f32 %v7729_v37 }
 0xb7b   : > { %v2304_v51 = vpop.f32.mrf.mxu3  ;;  %5849 = vrsqrt.f32 %v7736_v11 }
 0xb7c   : > { %v2339_v63 = vsub.f32 %v2304_v51, %v2323_v53  ;;  %5851 = vrsqrt.f32 %v7741_v6 }
 0xb7d   : > { %5853 = vrsqrt.f32 %v7743_v22 }
 0xb7e   : > { %v2355_v62 = vmax.f32 %v2339_v63, 0.0  ;;  %5855 = vrsqrt.f32 %v7747_v9 }
 0xb80   : > { %v7754_v8 = vadd.f32 1e-05, %v2355_v62  ;;  %v7761_v50 = vpop.eup %5847 }
 0xb81   : > { %v7759_v48 = vpop.f32.mrf.mxu2  ;;  %v7769_v25 = vpop.eup %5849  ;;  %v2504_v33 = vmul.f32 %v7761_v50, %v7729_v37  ;;  %vm2510_vm13 = vweird.f32 %v7761_v50  ;;  %v2547_v37 = vsub.f32 %v7603_v56, %v7734_v34 }
 0xb82   : > { %5857 = vrsqrt.f32 %v7754_v8  ;;  %v2324_v28 = vmul.f32 %v7759_v48, %v7759_v48  ;;  %v7771_v14 = vpop.eup %5851  ;;  %v2494_v57 = vmul.f32 %v7769_v25, %v7736_v11  ;;  %vm2519_vm14 = vweird.f32 %v7754_v8  ;;  %vm7846_vm6 = vmor %vm2509_vm0, %vm2510_vm13 }
 0xb83   : > { %5859 = vrsqrt.f32 %v7750_v15  ;;  %v2306_v59 = vpop.f32.mrf.mxu3  ;;  %v7778_v49 = vpop.eup %5853  ;;  %v2484_v47 = vmul.f32 %v7771_v14, %v7741_v6  ;;  %v2505_v10 = vmul.f32 %v7761_v50, %v2504_v33  ;;  %vm2500_vm15 = vweird.f32 %v7769_v25 }
 0xb84   : > { %v2340_v55 = vsub.f32 %v2306_v59, %v2324_v28  ;;  %5861 = vrsqrt.f32 %v7756_v12  ;;  %v7780_v29 = vpop.eup %5855  ;;  %v2495_v23 = vmul.f32 %v7769_v25, %v2494_v57  ;;  %v2424_v63 = vmul.f32 %v7778_v49, %v7743_v22  ;;  %vm7852_vm7 = vmor %vm2499_vm5, %vm2500_vm15 }
 0xb85   : > { %5863 = vrsqrt.f32 %v7766_v19  ;;  %v2474_v53 = vmul.f32 %v7780_v29, %v7747_v9  ;;  %v2485_v35 = vmul.f32 %v7771_v14, %v2484_v47  ;;  %v2506_v18 = vmul.f32 0.5, %v2505_v10 }
 0xb86   : > { %v2356_v43 = vmax.f32 %v2340_v55, 0.0  ;;  %5865 = vrsqrt.f32 %v7773_v36  ;;  %v2496_v33 = vmul.f32 0.5, %v2495_v23  ;;  %v2425_v41 = vmul.f32 %v7778_v49, %v2424_v63 }
 0xb87   : > { %v2475_v59 = vmul.f32 %v7780_v29, %v2474_v53  ;;  %v2486_v30 = vmul.f32 0.5, %v2485_v35  ;;  %v2507_v10 = vsub.f32 1.5, %v2506_v18  ;;  %vm2490_vm4 = vweird.f32 %v7771_v14 }
 0xb88   : > { %v7785_v54 = vpop.eup %5857  ;;  %v7789_v52 = vadd.f32 1e-05, %v2356_v43  ;;  %v2497_v23 = vsub.f32 1.5, %v2496_v33  ;;  %v7827_v3 = vmul.f32 0.5, %v2425_v41  ;;  %vm2480_vm9 = vweird.f32 %v7780_v29 }
 0xb89   : > { %v7791_v60 = vpop.eup %5859  ;;  %v2514_v24 = vmul.f32 %v7785_v54, %v7754_v8  ;;  %v2476_v44 = vmul.f32 0.5, %v2475_v59  ;;  %vm2520_vm12 = vweird.f32 %v7785_v54  ;;  %v2487_v35 = vsub.f32 1.5, %v2486_v30 }
 0xb8a   : > { %5867 = vrsqrt.f32 %v7789_v52  ;;  %v7800_v4 = vpop.eup %5861  ;;  %v2464_v39 = vmul.f32 %v7791_v60, %v7750_v15  ;;  %vm7834_vm1 = vmor %vm2519_vm14, %vm2520_vm12  ;;  %v2498_v41 = vmul.f32 %v7769_v25, %v2497_v23  ;;  %vm2529_vm8 = vweird.f32 %v7789_v52 }
 0xb8b   : > { %v2515_v51 = vmul.f32 %v7785_v54, %v2514_v24  ;;  %v7809_v62 = vpop.eup %5863  ;;  %v2444_v28 = vmul.f32 %v7800_v4, %v7756_v12  ;;  %v2477_v33 = vsub.f32 1.5, %v2476_v44  ;;  %v2548_v56 = vsub.f32 %v7605_v1, %v7759_v48  ;;  %vm7873_vm12 = vmor %vm2489_vm11, %vm2490_vm4 }
 0xb8c   : > { %v7814_v55 = vpop.eup %5865  ;;  %v2404_v24 = vmul.f32 %v7809_v62, %v7766_v19  ;;  %v2465_v47 = vmul.f32 %v7791_v60, %v2464_v39  ;;  %vm2470_vm13 = vweird.f32 %v7791_v60  ;;  %vm2479_vm14 = vweird.f32 %v7747_v9 }
 0xb8d   : > { %v2516_v58 = vmul.f32 0.5, %v2515_v51  ;;  %v2384_v2 = vmul.f32 %v7814_v55, %v7773_v36  ;;  %v2445_v53 = vmul.f32 %v7800_v4, %v2444_v28  ;;  %v2508_v28 = vmul.f32 %v7761_v50, %v2507_v10  ;;  %vm7887_vm15 = vmor %vm2479_vm14, %vm2480_vm9 }
 0xb8e   : > { %v2405_v63 = vmul.f32 %v7809_v62, %v2404_v24  ;;  %v2466_v39 = vmul.f32 0.5, %v2465_v47  ;;  %v2488_v47 = vmul.f32 %v7771_v14, %v2487_v35  ;;  %v2546_v10 = vsub.f32 %v7601_v17, %v7718_v32  ;;  %v5441_v35 = vld [vmem:[%s9750_s3 + $0x90] sm:$0xf] }
 0xb8f   : > { %v2517_v43 = vsub.f32 1.5, %v2516_v58  ;;  %v2446_v59 = vmul.f32 0.5, %v2445_v53  ;;  %v2512_v11 = vsel %vm7846_vm6, %v7761_v50, %v2508_v28  ;;  %v2502_v50 = vsel %vm7852_vm7, %v7769_v25, %v2498_v41  ;;  %v7944_v25 = vld [vmem:[%s6223_s9 + $0x8] sm:$0xff] }
 0xb90   : > { %v5868_v57 = vpop.eup %5867  ;;  %v2545_v17 = vsub.f32 %v7599_v61, %v7708_v46  ;;  %v2562_v32 = vmul.f32 %v2546_v10, %v2512_v11  ;;  %v2492_v6 = vsel %vm7873_vm12, %v7771_v14, %v2488_v47  ;;  %v2544_v61 = vsub.f32 %v7597_v0, %v7703_v40  ;;  %10037 = vst [vmem:[#allocation13_spill] sm:$0xff] %v7944_v25 }
 0xb91   : > { %v2524_v51 = vmul.f32 %v5868_v57, %v7789_v52  ;;  %v2518_v58 = vmul.f32 %v7785_v54, %v2517_v43  ;;  %vm2530_vm2 = vweird.f32 %v5868_v57  ;;  %v2447_v53 = vsub.f32 1.5, %v2446_v59 }
 0xb92   : > { %vm2531_vm10 = vmor %vm2529_vm8, %vm2530_vm2  ;;  %v2385_v9 = vmul.f32 %v7814_v55, %v2384_v2  ;;  %vm2469_vm0 = vweird.f32 %v7750_v15  ;;  %v2578_v40 = vmax.f32 %v2562_v32, 0.0  ;;  %v2560_v28 = vmul.f32 %v2544_v61, %v2492_v6  ;;  %v7948_v61 = vld [vmem:[%s6223_s9 + $0x10] sm:$0xff] }
 0xb93   : > { %v2525_v7 = vmul.f32 %v5868_v57, %v2524_v51  ;;  %v2522_v30 = vsel %vm7834_vm1, %v7785_v54, %v2518_v58  ;;  %v2478_v51 = vmul.f32 %v7780_v29, %v2477_v33  ;;  %v2561_v58 = vmul.f32 %v2545_v17, %v2502_v50  ;;  %vm7898_vm1 = vmor %vm2469_vm0, %vm2470_vm13  ;;  %10038 = vst [vmem:[#allocation18_spill] sm:$0xff] %v7948_v61 }
 0xb94   : > { %v2563_v34 = vmul.f32 %v2547_v37, %v2522_v30  ;;  %v2427_v59 = vsub.f32 1.5, %v7827_v3  ;;  %vm2450_vm2 = vweird.f32 %v7800_v4  ;;  %v2448_v15 = vmul.f32 %v7800_v4, %v2447_v53 }
 0xb95   : > { %v2526_v18 = vmul.f32 0.5, %v2525_v7  ;;  %v2467_v7 = vsub.f32 1.5, %v2466_v39  ;;  %v2406_v39 = vmul.f32 0.5, %v2405_v63  ;;  %v2482_v14 = vsel %vm7887_vm15, %v7780_v29, %v2478_v51  ;;  %v10032_v51 = vld [vmem:[#allocation23_spill] sm:$0xff] }
 0xb96   : > { %v2579_v46 = vmax.f32 %v2563_v34, 0.0  ;;  %v2542_v29 = vsub.f32 %v7593_v42, %v7696_v31  ;;  %v2577_v63 = vmax.f32 %v2561_v58, 0.0  ;;  %vm2449_vm4 = vweird.f32 %v7756_v12  ;;  %v10031_v34 = vld [vmem:[#allocation29_spill] sm:$0xff] }
 0xb97   : > { %v2527_v8 = vsub.f32 1.5, %v2526_v18  ;;  %v2468_v48 = vmul.f32 %v7791_v60, %v2467_v7  ;;  %v2543_v18 = vsub.f32 %v7595_v27, %v7701_v20  ;;  %v2386_v27 = vmul.f32 0.5, %v2385_v9  ;;  %vm2451_vm5 = vmor %vm2449_vm4, %vm2450_vm2  ;;  %v5445_v58 = vld [vmem:[%s9750_s3 + $0xa0] sm:$0xf]  ;;  %v5647_v9 = vld [vmem:[%s9750_s3 + $0xa4] sm:$0xf0] }
 0xb98   : > { %v2595_v20 = vpack.c.bf16 %v2578_v40, %v2577_v63  ;;  %v2576_v3 = vmax.f32 %v2560_v28, 0.0  ;;  %v2407_v41 = vsub.f32 1.5, %v2406_v39  ;;  %vm2430_vm6 = vweird.f32 %v7778_v49  ;;  %v5437_v40 = vld [vmem:[%s9750_s3 + $0x80] sm:$0xf]  ;;  %v5645_v28 = vld [vmem:[%s9750_s3 + $0x84] sm:$0xf0] }
 0xb99   : > { %v2528_v54 = vmul.f32 %v5868_v57, %v2527_v8  ;;  %v2472_v2 = vsel %vm7898_vm1, %v7791_v60, %v2468_v48  ;;  %v2559_v33 = vmul.f32 %v2543_v18, %v2482_v14  ;;  %v2452_v60 = vsel %vm2451_vm5, %v7800_v4, %v2448_v15  ;;  %v7940_v48 = vld [vmem:[%s6223_s9] sm:$0xff]  ;;  %v7966_v14 = vld [vmem:[%s6223_s9 + $0x28] sm:$0xff]  ;;  %v5646_v18 = vld [vmem:[%s9750_s3 + $0x94] sm:$0xf0] }
 0xb9a   : > { %v2558_v43 = vmul.f32 %v2542_v29, %v2472_v2  ;;  %v2428_v30 = vmul.f32 %v7778_v49, %v2427_v59  ;;  %v2540_v42 = vsub.f32 %v7589_v45, %v7689_v5  ;;  %vm2429_vm7 = vweird.f32 %v7743_v22  ;;  %10036 = vst [vmem:[#allocation14_spill] sm:$0xff] %v7940_v48  ;;  %v7982_v2 = vld [vmem:[%s6223_s9 + $0x30] sm:$0xff]  ;;  %v5644_v29 = vld [vmem:[%s9750_s3 + $0x74] sm:$0xf0] }
 0xb9b   : > { %v2532_v52 = vsel %vm2531_vm10, %v5868_v57, %v2528_v54  ;;  %v2575_v31 = vmax.f32 %v2559_v33, 0.0  ;;  %vm2431_vm8 = vmor %vm2429_vm7, %vm2430_vm6  ;;  %v2387_v44 = vsub.f32 1.5, %v2386_v27  ;;  %vm2410_vm9 = vweird.f32 %v7809_v62  ;;  %10041 = vst [vmem:[#allocation25_spill] sm:$0xff] %v7966_v14  ;;  %v5433_v15 = vld [vmem:[%s9750_s3 + $0x70] sm:$0xf]  ;;  %v7992_v33 = vld [vmem:[%s6223_s9 + $0x38] sm:$0xff] }
 0xb9c   : > { %v2564_v1 = vmul.f32 %v2548_v56, %v2532_v52  ;;  %v2574_v8 = vmax.f32 %v2558_v43, 0.0  ;;  %v2556_v7 = vmul.f32 %v2540_v42, %v2452_v60  ;;  %v2432_v37 = vsel %vm2431_vm8, %v7778_v49, %v2428_v30  ;;  %v10033_v52 = vld [vmem:[#allocation16_spill] sm:$0xff]  ;;  %10042 = vst [vmem:[#allocation5_spill] sm:$0xff] %v7982_v2 }
 0xb9d   : > { %v2594_v12 = vpack.c.bf16 %v2576_v3, %v2575_v31  ;;  %v2408_v4 = vmul.f32 %v7809_v62, %v2407_v41  ;;  %v2538_v24 = vsub.f32 %v7585_v16, %v7682_v13  ;;  %v2573_v45 = vmax.f32 %v7706_v21, 0.0  ;;  %v10030_v16 = vld [vmem:[#allocation12_spill] sm:$0xff]  ;;  %10043 = vst [vmem:[#allocation6_spill] sm:$0xff] %v7992_v33 }
 0xb9e   : > { %v2580_v57 = vmax.f32 %v2564_v1, 0.0  ;;  %vm2409_vm10 = vweird.f32 %v7766_v19  ;;  %v2572_v22 = vmax.f32 %v2556_v7, 0.0  ;;  %vm2390_vm12 = vweird.f32 %v7814_v55 }
 0xb9f   : > { %vm2411_vm11 = vmor %vm2409_vm10, %vm2410_vm9  ;;  %v2593_v5 = vpack.c.bf16 %v2574_v8, %v2573_v45  ;;  %v2554_v54 = vmul.f32 %v2538_v24, %v2432_v37  ;;  %v2388_v49 = vmul.f32 %v7814_v55, %v2387_v44  ;;  %v2536_v47 = vsub.f32 %v7581_v38, %v7675_v26 }
 0xba0   : > { %v2596_v0 = vpack.c.bf16 %v2580_v57, %v2579_v46  ;;  %v2412_v11 = vsel %vm2411_vm11, %v7809_v62, %v2408_v4  ;;  %v2571_v13 = vmax.f32 %v10030_v16, 0.0  ;;  %vm2389_vm13 = vweird.f32 %v7773_v36  ;;  %v10034_v36 = vld [vmem:[#allocation24_spill] sm:$0xff]  ;;  %v7956_v57 = vld [vmem:[%s6223_s9 + $0x20] sm:$0xff] }
 0xba1   : > { %vm2391_vm14 = vmor %vm2389_vm13, %vm2390_vm12  ;;  %v2570_v19 = vmax.f32 %v2554_v54, 0.0  ;;  %v2552_v10 = vmul.f32 %v2536_v47, %v2412_v11  ;;  %v2534_v62 = vsub.f32 %v10032_v51, %v10031_v34  ;;  %v2569_v50 = vmax.f32 %v10033_v52, 0.0  ;;  %v7952_v46 = vld [vmem:[%s6223_s9 + $0x18] sm:$0xff]  ;;  %10040 = vst [vmem:[#allocation26_spill] sm:$0xff] %v7956_v57 }
 0xba2   : > { %2597 = vmatpush.bf16.msra.mxu1 %v2596_v0  ;;  %v2592_v21 = vpack.c.bf16 %v2572_v22, %v2571_v13  ;;  %v2392_v56 = vsel %vm2391_vm14, %v7814_v55, %v2388_v49  ;;  %v2567_v23 = vmax.f32 %v10034_v36, 0.0  ;;  %v10035_v55 = vld [vmem:[#allocation28_spill] sm:$0xff]  ;;  %10039 = vst [vmem:[#allocation27_spill] sm:$0xff] %v7952_v46  ;;  %v5446_v39 = vor.u32 %v5647_v9, %v5445_v58 }
 0xba3   : > { %v2591_v38 = vpack.c.bf16 %v2570_v19, %v2569_v50  ;;  %v2568_v26 = vmax.f32 %v2552_v10, 0.0  ;;  %v2550_v53 = vmul.f32 %v2534_v62, %v2392_v56  ;;  %v2565_v32 = vmax.f32 %v10035_v55, 0.0 }
 0xba4   : > { %2707 = vmatpush.bf16.msra.mxu0 %v5446_v39  ;;  %v5442_v0 = vor.u32 %v5646_v18, %v5441_v35  ;;  %v5438_v59 = vor.u32 %v5645_v28, %v5437_v40  ;;  %v5434_v63 = vor.u32 %v5644_v29, %v5433_v15  ;;  %vm2678_vm15 = vcmask 523264  }
 0xba5   : > { %v2590_v17 = vpack.c.bf16 %v2568_v26, %v2567_v23  ;;  %v2566_v1 = vmax.f32 %v2550_v53, 0.0 }
 0xba6   : > { %2598 = vmatpush.bf16.msra.mxu1 %v2595_v20 }
 0xba7   : > { %v2589_v6 = vpack.c.bf16 %v2566_v1, %v2565_v32 }
 0xba8   : > { %2708 = vmatpush.bf16.msra.mxu0 %v5442_v0 }
 0xbaa   : > { %2599 = vmatpush.bf16.msra.mxu1 %v2594_v12 }
 0xbac   : > { %2709 = vmatpush.bf16.msra.mxu0 %v5438_v59 }
 0xbae   : > { %2600 = vmatpush.bf16.msra.mxu1 %v2593_v5 }
 0xbb0   : > { %2710 = vmatpush.bf16.msra.mxu0 %v5434_v63 }
 0xbb2   : > { %2601 = vmatpush.bf16.msra.mxu1 %v2592_v21 }
 0xbb6   : > { %2602 = vmatpush.bf16.msra.mxu1 %v2591_v38 }
 0xbba   : > { %2603 = vmatpush.bf16.msra.mxu1 %v2590_v17 }
 0xbbe   : > { %2604 = vmatpush.bf16.msra.mxu1 %v2589_v6 }
 0xbc1   : > { %2605 = vmatmul.bf16.vlgmr.msra.gmra.mxu1 %v7940_v48 }
 0xbd1   : > { %2610 = vmatmul.bf16.gmra.mxu1 %v7944_v25 }
 0xbe1   : > { %2615 = vmatmul.bf16.gmra.mxu1 %v7948_v61 }
 0xbf1   : > { %2620 = vmatmul.bf16.gmra.mxu1 %v7952_v46 }
 0xc01   : > { %2625 = vmatmul.bf16.gmra.mxu1 %v7956_v57 }
 0xc11   : > { %2630 = vmatmul.bf16.gmra.mxu1 %v7966_v14 }
 0xc21   : > { %2635 = vmatmul.bf16.gmra.mxu1 %v7982_v2 }
 0xc31   : > { %2640 = vmatmul.bf16.gmra.mxu1 %v7992_v33 }
 0xc3e   : > { %v2606_v27 = vpop.f32.mrf.mxu1 }
 0xc46   : > { %v2608_v20 = vpop.f32.mrf.mxu1 }
 0xc47   : > { %v2646_v3 = vpack.c.bf16 %v2608_v20, %v2606_v27 }
 0xc49   : > { %5447 = vmatmul.msk.bf16.vlgmr.msra.gmra.mxu0 %vm2678_vm15, %v2646_v3 }
 0xc4e   : > { %v2611_v43 = vpop.f32.mrf.mxu1 }
 0xc56   : > { %v2613_v41 = vpop.f32.mrf.mxu1 }
 0xc57   : > { %v2647_v60 = vpack.c.bf16 %v2613_v41, %v2611_v43 }
 0xc59   : > { %5448 = vmatmul.msk.bf16.gmra.mxu0 %vm2678_vm15, %v2647_v60 }
 0xc5e   : > { %v2616_v30 = vpop.f32.mrf.mxu1 }
 0xc66   : > { %v2618_v42 = vpop.f32.mrf.mxu1 }
 0xc67   : > { %v2648_v31 = vpack.c.bf16 %v2618_v42, %v2616_v30 }
 0xc69   : > { %5449 = vmatmul.msk.bf16.gmra.mxu0 %vm2678_vm15, %v2648_v31 }
 0xc6e   : > { %v2621_v12 = vpop.f32.mrf.mxu1 }
 0xc76   : > { %v2623_v8 = vpop.f32.mrf.mxu1 }
 0xc77   : > { %v2649_v7 = vpack.c.bf16 %v2623_v8, %v2621_v12 }
 0xc79   : > { %5450 = vmatmul.msk.bf16.gmra.mxu0 %vm2678_vm15, %v2649_v7 }
 0xc7e   : > { %v2626_v44 = vpop.f32.mrf.mxu1 }
 0xc86   : > { %v2628_v37 = vpop.f32.mrf.mxu1 }
 0xc87   : > { %v2650_v4 = vpack.c.bf16 %v2628_v37, %v2626_v44 }
 0xc89   : > { %5451 = vmatmul.msk.bf16.gmra.mxu0 %vm2678_vm15, %v2650_v4 }
 0xc8e   : > { %v2631_v24 = vpop.f32.mrf.mxu1 }
 0xc96   : > { %v2633_v45 = vpop.f32.mrf.mxu1 }
 0xc97   : > { %v2651_v5 = vpack.c.bf16 %v2633_v45, %v2631_v24  ;;  %v8086_v45 = vld [vmem:[%s9749_s2] sm:$0xff] }
 0xc98   : > { %10045 = vst [vmem:[#allocation8_spill] sm:$0xff] %v8086_v45 }
 0xc99   : > { %5452 = vmatmul.msk.bf16.gmra.mxu0 %vm2678_vm15, %v2651_v5  ;;  %v8093_v5 = vld [vmem:[%s9749_s2 + $0x8] sm:$0xff] }
 0xc9a   : > { %10046 = vst [vmem:[#allocation10_spill] sm:$0xff] %v8093_v5 }
 0xc9e   : > { %v2636_v22 = vpop.f32.mrf.mxu1 }
 0xca6   : > { %v2638_v54 = vpop.f32.mrf.mxu1 }
 0xca7   : > { %v2652_v11 = vpack.c.bf16 %v2638_v54, %v2636_v22  ;;  %v8100_v22 = vld [vmem:[%s9749_s2 + $0x10] sm:$0xff]  ;;  %v8107_v54 = vld [vmem:[%s9749_s2 + $0x18] sm:$0xff] }
 0xca8   : > { %10047 = vst [vmem:[#allocation9_spill] sm:$0xff] %v8100_v22 }
 0xca9   : > { %5453 = vmatmul.msk.bf16.gmra.mxu0 %vm2678_vm15, %v2652_v11  ;;  %10048 = vst [vmem:[#allocation11_spill] sm:$0xff] %v8107_v54  ;;  %v8114_v11 = vld [vmem:[%s9749_s2 + $0x20] sm:$0xff] }
 0xcaa   : > { %10049 = vst [vmem:[#allocation15_spill] sm:$0xff] %v8114_v11 }
 0xcae   : > { %v2641_v49 = vpop.f32.mrf.mxu1 }
 0xcb6   : > { %v2643_v47 = vpop.f32.mrf.mxu1 }
 0xcb7   : > { %v2653_v16 = vpack.c.bf16 %v2643_v47, %v2641_v49  ;;  %v8121_v49 = vld [vmem:[%s9749_s2 + $0x28] sm:$0xff]  ;;  %v8128_v47 = vld [vmem:[%s9749_s2 + $0x30] sm:$0xff] }
 0xcb8   : > { %10050 = vst [vmem:[#allocation17_spill] sm:$0xff] %v8121_v49 }
 0xcb9   : > { %5454 = vmatmul.msk.bf16.gmra.mxu0 %vm2678_vm15, %v2653_v16  ;;  %10051 = vst [vmem:[#allocation19_spill] sm:$0xff] %v8128_v47  ;;  %v8135_v16 = vld [vmem:[%s9749_s2 + $0x38] sm:$0xff] }
 0xcba   : > { %10052 = vst [vmem:[#allocation20_spill] sm:$0xff] %v8135_v16 }
 0xcc6   : > { %v8003_v13 = vpop.f32.mrf.mxu0 }
 0xcc7   : > { %v2809_v37 = vmul.f32 %v8003_v13, %v8003_v13 }
 0xcce   : > { %v8005_v21 = vpop.f32.mrf.mxu0 }
 0xccf   : > { %10044 = vst [vmem:[#allocation7_spill] sm:$0xff] %v8005_v21  ;;  %v2810_v7 = vmul.f32 %v8005_v21, %v8005_v21  ;;  %v2752_v4 = vpack.c.bf16 %v8005_v21, %v8003_v13 }
 0xcd1   : > { %v2825_v24 = vpack.c.bf16 %v2810_v7, %v2809_v37 }
 0xcd6   : > { %v8007_v19 = vpop.f32.mrf.mxu0 }
 0xcd7   : > { %v2811_v12 = vmul.f32 %v8007_v19, %v8007_v19 }
 0xcde   : > { %v8009_v10 = vpop.f32.mrf.mxu0 }
 0xcdf   : > { %v2812_v42 = vmul.f32 %v8009_v10, %v8009_v10  ;;  %v2753_v8 = vpack.c.bf16 %v8009_v10, %v8007_v19 }
 0xce1   : > { %v2826_v44 = vpack.c.bf16 %v2812_v42, %v2811_v12 }
 0xce6   : > { %v8011_v56 = vpop.f32.mrf.mxu0 }
 0xce7   : > { %v2813_v60 = vmul.f32 %v8011_v56, %v8011_v56 }
 0xcee   : > { %v8013_v34 = vpop.f32.mrf.mxu0 }
 0xcef   : > { %v2814_v43 = vmul.f32 %v8013_v34, %v8013_v34  ;;  %v2754_v30 = vpack.c.bf16 %v8013_v34, %v8011_v56 }
 0xcf1   : > { %v2827_v31 = vpack.c.bf16 %v2814_v43, %v2813_v60 }
 0xcf6   : > { %v8015_v51 = vpop.f32.mrf.mxu0 }
 0xcf7   : > { %v2815_v20 = vmul.f32 %v8015_v51, %v8015_v51 }
 0xcfe   : > { %v8017_v62 = vpop.f32.mrf.mxu0 }
 0xcff   : > { %v2816_v63 = vmul.f32 %v8017_v62, %v8017_v62  ;;  %v2755_v3 = vpack.c.bf16 %v8017_v62, %v8015_v51 }
 0xd01   : > { %v2828_v41 = vpack.c.bf16 %v2816_v63, %v2815_v20 }
 0xd06   : > { %v8019_v52 = vpop.f32.mrf.mxu0 }
 0xd07   : > { %v2817_v15 = vmul.f32 %v8019_v52, %v8019_v52 }
 0xd0e   : > { %v8021_v50 = vpop.f32.mrf.mxu0 }
 0xd0f   : > { %v2818_v28 = vmul.f32 %v8021_v50, %v8021_v50  ;;  %v2756_v29 = vpack.c.bf16 %v8021_v50, %v8019_v52 }
 0xd11   : > { %v2829_v27 = vpack.c.bf16 %v2818_v28, %v2817_v15 }
 0xd16   : > { %v8023_v38 = vpop.f32.mrf.mxu0 }
 0xd17   : > { %v2819_v0 = vmul.f32 %v8023_v38, %v8023_v38 }
 0xd1e   : > { %v8025_v26 = vpop.f32.mrf.mxu0 }
 0xd1f   : > { %v2820_v35 = vmul.f32 %v8025_v26, %v8025_v26  ;;  %v2757_v40 = vpack.c.bf16 %v8025_v26, %v8023_v38 }
 0xd21   : > { %v2830_v59 = vpack.c.bf16 %v2820_v35, %v2819_v0 }
 0xd26   : > { %v8027_v53 = vpop.f32.mrf.mxu0 }
 0xd27   : > { %v2821_v9 = vmul.f32 %v8027_v53, %v8027_v53 }
 0xd2e   : > { %v8029_v36 = vpop.f32.mrf.mxu0 }
 0xd2f   : > { %v2822_v6 = vmul.f32 %v8029_v36, %v8029_v36  ;;  %v2758_v39 = vpack.c.bf16 %v8029_v36, %v8027_v53 }
 0xd31   : > { %v2831_v18 = vpack.c.bf16 %v2822_v6, %v2821_v9 }
 0xd36   : > { %v8031_v23 = vpop.f32.mrf.mxu0 }
 0xd37   : > { %v2823_v1 = vmul.f32 %v8031_v23, %v8031_v23 }
 0xd3e   : > { %v8033_v17 = vpop.f32.mrf.mxu0 }
 0xd3f   : > { %v2759_v55 = vpack.c.bf16 %v8033_v17, %v8031_v23  ;;  %v2824_v32 = vmul.f32 %v8033_v17, %v8033_v17 }
 0xd41   : > { %2760 = vmatpush.bf16.msra.mxu2 %v2759_v55  ;;  %v2832_v58 = vpack.c.bf16 %v2824_v32, %v2823_v1 }
 0xd43   : > { %2833 = vmatpush.bf16.msra.mxu3 %v2832_v58 }
 0xd45   : > { %2761 = vmatpush.bf16.msra.mxu2 %v2758_v39 }
 0xd47   : > { %2834 = vmatpush.bf16.msra.mxu3 %v2831_v18 }
 0xd49   : > { %2762 = vmatpush.bf16.msra.mxu2 %v2757_v40 }
 0xd4b   : > { %2835 = vmatpush.bf16.msra.mxu3 %v2830_v59 }
 0xd4d   : > { %2763 = vmatpush.bf16.msra.mxu2 %v2756_v29 }
 0xd4f   : > { %2836 = vmatpush.bf16.msra.mxu3 %v2829_v27 }
 0xd51   : > { %2764 = vmatpush.bf16.msra.mxu2 %v2755_v3 }
 0xd53   : > { %2837 = vmatpush.bf16.msra.mxu3 %v2828_v41 }
 0xd55   : > { %2765 = vmatpush.bf16.msra.mxu2 %v2754_v30 }
 0xd57   : > { %2838 = vmatpush.bf16.msra.mxu3 %v2827_v31 }
 0xd59   : > { %2766 = vmatpush.bf16.msra.mxu2 %v2753_v8 }
 0xd5b   : > { %2839 = vmatpush.bf16.msra.mxu3 %v2826_v44 }
 0xd5d   : > { %2767 = vmatpush.bf16.msra.mxu2 %v2752_v4 }
 0xd5f   : > { %2840 = vmatpush.bf16.msra.mxu3 %v2825_v24 }
 0xd60   : > { %2768 = vmatmul.bf16.vlgmr.msra.gmra.mxu2 %v8086_v45 }
 0xd62   : > { %2841 = vmatmul.bf16.vlgmr.msra.gmra.mxu3 %v8086_v45 }
 0xd70   : > { %2773 = vmatmul.bf16.gmra.mxu2 %v8093_v5 }
 0xd72   : > { %2846 = vmatmul.bf16.gmra.mxu3 %v8093_v5 }
 0xd80   : > { %2778 = vmatmul.bf16.gmra.mxu2 %v8100_v22 }
 0xd82   : > { %2851 = vmatmul.bf16.gmra.mxu3 %v8100_v22 }
 0xd90   : > { %2783 = vmatmul.bf16.gmra.mxu2 %v8107_v54 }
 0xd92   : > { %2856 = vmatmul.bf16.gmra.mxu3 %v8107_v54 }
 0xda0   : > { %2788 = vmatmul.bf16.gmra.mxu2 %v8114_v11 }
 0xda2   : > { %2861 = vmatmul.bf16.gmra.mxu3 %v8114_v11 }
 0xdb0   : > { %2793 = vmatmul.bf16.gmra.mxu2 %v8121_v49 }
 0xdb2   : > { %2866 = vmatmul.bf16.gmra.mxu3 %v8121_v49 }
 0xdc0   : > { %2798 = vmatmul.bf16.gmra.mxu2 %v8128_v47 }
 0xdc2   : > { %2871 = vmatmul.bf16.gmra.mxu3 %v8128_v47 }
 0xdd0   : > { %2803 = vmatmul.bf16.gmra.mxu2 %v8135_v16 }
 0xdd2   : > { %2876 = vmatmul.bf16.gmra.mxu3 %v8135_v16 }
 0xde3   : > { %v2769_v1 = vpop.f32.mrf.mxu2 }
 0xde4   : > { %v2882_v55 = vmul.f32 %v2769_v1, %v2769_v1  ;;  %v3106_v60 = vsub.f32 %v8003_v13, %v2769_v1 }
 0xde5   : > { %v2842_v32 = vpop.f32.mrf.mxu3 }
 0xde6   : > { %v2898_v6 = vsub.f32 %v2842_v32, %v2882_v55 }
 0xde8   : > { %v2914_v58 = vmax.f32 %v2898_v6, 0.0 }
 0xdea   : > { %v2930_v9 = vadd.f32 1e-05, %v2914_v58 }
 0xdeb   : > { %v8139_v39 = vpop.f32.mrf.mxu2 }
 0xdec   : > { %10053 = vst [vmem:[#allocation21_spill] sm:$0xff] %v8139_v39  ;;  %5869 = vrsqrt.f32 %v2930_v9  ;;  %vm2952_vm1 = vweird.f32 %v2930_v9 }
 0xded   : > { %v8141_v35 = vpop.f32.mrf.mxu3 }
 0xdf2   : > { %v5870_v18 = vpop.eup %5869 }
 0xdf3   : > { %v2947_v0 = vmul.f32 %v5870_v18, %v2930_v9  ;;  %v2774_v40 = vpop.f32.mrf.mxu2  ;;  %vm2953_vm0 = vweird.f32 %v5870_v18 }
 0xdf4   : > { %v2884_v28 = vmul.f32 %v2774_v40, %v2774_v40  ;;  %vm2954_vm2 = vmor %vm2952_vm1, %vm2953_vm0  ;;  %v3108_v9 = vsub.f32 %v8007_v19, %v2774_v40 }
 0xdf5   : > { %v2948_v59 = vmul.f32 %v5870_v18, %v2947_v0  ;;  %v2847_v15 = vpop.f32.mrf.mxu3 }
 0xdf6   : > { %v2900_v29 = vsub.f32 %v2847_v15, %v2884_v28 }
 0xdf7   : > { %v2949_v63 = vmul.f32 0.5, %v2948_v59 }
 0xdf8   : > { %v2916_v27 = vmax.f32 %v2900_v29, 0.0 }
 0xdf9   : > { %v2950_v20 = vsub.f32 1.5, %v2949_v63 }
 0xdfa   : > { %v2932_v3 = vadd.f32 1e-05, %v2916_v27 }
 0xdfb   : > { %v2951_v43 = vmul.f32 %v5870_v18, %v2950_v20  ;;  %v8143_v41 = vpop.f32.mrf.mxu2 }
 0xdfc   : > { %5871 = vrsqrt.f32 %v2932_v3  ;;  %vm2972_vm5 = vweird.f32 %v2932_v3 }
 0xdfd   : > { %v8146_v30 = vpop.f32.mrf.mxu3  ;;  %v2955_v42 = vsel %vm2954_vm2, %v5870_v18, %v2951_v43 }
 0xdfe   : > { %v8148_v31 = vmul.f32 %v3106_v60, %v2955_v42 }
 0xe00   : > { %10054 = vst [vmem:[#allocation22_spill] sm:$0xff] %v8148_v31 }
 0xe02   : > { %v5872_v12 = vpop.eup %5871 }
 0xe03   : > { %v2967_v8 = vmul.f32 %v5872_v12, %v2932_v3  ;;  %v2779_v7 = vpop.f32.mrf.mxu2  ;;  %vm2973_vm4 = vweird.f32 %v5872_v12 }
 0xe04   : > { %v2886_v44 = vmul.f32 %v2779_v7, %v2779_v7  ;;  %vm2974_vm6 = vmor %vm2972_vm5, %vm2973_vm4 }
 0xe05   : > { %v2968_v37 = vmul.f32 %v5872_v12, %v2967_v8  ;;  %v2852_v4 = vpop.f32.mrf.mxu3 }
 0xe06   : > { %v2902_v24 = vsub.f32 %v2852_v4, %v2886_v44 }
 0xe07   : > { %v2969_v55 = vmul.f32 0.5, %v2968_v37 }
 0xe08   : > { %v2918_v32 = vmax.f32 %v2902_v24, 0.0 }
 0xe09   : > { %v2970_v6 = vsub.f32 1.5, %v2969_v55 }
 0xe0a   : > { %v2934_v58 = vadd.f32 1e-05, %v2918_v32 }
 0xe0b   : > { %v2971_v13 = vmul.f32 %v5872_v12, %v2970_v6  ;;  %v8150_v1 = vpop.f32.mrf.mxu2 }
 0xe0c   : > { %5873 = vrsqrt.f32 %v2934_v58  ;;  %vm2992_vm8 = vweird.f32 %v2934_v58 }
 0xe0d   : > { %v8153_v18 = vpop.f32.mrf.mxu3  ;;  %v2975_v0 = vsel %vm2974_vm6, %v5872_v12, %v2971_v13  ;;  %v3110_v12 = vsub.f32 %v8011_v56, %v2779_v7 }
 0xe0e   : > { %v8155_v28 = vmul.f32 %v3108_v9, %v2975_v0 }
 0xe10   : > { %10055 = vst [vmem:[#allocation12_spill] sm:$0xff] %v8155_v28 }
 0xe12   : > { %v5874_v59 = vpop.eup %5873 }
 0xe13   : > { %v2987_v15 = vmul.f32 %v5874_v59, %v2934_v58  ;;  %v2784_v29 = vpop.f32.mrf.mxu2  ;;  %vm2993_vm7 = vweird.f32 %v5874_v59 }
 0xe14   : > { %v2888_v63 = vmul.f32 %v2784_v29, %v2784_v29  ;;  %vm2994_vm9 = vmor %vm2992_vm8, %vm2993_vm7 }
 0xe15   : > { %v2988_v27 = vmul.f32 %v5874_v59, %v2987_v15  ;;  %v2857_v20 = vpop.f32.mrf.mxu3 }
 0xe16   : > { %v2904_v43 = vsub.f32 %v2857_v20, %v2888_v63 }
 0xe17   : > { %v2989_v60 = vmul.f32 0.5, %v2988_v27 }
 0xe18   : > { %v2920_v3 = vmax.f32 %v2904_v43, 0.0 }
 0xe19   : > { %v2990_v42 = vsub.f32 1.5, %v2989_v60 }
 0xe1a   : > { %v2936_v8 = vadd.f32 1e-05, %v2920_v3 }
 0xe1b   : > { %v2991_v19 = vmul.f32 %v5874_v59, %v2990_v42  ;;  %v8157_v40 = vpop.f32.mrf.mxu2 }
 0xe1c   : > { %5875 = vrsqrt.f32 %v2936_v8  ;;  %vm3012_vm11 = vweird.f32 %v2936_v8 }
 0xe1d   : > { %v8160_v44 = vpop.f32.mrf.mxu3  ;;  %v2995_v37 = vsel %vm2994_vm9, %v5874_v59, %v2991_v19  ;;  %v3112_v59 = vsub.f32 %v8015_v51, %v2784_v29 }
 0xe1e   : > { %v8162_v4 = vmul.f32 %v3110_v12, %v2995_v37 }
 0xe20   : > { %10056 = vst [vmem:[#allocation29_spill] sm:$0xff] %v8162_v4 }
 0xe22   : > { %v5876_v24 = vpop.eup %5875 }
 0xe23   : > { %v3007_v55 = vmul.f32 %v5876_v24, %v2936_v8  ;;  %v2789_v32 = vpop.f32.mrf.mxu2  ;;  %vm3013_vm10 = vweird.f32 %v5876_v24 }
 0xe24   : > { %v2890_v6 = vmul.f32 %v2789_v32, %v2789_v32  ;;  %vm3014_vm12 = vmor %vm3012_vm11, %vm3013_vm10  ;;  %v3114_v51 = vsub.f32 %v8019_v52, %v2789_v32 }
 0xe25   : > { %v3008_v13 = vmul.f32 %v5876_v24, %v3007_v55  ;;  %v2862_v9 = vpop.f32.mrf.mxu3 }
 0xe26   : > { %v2906_v0 = vsub.f32 %v2862_v9, %v2890_v6 }
 0xe27   : > { %v3009_v15 = vmul.f32 0.5, %v3008_v13 }
 0xe28   : > { %v2922_v58 = vmax.f32 %v2906_v0, 0.0 }
 0xe29   : > { %v3010_v63 = vsub.f32 1.5, %v3009_v15 }
 0xe2a   : > { %v2938_v27 = vadd.f32 1e-05, %v2922_v58 }
 0xe2b   : > { %v3011_v56 = vmul.f32 %v5876_v24, %v3010_v63  ;;  %v8164_v7 = vpop.f32.mrf.mxu2 }
 0xe2c   : > { %5877 = vrsqrt.f32 %v2938_v27  ;;  %vm3032_vm14 = vweird.f32 %v2938_v27 }
 0xe2d   : > { %v2864_v20 = vpop.f32.mrf.mxu3  ;;  %v3015_v43 = vsel %vm3014_vm12, %v5876_v24, %v3011_v56 }
 0xe2e   : > { %v8167_v60 = vmul.f32 %v3112_v59, %v3015_v43  ;;  %v2891_v43 = vmul.f32 %v8164_v7, %v8164_v7 }
 0xe30   : > { %10057 = vst [vmem:[#allocation23_spill] sm:$0xff] %v8167_v60 }
 0xe32   : > { %v5878_v3 = vpop.eup %5877 }
 0xe33   : > { %v3027_v42 = vmul.f32 %v5878_v3, %v2938_v27  ;;  %v8169_v19 = vpop.f32.mrf.mxu2  ;;  %vm3033_vm13 = vweird.f32 %v5878_v3  ;;  %v2887_v27 = vmul.f32 %v8150_v1, %v8150_v1 }
 0xe34   : > { %vm3034_vm15 = vmor %vm3032_vm14, %vm3033_vm13  ;;  %v2892_v52 = vmul.f32 %v8169_v19, %v8169_v19 }
 0xe35   : > { %v3028_v12 = vmul.f32 %v5878_v3, %v3027_v42  ;;  %v2867_v37 = vpop.f32.mrf.mxu3 }
 0xe37   : > { %v3029_v55 = vmul.f32 0.5, %v3028_v12  ;;  %v2903_v12 = vsub.f32 %v8153_v18, %v2887_v27 }
 0xe39   : > { %v3030_v6 = vsub.f32 1.5, %v3029_v55  ;;  %v2919_v47 = vmax.f32 %v2903_v12, 0.0 }
 0xe3b   : > { %v3031_v8 = vmul.f32 %v5878_v3, %v3030_v6  ;;  %v8171_v13 = vpop.f32.mrf.mxu2  ;;  %v2889_v6 = vmul.f32 %v8157_v40, %v8157_v40 }
 0xe3c   : > { %v2893_v63 = vmul.f32 %v8171_v13, %v8171_v13 }
 0xe3d   : > { %v2869_v29 = vpop.f32.mrf.mxu3  ;;  %v3035_v24 = vsel %vm3034_vm15, %v5878_v3, %v3031_v8  ;;  %v2908_v8 = vsub.f32 %v2867_v37, %v2892_v52  ;;  %v2905_v18 = vsub.f32 %v8160_v44, %v2889_v6 }
 0xe3e   : > { %v8174_v9 = vmul.f32 %v3114_v51, %v3035_v24  ;;  %v2909_v3 = vsub.f32 %v2869_v29, %v2893_v63  ;;  %v2883_v29 = vmul.f32 %v8139_v39, %v8139_v39 }
 0xe3f   : > { %v2924_v63 = vmax.f32 %v2908_v8, 0.0  ;;  %v2921_v12 = vmax.f32 %v2905_v18, 0.0 }
 0xe40   : > { %v2925_v16 = vmax.f32 %v2909_v3, 0.0  ;;  %v8211_v3 = vadd.f32 1e-05, %v2919_v47  ;;  %v2899_v44 = vsub.f32 %v8141_v35, %v2883_v29 }
 0xe43   : > { %v8176_v0 = vpop.f32.mrf.mxu2 }
 0xe44   : > { %v2894_v58 = vmul.f32 %v8176_v0, %v8176_v0 }
 0xe45   : > { %v2872_v15 = vpop.f32.mrf.mxu3 }
 0xe46   : > { %v2910_v56 = vsub.f32 %v2872_v15, %v2894_v58  ;;  %v2885_v15 = vmul.f32 %v8143_v41, %v8143_v41  ;;  %v2907_v58 = vsub.f32 %v2864_v20, %v2891_v43 }
 0xe48   : > { %v2926_v51 = vmax.f32 %v2910_v56, 0.0  ;;  %v2901_v52 = vsub.f32 %v8146_v30, %v2885_v15  ;;  %v2923_v20 = vmax.f32 %v2907_v58, 0.0  ;;  %v8209_v56 = vadd.f32 1e-05, %v2925_v16 }
 0xe49   : > { %v2915_v16 = vmax.f32 %v2899_v44, 0.0  ;;  %v8224_v30 = vadd.f32 1e-05, %v2921_v12 }
 0xe4a   : > { %v2917_v8 = vmax.f32 %v2901_v52, 0.0  ;;  %vm3062_vm15 = vweird.f32 %v8209_v56 }
 0xe4b   : > { %v8186_v32 = vpop.f32.mrf.mxu2  ;;  %v8241_v52 = vadd.f32 1e-05, %v2915_v16 }
 0xe4c   : > { %v2895_v59 = vmul.f32 %v8186_v32, %v8186_v32  ;;  %v8234_v58 = vadd.f32 1e-05, %v2917_v8 }
 0xe4d   : > { %v2874_v42 = vpop.f32.mrf.mxu3 }
 0xe4e   : > { %v2911_v55 = vsub.f32 %v2874_v42, %v2895_v59  ;;  %v8204_v59 = vadd.f32 1e-05, %v2926_v51  ;;  %v8218_v51 = vadd.f32 1e-05, %v2923_v20 }
 0xe50   : > { %v2927_v24 = vmax.f32 %v2911_v55, 0.0  ;;  %v8215_v55 = vadd.f32 1e-05, %v2924_v63  ;;  %vm3072_vm9 = vweird.f32 %v8204_v59 }
 0xe52   : > { %v8197_v49 = vadd.f32 1e-05, %v2927_v24 }
 0xe53   : > { %v8202_v27 = vpop.f32.mrf.mxu2 }
 0xe54   : > { %v2896_v37 = vmul.f32 %v8202_v27, %v8202_v27  ;;  %5879 = vrsqrt.f32 %v8197_v49  ;;  %vm3082_vm5 = vweird.f32 %v8197_v49 }
 0xe55   : > { %v2877_v43 = vpop.f32.mrf.mxu3  ;;  %5881 = vrsqrt.f32 %v8204_v59 }
 0xe56   : > { %v2912_v42 = vsub.f32 %v2877_v43, %v2896_v37  ;;  %5883 = vrsqrt.f32 %v8209_v56 }
 0xe57   : > { %5885 = vrsqrt.f32 %v8211_v3 }
 0xe58   : > { %v2928_v6 = vmax.f32 %v2912_v42, 0.0  ;;  %5887 = vrsqrt.f32 %v8215_v55 }
 0xe5a   : > { %v8222_v47 = vadd.f32 1e-05, %v2928_v6  ;;  %v8229_v24 = vpop.eup %5879 }
 0xe5b   : > { %v8227_v35 = vpop.f32.mrf.mxu2  ;;  %v8237_v18 = vpop.eup %5881  ;;  %v3077_v20 = vmul.f32 %v8229_v24, %v8197_v49  ;;  %vm3083_vm1 = vweird.f32 %v8229_v24  ;;  %v3120_v49 = vsub.f32 %v8031_v23, %v8202_v27 }
 0xe5c   : > { %5889 = vrsqrt.f32 %v8222_v47  ;;  %v2897_v15 = vmul.f32 %v8227_v35, %v8227_v35  ;;  %v8239_v37 = vpop.eup %5883  ;;  %v3067_v12 = vmul.f32 %v8237_v18, %v8204_v59  ;;  %vm3092_vm2 = vweird.f32 %v8222_v47  ;;  %vm8314_vm10 = vmor %vm3082_vm5, %vm3083_vm1 }
 0xe5d   : > { %5891 = vrsqrt.f32 %v8218_v51  ;;  %v2879_v29 = vpop.f32.mrf.mxu3  ;;  %v8246_v43 = vpop.eup %5885  ;;  %v3057_v8 = vmul.f32 %v8239_v37, %v8209_v56  ;;  %vm3073_vm4 = vweird.f32 %v8237_v18  ;;  %vm3063_vm8 = vweird.f32 %v8239_v37 }
 0xe5e   : > { %v2913_v63 = vsub.f32 %v2879_v29, %v2897_v15  ;;  %5893 = vrsqrt.f32 %v8224_v30  ;;  %v8248_v44 = vpop.eup %5887  ;;  %v3078_v29 = vmul.f32 %v8229_v24, %v3077_v20  ;;  %v3068_v22 = vmul.f32 %v8237_v18, %v3067_v12  ;;  %vm8320_vm11 = vmor %vm3072_vm9, %vm3073_vm4 }
 0xe5f   : > { %5895 = vrsqrt.f32 %v8234_v58  ;;  %v3047_v11 = vmul.f32 %v8248_v44, %v8215_v55  ;;  %v2997_v5 = vmul.f32 %v8246_v43, %v8211_v3  ;;  %v3058_v45 = vmul.f32 %v8239_v37, %v3057_v8 }
 0xe60   : > { %v2929_v42 = vmax.f32 %v2913_v63, 0.0  ;;  %5897 = vrsqrt.f32 %v8241_v52  ;;  %v3079_v2 = vmul.f32 0.5, %v3078_v29  ;;  %vm3053_vm13 = vweird.f32 %v8248_v44 }
 0xe61   : > { %v3048_v46 = vmul.f32 %v8248_v44, %v3047_v11  ;;  %v2998_v31 = vmul.f32 %v8246_v43, %v2997_v5  ;;  %v3059_v28 = vmul.f32 0.5, %v3058_v45  ;;  %v3121_v23 = vsub.f32 %v8033_v17, %v8227_v35  ;;  %v10077_v35 = vld [vmem:[#allocation13_spill] sm:$0xff] }
 0xe62   : > { %v8253_v6 = vpop.eup %5889  ;;  %v8257_v16 = vadd.f32 1e-05, %v2929_v42  ;;  %v3080_v29 = vsub.f32 1.5, %v3079_v2  ;;  %vm3042_vm5 = vweird.f32 %v8218_v51 }
 0xe63   : > { %v8259_v15 = vpop.eup %5891  ;;  %v3087_v63 = vmul.f32 %v8253_v6, %v8222_v47  ;;  %v3049_v21 = vmul.f32 0.5, %v3048_v46  ;;  %vm3093_vm0 = vweird.f32 %v8253_v6  ;;  %v8295_v60 = vmul.f32 0.5, %v2998_v31 }
 0xe64   : > { %5899 = vrsqrt.f32 %v8257_v16  ;;  %v8268_v54 = vpop.eup %5893  ;;  %v3037_v20 = vmul.f32 %v8259_v15, %v8218_v51  ;;  %v3060_v2 = vsub.f32 1.5, %v3059_v28  ;;  %vm8302_vm6 = vmor %vm3092_vm2, %vm3093_vm0  ;;  %vm3102_vm12 = vweird.f32 %v8257_v16 }
 0xe65   : > { %v3088_v42 = vmul.f32 %v8253_v6, %v3087_v63  ;;  %v8277_v33 = vpop.eup %5895  ;;  %v3017_v57 = vmul.f32 %v8268_v54, %v8224_v30  ;;  %v3069_v63 = vmul.f32 0.5, %v3068_v22  ;;  %vm8341_vm0 = vmor %vm3062_vm15, %vm3063_vm8  ;;  %vm3043_vm1 = vweird.f32 %v8259_v15 }
 0xe66   : > { %v8282_v12 = vpop.eup %5897  ;;  %v2977_v48 = vmul.f32 %v8277_v33, %v8234_v58  ;;  %v3038_v8 = vmul.f32 %v8259_v15, %v3037_v20  ;;  %vm3052_vm2 = vweird.f32 %v8215_v55  ;;  %vm3022_vm8 = vweird.f32 %v8224_v30 }
 0xe67   : > { %v3089_v14 = vmul.f32 0.5, %v3088_v42  ;;  %v2957_v4 = vmul.f32 %v8282_v12, %v8241_v52  ;;  %v3018_v11 = vmul.f32 %v8268_v54, %v3017_v57  ;;  %v3070_v22 = vsub.f32 1.5, %v3069_v63  ;;  %vm8355_vm4 = vmor %vm3052_vm2, %vm3053_vm13 }
 0xe68   : > { %v2978_v5 = vmul.f32 %v8277_v33, %v2977_v48  ;;  %v3039_v45 = vmul.f32 0.5, %v3038_v8  ;;  %v3081_v57 = vmul.f32 %v8229_v24, %v3080_v29  ;;  %v3050_v63 = vsub.f32 1.5, %v3049_v21 }
 0xe69   : > { %v3090_v61 = vsub.f32 1.5, %v3089_v14  ;;  %v3019_v46 = vmul.f32 0.5, %v3018_v11  ;;  %v3071_v48 = vmul.f32 %v8237_v18, %v3070_v22  ;;  %v3061_v8 = vmul.f32 %v8239_v37, %v3060_v2  ;;  %v5469_v2 = vld [vmem:[%s9750_s3 + $0xe0] sm:$0xf] }
 0xe6a   : > { %v5900_v25 = vpop.eup %5899  ;;  %v3085_v59 = vsel %vm8314_vm10, %v8229_v24, %v3081_v57  ;;  %v3119_v29 = vsub.f32 %v8029_v36, %v8186_v32  ;;  %v3118_v36 = vsub.f32 %v8027_v53, %v8176_v0  ;;  %v3117_v53 = vsub.f32 %v8025_v26, %v8171_v13 }
 0xe6b   : > { %v3097_v42 = vmul.f32 %v5900_v25, %v8257_v16  ;;  %v3091_v14 = vmul.f32 %v8253_v6, %v3090_v61  ;;  %vm3103_vm7 = vweird.f32 %v5900_v25  ;;  %v3075_v24 = vsel %vm8320_vm11, %v8237_v18, %v3071_v48 }
 0xe6c   : > { %vm3104_vm14 = vmor %vm3102_vm12, %vm3103_vm7  ;;  %v3020_v11 = vsub.f32 1.5, %v3019_v46  ;;  %v3135_v32 = vmul.f32 %v3119_v29, %v3085_v59  ;;  %v2958_v55 = vmul.f32 %v8282_v12, %v2957_v4  ;;  %v3000_v46 = vsub.f32 1.5, %v8295_v60 }
 0xe6d   : > { %v3098_v39 = vmul.f32 %v5900_v25, %v3097_v42  ;;  %v3095_v31 = vsel %vm8302_vm6, %v8253_v6, %v3091_v14  ;;  %v3051_v42 = vmul.f32 %v8248_v44, %v3050_v63  ;;  %v3134_v14 = vmul.f32 %v3118_v36, %v3075_v24  ;;  %vm8366_vm6 = vmor %vm3042_vm5, %vm3043_vm1 }
 0xe6e   : > { %v3136_v27 = vmul.f32 %v3120_v49, %v3095_v31  ;;  %v3151_v13 = vmax.f32 %v3135_v32, 0.0  ;;  %vm3023_vm7 = vweird.f32 %v8268_v54  ;;  %v3021_v51 = vmul.f32 %v8268_v54, %v3020_v11  ;;  %v10075_v32 = vld [vmem:[#allocation22_spill] sm:$0xff] }
 0xe6f   : > { %v3099_v20 = vmul.f32 0.5, %v3098_v39  ;;  %v3040_v39 = vsub.f32 1.5, %v3039_v45  ;;  %v2979_v45 = vmul.f32 0.5, %v2978_v5  ;;  %v3150_v5 = vmax.f32 %v3134_v14, 0.0  ;;  %vm3024_vm9 = vmor %vm3022_vm8, %vm3023_vm7  ;;  %v5473_v14 = vld [vmem:[%s9750_s3 + $0xf0] sm:$0xf] }
 0xe70   : > { %v3152_v0 = vmax.f32 %v3136_v27, 0.0  ;;  %vm3003_vm10 = vweird.f32 %v8246_v43  ;;  %v3001_v31 = vmul.f32 %v8246_v43, %v3000_v46  ;;  %vm3002_vm11 = vweird.f32 %v8211_v3  ;;  %v10071_v27 = vld [vmem:[#allocation21_spill] sm:$0xff] }
 0xe71   : > { %v3100_v28 = vsub.f32 1.5, %v3099_v20  ;;  %v3041_v56 = vmul.f32 %v8259_v15, %v3040_v39  ;;  %v3116_v20 = vsub.f32 %v8023_v38, %v8169_v19  ;;  %v2959_v38 = vmul.f32 0.5, %v2958_v55  ;;  %vm3004_vm12 = vmor %vm3002_vm11, %vm3003_vm10  ;;  %v5652_v55 = vld [vmem:[%s9750_s3 + $0xf4] sm:$0xf0] }
 0xe72   : > { %v3170_v19 = vpack.c.bf16 %v3151_v13, %v3150_v5  ;;  %v2980_v48 = vsub.f32 1.5, %v2979_v45  ;;  %vm2983_vm13 = vweird.f32 %v8277_v33  ;;  %v3005_v49 = vsel %vm3004_vm12, %v8246_v43, %v3001_v31  ;;  %v5465_v13 = vld [vmem:[%s9750_s3 + $0xd0] sm:$0xf]  ;;  %v10082_v5 = vld [vmem:[#allocation5_spill] sm:$0xff] }
 0xe73   : > { %v3101_v6 = vmul.f32 %v5900_v25, %v3100_v28  ;;  %v3045_v4 = vsel %vm8366_vm6, %v8259_v15, %v3041_v56  ;;  %v3025_v15 = vsel %vm3024_vm9, %v8268_v54, %v3021_v51  ;;  %v2960_v21 = vsub.f32 1.5, %v2959_v38  ;;  %v5649_v51 = vld [vmem:[%s9750_s3 + $0xc4] sm:$0xf0]  ;;  %v5648_v38 = vld [vmem:[%s9750_s3 + $0xb4] sm:$0xf0] }
 0xe74   : > { %v2981_v54 = vmul.f32 %v8277_v33, %v2980_v48  ;;  %v3111_v47 = vsub.f32 %v8013_v34, %v8150_v1  ;;  %v10070_v34 = vld [vmem:[#allocation23_spill] sm:$0xff]  ;;  %vm2962_vm1 = vweird.f32 %v8241_v52  ;;  %v5474_v45 = vor.u32 %v5652_v55, %v5473_v14 }
 0xe75   : > { %v3105_v16 = vsel %vm3104_vm14, %v5900_v25, %v3101_v6  ;;  %v3065_v25 = vsel %vm8341_vm0, %v8239_v37, %v3061_v8  ;;  %v3055_v37 = vsel %vm8355_vm4, %v8248_v44, %v3051_v42  ;;  %v3115_v44 = vsub.f32 %v8021_v50, %v8164_v7  ;;  %v10072_v42 = vld [vmem:[#allocation7_spill] sm:$0xff] }
 0xe76   : > { %v3137_v17 = vmul.f32 %v3121_v23, %v3105_v16  ;;  %v3133_v57 = vmul.f32 %v3117_v53, %v3065_v25  ;;  %v3132_v63 = vmul.f32 %v3116_v20, %v3055_v37  ;;  %v3113_v50 = vsub.f32 %v8017_v62, %v8157_v40  ;;  %v10078_v53 = vld [vmem:[#allocation18_spill] sm:$0xff]  ;;  %3287 = vmatpush.bf16.msrb.mxu0 %v5474_v45  ;;  %v10081_v37 = vld [vmem:[#allocation25_spill] sm:$0xff] }
 0xe77   : > { %v3131_v61 = vmul.f32 %v3115_v44, %v3045_v4  ;;  %v3146_v62 = vmax.f32 %v8174_v9, 0.0  ;;  %vm2982_vm14 = vweird.f32 %v8234_v58  ;;  %v3127_v6 = vmul.f32 %v3111_v47, %v3005_v49  ;;  %v5651_v20 = vld [vmem:[%s9750_s3 + $0xe4] sm:$0xf0]  ;;  %v5461_v4 = vld [vmem:[%s9750_s3 + $0xc0] sm:$0xf] }
 0xe78   : > { %v3153_v18 = vmax.f32 %v3137_v17, 0.0  ;;  %v3149_v60 = vmax.f32 %v3133_v57, 0.0  ;;  %v3148_v7 = vmax.f32 %v3132_v63, 0.0  ;;  %v3129_v39 = vmul.f32 %v3113_v50, %v3025_v15  ;;  %vm2984_vm15 = vmor %vm2982_vm14, %vm2983_vm13  ;;  %v5650_v57 = vld [vmem:[%s9750_s3 + $0xd4] sm:$0xf0] }
 0xe79   : > { %v3147_v28 = vmax.f32 %v3131_v61, 0.0  ;;  %vm2963_vm0 = vweird.f32 %v8282_v12  ;;  %v2985_v59 = vsel %vm2984_vm15, %v8277_v33, %v2981_v54  ;;  %v2961_v43 = vmul.f32 %v8282_v12, %v2960_v21  ;;  %v10073_v33 = vld [vmem:[#allocation29_spill] sm:$0xff]  ;;  %v5457_v63 = vld [vmem:[%s9750_s3 + $0xb0] sm:$0xf] }
 0xe7a   : > { %v3171_v26 = vpack.c.bf16 %v3153_v18, %v3152_v0  ;;  %v3169_v30 = vpack.c.bf16 %v3149_v60, %v3148_v7  ;;  %v3145_v3 = vmax.f32 %v3129_v39, 0.0  ;;  %v3109_v8 = vsub.f32 %v8009_v10, %v8143_v41  ;;  %vm2964_vm2 = vmor %vm2962_vm1, %vm2963_vm0  ;;  %v10074_v41 = vld [vmem:[#allocation12_spill] sm:$0xff]  ;;  %v10079_v0 = vld [vmem:[#allocation27_spill] sm:$0xff] }
 0xe7b   : > { %v3168_v40 = vpack.c.bf16 %v3147_v28, %v3146_v62  ;;  %v3144_v1 = vmax.f32 %v10070_v34, 0.0  ;;  %v3143_v58 = vmax.f32 %v3127_v6, 0.0  ;;  %v2965_v23 = vsel %vm2964_vm2, %v8282_v12, %v2961_v43  ;;  %v10076_v12 = vld [vmem:[#allocation14_spill] sm:$0xff] }
 0xe7c   : > { %3172 = vmatpush.bf16.msrb.mxu1 %v3171_v26  ;;  %v3125_v29 = vmul.f32 %v3109_v8, %v2985_v59  ;;  %v3107_v16 = vsub.f32 %v10072_v42, %v10071_v27  ;;  %v3142_v24 = vmax.f32 %v10073_v33, 0.0  ;;  %v3140_v36 = vmax.f32 %v10074_v41, 0.0  ;;  %v10080_v18 = vld [vmem:[#allocation26_spill] sm:$0xff] }
 0xe7d   : > { %v3167_v9 = vpack.c.bf16 %v3145_v3, %v3144_v1  ;;  %v3138_v25 = vmax.f32 %v10075_v32, 0.0  ;;  %v5470_v26 = vor.u32 %v5651_v20, %v5469_v2  ;;  %v5466_v46 = vor.u32 %v5650_v57, %v5465_v13  ;;  %v10083_v60 = vld [vmem:[#allocation6_spill] sm:$0xff] }
 0xe7e   : > { %v3166_v11 = vpack.c.bf16 %v3143_v58, %v3142_v24  ;;  %v3141_v22 = vmax.f32 %v3125_v29, 0.0  ;;  %v3123_v10 = vmul.f32 %v3107_v16, %v2965_v23  ;;  %v5462_v44 = vor.u32 %v5649_v51, %v5461_v4 }
 0xe7f   : > { %3288 = vmatpush.bf16.msrb.mxu0 %v5470_v26  ;;  %vm3259_vm4 = vcmask 654336  }
 0xe80   : > { %3173 = vmatpush.bf16.msrb.mxu1 %v3170_v19  ;;  %v3165_v17 = vpack.c.bf16 %v3141_v22, %v3140_v36  ;;  %v3139_v52 = vmax.f32 %v3123_v10, 0.0  ;;  %v5458_v19 = vor.u32 %v5648_v38, %v5457_v63 }
 0xe82   : > { %v3164_v56 = vpack.c.bf16 %v3139_v52, %v3138_v25 }
 0xe83   : > { %3289 = vmatpush.bf16.msrb.mxu0 %v5466_v46 }
 0xe84   : > { %3174 = vmatpush.bf16.msrb.mxu1 %v3169_v30 }
 0xe87   : > { %3290 = vmatpush.bf16.msrb.mxu0 %v5462_v44 }
 0xe88   : > { %3175 = vmatpush.bf16.msrb.mxu1 %v3168_v40 }
 0xe8b   : > { %3291 = vmatpush.bf16.msrb.mxu0 %v5458_v19 }
 0xe8c   : > { %3176 = vmatpush.bf16.msrb.mxu1 %v3167_v9 }
 0xe90   : > { %3177 = vmatpush.bf16.msrb.mxu1 %v3166_v11 }
 0xe94   : > { %3178 = vmatpush.bf16.msrb.mxu1 %v3165_v17 }
 0xe98   : > { %3179 = vmatpush.bf16.msrb.mxu1 %v3164_v56 }
 0xe9b   : > { %3180 = vmatmul.bf16.vlgmr.msrb.gmra.mxu1 %v10076_v12 }
 0xeab   : > { %3185 = vmatmul.bf16.gmra.mxu1 %v10077_v35 }
 0xebb   : > { %3190 = vmatmul.bf16.gmra.mxu1 %v10078_v53 }
 0xecb   : > { %3195 = vmatmul.bf16.gmra.mxu1 %v10079_v0 }
 0xedb   : > { %3200 = vmatmul.bf16.gmra.mxu1 %v10080_v18 }
 0xeeb   : > { %3205 = vmatmul.bf16.gmra.mxu1 %v10081_v37 }
 0xefb   : > { %3210 = vmatmul.bf16.gmra.mxu1 %v10082_v5 }
 0xf0b   : > { %3215 = vmatmul.bf16.gmra.mxu1 %v10083_v60 }
 0xf18   : > { %v3181_v61 = vpop.f32.mrf.mxu1 }
 0xf20   : > { %v3183_v48 = vpop.f32.mrf.mxu1 }
 0xf21   : > { %v3221_v15 = vpack.c.bf16 %v3183_v48, %v3181_v61 }
 0xf23   : > { %5475 = vmatmul.msk.bf16.vlgmr.msrb.gmra.mxu0 %vm3259_vm4, %v3221_v15 }
 0xf28   : > { %v3186_v31 = vpop.f32.mrf.mxu1 }
 0xf30   : > { %v3188_v50 = vpop.f32.mrf.mxu1 }
 0xf31   : > { %v3222_v7 = vpack.c.bf16 %v3188_v50, %v3186_v31 }
 0xf33   : > { %5476 = vmatmul.msk.bf16.gmra.mxu0 %vm3259_vm4, %v3222_v7 }
 0xf38   : > { %v3191_v30 = vpop.f32.mrf.mxu1 }
 0xf40   : > { %v3193_v28 = vpop.f32.mrf.mxu1 }
 0xf41   : > { %v3223_v39 = vpack.c.bf16 %v3193_v28, %v3191_v30 }
 0xf43   : > { %5477 = vmatmul.msk.bf16.gmra.mxu0 %vm3259_vm4, %v3223_v39  ;;  %v10085_v39 = vld [vmem:[#allocation8_spill] sm:$0xff] }
 0xf48   : > { %v3196_v21 = vpop.f32.mrf.mxu1 }
 0xf50   : > { %v3198_v49 = vpop.f32.mrf.mxu1 }
 0xf51   : > { %v3224_v54 = vpack.c.bf16 %v3198_v49, %v3196_v21  ;;  %v10086_v21 = vld [vmem:[#allocation10_spill] sm:$0xff]  ;;  %v10087_v49 = vld [vmem:[#allocation9_spill] sm:$0xff] }
 0xf53   : > { %5478 = vmatmul.msk.bf16.gmra.mxu0 %vm3259_vm4, %v3224_v54  ;;  %v10088_v54 = vld [vmem:[#allocation11_spill] sm:$0xff] }
 0xf58   : > { %v3201_v47 = vpop.f32.mrf.mxu1 }
 0xf60   : > { %v3203_v62 = vpop.f32.mrf.mxu1 }
 0xf61   : > { %v3225_v40 = vpack.c.bf16 %v3203_v62, %v3201_v47  ;;  %v10089_v47 = vld [vmem:[#allocation15_spill] sm:$0xff]  ;;  %v10090_v62 = vld [vmem:[#allocation17_spill] sm:$0xff] }
 0xf63   : > { %5479 = vmatmul.msk.bf16.gmra.mxu0 %vm3259_vm4, %v3225_v40  ;;  %v10091_v40 = vld [vmem:[#allocation19_spill] sm:$0xff] }
 0xf68   : > { %v3206_v3 = vpop.f32.mrf.mxu1 }
 0xf70   : > { %v3208_v6 = vpop.f32.mrf.mxu1 }
 0xf71   : > { %v3226_v59 = vpack.c.bf16 %v3208_v6, %v3206_v3  ;;  %v10092_v3 = vld [vmem:[#allocation20_spill] sm:$0xff] }
 0xf73   : > { %5480 = vmatmul.msk.bf16.gmra.mxu0 %vm3259_vm4, %v3226_v59 }
 0xf78   : > { %v3211_v43 = vpop.f32.mrf.mxu1 }
 0xf80   : > { %v3213_v8 = vpop.f32.mrf.mxu1 }
 0xf81   : > { %v3227_v34 = vpack.c.bf16 %v3213_v8, %v3211_v43 }
 0xf83   : > { %5481 = vmatmul.msk.bf16.gmra.mxu0 %vm3259_vm4, %v3227_v34 }
 0xf88   : > { %v3216_v1 = vpop.f32.mrf.mxu1 }
 0xf90   : > { %v3218_v9 = vpop.f32.mrf.mxu1 }
 0xf91   : > { %v3228_v58 = vpack.c.bf16 %v3218_v9, %v3216_v1 }
 0xf93   : > { %5482 = vmatmul.msk.bf16.gmra.mxu0 %vm3259_vm4, %v3228_v58 }
 0xfa0   : > { %v8453_v29 = vpop.f32.mrf.mxu0 }
 0xfa1   : > { %v3390_v7 = vmul.f32 %v8453_v29, %v8453_v29 }
 0xfa8   : > { %v8455_v23 = vpop.f32.mrf.mxu0 }
 0xfa9   : > { %10084 = vst [vmem:[#allocation16_spill] sm:$0xff] %v8455_v23  ;;  %v3391_v31 = vmul.f32 %v8455_v23, %v8455_v23  ;;  %v3333_v30 = vpack.c.bf16 %v8455_v23, %v8453_v29 }
 0xfab   : > { %v3406_v28 = vpack.c.bf16 %v3391_v31, %v3390_v7 }
 0xfb0   : > { %v8457_v27 = vpop.f32.mrf.mxu0 }
 0xfb1   : > { %v3392_v48 = vmul.f32 %v8457_v27, %v8457_v27 }
 0xfb8   : > { %v8459_v42 = vpop.f32.mrf.mxu0 }
 0xfb9   : > { %v3393_v60 = vmul.f32 %v8459_v42, %v8459_v42  ;;  %v3334_v15 = vpack.c.bf16 %v8459_v42, %v8457_v27 }
 0xfbb   : > { %v3407_v50 = vpack.c.bf16 %v3393_v60, %v3392_v48 }
 0xfc0   : > { %v8461_v16 = vpop.f32.mrf.mxu0 }
 0xfc1   : > { %v3394_v38 = vmul.f32 %v8461_v16, %v8461_v16 }
 0xfc8   : > { %v8463_v33 = vpop.f32.mrf.mxu0 }
 0xfc9   : > { %v3395_v5 = vmul.f32 %v8463_v33, %v8463_v33  ;;  %v3335_v19 = vpack.c.bf16 %v8463_v33, %v8461_v16 }
 0xfcb   : > { %v3408_v61 = vpack.c.bf16 %v3395_v5, %v3394_v38 }
 0xfd0   : > { %v8465_v24 = vpop.f32.mrf.mxu0 }
 0xfd1   : > { %v3396_v51 = vmul.f32 %v8465_v24, %v8465_v24 }
 0xfd8   : > { %v8467_v11 = vpop.f32.mrf.mxu0 }
 0xfd9   : > { %v3397_v46 = vmul.f32 %v8467_v11, %v8467_v11  ;;  %v3336_v44 = vpack.c.bf16 %v8467_v11, %v8465_v24 }
 0xfdb   : > { %v3409_v63 = vpack.c.bf16 %v3397_v46, %v3396_v51 }
 0xfe0   : > { %v8469_v22 = vpop.f32.mrf.mxu0 }
 0xfe1   : > { %v3398_v13 = vmul.f32 %v8469_v22, %v8469_v22 }
 0xfe8   : > { %v8471_v10 = vpop.f32.mrf.mxu0 }
 0xfe9   : > { %v3399_v20 = vmul.f32 %v8471_v10, %v8471_v10  ;;  %v3337_v57 = vpack.c.bf16 %v8471_v10, %v8469_v22 }
 0xfeb   : > { %v3410_v4 = vpack.c.bf16 %v3399_v20, %v3398_v13 }
 0xff0   : > { %v8473_v41 = vpop.f32.mrf.mxu0 }
 0xff1   : > { %v3400_v37 = vmul.f32 %v8473_v41, %v8473_v41 }
 0xff8   : > { %v8475_v36 = vpop.f32.mrf.mxu0 }
 0xff9   : > { %v3401_v55 = vmul.f32 %v8475_v36, %v8475_v36  ;;  %v3338_v2 = vpack.c.bf16 %v8475_v36, %v8473_v41 }
 0xffb   : > { %v3411_v26 = vpack.c.bf16 %v3401_v55, %v3400_v37 }
0x1000   : > { %v8477_v17 = vpop.f32.mrf.mxu0 }
0x1001   : > { %v3402_v18 = vmul.f32 %v8477_v17, %v8477_v17 }
0x1008   : > { %v8479_v52 = vpop.f32.mrf.mxu0 }
0x1009   : > { %v3403_v53 = vmul.f32 %v8479_v52, %v8479_v52  ;;  %v3339_v14 = vpack.c.bf16 %v8479_v52, %v8477_v17 }
0x100b   : > { %v3412_v45 = vpack.c.bf16 %v3403_v53, %v3402_v18 }
0x1010   : > { %v8481_v32 = vpop.f32.mrf.mxu0 }
0x1011   : > { %v3404_v56 = vmul.f32 %v8481_v32, %v8481_v32 }
0x1018   : > { %v8483_v25 = vpop.f32.mrf.mxu0 }
0x1019   : > { %v3340_v12 = vpack.c.bf16 %v8483_v25, %v8481_v32  ;;  %v3405_v35 = vmul.f32 %v8483_v25, %v8483_v25 }
0x101b   : > { %3341 = vmatpush.bf16.msrb.mxu2 %v3340_v12  ;;  %v3413_v0 = vpack.c.bf16 %v3405_v35, %v3404_v56 }
0x101d   : > { %3414 = vmatpush.bf16.msrb.mxu3 %v3413_v0 }
0x101f   : > { %3342 = vmatpush.bf16.msrb.mxu2 %v3339_v14 }
0x1021   : > { %3415 = vmatpush.bf16.msrb.mxu3 %v3412_v45 }
0x1023   : > { %3343 = vmatpush.bf16.msrb.mxu2 %v3338_v2 }
0x1025   : > { %3416 = vmatpush.bf16.msrb.mxu3 %v3411_v26 }
0x1027   : > { %3344 = vmatpush.bf16.msrb.mxu2 %v3337_v57 }
0x1029   : > { %3417 = vmatpush.bf16.msrb.mxu3 %v3410_v4 }
0x102b   : > { %3345 = vmatpush.bf16.msrb.mxu2 %v3336_v44 }
0x102d   : > { %3418 = vmatpush.bf16.msrb.mxu3 %v3409_v63 }
0x102f   : > { %3346 = vmatpush.bf16.msrb.mxu2 %v3335_v19 }
0x1031   : > { %3419 = vmatpush.bf16.msrb.mxu3 %v3408_v61 }
0x1033   : > { %3347 = vmatpush.bf16.msrb.mxu2 %v3334_v15 }
0x1035   : > { %3420 = vmatpush.bf16.msrb.mxu3 %v3407_v50 }
0x1037   : > { %3348 = vmatpush.bf16.msrb.mxu2 %v3333_v30 }
0x1039   : > { %3421 = vmatpush.bf16.msrb.mxu3 %v3406_v28 }
0x103a   : > { %3349 = vmatmul.bf16.vlgmr.msrb.gmra.mxu2 %v10085_v39 }
0x103c   : > { %3422 = vmatmul.bf16.vlgmr.msrb.gmra.mxu3 %v10085_v39 }
0x104a   : > { %3354 = vmatmul.bf16.gmra.mxu2 %v10086_v21 }
0x104c   : > { %3427 = vmatmul.bf16.gmra.mxu3 %v10086_v21 }
0x105a   : > { %3359 = vmatmul.bf16.gmra.mxu2 %v10087_v49 }
0x105c   : > { %3432 = vmatmul.bf16.gmra.mxu3 %v10087_v49 }
0x106a   : > { %3364 = vmatmul.bf16.gmra.mxu2 %v10088_v54 }
0x106c   : > { %3437 = vmatmul.bf16.gmra.mxu3 %v10088_v54 }
0x107a   : > { %3369 = vmatmul.bf16.gmra.mxu2 %v10089_v47 }
0x107c   : > { %3442 = vmatmul.bf16.gmra.mxu3 %v10089_v47 }
0x108a   : > { %3374 = vmatmul.bf16.gmra.mxu2 %v10090_v62 }
0x108c   : > { %3447 = vmatmul.bf16.gmra.mxu3 %v10090_v62 }
0x109a   : > { %3379 = vmatmul.bf16.gmra.mxu2 %v10091_v40 }
0x109c   : > { %3452 = vmatmul.bf16.gmra.mxu3 %v10091_v40 }
0x10aa   : > { %3384 = vmatmul.bf16.gmra.mxu2 %v10092_v3 }
0x10ac   : > { %3457 = vmatmul.bf16.gmra.mxu3 %v10092_v3 }
0x10bd   : > { %v3350_v6 = vpop.f32.mrf.mxu2 }
0x10be   : > { %v3463_v59 = vmul.f32 %v3350_v6, %v3350_v6  ;;  %v3687_v13 = vsub.f32 %v8453_v29, %v3350_v6 }
0x10bf   : > { %v3423_v43 = vpop.f32.mrf.mxu3 }
0x10c0   : > { %v3479_v8 = vsub.f32 %v3423_v43, %v3463_v59 }
0x10c2   : > { %v3495_v34 = vmax.f32 %v3479_v8, 0.0 }
0x10c4   : > { %v3511_v1 = vadd.f32 1e-05, %v3495_v34 }
0x10c5   : > { %v8549_v9 = vpop.f32.mrf.mxu2 }
0x10c6   : > { %10093 = vst [vmem:[#allocation24_spill] sm:$0xff] %v8549_v9  ;;  %5901 = vrsqrt.f32 %v3511_v1  ;;  %vm3533_vm6 = vweird.f32 %v3511_v1 }
0x10c7   : > { %v8551_v58 = vpop.f32.mrf.mxu3 }
0x10cc   : > { %v5902_v56 = vpop.eup %5901 }
0x10cd   : > { %v3528_v12 = vmul.f32 %v5902_v56, %v3511_v1  ;;  %v3355_v35 = vpop.f32.mrf.mxu2  ;;  %vm3534_vm5 = vweird.f32 %v5902_v56 }
0x10ce   : > { %v3465_v53 = vmul.f32 %v3355_v35, %v3355_v35  ;;  %vm3535_vm7 = vmor %vm3533_vm6, %vm3534_vm5  ;;  %v3689_v7 = vsub.f32 %v8457_v27, %v3355_v35 }
0x10cf   : > { %v3529_v0 = vmul.f32 %v5902_v56, %v3528_v12  ;;  %v3428_v18 = vpop.f32.mrf.mxu3 }
0x10d0   : > { %v3481_v14 = vsub.f32 %v3428_v18, %v3465_v53 }
0x10d1   : > { %v3530_v55 = vmul.f32 0.5, %v3529_v0 }
0x10d2   : > { %v3497_v45 = vmax.f32 %v3481_v14, 0.0 }
0x10d3   : > { %v3531_v37 = vsub.f32 1.5, %v3530_v55 }
0x10d4   : > { %v3513_v2 = vadd.f32 1e-05, %v3497_v45 }
0x10d5   : > { %v3532_v20 = vmul.f32 %v5902_v56, %v3531_v37  ;;  %v8553_v26 = vpop.f32.mrf.mxu2 }
0x10d6   : > { %5903 = vrsqrt.f32 %v3513_v2  ;;  %vm3553_vm9 = vweird.f32 %v3513_v2 }
0x10d7   : > { %v8556_v57 = vpop.f32.mrf.mxu3  ;;  %v3536_v46 = vsel %vm3535_vm7, %v5902_v56, %v3532_v20 }
0x10d8   : > { %v8558_v4 = vmul.f32 %v3687_v13, %v3536_v46 }
0x10da   : > { %10094 = vst [vmem:[#allocation28_spill] sm:$0xff] %v8558_v4 }
0x10dc   : > { %v5904_v51 = vpop.eup %5903 }
0x10dd   : > { %v3548_v44 = vmul.f32 %v5904_v51, %v3513_v2  ;;  %v3360_v5 = vpop.f32.mrf.mxu2  ;;  %vm3554_vm8 = vweird.f32 %v5904_v51 }
0x10de   : > { %v3467_v63 = vmul.f32 %v3360_v5, %v3360_v5  ;;  %vm3555_vm10 = vmor %vm3553_vm9, %vm3554_vm8  ;;  %v3691_v1 = vsub.f32 %v8461_v16, %v3360_v5 }
0x10df   : > { %v3549_v38 = vmul.f32 %v5904_v51, %v3548_v44  ;;  %v3433_v19 = vpop.f32.mrf.mxu3 }
0x10e0   : > { %v3483_v60 = vsub.f32 %v3433_v19, %v3467_v63 }
0x10e1   : > { %v3550_v61 = vmul.f32 0.5, %v3549_v38 }
0x10e2   : > { %v3499_v48 = vmax.f32 %v3483_v60, 0.0 }
0x10e3   : > { %v3551_v15 = vsub.f32 1.5, %v3550_v61 }
0x10e4   : > { %v3515_v31 = vadd.f32 1e-05, %v3499_v48 }
0x10e5   : > { %v3552_v29 = vmul.f32 %v5904_v51, %v3551_v15  ;;  %v8560_v50 = vpop.f32.mrf.mxu2 }
0x10e6   : > { %5905 = vrsqrt.f32 %v3515_v31  ;;  %vm3573_vm12 = vweird.f32 %v3515_v31 }
0x10e7   : > { %v8563_v30 = vpop.f32.mrf.mxu3  ;;  %v3556_v28 = vsel %vm3555_vm10, %v5904_v51, %v3552_v29 }
0x10e8   : > { %v8565_v39 = vmul.f32 %v3689_v7, %v3556_v28 }
0x10ea   : > { %10095 = vst [vmem:[#allocation23_spill] sm:$0xff] %v8565_v39 }
0x10ec   : > { %v5906_v21 = vpop.eup %5905 }
0x10ed   : > { %v3568_v49 = vmul.f32 %v5906_v21, %v3515_v31  ;;  %v3365_v54 = vpop.f32.mrf.mxu2  ;;  %vm3574_vm11 = vweird.f32 %v5906_v21 }
0x10ee   : > { %v3469_v47 = vmul.f32 %v3365_v54, %v3365_v54  ;;  %vm3575_vm13 = vmor %vm3573_vm12, %vm3574_vm11  ;;  %v3693_v44 = vsub.f32 %v8465_v24, %v3365_v54 }
0x10ef   : > { %v3569_v62 = vmul.f32 %v5906_v21, %v3568_v49  ;;  %v3438_v40 = vpop.f32.mrf.mxu3 }
0x10f0   : > { %v3485_v3 = vsub.f32 %v3438_v40, %v3469_v47 }
0x10f1   : > { %v3570_v6 = vmul.f32 0.5, %v3569_v62 }
0x10f2   : > { %v3501_v59 = vmax.f32 %v3485_v3, 0.0 }
0x10f3   : > { %v3571_v43 = vsub.f32 1.5, %v3570_v6  ;;  %v3468_v6 = vmul.f32 %v8560_v50, %v8560_v50 }
0x10f4   : > { %v3517_v8 = vadd.f32 1e-05, %v3501_v59 }
0x10f5   : > { %v3572_v27 = vmul.f32 %v5906_v21, %v3571_v43  ;;  %v8567_v34 = vpop.f32.mrf.mxu2 }
0x10f6   : > { %5907 = vrsqrt.f32 %v3517_v8  ;;  %vm3593_vm15 = vweird.f32 %v3517_v8 }
0x10f7   : > { %v8570_v56 = vpop.f32.mrf.mxu3  ;;  %v3576_v12 = vsel %vm3575_vm13, %v5906_v21, %v3572_v27 }
0x10f8   : > { %v8572_v35 = vmul.f32 %v3691_v1, %v3576_v12 }
0x10fa   : > { %10096 = vst [vmem:[#allocation21_spill] sm:$0xff] %v8572_v35 }
0x10fc   : > { %v5908_v53 = vpop.eup %5907 }
0x10fd   : > { %v3588_v0 = vmul.f32 %v5908_v53, %v3517_v8  ;;  %v3370_v18 = vpop.f32.mrf.mxu2  ;;  %vm3594_vm14 = vweird.f32 %v5908_v53 }
0x10fe   : > { %v3471_v14 = vmul.f32 %v3370_v18, %v3370_v18  ;;  %vm3595_vm0 = vmor %vm3593_vm15, %vm3594_vm14  ;;  %v3695_v24 = vsub.f32 %v8469_v22, %v3370_v18  ;;  %v3470_v18 = vmul.f32 %v8567_v34, %v8567_v34 }
0x10ff   : > { %v3589_v55 = vmul.f32 %v5908_v53, %v3588_v0  ;;  %v3443_v45 = vpop.f32.mrf.mxu3 }
0x1100   : > { %v3487_v37 = vsub.f32 %v3443_v45, %v3471_v14 }
0x1101   : > { %v3590_v2 = vmul.f32 0.5, %v3589_v55 }
0x1102   : > { %v3503_v20 = vmax.f32 %v3487_v37, 0.0  ;;  %v3466_v37 = vmul.f32 %v8553_v26, %v8553_v26 }
0x1103   : > { %v3591_v13 = vsub.f32 1.5, %v3590_v2 }
0x1104   : > { %v3519_v46 = vadd.f32 1e-05, %v3503_v20 }
0x1105   : > { %v3592_v16 = vmul.f32 %v5908_v53, %v3591_v13  ;;  %v8574_v51 = vpop.f32.mrf.mxu2 }
0x1106   : > { %5909 = vrsqrt.f32 %v3519_v46  ;;  %vm3613_vm2 = vweird.f32 %v3519_v46  ;;  %v3472_v27 = vmul.f32 %v8574_v51, %v8574_v51 }
0x1107   : > { %v3445_v5 = vpop.f32.mrf.mxu3  ;;  %v3596_v63 = vsel %vm3595_vm0, %v5908_v53, %v3592_v16  ;;  %v3484_v53 = vsub.f32 %v8563_v30, %v3468_v6  ;;  %v3464_v16 = vmul.f32 %v8549_v9, %v8549_v9  ;;  %v3486_v30 = vsub.f32 %v8570_v56, %v3470_v18 }
0x1108   : > { %v8577_v38 = vmul.f32 %v3693_v44, %v3596_v63  ;;  %v3488_v2 = vsub.f32 %v3445_v5, %v3472_v27 }
0x1109   : > { %v3500_v13 = vmax.f32 %v3484_v53, 0.0  ;;  %v3480_v56 = vsub.f32 %v8551_v58, %v3464_v16 }
0x110a   : > { %10097 = vst [vmem:[#allocation7_spill] sm:$0xff] %v8577_v38  ;;  %v3504_v5 = vmax.f32 %v3488_v2, 0.0 }
0x110c   : > { %v5910_v19 = vpop.eup %5909 }
0x110d   : > { %v3608_v60 = vmul.f32 %v5910_v19, %v3519_v46  ;;  %v8579_v61 = vpop.f32.mrf.mxu2  ;;  %vm3614_vm1 = vweird.f32 %v5910_v19 }
0x110e   : > { %vm3615_vm4 = vmor %vm3613_vm2, %vm3614_vm1  ;;  %v3473_v22 = vmul.f32 %v8579_v61, %v8579_v61 }
0x110f   : > { %v3609_v48 = vmul.f32 %v5910_v19, %v3608_v60  ;;  %v3448_v15 = vpop.f32.mrf.mxu3 }
0x1110   : > { %v3489_v14 = vsub.f32 %v3448_v15, %v3473_v22 }
0x1111   : > { %v3610_v31 = vmul.f32 0.5, %v3609_v48  ;;  %v3482_v48 = vsub.f32 %v8556_v57, %v3466_v37 }
0x1112   : > { %v3505_v44 = vmax.f32 %v3489_v14, 0.0 }
0x1113   : > { %v3611_v29 = vsub.f32 1.5, %v3610_v31 }
0x1115   : > { %v3612_v7 = vmul.f32 %v5910_v19, %v3611_v29  ;;  %v8581_v28 = vpop.f32.mrf.mxu2  ;;  %v8621_v29 = vadd.f32 1e-05, %v3500_v13 }
0x1116   : > { %v3474_v3 = vmul.f32 %v8581_v28, %v8581_v28 }
0x1117   : > { %v3450_v21 = vpop.f32.mrf.mxu3  ;;  %v3616_v49 = vsel %vm3615_vm4, %v5910_v19, %v3612_v7 }
0x1118   : > { %v8584_v54 = vmul.f32 %v3695_v24, %v3616_v49  ;;  %v3490_v1 = vsub.f32 %v3450_v21, %v3474_v3  ;;  %v3502_v24 = vmax.f32 %v3486_v30, 0.0  ;;  %v8625_v21 = vadd.f32 1e-05, %v3505_v44 }
0x1119   : > { %v3496_v3 = vmax.f32 %v3480_v56, 0.0 }
0x111a   : > { %v3506_v20 = vmax.f32 %v3490_v1, 0.0  ;;  %v8634_v6 = vadd.f32 1e-05, %v3502_v24 }
0x111c   : > { %v8619_v15 = vadd.f32 1e-05, %v3506_v20 }
0x111d   : > { %v8586_v47 = vpop.f32.mrf.mxu2 }
0x111e   : > { %v3475_v40 = vmul.f32 %v8586_v47, %v8586_v47  ;;  %vm3643_vm4 = vweird.f32 %v8619_v15 }
0x111f   : > { %v3453_v62 = vpop.f32.mrf.mxu3 }
0x1120   : > { %v3491_v43 = vsub.f32 %v3453_v62, %v3475_v40  ;;  %v3498_v62 = vmax.f32 %v3482_v48, 0.0  ;;  %v8628_v40 = vadd.f32 1e-05, %v3504_v5 }
0x1122   : > { %v3507_v55 = vmax.f32 %v3491_v43, 0.0 }
0x1124   : > { %v8614_v19 = vadd.f32 1e-05, %v3507_v55 }
0x1125   : > { %v8596_v59 = vpop.f32.mrf.mxu2 }
0x1126   : > { %v3476_v8 = vmul.f32 %v8596_v59, %v8596_v59  ;;  %vm3653_vm13 = vweird.f32 %v8614_v19 }
0x1127   : > { %v3455_v12 = vpop.f32.mrf.mxu3 }
0x1128   : > { %v3492_v0 = vsub.f32 %v3455_v12, %v3476_v8  ;;  %v8644_v8 = vadd.f32 1e-05, %v3498_v62 }
0x112a   : > { %v3508_v45 = vmax.f32 %v3492_v0, 0.0  ;;  %v8651_v0 = vadd.f32 1e-05, %v3496_v3 }
0x112c   : > { %v8607_v46 = vadd.f32 1e-05, %v3508_v45 }
0x112d   : > { %v8612_v63 = vpop.f32.mrf.mxu2 }
0x112e   : > { %v3477_v60 = vmul.f32 %v8612_v63, %v8612_v63  ;;  %5911 = vrsqrt.f32 %v8607_v46  ;;  %vm3663_vm9 = vweird.f32 %v8607_v46 }
0x112f   : > { %v3458_v31 = vpop.f32.mrf.mxu3  ;;  %5913 = vrsqrt.f32 %v8614_v19 }
0x1130   : > { %v3493_v7 = vsub.f32 %v3458_v31, %v3477_v60  ;;  %5915 = vrsqrt.f32 %v8619_v15 }
0x1131   : > { %5917 = vrsqrt.f32 %v8621_v29 }
0x1132   : > { %v3509_v49 = vmax.f32 %v3493_v7, 0.0  ;;  %5919 = vrsqrt.f32 %v8625_v21 }
0x1134   : > { %v8632_v57 = vadd.f32 1e-05, %v3509_v49  ;;  %v8639_v22 = vpop.eup %5911 }
0x1135   : > { %v8637_v58 = vpop.f32.mrf.mxu2  ;;  %v8647_v1 = vpop.eup %5913  ;;  %v3658_v18 = vmul.f32 %v8639_v22, %v8607_v46  ;;  %vm3664_vm6 = vweird.f32 %v8639_v22  ;;  %v3701_v46 = vsub.f32 %v8481_v32, %v8612_v63 }
0x1136   : > { %5921 = vrsqrt.f32 %v8632_v57  ;;  %v3478_v43 = vmul.f32 %v8637_v58, %v8637_v58  ;;  %v8649_v53 = vpop.eup %5915  ;;  %v3648_v37 = vmul.f32 %v8647_v1, %v8614_v19  ;;  %vm3673_vm7 = vweird.f32 %v8632_v57  ;;  %vm8724_vm14 = vmor %vm3663_vm9, %vm3664_vm6 }
0x1137   : > { %5923 = vrsqrt.f32 %v8628_v40  ;;  %v3460_v27 = vpop.f32.mrf.mxu3  ;;  %v8656_v14 = vpop.eup %5917  ;;  %v3638_v20 = vmul.f32 %v8649_v53, %v8619_v15  ;;  %v3659_v30 = vmul.f32 %v8639_v22, %v3658_v18  ;;  %vm3654_vm8 = vweird.f32 %v8647_v1 }
0x1138   : > { %v3494_v12 = vsub.f32 %v3460_v27, %v3478_v43  ;;  %5925 = vrsqrt.f32 %v8634_v6  ;;  %v8658_v45 = vpop.eup %5919  ;;  %v3649_v5 = vmul.f32 %v8647_v1, %v3648_v37  ;;  %v3578_v7 = vmul.f32 %v8656_v14, %v8621_v29  ;;  %vm8730_vm15 = vmor %vm3653_vm13, %vm3654_vm8 }
0x1139   : > { %5927 = vrsqrt.f32 %v8644_v8  ;;  %v3628_v60 = vmul.f32 %v8658_v45, %v8625_v21  ;;  %v3639_v24 = vmul.f32 %v8649_v53, %v3638_v20  ;;  %v3660_v62 = vmul.f32 0.5, %v3659_v30 }
0x113a   : > { %v3510_v55 = vmax.f32 %v3494_v12, 0.0  ;;  %5929 = vrsqrt.f32 %v8651_v0  ;;  %v3650_v18 = vmul.f32 0.5, %v3649_v5  ;;  %v3579_v4 = vmul.f32 %v8656_v14, %v3578_v7 }
0x113b   : > { %v3629_v27 = vmul.f32 %v8658_v45, %v3628_v60  ;;  %v3640_v39 = vmul.f32 0.5, %v3639_v24  ;;  %v3661_v30 = vsub.f32 1.5, %v3660_v62  ;;  %vm3644_vm12 = vweird.f32 %v8649_v53 }
0x113c   : > { %v8663_v2 = vpop.eup %5921  ;;  %v8667_v13 = vadd.f32 1e-05, %v3510_v55  ;;  %v3651_v5 = vsub.f32 1.5, %v3650_v18  ;;  %v8705_v38 = vmul.f32 0.5, %v3579_v4  ;;  %vm3634_vm1 = vweird.f32 %v8658_v45 }
0x113d   : > { %v8669_v16 = vpop.eup %5923  ;;  %v3668_v44 = vmul.f32 %v8663_v2, %v8632_v57  ;;  %v3630_v23 = vmul.f32 0.5, %v3629_v27  ;;  %vm3674_vm5 = vweird.f32 %v8663_v2  ;;  %v3641_v24 = vsub.f32 1.5, %v3640_v39 }
0x113e   : > { %5931 = vrsqrt.f32 %v8667_v13  ;;  %v8678_v48 = vpop.eup %5925  ;;  %v3618_v56 = vmul.f32 %v8669_v16, %v8628_v40  ;;  %vm8712_vm10 = vmor %vm3673_vm7, %vm3674_vm5  ;;  %v3652_v4 = vmul.f32 %v8647_v1, %v3651_v5  ;;  %vm3683_vm0 = vweird.f32 %v8667_v13 }
0x113f   : > { %v3669_v31 = vmul.f32 %v8663_v2, %v3668_v44  ;;  %v8687_v49 = vpop.eup %5927  ;;  %v3598_v43 = vmul.f32 %v8678_v48, %v8634_v6  ;;  %v3631_v18 = vsub.f32 1.5, %v3630_v23  ;;  %v3702_v32 = vsub.f32 %v8483_v25, %v8637_v58  ;;  %vm8751_vm5 = vmor %vm3643_vm4, %vm3644_vm12 }
0x1140   : > { %v8692_v12 = vpop.eup %5929  ;;  %v3558_v44 = vmul.f32 %v8687_v49, %v8644_v8  ;;  %v3619_v20 = vmul.f32 %v8669_v16, %v3618_v56  ;;  %vm3624_vm6 = vweird.f32 %v8669_v16  ;;  %vm3633_vm7 = vweird.f32 %v8625_v21 }
0x1141   : > { %v3670_v3 = vmul.f32 0.5, %v3669_v31  ;;  %v3538_v35 = vmul.f32 %v8692_v12, %v8651_v0  ;;  %v3599_v60 = vmul.f32 %v8678_v48, %v3598_v43  ;;  %v3662_v43 = vmul.f32 %v8639_v22, %v3661_v30  ;;  %vm8765_vm8 = vmor %vm3633_vm7, %vm3634_vm1 }
0x1142   : > { %v3559_v7 = vmul.f32 %v8687_v49, %v3558_v44  ;;  %v3620_v56 = vmul.f32 0.5, %v3619_v20  ;;  %v3642_v20 = vmul.f32 %v8649_v53, %v3641_v24  ;;  %v3700_v30 = vsub.f32 %v8479_v52, %v8596_v59  ;;  %v5501_v24 = vld [vmem:[%s9750_s3 + $0x140] sm:$0xf] }
0x1143   : > { %v3671_v55 = vsub.f32 1.5, %v3670_v3  ;;  %v3600_v27 = vmul.f32 0.5, %v3599_v60  ;;  %v3666_v19 = vsel %vm8724_vm14, %v8639_v22, %v3662_v43  ;;  %v3656_v22 = vsel %vm8730_vm15, %v8647_v1, %v3652_v4  ;;  %v8822_v1 = vld [vmem:[%s6223_s9 + $0x8] sm:$0xff] }
0x1144   : > { %v5932_v37 = vpop.eup %5931  ;;  %v3699_v52 = vsub.f32 %v8477_v17, %v8586_v47  ;;  %v3716_v59 = vmul.f32 %v3700_v30, %v3666_v19  ;;  %v3646_v15 = vsel %vm8751_vm5, %v8649_v53, %v3642_v20  ;;  %v3698_v17 = vsub.f32 %v8475_v36, %v8581_v28  ;;  %10117 = vst [vmem:[#allocation12_spill] sm:$0xff] %v8822_v1 }
0x1145   : > { %v3678_v31 = vmul.f32 %v5932_v37, %v8667_v13  ;;  %v3672_v3 = vmul.f32 %v8663_v2, %v3671_v55  ;;  %vm3684_vm11 = vweird.f32 %v5932_v37  ;;  %v3601_v60 = vsub.f32 1.5, %v3600_v27 }
0x1146   : > { %vm3685_vm2 = vmor %vm3683_vm0, %vm3684_vm11  ;;  %v3539_v21 = vmul.f32 %v8692_v12, %v3538_v35  ;;  %vm3623_vm9 = vweird.f32 %v8628_v40  ;;  %v3732_v28 = vmax.f32 %v3716_v59, 0.0  ;;  %v3714_v43 = vmul.f32 %v3698_v17, %v3646_v15  ;;  %v8826_v17 = vld [vmem:[%s6223_s9 + $0x10] sm:$0xff] }
0x1147   : > { %v3679_v9 = vmul.f32 %v5932_v37, %v3678_v31  ;;  %v3676_v39 = vsel %vm8712_vm10, %v8663_v2, %v3672_v3  ;;  %v3632_v31 = vmul.f32 %v8658_v45, %v3631_v18  ;;  %v3715_v3 = vmul.f32 %v3699_v52, %v3656_v22  ;;  %vm8776_vm10 = vmor %vm3623_vm9, %vm3624_vm6  ;;  %10118 = vst [vmem:[#allocation22_spill] sm:$0xff] %v8826_v17 }
0x1148   : > { %v3717_v63 = vmul.f32 %v3701_v46, %v3676_v39  ;;  %v3581_v27 = vsub.f32 1.5, %v8705_v38  ;;  %vm3604_vm11 = vweird.f32 %v8678_v48  ;;  %v3602_v40 = vmul.f32 %v8678_v48, %v3601_v60 }
0x1149   : > { %v3680_v62 = vmul.f32 0.5, %v3679_v9  ;;  %v3621_v9 = vsub.f32 1.5, %v3620_v56  ;;  %v3560_v56 = vmul.f32 0.5, %v3559_v7  ;;  %v3636_v53 = vsel %vm8765_vm8, %v8658_v45, %v3632_v31  ;;  %v10112_v31 = vld [vmem:[#allocation16_spill] sm:$0xff] }
0x114a   : > { %v3733_v47 = vmax.f32 %v3717_v63, 0.0  ;;  %v3696_v45 = vsub.f32 %v8471_v10, %v8574_v51  ;;  %v3731_v7 = vmax.f32 %v3715_v3, 0.0  ;;  %vm3603_vm12 = vweird.f32 %v8634_v6  ;;  %v10111_v63 = vld [vmem:[#allocation24_spill] sm:$0xff]  ;;  %v5505_v3 = vld [vmem:[%s9750_s3 + $0x150] sm:$0xf] }
0x114b   : > { %v3681_v57 = vsub.f32 1.5, %v3680_v62  ;;  %v3622_v58 = vmul.f32 %v8669_v16, %v3621_v9  ;;  %v3697_v62 = vsub.f32 %v8473_v41, %v8579_v61  ;;  %v3540_v41 = vmul.f32 0.5, %v3539_v21  ;;  %vm3605_vm13 = vmor %vm3603_vm12, %vm3604_vm11  ;;  %v5658_v21 = vld [vmem:[%s9750_s3 + $0x154] sm:$0xf0] }
0x114c   : > { %v3753_v61 = vpack.c.bf16 %v3732_v28, %v3731_v7  ;;  %v3730_v38 = vmax.f32 %v3714_v43, 0.0  ;;  %v3561_v4 = vsub.f32 1.5, %v3560_v56  ;;  %vm3584_vm14 = vweird.f32 %v8656_v14  ;;  %v5656_v43 = vld [vmem:[%s9750_s3 + $0x134] sm:$0xf0]  ;;  %v5489_v7 = vld [vmem:[%s9750_s3 + $0x110] sm:$0xf] }
0x114d   : > { %v3682_v2 = vmul.f32 %v5932_v37, %v3681_v57  ;;  %v3626_v35 = vsel %vm8776_vm10, %v8669_v16, %v3622_v58  ;;  %v3713_v18 = vmul.f32 %v3697_v62, %v3636_v53  ;;  %v3606_v16 = vsel %vm3605_vm13, %v8678_v48, %v3602_v40  ;;  %v8818_v58 = vld [vmem:[%s6223_s9] sm:$0xff]  ;;  %v8844_v53 = vld [vmem:[%s6223_s9 + $0x28] sm:$0xff] }
0x114e   : > { %v3712_v55 = vmul.f32 %v3696_v45, %v3626_v35  ;;  %v3582_v39 = vmul.f32 %v8656_v14, %v3581_v27  ;;  %v3694_v10 = vsub.f32 %v8467_v11, %v8567_v34  ;;  %vm3583_vm15 = vweird.f32 %v8621_v29  ;;  %10116 = vst [vmem:[#allocation29_spill] sm:$0xff] %v8818_v58  ;;  %v5657_v62 = vld [vmem:[%s9750_s3 + $0x144] sm:$0xf0]  ;;  %v5493_v35 = vld [vmem:[%s9750_s3 + $0x120] sm:$0xf] }
0x114f   : > { %v3686_v13 = vsel %vm3685_vm2, %v5932_v37, %v3682_v2  ;;  %v3729_v51 = vmax.f32 %v3713_v18, 0.0  ;;  %vm3585_vm0 = vmor %vm3583_vm15, %vm3584_vm14  ;;  %v3541_v23 = vsub.f32 1.5, %v3540_v41  ;;  %vm3564_vm1 = vweird.f32 %v8687_v49  ;;  %10121 = vst [vmem:[#allocation18_spill] sm:$0xff] %v8844_v53  ;;  %v5655_v40 = vld [vmem:[%s9750_s3 + $0x124] sm:$0xf0] }
0x1150   : > { %v3718_v25 = vmul.f32 %v3702_v32, %v3686_v13  ;;  %v3728_v57 = vmax.f32 %v3712_v55, 0.0  ;;  %v3710_v9 = vmul.f32 %v3694_v10, %v3606_v16  ;;  %v3586_v46 = vsel %vm3585_vm0, %v8656_v14, %v3582_v39  ;;  %v10113_v13 = vld [vmem:[#allocation21_spill] sm:$0xff]  ;;  %v5654_v18 = vld [vmem:[%s9750_s3 + $0x114] sm:$0xf0]  ;;  %v5653_v55 = vld [vmem:[%s9750_s3 + $0x104] sm:$0xf0] }
0x1151   : > { %v3752_v6 = vpack.c.bf16 %v3730_v38, %v3729_v51  ;;  %v3562_v48 = vmul.f32 %v8687_v49, %v3561_v4  ;;  %v3692_v44 = vsub.f32 %v8463_v33, %v8560_v50  ;;  %v3727_v11 = vmax.f32 %v8584_v54, 0.0  ;;  %v10110_v33 = vld [vmem:[#allocation7_spill] sm:$0xff]  ;;  %v5485_v38 = vld [vmem:[%s9750_s3 + $0x100] sm:$0xf]  ;;  %v8882_v16 = vld [vmem:[%s6223_s9 + $0x38] sm:$0xff] }
0x1152   : > { %v3734_v37 = vmax.f32 %v3718_v25, 0.0  ;;  %vm3563_vm2 = vweird.f32 %v8644_v8  ;;  %v3726_v29 = vmax.f32 %v3710_v9, 0.0  ;;  %vm3544_vm5 = vweird.f32 %v8692_v12  ;;  %10123 = vst [vmem:[#allocation26_spill] sm:$0xff] %v8882_v16 }
0x1153   : > { %vm3565_vm4 = vmor %vm3563_vm2, %vm3564_vm1  ;;  %v3751_v34 = vpack.c.bf16 %v3728_v57, %v3727_v11  ;;  %v3708_v2 = vmul.f32 %v3692_v44, %v3586_v46  ;;  %v3542_v14 = vmul.f32 %v8692_v12, %v3541_v23  ;;  %v3690_v20 = vsub.f32 %v8459_v42, %v8553_v26 }
0x1154   : > { %v3754_v36 = vpack.c.bf16 %v3734_v37, %v3733_v47  ;;  %v3566_v19 = vsel %vm3565_vm4, %v8687_v49, %v3562_v48  ;;  %v3725_v50 = vmax.f32 %v10110_v33, 0.0  ;;  %vm3543_vm6 = vweird.f32 %v8651_v0  ;;  %v10114_v0 = vld [vmem:[#allocation23_spill] sm:$0xff]  ;;  %v8830_v47 = vld [vmem:[%s6223_s9 + $0x18] sm:$0xff]  ;;  %v8834_v37 = vld [vmem:[%s6223_s9 + $0x20] sm:$0xff] }
0x1155   : > { %vm3545_vm7 = vmor %vm3543_vm6, %vm3544_vm5  ;;  %v3724_v8 = vmax.f32 %v3708_v2, 0.0  ;;  %v3706_v30 = vmul.f32 %v3690_v20, %v3566_v19  ;;  %v3688_v49 = vsub.f32 %v10112_v31, %v10111_v63  ;;  %v3723_v22 = vmax.f32 %v10113_v13, 0.0  ;;  %10119 = vst [vmem:[#allocation14_spill] sm:$0xff] %v8830_v47 }
0x1156   : > { %3755 = vmatpush.bf16.msra.mxu1 %v3754_v36  ;;  %v3750_v54 = vpack.c.bf16 %v3726_v29, %v3725_v50  ;;  %v3546_v32 = vsel %vm3545_vm7, %v8692_v12, %v3542_v14  ;;  %v3721_v5 = vmax.f32 %v10114_v0, 0.0  ;;  %v10115_v12 = vld [vmem:[#allocation28_spill] sm:$0xff]  ;;  %10120 = vst [vmem:[#allocation13_spill] sm:$0xff] %v8834_v37  ;;  %v5506_v56 = vor.u32 %v5658_v21, %v5505_v3  ;;  %v5497_v36 = vld [vmem:[%s9750_s3 + $0x130] sm:$0xf] }
0x1157   : > { %v3749_v42 = vpack.c.bf16 %v3724_v8, %v3723_v22  ;;  %v3722_v26 = vmax.f32 %v3706_v30, 0.0  ;;  %v3704_v60 = vmul.f32 %v3688_v49, %v3546_v32  ;;  %v3719_v59 = vmax.f32 %v10115_v12, 0.0 }
0x1158   : > { %3875 = vmatpush.bf16.msra.mxu0 %v5506_v56  ;;  %v5502_v28 = vor.u32 %v5657_v62, %v5501_v24  ;;  %v5498_v27 = vor.u32 %v5656_v43, %v5497_v36  ;;  %v5494_v45 = vor.u32 %v5655_v40, %v5493_v35  ;;  %v5490_v41 = vor.u32 %v5654_v18, %v5489_v7 }
0x1159   : > { %v3748_v52 = vpack.c.bf16 %v3722_v26, %v3721_v5  ;;  %v3720_v25 = vmax.f32 %v3704_v60, 0.0  ;;  %v5486_v4 = vor.u32 %v5653_v55, %v5485_v38  ;;  %vm3848_vm8 = vcmask 785408  }
0x115a   : > { %3756 = vmatpush.bf16.msra.mxu1 %v3753_v61  ;;  %v8872_v61 = vld [vmem:[%s6223_s9 + $0x30] sm:$0xff] }
0x115b   : > { %v3747_v15 = vpack.c.bf16 %v3720_v25, %v3719_v59  ;;  %10122 = vst [vmem:[#allocation27_spill] sm:$0xff] %v8872_v61 }
0x115c   : > { %3876 = vmatpush.bf16.msra.mxu0 %v5502_v28 }
0x115e   : > { %3757 = vmatpush.bf16.msra.mxu1 %v3752_v6 }
0x1160   : > { %3877 = vmatpush.bf16.msra.mxu0 %v5498_v27 }
0x1162   : > { %3758 = vmatpush.bf16.msra.mxu1 %v3751_v34 }
0x1164   : > { %3878 = vmatpush.bf16.msra.mxu0 %v5494_v45 }
0x1166   : > { %3759 = vmatpush.bf16.msra.mxu1 %v3750_v54 }
0x1168   : > { %3879 = vmatpush.bf16.msra.mxu0 %v5490_v41 }
0x116a   : > { %3760 = vmatpush.bf16.msra.mxu1 %v3749_v42 }
0x116c   : > { %3880 = vmatpush.bf16.msra.mxu0 %v5486_v4 }
0x116e   : > { %3761 = vmatpush.bf16.msra.mxu1 %v3748_v52 }
0x1172   : > { %3762 = vmatpush.bf16.msra.mxu1 %v3747_v15 }
0x1175   : > { %3763 = vmatmul.bf16.vlgmr.msra.gmra.mxu1 %v8818_v58 }
0x1185   : > { %3768 = vmatmul.bf16.gmra.mxu1 %v8822_v1 }
0x1195   : > { %3773 = vmatmul.bf16.gmra.mxu1 %v8826_v17 }
0x11a5   : > { %3778 = vmatmul.bf16.gmra.mxu1 %v8830_v47 }
0x11b5   : > { %3783 = vmatmul.bf16.gmra.mxu1 %v8834_v37 }
0x11c5   : > { %3788 = vmatmul.bf16.gmra.mxu1 %v8844_v53 }
0x11d5   : > { %3793 = vmatmul.bf16.gmra.mxu1 %v8872_v61 }
0x11e5   : > { %3798 = vmatmul.bf16.gmra.mxu1 %v8882_v16 }
0x11f2   : > { %v3764_v39 = vpop.f32.mrf.mxu1 }
0x11fa   : > { %v3766_v10 = vpop.f32.mrf.mxu1 }
0x11fb   : > { %v3804_v51 = vpack.c.bf16 %v3766_v10, %v3764_v39 }
0x11fd   : > { %5507 = vmatmul.msk.bf16.vlgmr.msra.gmra.mxu0 %vm3848_vm8, %v3804_v51 }
0x1202   : > { %v3769_v6 = vpop.f32.mrf.mxu1 }
0x120a   : > { %v3771_v57 = vpop.f32.mrf.mxu1 }
0x120b   : > { %v3805_v9 = vpack.c.bf16 %v3771_v57, %v3769_v6 }
0x120d   : > { %5508 = vmatmul.msk.bf16.gmra.mxu0 %vm3848_vm8, %v3805_v9 }
0x1212   : > { %v3774_v23 = vpop.f32.mrf.mxu1 }
0x121a   : > { %v3776_v46 = vpop.f32.mrf.mxu1 }
0x121b   : > { %v3806_v48 = vpack.c.bf16 %v3776_v46, %v3774_v23 }
0x121d   : > { %5509 = vmatmul.msk.bf16.gmra.mxu0 %vm3848_vm8, %v3806_v48 }
0x1222   : > { %v3779_v44 = vpop.f32.mrf.mxu1 }
0x122a   : > { %v3781_v11 = vpop.f32.mrf.mxu1 }
0x122b   : > { %v3807_v34 = vpack.c.bf16 %v3781_v11, %v3779_v44 }
0x122d   : > { %5510 = vmatmul.msk.bf16.gmra.mxu0 %vm3848_vm8, %v3807_v34 }
0x1232   : > { %v3784_v29 = vpop.f32.mrf.mxu1 }
0x123a   : > { %v3786_v2 = vpop.f32.mrf.mxu1 }
0x123b   : > { %v3808_v19 = vpack.c.bf16 %v3786_v2, %v3784_v29 }
0x123d   : > { %5511 = vmatmul.msk.bf16.gmra.mxu0 %vm3848_vm8, %v3808_v19 }
0x1242   : > { %v3789_v14 = vpop.f32.mrf.mxu1 }
0x124a   : > { %v3791_v20 = vpop.f32.mrf.mxu1 }
0x124b   : > { %v3809_v33 = vpack.c.bf16 %v3791_v20, %v3789_v14  ;;  %v8976_v20 = vld [vmem:[%s9749_s2] sm:$0xff] }
0x124c   : > { %10125 = vst [vmem:[#allocation5_spill] sm:$0xff] %v8976_v20 }
0x124d   : > { %5512 = vmatmul.msk.bf16.gmra.mxu0 %vm3848_vm8, %v3809_v33  ;;  %v8983_v33 = vld [vmem:[%s9749_s2 + $0x8] sm:$0xff] }
0x124e   : > { %10126 = vst [vmem:[#allocation6_spill] sm:$0xff] %v8983_v33 }
0x1252   : > { %v3794_v50 = vpop.f32.mrf.mxu1 }
0x125a   : > { %v3796_v54 = vpop.f32.mrf.mxu1 }
0x125b   : > { %v3810_v8 = vpack.c.bf16 %v3796_v54, %v3794_v50  ;;  %v8990_v50 = vld [vmem:[%s9749_s2 + $0x10] sm:$0xff]  ;;  %v8997_v54 = vld [vmem:[%s9749_s2 + $0x18] sm:$0xff] }
0x125c   : > { %10127 = vst [vmem:[#allocation8_spill] sm:$0xff] %v8990_v50 }
0x125d   : > { %5513 = vmatmul.msk.bf16.gmra.mxu0 %vm3848_vm8, %v3810_v8  ;;  %10128 = vst [vmem:[#allocation10_spill] sm:$0xff] %v8997_v54  ;;  %v9004_v8 = vld [vmem:[%s9749_s2 + $0x20] sm:$0xff] }
0x125e   : > { %10129 = vst [vmem:[#allocation9_spill] sm:$0xff] %v9004_v8 }
0x1262   : > { %v3799_v30 = vpop.f32.mrf.mxu1 }
0x126a   : > { %v3801_v32 = vpop.f32.mrf.mxu1 }
0x126b   : > { %v3811_v63 = vpack.c.bf16 %v3801_v32, %v3799_v30  ;;  %v9011_v30 = vld [vmem:[%s9749_s2 + $0x28] sm:$0xff]  ;;  %v9018_v32 = vld [vmem:[%s9749_s2 + $0x30] sm:$0xff] }
0x126c   : > { %10130 = vst [vmem:[#allocation11_spill] sm:$0xff] %v9011_v30 }
0x126d   : > { %5514 = vmatmul.msk.bf16.gmra.mxu0 %vm3848_vm8, %v3811_v63  ;;  %10131 = vst [vmem:[#allocation15_spill] sm:$0xff] %v9018_v32  ;;  %v9025_v63 = vld [vmem:[%s9749_s2 + $0x38] sm:$0xff] }
0x126e   : > { %10132 = vst [vmem:[#allocation17_spill] sm:$0xff] %v9025_v63 }
0x127a   : > { %v8893_v31 = vpop.f32.mrf.mxu0 }
0x127b   : > { %v3979_v2 = vmul.f32 %v8893_v31, %v8893_v31 }
0x1282   : > { %v8895_v49 = vpop.f32.mrf.mxu0 }
0x1283   : > { %10124 = vst [vmem:[#allocation25_spill] sm:$0xff] %v8895_v49  ;;  %v3980_v34 = vmul.f32 %v8895_v49, %v8895_v49  ;;  %v3922_v19 = vpack.c.bf16 %v8895_v49, %v8893_v31 }
0x1285   : > { %v3995_v14 = vpack.c.bf16 %v3980_v34, %v3979_v2 }
0x128a   : > { %v8897_v13 = vpop.f32.mrf.mxu0 }
0x128b   : > { %v3981_v44 = vmul.f32 %v8897_v13, %v8897_v13 }
0x1292   : > { %v8899_v22 = vpop.f32.mrf.mxu0 }
0x1293   : > { %v3982_v46 = vmul.f32 %v8899_v22, %v8899_v22  ;;  %v3923_v11 = vpack.c.bf16 %v8899_v22, %v8897_v13 }
0x1295   : > { %v3996_v29 = vpack.c.bf16 %v3982_v46, %v3981_v44 }
0x129a   : > { %v8901_v42 = vpop.f32.mrf.mxu0 }
0x129b   : > { %v3983_v9 = vmul.f32 %v8901_v42, %v8901_v42 }
0x12a2   : > { %v8903_v26 = vpop.f32.mrf.mxu0 }
0x12a3   : > { %v3984_v6 = vmul.f32 %v8903_v26, %v8903_v26  ;;  %v3924_v23 = vpack.c.bf16 %v8903_v26, %v8901_v42 }
0x12a5   : > { %v3997_v48 = vpack.c.bf16 %v3984_v6, %v3983_v9 }
0x12aa   : > { %v8905_v60 = vpop.f32.mrf.mxu0 }
0x12ab   : > { %v3985_v10 = vmul.f32 %v8905_v60, %v8905_v60 }
0x12b2   : > { %v8907_v0 = vpop.f32.mrf.mxu0 }
0x12b3   : > { %v3986_v4 = vmul.f32 %v8907_v0, %v8907_v0  ;;  %v3925_v51 = vpack.c.bf16 %v8907_v0, %v8905_v60 }
0x12b5   : > { %v3998_v57 = vpack.c.bf16 %v3986_v4, %v3985_v10 }
0x12ba   : > { %v8909_v5 = vpop.f32.mrf.mxu0 }
0x12bb   : > { %v3987_v38 = vmul.f32 %v8909_v5, %v8909_v5 }
0x12c2   : > { %v8911_v52 = vpop.f32.mrf.mxu0 }
0x12c3   : > { %v3988_v18 = vmul.f32 %v8911_v52, %v8911_v52  ;;  %v3926_v55 = vpack.c.bf16 %v8911_v52, %v8909_v5 }
0x12c5   : > { %v3999_v39 = vpack.c.bf16 %v3988_v18, %v3987_v38 }
0x12ca   : > { %v8913_v25 = vpop.f32.mrf.mxu0 }
0x12cb   : > { %v3989_v45 = vmul.f32 %v8913_v25, %v8913_v25 }
0x12d2   : > { %v8915_v12 = vpop.f32.mrf.mxu0 }
0x12d3   : > { %v3990_v35 = vmul.f32 %v8915_v12, %v8915_v12  ;;  %v3927_v7 = vpack.c.bf16 %v8915_v12, %v8913_v25 }
0x12d5   : > { %v4000_v41 = vpack.c.bf16 %v3990_v35, %v3989_v45 }
0x12da   : > { %v8917_v59 = vpop.f32.mrf.mxu0 }
0x12db   : > { %v3991_v43 = vmul.f32 %v8917_v59, %v8917_v59 }
0x12e2   : > { %v8919_v15 = vpop.f32.mrf.mxu0 }
0x12e3   : > { %v3992_v36 = vmul.f32 %v8919_v15, %v8919_v15  ;;  %v3928_v27 = vpack.c.bf16 %v8919_v15, %v8917_v59 }
0x12e5   : > { %v4001_v40 = vpack.c.bf16 %v3992_v36, %v3991_v43 }
0x12ea   : > { %v8921_v3 = vpop.f32.mrf.mxu0 }
0x12eb   : > { %v3993_v56 = vmul.f32 %v8921_v3, %v8921_v3 }
0x12f2   : > { %v8923_v21 = vpop.f32.mrf.mxu0 }
0x12f3   : > { %v3929_v24 = vpack.c.bf16 %v8923_v21, %v8921_v3  ;;  %v3994_v62 = vmul.f32 %v8923_v21, %v8923_v21 }
0x12f5   : > { %3930 = vmatpush.bf16.msra.mxu2 %v3929_v24  ;;  %v4002_v28 = vpack.c.bf16 %v3994_v62, %v3993_v56 }
0x12f7   : > { %4003 = vmatpush.bf16.msra.mxu3 %v4002_v28 }
0x12f9   : > { %3931 = vmatpush.bf16.msra.mxu2 %v3928_v27 }
0x12fb   : > { %4004 = vmatpush.bf16.msra.mxu3 %v4001_v40 }
0x12fd   : > { %3932 = vmatpush.bf16.msra.mxu2 %v3927_v7 }
0x12ff   : > { %4005 = vmatpush.bf16.msra.mxu3 %v4000_v41 }
0x1301   : > { %3933 = vmatpush.bf16.msra.mxu2 %v3926_v55 }
0x1303   : > { %4006 = vmatpush.bf16.msra.mxu3 %v3999_v39 }
0x1305   : > { %3934 = vmatpush.bf16.msra.mxu2 %v3925_v51 }
0x1307   : > { %4007 = vmatpush.bf16.msra.mxu3 %v3998_v57 }
0x1309   : > { %3935 = vmatpush.bf16.msra.mxu2 %v3924_v23 }
0x130b   : > { %4008 = vmatpush.bf16.msra.mxu3 %v3997_v48 }
0x130d   : > { %3936 = vmatpush.bf16.msra.mxu2 %v3923_v11 }
0x130f   : > { %4009 = vmatpush.bf16.msra.mxu3 %v3996_v29 }
0x1311   : > { %3937 = vmatpush.bf16.msra.mxu2 %v3922_v19 }
0x1313   : > { %4010 = vmatpush.bf16.msra.mxu3 %v3995_v14 }
0x1314   : > { %3938 = vmatmul.bf16.vlgmr.msra.gmra.mxu2 %v8976_v20 }
0x1316   : > { %4011 = vmatmul.bf16.vlgmr.msra.gmra.mxu3 %v8976_v20 }
0x1324   : > { %3943 = vmatmul.bf16.gmra.mxu2 %v8983_v33 }
0x1326   : > { %4016 = vmatmul.bf16.gmra.mxu3 %v8983_v33 }
0x1334   : > { %3948 = vmatmul.bf16.gmra.mxu2 %v8990_v50 }
0x1336   : > { %4021 = vmatmul.bf16.gmra.mxu3 %v8990_v50 }
0x1344   : > { %3953 = vmatmul.bf16.gmra.mxu2 %v8997_v54 }
0x1346   : > { %4026 = vmatmul.bf16.gmra.mxu3 %v8997_v54 }
0x1354   : > { %3958 = vmatmul.bf16.gmra.mxu2 %v9004_v8 }
0x1356   : > { %4031 = vmatmul.bf16.gmra.mxu3 %v9004_v8 }
0x1364   : > { %3963 = vmatmul.bf16.gmra.mxu2 %v9011_v30 }
0x1366   : > { %4036 = vmatmul.bf16.gmra.mxu3 %v9011_v30 }
0x1374   : > { %3968 = vmatmul.bf16.gmra.mxu2 %v9018_v32 }
0x1376   : > { %4041 = vmatmul.bf16.gmra.mxu3 %v9018_v32 }
0x1384   : > { %3973 = vmatmul.bf16.gmra.mxu2 %v9025_v63 }
0x1386   : > { %4046 = vmatmul.bf16.gmra.mxu3 %v9025_v63 }
0x1397   : > { %v3939_v56 = vpop.f32.mrf.mxu2 }
0x1398   : > { %v4052_v24 = vmul.f32 %v3939_v56, %v3939_v56  ;;  %v4276_v9 = vsub.f32 %v8893_v31, %v3939_v56 }
0x1399   : > { %v4012_v62 = vpop.f32.mrf.mxu3 }
0x139a   : > { %v4068_v36 = vsub.f32 %v4012_v62, %v4052_v24 }
0x139c   : > { %v4084_v28 = vmax.f32 %v4068_v36, 0.0 }
0x139e   : > { %v4100_v43 = vadd.f32 1e-05, %v4084_v28 }
0x139f   : > { %v9029_v27 = vpop.f32.mrf.mxu2 }
0x13a0   : > { %10133 = vst [vmem:[#allocation19_spill] sm:$0xff] %v9029_v27  ;;  %5933 = vrsqrt.f32 %v4100_v43  ;;  %vm4122_vm10 = vweird.f32 %v4100_v43 }
0x13a1   : > { %v9031_v35 = vpop.f32.mrf.mxu3 }
0x13a6   : > { %v5934_v40 = vpop.eup %5933 }
0x13a7   : > { %v4117_v45 = vmul.f32 %v5934_v40, %v4100_v43  ;;  %v3944_v7 = vpop.f32.mrf.mxu2  ;;  %vm4123_vm9 = vweird.f32 %v5934_v40 }
0x13a8   : > { %v4054_v18 = vmul.f32 %v3944_v7, %v3944_v7  ;;  %vm4124_vm11 = vmor %vm4122_vm10, %vm4123_vm9  ;;  %v4278_v43 = vsub.f32 %v8897_v13, %v3944_v7 }
0x13a9   : > { %v4118_v41 = vmul.f32 %v5934_v40, %v4117_v45  ;;  %v4017_v38 = vpop.f32.mrf.mxu3 }
0x13aa   : > { %v4070_v55 = vsub.f32 %v4017_v38, %v4054_v18 }
0x13ab   : > { %v4119_v4 = vmul.f32 0.5, %v4118_v41 }
0x13ac   : > { %v4086_v39 = vmax.f32 %v4070_v55, 0.0 }
0x13ad   : > { %v4120_v10 = vsub.f32 1.5, %v4119_v4 }
0x13ae   : > { %v4102_v51 = vadd.f32 1e-05, %v4086_v39 }
0x13af   : > { %v4121_v6 = vmul.f32 %v5934_v40, %v4120_v10  ;;  %v9033_v57 = vpop.f32.mrf.mxu2 }
0x13b0   : > { %5935 = vrsqrt.f32 %v4102_v51  ;;  %vm4142_vm13 = vweird.f32 %v4102_v51 }
0x13b1   : > { %v9036_v23 = vpop.f32.mrf.mxu3  ;;  %v4125_v46 = vsel %vm4124_vm11, %v5934_v40, %v4121_v6 }
0x13b2   : > { %v9038_v48 = vmul.f32 %v4276_v9, %v4125_v46 }
0x13b4   : > { %10134 = vst [vmem:[#allocation20_spill] sm:$0xff] %v9038_v48 }
0x13b6   : > { %v5936_v44 = vpop.eup %5935 }
0x13b7   : > { %v4137_v11 = vmul.f32 %v5936_v44, %v4102_v51  ;;  %v3949_v34 = vpop.f32.mrf.mxu2  ;;  %vm4143_vm12 = vweird.f32 %v5936_v44 }
0x13b8   : > { %v4056_v29 = vmul.f32 %v3949_v34, %v3949_v34  ;;  %vm4144_vm14 = vmor %vm4142_vm13, %vm4143_vm12 }
0x13b9   : > { %v4138_v2 = vmul.f32 %v5936_v44, %v4137_v11  ;;  %v4022_v19 = vpop.f32.mrf.mxu3 }
0x13ba   : > { %v4072_v14 = vsub.f32 %v4022_v19, %v4056_v29 }
0x13bb   : > { %v4139_v24 = vmul.f32 0.5, %v4138_v2 }
0x13bc   : > { %v4088_v62 = vmax.f32 %v4072_v14, 0.0 }
0x13bd   : > { %v4140_v36 = vsub.f32 1.5, %v4139_v24 }
0x13be   : > { %v4104_v28 = vadd.f32 1e-05, %v4088_v62 }
0x13bf   : > { %v4141_v31 = vmul.f32 %v5936_v44, %v4140_v36  ;;  %v9040_v56 = vpop.f32.mrf.mxu2 }
0x13c0   : > { %5937 = vrsqrt.f32 %v4104_v28  ;;  %vm4162_vm0 = vweird.f32 %v4104_v28 }
0x13c1   : > { %v9043_v40 = vpop.f32.mrf.mxu3  ;;  %v4145_v45 = vsel %vm4144_vm14, %v5936_v44, %v4141_v31  ;;  %v4280_v44 = vsub.f32 %v8901_v42, %v3949_v34 }
0x13c2   : > { %v9045_v18 = vmul.f32 %v4278_v43, %v4145_v45 }
0x13c4   : > { %10135 = vst [vmem:[#allocation7_spill] sm:$0xff] %v9045_v18 }
0x13c6   : > { %v5938_v41 = vpop.eup %5937 }
0x13c7   : > { %v4157_v38 = vmul.f32 %v5938_v41, %v4104_v28  ;;  %v3954_v55 = vpop.f32.mrf.mxu2  ;;  %vm4163_vm15 = vweird.f32 %v5938_v41 }
0x13c8   : > { %v4058_v4 = vmul.f32 %v3954_v55, %v3954_v55  ;;  %vm4164_vm1 = vmor %vm4162_vm0, %vm4163_vm15 }
0x13c9   : > { %v4158_v39 = vmul.f32 %v5938_v41, %v4157_v38  ;;  %v4027_v10 = vpop.f32.mrf.mxu3 }
0x13ca   : > { %v4074_v6 = vsub.f32 %v4027_v10, %v4058_v4 }
0x13cb   : > { %v4159_v9 = vmul.f32 0.5, %v4158_v39 }
0x13cc   : > { %v4090_v51 = vmax.f32 %v4074_v6, 0.0 }
0x13cd   : > { %v4160_v46 = vsub.f32 1.5, %v4159_v9 }
0x13ce   : > { %v4106_v11 = vadd.f32 1e-05, %v4090_v51 }
0x13cf   : > { %v4161_v13 = vmul.f32 %v5938_v41, %v4160_v46  ;;  %v9047_v7 = vpop.f32.mrf.mxu2 }
0x13d0   : > { %5939 = vrsqrt.f32 %v4106_v11  ;;  %vm4182_vm4 = vweird.f32 %v4106_v11 }
0x13d1   : > { %v9050_v29 = vpop.f32.mrf.mxu3  ;;  %v4165_v2 = vsel %vm4164_vm1, %v5938_v41, %v4161_v13  ;;  %v4282_v41 = vsub.f32 %v8905_v60, %v3954_v55 }
0x13d2   : > { %v9052_v19 = vmul.f32 %v4280_v44, %v4165_v2 }
0x13d4   : > { %10136 = vst [vmem:[#allocation24_spill] sm:$0xff] %v9052_v19 }
0x13d6   : > { %v5940_v14 = vpop.eup %5939 }
0x13d7   : > { %v4177_v24 = vmul.f32 %v5940_v14, %v4106_v11  ;;  %v3959_v62 = vpop.f32.mrf.mxu2  ;;  %vm4183_vm2 = vweird.f32 %v5940_v14 }
0x13d8   : > { %v4060_v36 = vmul.f32 %v3959_v62, %v3959_v62  ;;  %vm4184_vm5 = vmor %vm4182_vm4, %vm4183_vm2  ;;  %v4284_v60 = vsub.f32 %v8909_v5, %v3959_v62 }
0x13d9   : > { %v4178_v31 = vmul.f32 %v5940_v14, %v4177_v24  ;;  %v4032_v43 = vpop.f32.mrf.mxu3 }
0x13da   : > { %v4076_v45 = vsub.f32 %v4032_v43, %v4060_v36 }
0x13db   : > { %v4179_v38 = vmul.f32 0.5, %v4178_v31 }
0x13dc   : > { %v4092_v28 = vmax.f32 %v4076_v45, 0.0 }
0x13dd   : > { %v4180_v4 = vsub.f32 1.5, %v4179_v38 }
0x13de   : > { %v4108_v39 = vadd.f32 1e-05, %v4092_v28 }
0x13df   : > { %v4181_v42 = vmul.f32 %v5940_v14, %v4180_v4  ;;  %v9054_v34 = vpop.f32.mrf.mxu2 }
0x13e0   : > { %5941 = vrsqrt.f32 %v4108_v39  ;;  %vm4202_vm7 = vweird.f32 %v4108_v39 }
0x13e1   : > { %v4034_v10 = vpop.f32.mrf.mxu3  ;;  %v4185_v6 = vsel %vm4184_vm5, %v5940_v14, %v4181_v42 }
0x13e2   : > { %v9057_v9 = vmul.f32 %v4282_v41, %v4185_v6  ;;  %v4061_v6 = vmul.f32 %v9054_v34, %v9054_v34 }
0x13e4   : > { %10137 = vst [vmem:[#allocation16_spill] sm:$0xff] %v9057_v9 }
0x13e6   : > { %v5942_v51 = vpop.eup %5941 }
0x13e7   : > { %v4197_v46 = vmul.f32 %v5942_v51, %v4108_v39  ;;  %v9059_v13 = vpop.f32.mrf.mxu2  ;;  %vm4203_vm6 = vweird.f32 %v5942_v51  ;;  %v4057_v39 = vmul.f32 %v9040_v56, %v9040_v56 }
0x13e8   : > { %vm4204_vm8 = vmor %vm4202_vm7, %vm4203_vm6  ;;  %v4062_v5 = vmul.f32 %v9059_v13, %v9059_v13 }
0x13e9   : > { %v4198_v44 = vmul.f32 %v5942_v51, %v4197_v46  ;;  %v4037_v2 = vpop.f32.mrf.mxu3 }
0x13eb   : > { %v4199_v24 = vmul.f32 0.5, %v4198_v44  ;;  %v4073_v44 = vsub.f32 %v9043_v40, %v4057_v39 }
0x13ed   : > { %v4200_v36 = vsub.f32 1.5, %v4199_v24  ;;  %v4089_v32 = vmax.f32 %v4073_v44, 0.0 }
0x13ef   : > { %v4201_v11 = vmul.f32 %v5942_v51, %v4200_v36  ;;  %v9061_v31 = vpop.f32.mrf.mxu2  ;;  %v4059_v36 = vmul.f32 %v9047_v7, %v9047_v7 }
0x13f0   : > { %v4063_v4 = vmul.f32 %v9061_v31, %v9061_v31 }
0x13f1   : > { %v4039_v55 = vpop.f32.mrf.mxu3  ;;  %v4205_v14 = vsel %vm4204_vm8, %v5942_v51, %v4201_v11  ;;  %v4078_v11 = vsub.f32 %v4037_v2, %v4062_v5  ;;  %v4075_v40 = vsub.f32 %v9050_v29, %v4059_v36 }
0x13f2   : > { %v9064_v43 = vmul.f32 %v4284_v60, %v4205_v14  ;;  %v4079_v51 = vsub.f32 %v4039_v55, %v4063_v4  ;;  %v4053_v55 = vmul.f32 %v9029_v27, %v9029_v27 }
0x13f3   : > { %v4094_v4 = vmax.f32 %v4078_v11, 0.0  ;;  %v4091_v44 = vmax.f32 %v4075_v40, 0.0 }
0x13f4   : > { %v4095_v63 = vmax.f32 %v4079_v51, 0.0  ;;  %v9101_v51 = vadd.f32 1e-05, %v4089_v32  ;;  %v4069_v29 = vsub.f32 %v9031_v35, %v4053_v55 }
0x13f7   : > { %v9066_v45 = vpop.f32.mrf.mxu2 }
0x13f8   : > { %v4064_v28 = vmul.f32 %v9066_v45, %v9066_v45 }
0x13f9   : > { %v4042_v38 = vpop.f32.mrf.mxu3 }
0x13fa   : > { %v4080_v42 = vsub.f32 %v4042_v38, %v4064_v28  ;;  %v4055_v38 = vmul.f32 %v9033_v57, %v9033_v57  ;;  %v4077_v28 = vsub.f32 %v4034_v10, %v4061_v6 }
0x13fc   : > { %v4096_v60 = vmax.f32 %v4080_v42, 0.0  ;;  %v4071_v5 = vsub.f32 %v9036_v23, %v4055_v38  ;;  %v4093_v10 = vmax.f32 %v4077_v28, 0.0  ;;  %v9099_v42 = vadd.f32 1e-05, %v4095_v63 }
0x13fd   : > { %v4085_v63 = vmax.f32 %v4069_v29, 0.0  ;;  %v9114_v23 = vadd.f32 1e-05, %v4091_v44 }
0x13fe   : > { %v4087_v11 = vmax.f32 %v4071_v5, 0.0  ;;  %vm4232_vm8 = vweird.f32 %v9099_v42 }
0x13ff   : > { %v9076_v62 = vpop.f32.mrf.mxu2  ;;  %v9131_v5 = vadd.f32 1e-05, %v4085_v63 }
0x1400   : > { %v4065_v41 = vmul.f32 %v9076_v62, %v9076_v62  ;;  %v9124_v28 = vadd.f32 1e-05, %v4087_v11 }
0x1401   : > { %v4044_v46 = vpop.f32.mrf.mxu3 }
0x1402   : > { %v4081_v24 = vsub.f32 %v4044_v46, %v4065_v41  ;;  %v9094_v41 = vadd.f32 1e-05, %v4096_v60  ;;  %v9108_v60 = vadd.f32 1e-05, %v4093_v10 }
0x1404   : > { %v4097_v14 = vmax.f32 %v4081_v24, 0.0  ;;  %v9105_v24 = vadd.f32 1e-05, %v4094_v4  ;;  %vm4242_vm1 = vweird.f32 %v9094_v41 }
0x1406   : > { %v9087_v30 = vadd.f32 1e-05, %v4097_v14 }
0x1407   : > { %v9092_v39 = vpop.f32.mrf.mxu2 }
0x1408   : > { %v4066_v2 = vmul.f32 %v9092_v39, %v9092_v39  ;;  %5943 = vrsqrt.f32 %v9087_v30  ;;  %vm4252_vm13 = vweird.f32 %v9087_v30 }
0x1409   : > { %v4047_v6 = vpop.f32.mrf.mxu3  ;;  %5945 = vrsqrt.f32 %v9094_v41 }
0x140a   : > { %v4082_v46 = vsub.f32 %v4047_v6, %v4066_v2  ;;  %5947 = vrsqrt.f32 %v9099_v42 }
0x140b   : > { %5949 = vrsqrt.f32 %v9101_v51 }
0x140c   : > { %v4098_v36 = vmax.f32 %v4082_v46, 0.0  ;;  %5951 = vrsqrt.f32 %v9105_v24 }
0x140e   : > { %v9112_v32 = vadd.f32 1e-05, %v4098_v36  ;;  %v9119_v14 = vpop.eup %5943 }
0x140f   : > { %v9117_v35 = vpop.f32.mrf.mxu2  ;;  %v9127_v40 = vpop.eup %5945  ;;  %v4247_v10 = vmul.f32 %v9119_v14, %v9087_v30  ;;  %vm4253_vm10 = vweird.f32 %v9119_v14  ;;  %v4290_v30 = vsub.f32 %v8921_v3, %v9092_v39 }
0x1410   : > { %5953 = vrsqrt.f32 %v9112_v32  ;;  %v4067_v38 = vmul.f32 %v9117_v35, %v9117_v35  ;;  %v9129_v2 = vpop.eup %5947  ;;  %v4237_v44 = vmul.f32 %v9127_v40, %v9094_v41  ;;  %vm4262_vm11 = vweird.f32 %v9112_v32  ;;  %vm9204_vm2 = vmor %vm4252_vm13, %vm4253_vm10 }
0x1411   : > { %5955 = vrsqrt.f32 %v9108_v60  ;;  %v4049_v55 = vpop.f32.mrf.mxu3  ;;  %v9136_v6 = vpop.eup %5949  ;;  %v4227_v11 = vmul.f32 %v9129_v2, %v9099_v42  ;;  %vm4243_vm12 = vweird.f32 %v9127_v40  ;;  %vm4233_vm0 = vweird.f32 %v9129_v2  ;;  %v10157_v42 = vld [vmem:[#allocation12_spill] sm:$0xff] }
0x1412   : > { %v4083_v4 = vsub.f32 %v4049_v55, %v4067_v38  ;;  %5957 = vrsqrt.f32 %v9114_v23  ;;  %v9138_v29 = vpop.eup %5951  ;;  %v4248_v55 = vmul.f32 %v9119_v14, %v4247_v10  ;;  %v4238_v50 = vmul.f32 %v9127_v40, %v4237_v44  ;;  %vm9211_vm4 = vmor %vm4242_vm1, %vm4243_vm12 }
0x1413   : > { %5959 = vrsqrt.f32 %v9124_v28  ;;  %v4217_v8 = vmul.f32 %v9138_v29, %v9105_v24  ;;  %v4167_v33 = vmul.f32 %v9136_v6, %v9101_v51  ;;  %v4228_v20 = vmul.f32 %v9129_v2, %v4227_v11 }
0x1414   : > { %v4099_v46 = vmax.f32 %v4083_v4, 0.0  ;;  %5961 = vrsqrt.f32 %v9131_v5  ;;  %v4249_v61 = vmul.f32 0.5, %v4248_v55  ;;  %vm4223_vm6 = vweird.f32 %v9138_v29 }
0x1415   : > { %v4218_v47 = vmul.f32 %v9138_v29, %v4217_v8  ;;  %v4168_v48 = vmul.f32 %v9136_v6, %v4167_v33  ;;  %v4229_v18 = vmul.f32 0.5, %v4228_v20  ;;  %v4291_v3 = vsub.f32 %v8923_v21, %v9117_v35 }
0x1416   : > { %v9143_v36 = vpop.eup %5953  ;;  %v9147_v63 = vadd.f32 1e-05, %v4099_v46  ;;  %v4250_v55 = vsub.f32 1.5, %v4249_v61  ;;  %vm4212_vm13 = vweird.f32 %v9108_v60 }
0x1417   : > { %v9149_v38 = vpop.eup %5955  ;;  %v4257_v4 = vmul.f32 %v9143_v36, %v9112_v32  ;;  %v4219_v49 = vmul.f32 0.5, %v4218_v47  ;;  %vm4263_vm9 = vweird.f32 %v9143_v36  ;;  %v9185_v9 = vmul.f32 0.5, %v4168_v48 }
0x1418   : > { %5963 = vrsqrt.f32 %v9147_v63  ;;  %v9158_v54 = vpop.eup %5957  ;;  %v4207_v10 = vmul.f32 %v9149_v38, %v9108_v60  ;;  %v4230_v61 = vsub.f32 1.5, %v4229_v18  ;;  %vm9192_vm14 = vmor %vm4262_vm11, %vm4263_vm9  ;;  %vm4272_vm5 = vweird.f32 %v9147_v63 }
0x1419   : > { %v4258_v46 = vmul.f32 %v9143_v36, %v4257_v4  ;;  %v9167_v16 = vpop.eup %5959  ;;  %v4187_v37 = vmul.f32 %v9158_v54, %v9114_v23  ;;  %v4239_v4 = vmul.f32 0.5, %v4238_v50  ;;  %vm9231_vm9 = vmor %vm4232_vm8, %vm4233_vm0  ;;  %vm4213_vm10 = vweird.f32 %v9149_v38 }
0x141a   : > { %v9172_v44 = vpop.eup %5961  ;;  %v4147_v58 = vmul.f32 %v9167_v16, %v9124_v28  ;;  %v4208_v11 = vmul.f32 %v9149_v38, %v4207_v10  ;;  %v4251_v10 = vmul.f32 %v9119_v14, %v4250_v55  ;;  %v4289_v55 = vsub.f32 %v8919_v15, %v9076_v62 }
0x141b   : > { %v4259_v53 = vmul.f32 0.5, %v4258_v46  ;;  %v4127_v19 = vmul.f32 %v9172_v44, %v9131_v5  ;;  %v4188_v8 = vmul.f32 %v9158_v54, %v4187_v37  ;;  %v4240_v50 = vsub.f32 1.5, %v4239_v4 }
0x141c   : > { %v4148_v33 = vmul.f32 %v9167_v16, %v4147_v58  ;;  %v4209_v20 = vmul.f32 0.5, %v4208_v11  ;;  %v4220_v4 = vsub.f32 1.5, %v4219_v49  ;;  %v4255_v41 = vsel %vm9204_vm2, %v9119_v14, %v4251_v10 }
0x141d   : > { %v4260_v17 = vsub.f32 1.5, %v4259_v53  ;;  %v4189_v47 = vmul.f32 0.5, %v4188_v8  ;;  %v4241_v58 = vmul.f32 %v9127_v40, %v4240_v50  ;;  %v4288_v15 = vsub.f32 %v8917_v59, %v9066_v45 }
0x141e   : > { %v5964_v1 = vpop.eup %5963  ;;  %v4210_v32 = vsub.f32 1.5, %v4209_v20  ;;  %v4305_v62 = vmul.f32 %v4289_v55, %v4255_v41  ;;  %vm4222_vm11 = vweird.f32 %v9105_v24  ;;  %v4287_v59 = vsub.f32 %v8915_v12, %v9061_v31 }
0x141f   : > { %v4267_v46 = vmul.f32 %v5964_v1, %v9147_v63  ;;  %v4261_v53 = vmul.f32 %v9143_v36, %v4260_v17  ;;  %vm4273_vm15 = vweird.f32 %v5964_v1  ;;  %v4245_v63 = vsel %vm9211_vm4, %v9127_v40, %v4241_v58  ;;  %vm9245_vm12 = vmor %vm4222_vm11, %vm4223_vm6 }
0x1420   : > { %vm4274_vm7 = vmor %vm4272_vm5, %vm4273_vm15  ;;  %v4190_v14 = vsub.f32 1.5, %v4189_v47  ;;  %v4211_v35 = vmul.f32 %v9149_v38, %v4210_v32  ;;  %v4128_v20 = vmul.f32 %v9172_v44, %v4127_v19  ;;  %v4286_v10 = vsub.f32 %v8913_v25, %v9059_v13 }
0x1421   : > { %v4268_v27 = vmul.f32 %v5964_v1, %v4267_v46  ;;  %v4265_v48 = vsel %vm9192_vm14, %v9143_v36, %v4261_v53  ;;  %v4221_v46 = vmul.f32 %v9138_v29, %v4220_v4  ;;  %v4304_v53 = vmul.f32 %v4288_v15, %v4245_v63  ;;  %vm9256_vm14 = vmor %vm4212_vm13, %vm4213_vm10 }
0x1422   : > { %v4306_v39 = vmul.f32 %v4290_v30, %v4265_v48  ;;  %v4321_v31 = vmax.f32 %v4305_v62, 0.0  ;;  %v4170_v47 = vsub.f32 1.5, %v9185_v9  ;;  %vm4193_vm15 = vweird.f32 %v9158_v54  ;;  %v10155_v62 = vld [vmem:[#allocation20_spill] sm:$0xff] }
0x1423   : > { %v4269_v37 = vmul.f32 0.5, %v4268_v27  ;;  %v4231_v27 = vmul.f32 %v9129_v2, %v4230_v61  ;;  %v4149_v61 = vmul.f32 0.5, %v4148_v33  ;;  %v4225_v24 = vsel %vm9245_vm12, %v9138_v29, %v4221_v46  ;;  %v10152_v46 = vld [vmem:[#allocation25_spill] sm:$0xff] }
0x1424   : > { %v4322_v45 = vmax.f32 %v4306_v39, 0.0  ;;  %v4215_v19 = vsel %vm9256_vm14, %v9149_v38, %v4211_v35  ;;  %v4191_v60 = vmul.f32 %v9158_v54, %v4190_v14  ;;  %v4285_v29 = vsub.f32 %v8911_v52, %v9054_v34  ;;  %v10151_v39 = vld [vmem:[#allocation19_spill] sm:$0xff] }
0x1425   : > { %v4270_v18 = vsub.f32 1.5, %v4269_v37  ;;  %v4320_v33 = vmax.f32 %v4304_v53, 0.0  ;;  %v4302_v4 = vmul.f32 %v4286_v10, %v4225_v24  ;;  %vm4192_vm0 = vweird.f32 %v9114_v23  ;;  %v5541_v53 = vld [vmem:[%s9750_s3 + $0x1c0] sm:$0xf]  ;;  %v5537_v24 = vld [vmem:[%s9750_s3 + $0x1b0] sm:$0xf] }
0x1426   : > { %v4129_v25 = vmul.f32 0.5, %v4128_v20  ;;  %vm4194_vm1 = vmor %vm4192_vm0, %vm4193_vm15  ;;  %v4301_v17 = vmul.f32 %v4285_v29, %v4215_v19  ;;  %v4150_v58 = vsub.f32 1.5, %v4149_v61  ;;  %vm4173_vm2 = vweird.f32 %v9136_v6  ;;  %v5665_v20 = vld [vmem:[%s9750_s3 + $0x1c4] sm:$0xf0]  ;;  %v5529_v19 = vld [vmem:[%s9750_s3 + $0x190] sm:$0xf] }
0x1427   : > { %v4271_v11 = vmul.f32 %v5964_v1, %v4270_v18  ;;  %v4344_v13 = vpack.c.bf16 %v4321_v31, %v4320_v33  ;;  %v4195_v38 = vsel %vm4194_vm1, %v9158_v54, %v4191_v60  ;;  %v4171_v48 = vmul.f32 %v9136_v6, %v4170_v47  ;;  %v5533_v31 = vld [vmem:[%s9750_s3 + $0x1a0] sm:$0xf]  ;;  %v5662_v60 = vld [vmem:[%s9750_s3 + $0x194] sm:$0xf0] }
0x1428   : > { %v4283_v52 = vsub.f32 %v8907_v0, %v9047_v7  ;;  %v4318_v34 = vmax.f32 %v4302_v4, 0.0  ;;  %vm4172_vm4 = vweird.f32 %v9101_v51  ;;  %v4317_v18 = vmax.f32 %v4301_v17, 0.0  ;;  %v5525_v33 = vld [vmem:[%s9750_s3 + $0x180] sm:$0xf]  ;;  %v5661_v4 = vld [vmem:[%s9750_s3 + $0x184] sm:$0xf0] }
0x1429   : > { %v4275_v8 = vsel %vm4274_vm7, %v5964_v1, %v4271_v11  ;;  %v4235_v1 = vsel %vm9231_vm9, %v9129_v2, %v4231_v27  ;;  %vm4174_vm5 = vmor %vm4172_vm4, %vm4173_vm2  ;;  %v4130_v49 = vsub.f32 1.5, %v4129_v25  ;;  %vm4153_vm6 = vweird.f32 %v9167_v16  ;;  %v5664_v2 = vld [vmem:[%s9750_s3 + $0x1b4] sm:$0xf0] }
0x142a   : > { %v4307_v21 = vmul.f32 %v4291_v3, %v4275_v8  ;;  %v4303_v37 = vmul.f32 %v4287_v59, %v4235_v1  ;;  %v4299_v32 = vmul.f32 %v4283_v52, %v4195_v38  ;;  %v4175_v30 = vsel %vm4174_vm5, %v9136_v6, %v4171_v48  ;;  %v10158_v59 = vld [vmem:[#allocation22_spill] sm:$0xff]  ;;  %v5517_v38 = vld [vmem:[%s9750_s3 + $0x160] sm:$0xf] }
0x142b   : > { %v4151_v54 = vmul.f32 %v9167_v16, %v4150_v58  ;;  %v4281_v27 = vsub.f32 %v8903_v26, %v9040_v56  ;;  %v4316_v0 = vmax.f32 %v9064_v43, 0.0  ;;  %vm4152_vm7 = vweird.f32 %v9124_v28  ;;  %v10150_v26 = vld [vmem:[#allocation16_spill] sm:$0xff]  ;;  %v10162_v58 = vld [vmem:[#allocation27_spill] sm:$0xff]  ;;  %v5659_v48 = vld [vmem:[%s9750_s3 + $0x164] sm:$0xf0] }
0x142c   : > { %v4323_v40 = vmax.f32 %v4307_v21, 0.0  ;;  %v4319_v9 = vmax.f32 %v4303_v37, 0.0  ;;  %vm4154_vm8 = vmor %vm4152_vm7, %vm4153_vm6  ;;  %v4315_v51 = vmax.f32 %v4299_v32, 0.0  ;;  %vm4133_vm9 = vweird.f32 %v9172_v44  ;;  %v5663_v37 = vld [vmem:[%s9750_s3 + $0x1a4] sm:$0xf0] }
0x142d   : > { %v4342_v7 = vpack.c.bf16 %v4317_v18, %v4316_v0  ;;  %v4297_v36 = vmul.f32 %v4281_v27, %v4175_v30  ;;  %v4155_v11 = vsel %vm4154_vm8, %v9167_v16, %v4151_v54  ;;  %v4131_v6 = vmul.f32 %v9172_v44, %v4130_v49  ;;  %v10153_v16 = vld [vmem:[#allocation24_spill] sm:$0xff] }
0x142e   : > { %v4345_v12 = vpack.c.bf16 %v4323_v40, %v4322_v45  ;;  %v4343_v23 = vpack.c.bf16 %v4319_v9, %v4318_v34  ;;  %v4279_v41 = vsub.f32 %v8899_v22, %v9033_v57  ;;  %v4314_v56 = vmax.f32 %v10150_v26, 0.0  ;;  %v10154_v57 = vld [vmem:[#allocation7_spill] sm:$0xff]  ;;  %v10159_v45 = vld [vmem:[#allocation14_spill] sm:$0xff]  ;;  %v10160_v40 = vld [vmem:[#allocation13_spill] sm:$0xff] }
0x142f   : > { %vm4132_vm10 = vweird.f32 %v9131_v5  ;;  %v4313_v28 = vmax.f32 %v4297_v36, 0.0  ;;  %v4277_v8 = vsub.f32 %v10152_v46, %v10151_v39  ;;  %v4312_v63 = vmax.f32 %v10153_v16, 0.0  ;;  %v5660_v9 = vld [vmem:[%s9750_s3 + $0x174] sm:$0xf0]  ;;  %v10163_v34 = vld [vmem:[#allocation26_spill] sm:$0xff] }
0x1430   : > { %4346 = vmatpush.bf16.msrb.mxu1 %v4345_v12  ;;  %vm4134_vm11 = vmor %vm4132_vm10, %vm4133_vm9  ;;  %v4341_v43 = vpack.c.bf16 %v4315_v51, %v4314_v56  ;;  %v4295_v55 = vmul.f32 %v4279_v41, %v4155_v11  ;;  %v4310_v15 = vmax.f32 %v10154_v57, 0.0  ;;  %v4308_v35 = vmax.f32 %v10155_v62, 0.0  ;;  %v10161_v12 = vld [vmem:[#allocation18_spill] sm:$0xff] }
0x1431   : > { %v4135_v3 = vsel %vm4134_vm11, %v9172_v44, %v4131_v6  ;;  %v4340_v14 = vpack.c.bf16 %v4313_v28, %v4312_v63  ;;  %v10156_v44 = vld [vmem:[#allocation29_spill] sm:$0xff]  ;;  %v5542_v61 = vor.u32 %v5665_v20, %v5541_v53  ;;  %v5538_v10 = vor.u32 %v5664_v2, %v5537_v24 }
0x1432   : > { %v4311_v50 = vmax.f32 %v4295_v55, 0.0  ;;  %v4293_v22 = vmul.f32 %v4277_v8, %v4135_v3  ;;  %v5534_v47 = vor.u32 %v5663_v37, %v5533_v31  ;;  %v5530_v29 = vor.u32 %v5662_v60, %v5529_v19 }
0x1433   : > { %4471 = vmatpush.bf16.msrb.mxu0 %v5542_v61  ;;  %v5526_v25 = vor.u32 %v5661_v4, %v5525_v33  ;;  %v5518_v52 = vor.u32 %v5659_v48, %v5517_v38  ;;  %vm4445_vm12 = vcmask 916480  }
0x1434   : > { %4347 = vmatpush.bf16.msrb.mxu1 %v4344_v13  ;;  %v4339_v21 = vpack.c.bf16 %v4311_v50, %v4310_v15  ;;  %v4309_v5 = vmax.f32 %v4293_v22, 0.0  ;;  %v5521_v13 = vld [vmem:[%s9750_s3 + $0x170] sm:$0xf] }
0x1435   : > { %v5522_v17 = vor.u32 %v5660_v9, %v5521_v13 }
0x1436   : > { %v4338_v1 = vpack.c.bf16 %v4309_v5, %v4308_v35 }
0x1437   : > { %4472 = vmatpush.bf16.msrb.mxu0 %v5538_v10 }
0x1438   : > { %4348 = vmatpush.bf16.msrb.mxu1 %v4343_v23 }
0x143b   : > { %4473 = vmatpush.bf16.msrb.mxu0 %v5534_v47 }
0x143c   : > { %4349 = vmatpush.bf16.msrb.mxu1 %v4342_v7 }
0x143f   : > { %4474 = vmatpush.bf16.msrb.mxu0 %v5530_v29 }
0x1440   : > { %4350 = vmatpush.bf16.msrb.mxu1 %v4341_v43 }
0x1443   : > { %4475 = vmatpush.bf16.msrb.mxu0 %v5526_v25 }
0x1444   : > { %4351 = vmatpush.bf16.msrb.mxu1 %v4340_v14 }
0x1447   : > { %4476 = vmatpush.bf16.msrb.mxu0 %v5522_v17 }
0x1448   : > { %4352 = vmatpush.bf16.msrb.mxu1 %v4339_v21 }
0x144b   : > { %4477 = vmatpush.bf16.msrb.mxu0 %v5518_v52 }
0x144c   : > { %4353 = vmatpush.bf16.msrb.mxu1 %v4338_v1 }
0x144f   : > { %4354 = vmatmul.bf16.vlgmr.msrb.gmra.mxu1 %v10156_v44 }
0x145f   : > { %4359 = vmatmul.bf16.gmra.mxu1 %v10157_v42 }
0x146f   : > { %4364 = vmatmul.bf16.gmra.mxu1 %v10158_v59 }
0x147f   : > { %4369 = vmatmul.bf16.gmra.mxu1 %v10159_v45 }
0x148f   : > { %4374 = vmatmul.bf16.gmra.mxu1 %v10160_v40 }
0x149f   : > { %4379 = vmatmul.bf16.gmra.mxu1 %v10161_v12 }
0x14af   : > { %4384 = vmatmul.bf16.gmra.mxu1 %v10162_v58 }
0x14bf   : > { %4389 = vmatmul.bf16.gmra.mxu1 %v10163_v34 }
0x14cc   : > { %v4355_v23 = vpop.f32.mrf.mxu1 }
0x14d4   : > { %v4357_v18 = vpop.f32.mrf.mxu1 }
0x14d5   : > { %v4395_v32 = vpack.c.bf16 %v4357_v18, %v4355_v23 }
0x14d7   : > { %5543 = vmatmul.msk.bf16.vlgmr.msrb.gmra.mxu0 %vm4445_vm12, %v4395_v32 }
0x14dc   : > { %v4360_v49 = vpop.f32.mrf.mxu1 }
0x14e4   : > { %v4362_v30 = vpop.f32.mrf.mxu1 }
0x14e5   : > { %v4396_v54 = vpack.c.bf16 %v4362_v30, %v4360_v49 }
0x14e7   : > { %5544 = vmatmul.msk.bf16.gmra.mxu0 %vm4445_vm12, %v4396_v54 }
0x14ec   : > { %v4365_v27 = vpop.f32.mrf.mxu1 }
0x14f4   : > { %v4367_v0 = vpop.f32.mrf.mxu1 }
0x14f5   : > { %v4397_v7 = vpack.c.bf16 %v4367_v0, %v4365_v27 }
0x14f7   : > { %5545 = vmatmul.msk.bf16.gmra.mxu0 %vm4445_vm12, %v4397_v7  ;;  %v10164_v7 = vld [vmem:[#allocation5_spill] sm:$0xff] }
0x14fc   : > { %v4370_v51 = vpop.f32.mrf.mxu1 }
0x1504   : > { %v4372_v36 = vpop.f32.mrf.mxu1 }
0x1505   : > { %v4398_v11 = vpack.c.bf16 %v4372_v36, %v4370_v51  ;;  %v10165_v51 = vld [vmem:[#allocation6_spill] sm:$0xff]  ;;  %v10166_v36 = vld [vmem:[#allocation8_spill] sm:$0xff] }
0x1507   : > { %5546 = vmatmul.msk.bf16.gmra.mxu0 %vm4445_vm12, %v4398_v11  ;;  %v10167_v11 = vld [vmem:[#allocation10_spill] sm:$0xff] }
0x150c   : > { %v4375_v6 = vpop.f32.mrf.mxu1 }
0x1514   : > { %v4377_v41 = vpop.f32.mrf.mxu1 }
0x1515   : > { %v4399_v26 = vpack.c.bf16 %v4377_v41, %v4375_v6  ;;  %v10168_v6 = vld [vmem:[#allocation9_spill] sm:$0xff]  ;;  %v10169_v41 = vld [vmem:[#allocation11_spill] sm:$0xff] }
0x1517   : > { %5547 = vmatmul.msk.bf16.gmra.mxu0 %vm4445_vm12, %v4399_v26  ;;  %v10170_v26 = vld [vmem:[#allocation15_spill] sm:$0xff] }
0x151c   : > { %v4380_v56 = vpop.f32.mrf.mxu1 }
0x1524   : > { %v4382_v43 = vpop.f32.mrf.mxu1 }
0x1525   : > { %v4400_v28 = vpack.c.bf16 %v4382_v43, %v4380_v56  ;;  %v10171_v56 = vld [vmem:[#allocation17_spill] sm:$0xff] }
0x1527   : > { %5548 = vmatmul.msk.bf16.gmra.mxu0 %vm4445_vm12, %v4400_v28 }
0x152c   : > { %v4385_v55 = vpop.f32.mrf.mxu1 }
0x1534   : > { %v4387_v3 = vpop.f32.mrf.mxu1 }
0x1535   : > { %v4401_v39 = vpack.c.bf16 %v4387_v3, %v4385_v55 }
0x1537   : > { %5549 = vmatmul.msk.bf16.gmra.mxu0 %vm4445_vm12, %v4401_v39 }
0x153c   : > { %v4390_v46 = vpop.f32.mrf.mxu1 }
0x1544   : > { %v4392_v8 = vpop.f32.mrf.mxu1 }
0x1545   : > { %v4402_v16 = vpack.c.bf16 %v4392_v8, %v4390_v46 }
0x1547   : > { %5550 = vmatmul.msk.bf16.gmra.mxu0 %vm4445_vm12, %v4402_v16 }
0x1554   : > { %v9355_v63 = vpop.f32.mrf.mxu0 }
0x1555   : > { %v4576_v54 = vmul.f32 %v9355_v63, %v9355_v63 }
0x155c   : > { %v9357_v14 = vpop.f32.mrf.mxu0 }
0x155d   : > { %v4577_v49 = vmul.f32 %v9357_v14, %v9357_v14  ;;  %v4519_v27 = vpack.c.bf16 %v9357_v14, %v9355_v63 }
0x155f   : > { %v4592_v0 = vpack.c.bf16 %v4577_v49, %v4576_v54 }
0x1564   : > { %v9359_v50 = vpop.f32.mrf.mxu0 }
0x1565   : > { %v4578_v18 = vmul.f32 %v9359_v50, %v9359_v50 }
0x156c   : > { %v9361_v22 = vpop.f32.mrf.mxu0 }
0x156d   : > { %v4579_v34 = vmul.f32 %v9361_v22, %v9361_v22  ;;  %v4520_v32 = vpack.c.bf16 %v9361_v22, %v9359_v50 }
0x156f   : > { %v4593_v30 = vpack.c.bf16 %v4579_v34, %v4578_v18 }
0x1574   : > { %v9363_v57 = vpop.f32.mrf.mxu0 }
0x1575   : > { %v4580_v48 = vmul.f32 %v9363_v57, %v9363_v57 }
0x157c   : > { %v9365_v15 = vpop.f32.mrf.mxu0 }
0x157d   : > { %v4581_v58 = vmul.f32 %v9365_v15, %v9365_v15  ;;  %v4521_v52 = vpack.c.bf16 %v9365_v15, %v9363_v57 }
0x157f   : > { %v4594_v23 = vpack.c.bf16 %v4581_v58, %v4580_v48 }
0x1584   : > { %v9367_v21 = vpop.f32.mrf.mxu0 }
0x1585   : > { %v4582_v9 = vmul.f32 %v9367_v21, %v9367_v21 }
0x158c   : > { %v9369_v5 = vpop.f32.mrf.mxu0 }
0x158d   : > { %v4583_v25 = vmul.f32 %v9369_v5, %v9369_v5  ;;  %v4522_v17 = vpack.c.bf16 %v9369_v5, %v9367_v21 }
0x158f   : > { %v4595_v38 = vpack.c.bf16 %v4583_v25, %v4582_v9 }
0x1594   : > { %v9371_v62 = vpop.f32.mrf.mxu0 }
0x1595   : > { %v4584_v33 = vmul.f32 %v9371_v62, %v9371_v62 }
0x159c   : > { %v9373_v35 = vpop.f32.mrf.mxu0 }
0x159d   : > { %v4585_v60 = vmul.f32 %v9373_v35, %v9373_v35  ;;  %v4523_v4 = vpack.c.bf16 %v9373_v35, %v9371_v62 }
0x159f   : > { %v4596_v13 = vpack.c.bf16 %v4585_v60, %v4584_v33 }
0x15a4   : > { %v9375_v1 = vpop.f32.mrf.mxu0 }
0x15a5   : > { %v4586_v47 = vmul.f32 %v9375_v1, %v9375_v1 }
0x15ac   : > { %v9377_v44 = vpop.f32.mrf.mxu0 }
0x15ad   : > { %v4587_v31 = vmul.f32 %v9377_v44, %v9377_v44  ;;  %v4524_v19 = vpack.c.bf16 %v9377_v44, %v9375_v1 }
0x15af   : > { %v4597_v29 = vpack.c.bf16 %v4587_v31, %v4586_v47 }
0x15b4   : > { %v9379_v42 = vpop.f32.mrf.mxu0 }
0x15b5   : > { %v4588_v10 = vmul.f32 %v9379_v42, %v9379_v42 }
0x15bc   : > { %v9381_v59 = vpop.f32.mrf.mxu0 }
0x15bd   : > { %v4589_v24 = vmul.f32 %v9381_v59, %v9381_v59  ;;  %v4525_v12 = vpack.c.bf16 %v9381_v59, %v9379_v42 }
0x15bf   : > { %v4598_v37 = vpack.c.bf16 %v4589_v24, %v4588_v10 }
0x15c4   : > { %v9383_v45 = vpop.f32.mrf.mxu0 }
0x15c5   : > { %v4590_v53 = vmul.f32 %v9383_v45, %v9383_v45 }
0x15cc   : > { %v9385_v40 = vpop.f32.mrf.mxu0 }
0x15cd   : > { %v4526_v20 = vpack.c.bf16 %v9385_v40, %v9383_v45  ;;  %v4591_v61 = vmul.f32 %v9385_v40, %v9385_v40 }
0x15cf   : > { %v4599_v2 = vpack.c.bf16 %v4591_v61, %v4590_v53  ;;  %4527 = vmatpush.bf16.msrb.mxu2 %v4526_v20 }
0x15d1   : > { %4600 = vmatpush.bf16.msrb.mxu3 %v4599_v2 }
0x15d3   : > { %4528 = vmatpush.bf16.msrb.mxu2 %v4525_v12 }
0x15d5   : > { %4601 = vmatpush.bf16.msrb.mxu3 %v4598_v37 }
0x15d7   : > { %4529 = vmatpush.bf16.msrb.mxu2 %v4524_v19 }
0x15d9   : > { %4602 = vmatpush.bf16.msrb.mxu3 %v4597_v29 }
0x15db   : > { %4530 = vmatpush.bf16.msrb.mxu2 %v4523_v4 }
0x15dd   : > { %4603 = vmatpush.bf16.msrb.mxu3 %v4596_v13 }
0x15df   : > { %4531 = vmatpush.bf16.msrb.mxu2 %v4522_v17 }
0x15e1   : > { %4604 = vmatpush.bf16.msrb.mxu3 %v4595_v38 }
0x15e3   : > { %4532 = vmatpush.bf16.msrb.mxu2 %v4521_v52 }
0x15e5   : > { %4605 = vmatpush.bf16.msrb.mxu3 %v4594_v23 }
0x15e7   : > { %4533 = vmatpush.bf16.msrb.mxu2 %v4520_v32 }
0x15e9   : > { %4606 = vmatpush.bf16.msrb.mxu3 %v4593_v30 }
0x15eb   : > { %4534 = vmatpush.bf16.msrb.mxu2 %v4519_v27 }
0x15ed   : > { %4607 = vmatpush.bf16.msrb.mxu3 %v4592_v0 }
0x15ee   : > { %4535 = vmatmul.bf16.vlgmr.msrb.gmra.mxu2 %v10164_v7 }
0x15f0   : > { %4608 = vmatmul.bf16.vlgmr.msrb.gmra.mxu3 %v10164_v7 }
0x15fe   : > { %4540 = vmatmul.bf16.gmra.mxu2 %v10165_v51 }
0x1600   : > { %4613 = vmatmul.bf16.gmra.mxu3 %v10165_v51 }
0x160e   : > { %4545 = vmatmul.bf16.gmra.mxu2 %v10166_v36 }
0x1610   : > { %4618 = vmatmul.bf16.gmra.mxu3 %v10166_v36 }
0x161e   : > { %4550 = vmatmul.bf16.gmra.mxu2 %v10167_v11 }
0x1620   : > { %4623 = vmatmul.bf16.gmra.mxu3 %v10167_v11 }
0x162e   : > { %4555 = vmatmul.bf16.gmra.mxu2 %v10168_v6 }
0x1630   : > { %4628 = vmatmul.bf16.gmra.mxu3 %v10168_v6 }
0x163e   : > { %4560 = vmatmul.bf16.gmra.mxu2 %v10169_v41 }
0x1640   : > { %4633 = vmatmul.bf16.gmra.mxu3 %v10169_v41 }
0x164e   : > { %4565 = vmatmul.bf16.gmra.mxu2 %v10170_v26 }
0x1650   : > { %4638 = vmatmul.bf16.gmra.mxu3 %v10170_v26 }
0x165e   : > { %4570 = vmatmul.bf16.gmra.mxu2 %v10171_v56 }
0x1660   : > { %4643 = vmatmul.bf16.gmra.mxu3 %v10171_v56 }
0x1671   : > { %v4536_v43 = vpop.f32.mrf.mxu2 }
0x1672   : > { %v4649_v28 = vmul.f32 %v4536_v43, %v4536_v43  ;;  %v4873_v58 = vsub.f32 %v9355_v63, %v4536_v43 }
0x1673   : > { %v4609_v55 = vpop.f32.mrf.mxu3 }
0x1674   : > { %v4665_v3 = vsub.f32 %v4609_v55, %v4649_v28 }
0x1676   : > { %v4681_v39 = vmax.f32 %v4665_v3, 0.0 }
0x1678   : > { %v4697_v46 = vadd.f32 1e-05, %v4681_v39 }
0x1679   : > { %v4538_v8 = vpop.f32.mrf.mxu2 }
0x167a   : > { %5965 = vrsqrt.f32 %v4697_v46  ;;  %v4650_v16 = vmul.f32 %v4538_v8, %v4538_v8  ;;  %vm4719_vm14 = vweird.f32 %v4697_v46  ;;  %v4874_v51 = vsub.f32 %v9357_v14, %v4538_v8 }
0x167b   : > { %v4611_v53 = vpop.f32.mrf.mxu3 }
0x167c   : > { %v4666_v20 = vsub.f32 %v4611_v53, %v4650_v16 }
0x167e   : > { %v4682_v61 = vmax.f32 %v4666_v20, 0.0 }
0x1680   : > { %v5966_v24 = vpop.eup %5965  ;;  %v4698_v2 = vadd.f32 1e-05, %v4682_v61 }
0x1681   : > { %v4714_v10 = vmul.f32 %v5966_v24, %v4697_v46  ;;  %v9451_v12 = vpop.f32.mrf.mxu2  ;;  %vm4720_vm13 = vweird.f32 %v5966_v24 }
0x1682   : > { %5967 = vrsqrt.f32 %v4698_v2  ;;  %v4651_v31 = vmul.f32 %v9451_v12, %v9451_v12  ;;  %vm4721_vm15 = vmor %vm4719_vm14, %vm4720_vm13  ;;  %vm4729_vm1 = vweird.f32 %v4698_v2  ;;  %v4875_v61 = vsub.f32 %v9359_v50, %v9451_v12 }
0x1683   : > { %v4715_v37 = vmul.f32 %v5966_v24, %v4714_v10  ;;  %v4614_v47 = vpop.f32.mrf.mxu3 }
0x1684   : > { %v4667_v19 = vsub.f32 %v4614_v47, %v4651_v31 }
0x1685   : > { %v4716_v60 = vmul.f32 0.5, %v4715_v37 }
0x1686   : > { %v4683_v29 = vmax.f32 %v4667_v19, 0.0 }
0x1687   : > { %v4717_v33 = vsub.f32 1.5, %v4716_v60 }
0x1688   : > { %v5968_v4 = vpop.eup %5967  ;;  %v4699_v25 = vadd.f32 1e-05, %v4683_v29 }
0x1689   : > { %v4718_v13 = vmul.f32 %v5966_v24, %v4717_v33  ;;  %v4724_v9 = vmul.f32 %v5968_v4, %v4698_v2  ;;  %v9455_v17 = vpop.f32.mrf.mxu2  ;;  %vm4730_vm0 = vweird.f32 %v5968_v4 }
0x168a   : > { %5969 = vrsqrt.f32 %v4699_v25  ;;  %v4652_v38 = vmul.f32 %v9455_v17, %v9455_v17  ;;  %vm4731_vm2 = vmor %vm4729_vm1, %vm4730_vm0  ;;  %vm4739_vm5 = vweird.f32 %v4699_v25  ;;  %v4876_v12 = vsub.f32 %v9361_v22, %v9455_v17 }
0x168b   : > { %v4725_v48 = vmul.f32 %v5968_v4, %v4724_v9  ;;  %v4616_v52 = vpop.f32.mrf.mxu3  ;;  %v4722_v34 = vsel %vm4721_vm15, %v5966_v24, %v4718_v13 }
0x168c   : > { %v4668_v23 = vsub.f32 %v4616_v52, %v4652_v38  ;;  %v4889_v18 = vmul.f32 %v4873_v58, %v4722_v34 }
0x168d   : > { %v4726_v32 = vmul.f32 0.5, %v4725_v48 }
0x168e   : > { %v4684_v49 = vmax.f32 %v4668_v23, 0.0  ;;  %v4905_v55 = vmax.f32 %v4889_v18, 0.0 }
0x168f   : > { %v4727_v30 = vsub.f32 1.5, %v4726_v32 }
0x1690   : > { %v5970_v54 = vpop.eup %5969  ;;  %v4700_v27 = vadd.f32 1e-05, %v4684_v49 }
0x1691   : > { %v4728_v0 = vmul.f32 %v5968_v4, %v4727_v30  ;;  %v4734_v7 = vmul.f32 %v5970_v54, %v4699_v25  ;;  %v9460_v63 = vpop.f32.mrf.mxu2  ;;  %vm4740_vm4 = vweird.f32 %v5970_v54 }
0x1692   : > { %5971 = vrsqrt.f32 %v4700_v27  ;;  %v4653_v36 = vmul.f32 %v9460_v63, %v9460_v63  ;;  %vm4741_vm6 = vmor %vm4739_vm5, %vm4740_vm4  ;;  %vm4749_vm8 = vweird.f32 %v4700_v27 }
0x1693   : > { %v4735_v11 = vmul.f32 %v5970_v54, %v4734_v7  ;;  %v4619_v6 = vpop.f32.mrf.mxu3  ;;  %v4732_v41 = vsel %vm4731_vm2, %v5968_v4, %v4728_v0 }
0x1694   : > { %v4669_v26 = vsub.f32 %v4619_v6, %v4653_v36  ;;  %v4890_v56 = vmul.f32 %v4874_v51, %v4732_v41  ;;  %v4877_v51 = vsub.f32 %v9363_v57, %v9460_v63 }
0x1695   : > { %v4736_v43 = vmul.f32 0.5, %v4735_v11 }
0x1696   : > { %v4685_v28 = vmax.f32 %v4669_v26, 0.0  ;;  %v4906_v3 = vmax.f32 %v4890_v56, 0.0 }
0x1697   : > { %v4737_v39 = vsub.f32 1.5, %v4736_v43 }
0x1698   : > { %v5972_v46 = vpop.eup %5971  ;;  %v4701_v16 = vadd.f32 1e-05, %v4685_v28  ;;  %v9465_v53 = vpack.c.bf16 %v4906_v3, %v4905_v55 }
0x1699   : > { %v4738_v14 = vmul.f32 %v5970_v54, %v4737_v39  ;;  %v4744_v8 = vmul.f32 %v5972_v46, %v4700_v27  ;;  %v9467_v20 = vpop.f32.mrf.mxu2  ;;  %vm4750_vm7 = vweird.f32 %v5972_v46 }
0x169a   : > { %5973 = vrsqrt.f32 %v4701_v16  ;;  %v4654_v24 = vmul.f32 %v9467_v20, %v9467_v20  ;;  %vm4751_vm9 = vmor %vm4749_vm8, %vm4750_vm7  ;;  %vm4759_vm11 = vweird.f32 %v4701_v16  ;;  %v4878_v63 = vsub.f32 %v9365_v15, %v9467_v20 }
0x169b   : > { %v4745_v2 = vmul.f32 %v5972_v46, %v4744_v8  ;;  %v4621_v10 = vpop.f32.mrf.mxu3  ;;  %v4742_v31 = vsel %vm4741_vm6, %v5970_v54, %v4738_v14 }
0x169c   : > { %v4670_v37 = vsub.f32 %v4621_v10, %v4654_v24  ;;  %v4891_v47 = vmul.f32 %v4875_v61, %v4742_v31 }
0x169d   : > { %v4746_v19 = vmul.f32 0.5, %v4745_v2 }
0x169e   : > { %v4686_v60 = vmax.f32 %v4670_v37, 0.0  ;;  %v4907_v32 = vmax.f32 %v4891_v47, 0.0 }
0x169f   : > { %v4747_v29 = vsub.f32 1.5, %v4746_v19 }
0x16a0   : > { %v5974_v33 = vpop.eup %5973  ;;  %v4702_v4 = vadd.f32 1e-05, %v4686_v60 }
0x16a1   : > { %v4748_v25 = vmul.f32 %v5972_v46, %v4747_v29  ;;  %v4754_v13 = vmul.f32 %v5974_v33, %v4701_v16  ;;  %v9473_v50 = vpop.f32.mrf.mxu2  ;;  %vm4760_vm10 = vweird.f32 %v5974_v33 }
0x16a2   : > { %5975 = vrsqrt.f32 %v4702_v4  ;;  %v4655_v9 = vmul.f32 %v9473_v50, %v9473_v50  ;;  %vm4761_vm12 = vmor %vm4759_vm11, %vm4760_vm10  ;;  %vm4769_vm14 = vweird.f32 %v4702_v4 }
0x16a3   : > { %v4755_v58 = vmul.f32 %v5974_v33, %v4754_v13  ;;  %v4624_v38 = vpop.f32.mrf.mxu3  ;;  %v4752_v48 = vsel %vm4751_vm9, %v5972_v46, %v4748_v25  ;;  %v4879_v13 = vsub.f32 %v9367_v21, %v9473_v50 }
0x16a4   : > { %v4671_v52 = vsub.f32 %v4624_v38, %v4655_v9  ;;  %v4892_v34 = vmul.f32 %v4876_v12, %v4752_v48 }
0x16a5   : > { %v4756_v23 = vmul.f32 0.5, %v4755_v58 }
0x16a6   : > { %v4687_v18 = vmax.f32 %v4671_v52, 0.0  ;;  %v4908_v49 = vmax.f32 %v4892_v34, 0.0 }
0x16a7   : > { %v4757_v30 = vsub.f32 1.5, %v4756_v23 }
0x16a8   : > { %v5976_v54 = vpop.eup %5975  ;;  %v4703_v27 = vadd.f32 1e-05, %v4687_v18  ;;  %v9479_v0 = vpack.c.bf16 %v4908_v49, %v4907_v32 }
0x16a9   : > { %v4758_v22 = vmul.f32 %v5974_v33, %v4757_v30  ;;  %v4764_v17 = vmul.f32 %v5976_v54, %v4702_v4  ;;  %v9481_v7 = vpop.f32.mrf.mxu2  ;;  %vm4770_vm13 = vweird.f32 %v5976_v54 }
0x16aa   : > { %5977 = vrsqrt.f32 %v4703_v27  ;;  %v4656_v36 = vmul.f32 %v9481_v7, %v9481_v7  ;;  %vm4771_vm15 = vmor %vm4769_vm14, %vm4770_vm13  ;;  %vm4779_vm1 = vweird.f32 %v4703_v27  ;;  %v4880_v50 = vsub.f32 %v9369_v5, %v9481_v7 }
0x16ab   : > { %v4765_v11 = vmul.f32 %v5976_v54, %v4764_v17  ;;  %v4626_v6 = vpop.f32.mrf.mxu3  ;;  %v4762_v41 = vsel %vm4761_vm12, %v5974_v33, %v4758_v22 }
0x16ac   : > { %v4672_v26 = vsub.f32 %v4626_v6, %v4656_v36  ;;  %v4893_v56 = vmul.f32 %v4877_v51, %v4762_v41 }
0x16ad   : > { %v4766_v43 = vmul.f32 0.5, %v4765_v11 }
0x16ae   : > { %v4688_v28 = vmax.f32 %v4672_v26, 0.0  ;;  %v4909_v47 = vmax.f32 %v4893_v56, 0.0 }
0x16af   : > { %v4767_v55 = vsub.f32 1.5, %v4766_v43 }
0x16b0   : > { %v5978_v3 = vpop.eup %5977  ;;  %v4704_v39 = vadd.f32 1e-05, %v4688_v28 }
0x16b1   : > { %v4768_v46 = vmul.f32 %v5976_v54, %v4767_v55  ;;  %v4774_v16 = vmul.f32 %v5978_v3, %v4703_v27  ;;  %v9487_v57 = vpop.f32.mrf.mxu2  ;;  %vm4780_vm0 = vweird.f32 %v5978_v3 }
0x16b2   : > { %5979 = vrsqrt.f32 %v4704_v39  ;;  %v4657_v14 = vmul.f32 %v9487_v57, %v9487_v57  ;;  %vm4781_vm2 = vmor %vm4779_vm1, %vm4780_vm0  ;;  %vm4789_vm5 = vweird.f32 %v4704_v39 }
0x16b3   : > { %v4775_v8 = vmul.f32 %v5978_v3, %v4774_v16  ;;  %v4629_v61 = vpop.f32.mrf.mxu3  ;;  %v4772_v24 = vsel %vm4771_vm15, %v5976_v54, %v4768_v46  ;;  %v4881_v46 = vsub.f32 %v9371_v62, %v9487_v57 }
0x16b4   : > { %v4673_v2 = vsub.f32 %v4629_v61, %v4657_v14  ;;  %v4894_v10 = vmul.f32 %v4878_v63, %v4772_v24 }
0x16b5   : > { %v4776_v31 = vmul.f32 0.5, %v4775_v8 }
0x16b6   : > { %v4689_v37 = vmax.f32 %v4673_v2, 0.0  ;;  %v4910_v19 = vmax.f32 %v4894_v10, 0.0 }
0x16b7   : > { %v4777_v60 = vsub.f32 1.5, %v4776_v31 }
0x16b8   : > { %v5980_v29 = vpop.eup %5979  ;;  %v4705_v33 = vadd.f32 1e-05, %v4689_v37  ;;  %v9493_v4 = vpack.c.bf16 %v4910_v19, %v4909_v47 }
0x16b9   : > { %v4778_v15 = vmul.f32 %v5978_v3, %v4777_v60  ;;  %v4784_v20 = vmul.f32 %v5980_v29, %v4704_v39  ;;  %v9495_v25 = vpop.f32.mrf.mxu2  ;;  %vm4790_vm4 = vweird.f32 %v5980_v29 }
0x16ba   : > { %5981 = vrsqrt.f32 %v4705_v33  ;;  %v4658_v12 = vmul.f32 %v9495_v25, %v9495_v25  ;;  %vm4791_vm6 = vmor %vm4789_vm5, %vm4790_vm4  ;;  %vm4799_vm8 = vweird.f32 %v4705_v33  ;;  %v4882_v57 = vsub.f32 %v9373_v35, %v9495_v25 }
0x16bb   : > { %v4785_v9 = vmul.f32 %v5980_v29, %v4784_v20  ;;  %v4631_v58 = vpop.f32.mrf.mxu3  ;;  %v4782_v38 = vsel %vm4781_vm2, %v5978_v3, %v4778_v15 }
0x16bc   : > { %v4674_v48 = vsub.f32 %v4631_v58, %v4658_v12  ;;  %v4895_v52 = vmul.f32 %v4879_v13, %v4782_v38 }
0x16bd   : > { %v4786_v34 = vmul.f32 0.5, %v4785_v9 }
0x16be   : > { %v4690_v23 = vmax.f32 %v4674_v48, 0.0  ;;  %v4911_v26 = vmax.f32 %v4895_v52, 0.0 }
0x16bf   : > { %v4787_v18 = vsub.f32 1.5, %v4786_v34 }
0x16c0   : > { %v5982_v32 = vpop.eup %5981  ;;  %v4706_v49 = vadd.f32 1e-05, %v4690_v23 }
0x16c1   : > { %v4788_v30 = vmul.f32 %v5980_v29, %v4787_v18  ;;  %v4794_v54 = vmul.f32 %v5982_v32, %v4705_v33  ;;  %v9501_v21 = vpop.f32.mrf.mxu2  ;;  %vm4800_vm7 = vweird.f32 %v5982_v32 }
0x16c2   : > { %5983 = vrsqrt.f32 %v4706_v49  ;;  %v4659_v27 = vmul.f32 %v9501_v21, %v9501_v21  ;;  %vm4801_vm9 = vmor %vm4799_vm8, %vm4800_vm7  ;;  %vm4809_vm11 = vweird.f32 %v4706_v49 }
0x16c3   : > { %v4795_v22 = vmul.f32 %v5982_v32, %v4794_v54  ;;  %v4634_v17 = vpop.f32.mrf.mxu3  ;;  %v4792_v51 = vsel %vm4791_vm6, %v5980_v29, %v4788_v30 }
0x16c4   : > { %v4675_v36 = vsub.f32 %v4634_v17, %v4659_v27  ;;  %v4896_v11 = vmul.f32 %v4880_v50, %v4792_v51  ;;  %v4883_v51 = vsub.f32 %v9375_v1, %v9501_v21 }
0x16c5   : > { %v4796_v6 = vmul.f32 0.5, %v4795_v22 }
0x16c6   : > { %v4691_v41 = vmax.f32 %v4675_v36, 0.0  ;;  %v4912_v56 = vmax.f32 %v4896_v11, 0.0 }
0x16c7   : > { %v4797_v43 = vsub.f32 1.5, %v4796_v6 }
0x16c8   : > { %v5984_v28 = vpop.eup %5983  ;;  %v4707_v55 = vadd.f32 1e-05, %v4691_v41  ;;  %v9507_v3 = vpack.c.bf16 %v4912_v56, %v4911_v26 }
0x16c9   : > { %v4798_v5 = vmul.f32 %v5982_v32, %v4797_v43  ;;  %v4804_v7 = vmul.f32 %v5984_v28, %v4706_v49  ;;  %v9509_v39 = vpop.f32.mrf.mxu2  ;;  %vm4810_vm10 = vweird.f32 %v5984_v28 }
0x16ca   : > { %5985 = vrsqrt.f32 %v4707_v55  ;;  %v4660_v16 = vmul.f32 %v9509_v39, %v9509_v39  ;;  %vm4811_vm12 = vmor %vm4809_vm11, %vm4810_vm10  ;;  %vm4819_vm14 = vweird.f32 %v4707_v55  ;;  %v4884_v41 = vsub.f32 %v9377_v44, %v9509_v39 }
0x16cb   : > { %v4805_v63 = vmul.f32 %v5984_v28, %v4804_v7  ;;  %v4636_v14 = vpop.f32.mrf.mxu3  ;;  %v4802_v8 = vsel %vm4801_vm9, %v5982_v32, %v4798_v5 }
0x16cc   : > { %v4676_v61 = vsub.f32 %v4636_v14, %v4660_v16  ;;  %v4897_v24 = vmul.f32 %v4881_v46, %v4802_v8 }
0x16cd   : > { %v4806_v2 = vmul.f32 0.5, %v4805_v63 }
0x16ce   : > { %v4692_v10 = vmax.f32 %v4676_v61, 0.0  ;;  %v4913_v9 = vmax.f32 %v4897_v24, 0.0 }
0x16cf   : > { %v4807_v31 = vsub.f32 1.5, %v4806_v2 }
0x16d0   : > { %v5986_v37 = vpop.eup %5985  ;;  %v4708_v47 = vadd.f32 1e-05, %v4692_v10 }
0x16d1   : > { %v4808_v19 = vmul.f32 %v5984_v28, %v4807_v31  ;;  %v4814_v60 = vmul.f32 %v5986_v37, %v4707_v55  ;;  %v9515_v62 = vpop.f32.mrf.mxu2  ;;  %vm4820_vm13 = vweird.f32 %v5986_v37 }
0x16d2   : > { %5987 = vrsqrt.f32 %v4708_v47  ;;  %v4661_v12 = vmul.f32 %v9515_v62, %v9515_v62  ;;  %vm4821_vm15 = vmor %vm4819_vm14, %vm4820_vm13  ;;  %vm4829_vm1 = vweird.f32 %v4708_v47 }
0x16d3   : > { %v4815_v29 = vmul.f32 %v5986_v37, %v4814_v60  ;;  %v4639_v33 = vpop.f32.mrf.mxu3  ;;  %v4812_v15 = vsel %vm4811_vm12, %v5984_v28, %v4808_v19 }
0x16d4   : > { %v4898_v20 = vmul.f32 %v4882_v57, %v4812_v15  ;;  %v4677_v35 = vsub.f32 %v4639_v33, %v4661_v12 }
0x16d5   : > { %v4816_v13 = vmul.f32 0.5, %v4815_v29 }
0x16d6   : > { %v4914_v58 = vmax.f32 %v4898_v20, 0.0  ;;  %v4693_v50 = vmax.f32 %v4677_v35, 0.0 }
0x16d7   : > { %v4817_v38 = vsub.f32 1.5, %v4816_v13 }
0x16d8   : > { %v5988_v48 = vpop.eup %5987  ;;  %v9521_v52 = vpack.c.bf16 %v4914_v58, %v4913_v9  ;;  %v4709_v26 = vadd.f32 1e-05, %v4693_v50 }
0x16d9   : > { %v4824_v34 = vmul.f32 %v5988_v48, %v4708_v47  ;;  %v9523_v23 = vpop.f32.mrf.mxu2  ;;  %v4818_v18 = vmul.f32 %v5986_v37, %v4817_v38  ;;  %vm4830_vm0 = vweird.f32 %v5988_v48 }
0x16da   : > { %v4662_v25 = vmul.f32 %v9523_v23, %v9523_v23  ;;  %vm4831_vm2 = vmor %vm4829_vm1, %vm4830_vm0  ;;  %vm4839_vm11 = vweird.f32 %v4709_v26 }
0x16db   : > { %v4825_v32 = vmul.f32 %v5988_v48, %v4824_v34  ;;  %v4641_v49 = vpop.f32.mrf.mxu3  ;;  %v4822_v17 = vsel %vm4821_vm15, %v5986_v37, %v4818_v18  ;;  %v5668_v18 = vld [vmem:[%s9750_s3 + $0x1e4] sm:$0xf] }
0x16dc   : > { %v4678_v30 = vsub.f32 %v4641_v49, %v4662_v25  ;;  %v4899_v43 = vmul.f32 %v4883_v51, %v4822_v17 }
0x16dd   : > { %v4826_v54 = vmul.f32 0.5, %v4825_v32 }
0x16de   : > { %v4694_v27 = vmax.f32 %v4678_v30, 0.0  ;;  %v4915_v21 = vmax.f32 %v4899_v43, 0.0 }
0x16df   : > { %v4827_v22 = vsub.f32 1.5, %v4826_v54 }
0x16e0   : > { %v4710_v36 = vadd.f32 1e-05, %v4694_v27 }
0x16e1   : > { %v4828_v11 = vmul.f32 %v5988_v48, %v4827_v22  ;;  %v9529_v6 = vpop.f32.mrf.mxu2  ;;  %v4886_v22 = vsub.f32 %v9381_v59, %v9523_v23  ;;  %v5611_v59 = vld [vmem:[%s9750_s3 + $0x248] sm:$0xf0]  ;;  %v5681_v23 = vld [vmem:[%s9750_s3 + $0x244] sm:$0xf0] }
0x16e2   : > { %v4663_v56 = vmul.f32 %v9529_v6, %v9529_v6  ;;  %5989 = vrsqrt.f32 %v4710_v36  ;;  %vm4849_vm8 = vweird.f32 %v4710_v36  ;;  %v4887_v54 = vsub.f32 %v9383_v45, %v9529_v6 }
0x16e3   : > { %v4644_v28 = vpop.f32.mrf.mxu3  ;;  %v4832_v55 = vsel %vm4831_vm2, %v5988_v48, %v4828_v11  ;;  %5991 = vrsqrt.f32 %v4709_v26 }
0x16e4   : > { %v4679_v5 = vsub.f32 %v4644_v28, %v4663_v56  ;;  %v4900_v7 = vmul.f32 %v4884_v41, %v4832_v55  ;;  %v4885_v41 = vsub.f32 %v9379_v42, %v9515_v62  ;;  %v5680_v42 = vld [vmem:[%s9750_s3 + $0x244] sm:$0xf] }
0x16e5   : > { %v5614_v62 = vor.u32 %v5680_v42, %v5611_v59 }
0x16e6   : > { %v4695_v1 = vmax.f32 %v4679_v5, 0.0  ;;  %v4916_v46 = vmax.f32 %v4900_v7, 0.0 }
0x16e7   : > { %5131 = vmatpush.bf16.msra.mxu2 %v5614_v62 }
0x16e8   : > { %v4711_v16 = vadd.f32 1e-05, %v4695_v1  ;;  %v9535_v63 = vpack.c.bf16 %v4916_v46, %v4915_v21  ;;  %v5990_v44 = vpop.eup %5989  ;;  %v6045_v1 = vld [vmem:[%s6223_s9] sm:$0xff]  ;;  %v5603_v21 = vld [vmem:[%s9750_s3 + $0x238] sm:$0xf0] }
0x16e9   : > { %v4573_v14 = vpop.f32.mrf.mxu2  ;;  %v5992_v61 = vpop.eup %5991  ;;  %v4844_v2 = vmul.f32 %v5990_v44, %v4710_v36  ;;  %vm4850_vm5 = vweird.f32 %v5990_v44  ;;  %v5601_v46 = vld [vmem:[%s9750_s3 + $0x230] sm:$0xf] }
0x16ea   : > { %5993 = vrsqrt.f32 %v4711_v16  ;;  %v4664_v39 = vmul.f32 %v4573_v14, %v4573_v14  ;;  %v4834_v31 = vmul.f32 %v5992_v61, %v4709_v26  ;;  %vm4859_vm6 = vweird.f32 %v4711_v16  ;;  %vm4851_vm12 = vmor %vm4849_vm8, %vm4850_vm5 }
0x16eb   : > { %v4646_v8 = vpop.f32.mrf.mxu3  ;;  %v4845_v19 = vmul.f32 %v5990_v44, %v4844_v2  ;;  %vm4840_vm7 = vweird.f32 %v5992_v61  ;;  %v4888_v17 = vsub.f32 %v9385_v40, %v4573_v14  ;;  %v5609_v40 = vld [vmem:[%s9750_s3 + $0x240] sm:$0xf]  ;;  %v5595_v14 = vld [vmem:[%s9750_s3 + $0x228] sm:$0xf0]  ;;  %v5674_v2 = vld [vmem:[%s9750_s3 + $0x214] sm:$0xf] }
0x16ec   : > { %v4680_v24 = vsub.f32 %v4646_v8, %v4664_v39  ;;  %v4835_v57 = vmul.f32 %v5992_v61, %v4834_v31  ;;  %vm4841_vm13 = vmor %vm4839_vm11, %vm4840_vm7  ;;  %v5677_v8 = vld [vmem:[%s9750_s3 + $0x224] sm:$0xf0]  ;;  %v5585_v31 = vld [vmem:[%s9750_s3 + $0x210] sm:$0xf] }
0x16ed   : > { %v4846_v33 = vmul.f32 0.5, %v4845_v19 }
0x16ee   : > { %v4696_v10 = vmax.f32 %v4680_v24, 0.0  ;;  %v4836_v20 = vmul.f32 0.5, %v4835_v57  ;;  %v6047_v24 = vld [vmem:[%s6223_s9 + $0x10] sm:$0xff]  ;;  %v5672_v57 = vld [vmem:[%s9750_s3 + $0x204] sm:$0xf] }
0x16ef   : > { %v4847_v9 = vsub.f32 1.5, %v4846_v33  ;;  %v5577_v33 = vld [vmem:[%s9750_s3 + $0x200] sm:$0xf] }
0x16f0   : > { %v5994_v37 = vpop.eup %5993  ;;  %v4712_v47 = vadd.f32 1e-05, %v4696_v10  ;;  %v4837_v38 = vsub.f32 1.5, %v4836_v20  ;;  %v5587_v10 = vld [vmem:[%s9750_s3 + $0x218] sm:$0xf0] }
0x16f1   : > { %v4854_v60 = vmul.f32 %v5994_v37, %v4711_v16  ;;  %vm4860_vm4 = vweird.f32 %v5994_v37  ;;  %v4848_v35 = vmul.f32 %v5990_v44, %v4847_v9  ;;  %v6046_v16 = vld [vmem:[%s6223_s9 + $0x8] sm:$0xff]  ;;  %v5670_v9 = vld [vmem:[%s9750_s3 + $0x1f4] sm:$0xf] }
0x16f2   : > { %5995 = vrsqrt.f32 %v4712_v47  ;;  %vm9537_vm9 = vmor %vm4859_vm6, %vm4860_vm4  ;;  %v4838_v32 = vmul.f32 %v5992_v61, %v4837_v38  ;;  %vm4869_vm14 = vweird.f32 %v4712_v47  ;;  %v5673_v20 = vld [vmem:[%s9750_s3 + $0x204] sm:$0xf0]  ;;  %v5569_v38 = vld [vmem:[%s9750_s3 + $0x1f0] sm:$0xf] }
0x16f3   : > { %v4855_v29 = vmul.f32 %v5994_v37, %v4854_v60  ;;  %v4852_v27 = vsel %vm4851_vm12, %v5990_v44, %v4848_v35  ;;  %v5593_v44 = vld [vmem:[%s9750_s3 + $0x220] sm:$0xf]  ;;  %v6048_v60 = vld [vmem:[%s6223_s9 + $0x18] sm:$0xff] }
0x16f4   : > { %v4842_v11 = vsel %vm4841_vm13, %v5992_v61, %v4838_v32  ;;  %v4902_v56 = vmul.f32 %v4886_v22, %v4852_v27  ;;  %v5594_v61 = vor.u32 %v5677_v8, %v5593_v44  ;;  %v5563_v32 = vld [vmem:[%s9750_s3 + $0x1e8] sm:$0xf0]  ;;  %v6051_v27 = vld [vmem:[%s6223_s9 + $0x30] sm:$0xff] }
0x16f5   : > { %v4856_v15 = vmul.f32 0.5, %v4855_v29  ;;  %v4901_v6 = vmul.f32 %v4885_v41, %v4842_v11  ;;  %v5579_v29 = vld [vmem:[%s9750_s3 + $0x208] sm:$0xf0]  ;;  %v5553_v22 = vld [vmem:[%s9750_s3 + $0x1d0] sm:$0xf] }
0x16f6   : > { %v4918_v55 = vmax.f32 %v4902_v56, 0.0  ;;  %v5555_v11 = vld [vmem:[%s9750_s3 + $0x1d8] sm:$0xf0] }
0x16f7   : > { %v4857_v13 = vsub.f32 1.5, %v4856_v15  ;;  %v4917_v5 = vmax.f32 %v4901_v6, 0.0  ;;  %v5582_v15 = vor.u32 %v5672_v57, %v5579_v29 }
0x16f8   : > { %v5996_v12 = vpop.eup %5995 }
0x16f9   : > { %v4864_v58 = vmul.f32 %v5996_v12, %v4712_v47  ;;  %v4858_v48 = vmul.f32 %v5994_v37, %v4857_v13  ;;  %vm4870_vm10 = vweird.f32 %v5996_v12  ;;  %v4943_v7 = vpack.c.bf16 %v4918_v55, %v4917_v5  ;;  %v5675_v47 = vld [vmem:[%s9750_s3 + $0x214] sm:$0xf0] }
0x16fa   : > { %vm4871_vm15 = vmor %vm4869_vm14, %vm4870_vm10  ;;  %v5586_v19 = vor.u32 %v5675_v47, %v5585_v31  ;;  %v5578_v13 = vor.u32 %v5673_v20, %v5577_v33 }
0x16fb   : > { %v4865_v34 = vmul.f32 %v5996_v12, %v4864_v58  ;;  %v4862_v49 = vsel %vm9537_vm9, %v5994_v37, %v4858_v48  ;;  %v5590_v37 = vor.u32 %v5674_v2, %v5587_v10  ;;  %v5571_v58 = vld [vmem:[%s9750_s3 + $0x1f8] sm:$0xf0] }
0x16fc   : > { %v4903_v51 = vmul.f32 %v4887_v54, %v4862_v49  ;;  %v5574_v48 = vor.u32 %v5670_v9, %v5571_v58  ;;  %v5566_v49 = vor.u32 %v5668_v18, %v5563_v32  ;;  %v5669_v54 = vld [vmem:[%s9750_s3 + $0x1e4] sm:$0xf0] }
0x16fd   : > { %v4866_v25 = vmul.f32 0.5, %v4865_v34  ;;  %v5671_v34 = vld [vmem:[%s9750_s3 + $0x1f4] sm:$0xf0] }
0x16fe   : > { %v4919_v43 = vmax.f32 %v4903_v51, 0.0  ;;  %v5570_v35 = vor.u32 %v5671_v34, %v5569_v38  ;;  %v5666_v51 = vld [vmem:[%s9750_s3 + $0x1d4] sm:$0xf] }
0x16ff   : > { %v4867_v30 = vsub.f32 1.5, %v4866_v25  ;;  %v6050_v25 = vld [vmem:[%s6223_s9 + $0x28] sm:$0xff]  ;;  %v5558_v41 = vor.u32 %v5666_v51, %v5555_v11 }
0x1701   : > { %v4868_v50 = vmul.f32 %v5996_v12, %v4867_v30  ;;  %v5561_v30 = vld [vmem:[%s9750_s3 + $0x1e0] sm:$0xf] }
0x1703   : > { %v4872_v36 = vsel %vm4871_vm15, %v5996_v12, %v4868_v50  ;;  %v6049_v12 = vld [vmem:[%s6223_s9 + $0x20] sm:$0xff]  ;;  %v5562_v50 = vor.u32 %v5669_v54, %v5561_v30 }
0x1704   : > { %v4904_v26 = vmul.f32 %v4888_v17, %v4872_v36  ;;  %v5667_v17 = vld [vmem:[%s9750_s3 + $0x1d4] sm:$0xf0] }
0x1705   : > { %v5554_v36 = vor.u32 %v5667_v17, %v5553_v22 }
0x1706   : > { %v4920_v45 = vmax.f32 %v4904_v26, 0.0  ;;  %v6052_v26 = vld [vmem:[%s6223_s9 + $0x38] sm:$0xff]  ;;  %s203_s9 = sand.u32 1, %s6107_s16  }
0x1707   : > { %s5306_s12 = sshll.u32 %s203_s9, 8  ;;  %s5213_s29 = scalar_lea.sflag [#allocation3], %s203_s9 }
0x1708   : > { %v4944_v28 = vpack.c.bf16 %v4920_v45, %v4919_v43  ;;  %s9663_s13 = scalar_lea.vmem [#allocation2], %s5306_s12 }
0x1709   : > { %s5225_s27 = sshll.u32 %s9663_s13, 4  ;;  %s5226_s27 = int_to_ptr.vmem [resolvable:$true] %s5225_s27 }
0x170a   : > { %4945 = vmatpush.bf16.msra.mxu1 %v4944_v28 }
0x170e   : > { %4946 = vmatpush.bf16.msra.mxu1 %v4943_v7 }
0x1712   : > { %4947 = vmatpush.bf16.msra.mxu1 %v9535_v63  ;;  %v5676_v63 = vld [vmem:[%s9750_s3 + $0x224] sm:$0xf] }
0x1713   : > { %v5598_v39 = vor.u32 %v5676_v63, %v5595_v14 }
0x1716   : > { %4948 = vmatpush.bf16.msra.mxu1 %v9521_v52  ;;  %v5610_v52 = vor.u32 %v5681_v23, %v5609_v40 }
0x1718   : > { %5082 = vmatpush.bf16.msra.mxu0 %v5610_v52 }
0x171a   : > { %4949 = vmatpush.bf16.msra.mxu1 %v9507_v3  ;;  %v5678_v3 = vld [vmem:[%s9750_s3 + $0x234] sm:$0xf] }
0x171e   : > { %4950 = vmatpush.bf16.msra.mxu1 %v9493_v4  ;;  %v5606_v4 = vor.u32 %v5678_v3, %v5603_v21 }
0x1720   : > { %5132 = vmatpush.bf16.msra.mxu2 %v5606_v4 }
0x1722   : > { %4951 = vmatpush.bf16.msra.mxu1 %v9479_v0 }
0x1724   : > { %5133 = vmatpush.bf16.msra.mxu2 %v5598_v39 }
0x1726   : > { %4952 = vmatpush.bf16.msra.mxu1 %v9465_v53  ;;  %v5679_v53 = vld [vmem:[%s9750_s3 + $0x234] sm:$0xf0] }
0x1727   : > { %v5602_v0 = vor.u32 %v5679_v53, %v5601_v46 }
0x1728   : > { %5134 = vmatpush.bf16.msra.mxu2 %v5590_v37 }
0x1729   : > { %4953 = vmatmul.bf16.vlgmr.msra.gmra.mxu1 %v6045_v1  ;;  %5083 = vmatpush.bf16.msra.mxu0 %v5602_v0 }
0x172c   : > { %5135 = vmatpush.bf16.msra.mxu2 %v5582_v15 }
0x172d   : > { %5084 = vmatpush.bf16.msra.mxu0 %v5594_v61 }
0x1730   : > { %5136 = vmatpush.bf16.msra.mxu2 %v5574_v48 }
0x1731   : > { %5085 = vmatpush.bf16.msra.mxu0 %v5586_v19 }
0x1734   : > { %5137 = vmatpush.bf16.msra.mxu2 %v5566_v49 }
0x1735   : > { %5086 = vmatpush.bf16.msra.mxu0 %v5578_v13 }
0x1738   : > { %5138 = vmatpush.bf16.msra.mxu2 %v5558_v41 }
0x1739   : > { %4958 = vmatmul.bf16.gmra.mxu1 %v6046_v16  ;;  %5087 = vmatpush.bf16.msra.mxu0 %v5570_v35 }
0x173d   : > { %5088 = vmatpush.bf16.msra.mxu0 %v5562_v50 }
0x1741   : > { %5089 = vmatpush.bf16.msra.mxu0 %v5554_v36 }
0x1749   : > { %4963 = vmatmul.bf16.gmra.mxu1 %v6047_v24 }
0x1759   : > { %4968 = vmatmul.bf16.gmra.mxu1 %v6048_v60 }
0x1769   : > { %4973 = vmatmul.bf16.gmra.mxu1 %v6049_v12 }
0x1779   : > { %4978 = vmatmul.bf16.gmra.mxu1 %v6050_v25 }
0x1789   : > { %4983 = vmatmul.bf16.gmra.mxu1 %v6051_v27 }
0x1799   : > { %4988 = vmatmul.bf16.gmra.mxu1 %v6052_v26 }
0x17a6   : > { %v4954_v56 = vpop.f32.mrf.mxu1 }
0x17ae   : > { %v4956_v43 = vpop.f32.mrf.mxu1 }
0x17af   : > { %v4994_v45 = vpack.c.bf16 %v4956_v43, %v4954_v56 }
0x17b1   : > { %5090 = vmatmul.bf16.vlgmr.msra.gmra.mxu0 %v4994_v45  ;;  %5139 = vmatmul.bf16.vlgmr.msra.gmra.mxu2 %v4994_v45 }
0x17b6   : > { %v4959_v6 = vpop.f32.mrf.mxu1 }
0x17be   : > { %v4961_v28 = vpop.f32.mrf.mxu1 }
0x17bf   : > { %v4995_v55 = vpack.c.bf16 %v4961_v28, %v4959_v6 }
0x17c1   : > { %5095 = vmatmul.bf16.gmra.mxu0 %v4995_v55  ;;  %5144 = vmatmul.bf16.gmra.mxu2 %v4995_v55 }
0x17c6   : > { %v4964_v5 = vpop.f32.mrf.mxu1 }
0x17ce   : > { %v4966_v7 = vpop.f32.mrf.mxu1 }
0x17cf   : > { %v4996_v42 = vpack.c.bf16 %v4966_v7, %v4964_v5 }
0x17d1   : > { %5100 = vmatmul.bf16.gmra.mxu0 %v4996_v42  ;;  %5149 = vmatmul.bf16.gmra.mxu2 %v4996_v42 }
0x17d6   : > { %v4969_v59 = vpop.f32.mrf.mxu1 }
0x17de   : > { %v4971_v40 = vpop.f32.mrf.mxu1 }
0x17df   : > { %v4997_v62 = vpack.c.bf16 %v4971_v40, %v4969_v59 }
0x17e1   : > { %5105 = vmatmul.bf16.gmra.mxu0 %v4997_v62  ;;  %5154 = vmatmul.bf16.gmra.mxu2 %v4997_v62 }
0x17e6   : > { %v4974_v23 = vpop.f32.mrf.mxu1 }
0x17ee   : > { %v4976_v52 = vpop.f32.mrf.mxu1 }
0x17ef   : > { %v4998_v1 = vpack.c.bf16 %v4976_v52, %v4974_v23 }
0x17f1   : > { %5110 = vmatmul.bf16.gmra.mxu0 %v4998_v1  ;;  %5159 = vmatmul.bf16.gmra.mxu2 %v4998_v1 }
0x17f6   : > { %v4979_v3 = vpop.f32.mrf.mxu1 }
0x17fe   : > { %v4981_v21 = vpop.f32.mrf.mxu1 }
0x17ff   : > { %v4999_v46 = vpack.c.bf16 %v4981_v21, %v4979_v3 }
0x1801   : > { %5115 = vmatmul.bf16.gmra.mxu0 %v4999_v46  ;;  %5164 = vmatmul.bf16.gmra.mxu2 %v4999_v46 }
0x1806   : > { %v4984_v4 = vpop.f32.mrf.mxu1 }
0x180e   : > { %v4986_v53 = vpop.f32.mrf.mxu1 }
0x180f   : > { %v5000_v0 = vpack.c.bf16 %v4986_v53, %v4984_v4 }
0x1811   : > { %5120 = vmatmul.bf16.gmra.mxu0 %v5000_v0  ;;  %5169 = vmatmul.bf16.gmra.mxu2 %v5000_v0 }
0x1816   : > { %v4989_v16 = vpop.f32.mrf.mxu1 }
0x181e   : > { %v4991_v63 = vpop.f32.mrf.mxu1 }
0x181f   : > { %v5001_v14 = vpack.c.bf16 %v4991_v63, %v4989_v16 }
0x1821   : > { %5125 = vmatmul.bf16.gmra.mxu0 %v5001_v14  ;;  %5174 = vmatmul.bf16.gmra.mxu2 %v5001_v14 }
0x182e   : > { %v5091_v44 = vpop.f32.mrf.mxu0 }
0x182f   : > { %5180 = vst [vmem:[%s9663_s13] sm:$0xff] %v5091_v44 }
0x1834   : > { %v5140_v39 = vpop.f32.mrf.mxu2 }
0x1835   : > { %5181 = vst.msk [vmem:[%s9663_s13 + $0x8] sm:$0xff] %vm983_vm3, %v5140_v39 }
0x1836   : > { %v5093_v8 = vpop.f32.mrf.mxu0 }
0x1837   : > { %5182 = vst [vmem:[%s9663_s13 + $0x10] sm:$0xff] %v5093_v8 }
0x183c   : > { %v5142_v61 = vpop.f32.mrf.mxu2 }
0x183d   : > { %5183 = vst.msk [vmem:[%s9663_s13 + $0x18] sm:$0xff] %vm983_vm3, %v5142_v61 }
0x183e   : > { %v5096_v24 = vpop.f32.mrf.mxu0 }
0x183f   : > { %5184 = vst [vmem:[%s9663_s13 + $0x20] sm:$0xff] %v5096_v24 }
0x1844   : > { %v5145_v2 = vpop.f32.mrf.mxu2 }
0x1845   : > { %5185 = vst.msk [vmem:[%s9663_s13 + $0x28] sm:$0xff] %vm983_vm3, %v5145_v2 }
0x1846   : > { %v5098_v10 = vpop.f32.mrf.mxu0 }
0x1847   : > { %5186 = vst [vmem:[%s9663_s13 + $0x30] sm:$0xff] %v5098_v10 }
0x184c   : > { %v5147_v31 = vpop.f32.mrf.mxu2 }
0x184d   : > { %5187 = vst.msk [vmem:[%s9663_s13 + $0x38] sm:$0xff] %vm983_vm3, %v5147_v31 }
0x184e   : > { %v5101_v37 = vpop.f32.mrf.mxu0 }
0x184f   : > { %5188 = vst [vmem:[%s9663_s13 + $0x40] sm:$0xff] %v5101_v37 }
0x1854   : > { %v5150_v47 = vpop.f32.mrf.mxu2 }
0x1855   : > { %5189 = vst.msk [vmem:[%s9663_s13 + $0x48] sm:$0xff] %vm983_vm3, %v5150_v47 }
0x1856   : > { %v5103_v19 = vpop.f32.mrf.mxu0 }
0x1857   : > { %5190 = vst [vmem:[%s9663_s13 + $0x50] sm:$0xff] %v5103_v19 }
0x185c   : > { %v5152_v60 = vpop.f32.mrf.mxu2 }
0x185d   : > { %5191 = vst.msk [vmem:[%s9663_s13 + $0x58] sm:$0xff] %vm983_vm3, %v5152_v60 }
0x185e   : > { %v5106_v57 = vpop.f32.mrf.mxu0 }
0x185f   : > { %5192 = vst [vmem:[%s9663_s13 + $0x60] sm:$0xff] %v5106_v57 }
0x1864   : > { %v5155_v29 = vpop.f32.mrf.mxu2 }
0x1865   : > { %5193 = vst.msk [vmem:[%s9663_s13 + $0x68] sm:$0xff] %vm983_vm3, %v5155_v29 }
0x1866   : > { %v5108_v33 = vpop.f32.mrf.mxu0 }
0x1867   : > { %5194 = vst [vmem:[%s9663_s13 + $0x70] sm:$0xff] %v5108_v33 }
0x186c   : > { %v5157_v15 = vpop.f32.mrf.mxu2 }
0x186d   : > { %5195 = vst.msk [vmem:[%s9663_s13 + $0x78] sm:$0xff] %vm983_vm3, %v5157_v15 }
0x186e   : > { %v5111_v20 = vpop.f32.mrf.mxu0 }
0x186f   : > { %5196 = vst [vmem:[%s9663_s13 + $0x80] sm:$0xff] %v5111_v20 }
0x1874   : > { %v5160_v13 = vpop.f32.mrf.mxu2 }
0x1875   : > { %5197 = vst.msk [vmem:[%s9663_s13 + $0x88] sm:$0xff] %vm983_vm3, %v5160_v13 }
0x1876   : > { %v5113_v12 = vpop.f32.mrf.mxu0 }
0x1877   : > { %5198 = vst [vmem:[%s9663_s13 + $0x90] sm:$0xff] %v5113_v12 }
0x187c   : > { %v5162_v9 = vpop.f32.mrf.mxu2 }
0x187d   : > { %5199 = vst.msk [vmem:[%s9663_s13 + $0x98] sm:$0xff] %vm983_vm3, %v5162_v9 }
0x187e   : > { %v5116_v58 = vpop.f32.mrf.mxu0 }
0x187f   : > { %5200 = vst [vmem:[%s9663_s13 + $0xa0] sm:$0xff] %v5116_v58 }
0x1884   : > { %v5165_v38 = vpop.f32.mrf.mxu2 }
0x1885   : > { %5201 = vst.msk [vmem:[%s9663_s13 + $0xa8] sm:$0xff] %vm983_vm3, %v5165_v38 }
0x1886   : > { %v5118_v48 = vpop.f32.mrf.mxu0 }
0x1887   : > { %5202 = vst [vmem:[%s9663_s13 + $0xb0] sm:$0xff] %v5118_v48 }
0x188c   : > { %v5167_v34 = vpop.f32.mrf.mxu2 }
0x188d   : > { %5203 = vst.msk [vmem:[%s9663_s13 + $0xb8] sm:$0xff] %vm983_vm3, %v5167_v34 }
0x188e   : > { %v5121_v35 = vpop.f32.mrf.mxu0 }
0x188f   : > { %5204 = vst [vmem:[%s9663_s13 + $0xc0] sm:$0xff] %v5121_v35 }
0x1894   : > { %v5170_v25 = vpop.f32.mrf.mxu2 }
0x1895   : > { %5205 = vst.msk [vmem:[%s9663_s13 + $0xc8] sm:$0xff] %vm983_vm3, %v5170_v25 }
0x1896   : > { %v5123_v18 = vpop.f32.mrf.mxu0 }
0x1897   : > { %5206 = vst [vmem:[%s9663_s13 + $0xd0] sm:$0xff] %v5123_v18 }
0x189c   : > { %v5172_v32 = vpop.f32.mrf.mxu2 }
0x189d   : > { %5207 = vst.msk [vmem:[%s9663_s13 + $0xd8] sm:$0xff] %vm983_vm3, %v5172_v32 }
0x189e   : > { %v5126_v49 = vpop.f32.mrf.mxu0 }
0x189f   : > { %5208 = vst [vmem:[%s9663_s13 + $0xe0] sm:$0xff] %v5126_v49 }
0x18a4   : > { %v5175_v30 = vpop.f32.mrf.mxu2 }
0x18a5   : > { %5209 = vst.msk [vmem:[%s9663_s13 + $0xe8] sm:$0xff] %vm983_vm3, %v5175_v30 }
0x18a6   : > { %v5128_v54 = vpop.f32.mrf.mxu0 }
0x18a7   : > { %5210 = vst [vmem:[%s9663_s13 + $0xf0] sm:$0xff] %v5128_v54 }
0x18ac   : > { %v5177_v50 = vpop.f32.mrf.mxu2 }
0x18ad   : > { %5211 = vst.msk [vmem:[%s9663_s13 + $0xf8] sm:$0xff] %vm983_vm3, %v5177_v50 }
0x18ae   : > { %6080 = shalt.err (!%p6077_p3)
}
0x18af   : > { %s6118_s11 = smov 256   ;;  %s6119_s9 = smov 16  }
0x18b0   : > { %5699 = dma.vmem_to_hbm [thread:$0]  (%p6183_p5), %s5226_s27, 4096, %s5228_s28, %s5213_s29, %s6118_s11, %s6118_s11, %s6119_s9  }
0x18b1 PF: > { %p5705_p4 = scmp.ge.s32.totalorder %s6115_s18, 2  ;;  %s5242_s12 = sand.u32 1, %s6103_s15  }
0x18b2   : > { %s5243_s13 = scalar_lea.sflag [#allocation3], %s5242_s12 }
0x18b3   : > { %p5702_p7 = pnand %p5705_p4, %p6187_p6 }
0x18b5   : > { %p5703_p8 = pneg %p5702_p7 }
0x18b7   : > { %6098 = dma.done.wait (%p5703_p8), %s5243_s13, 4096  }
0x18b8   : > { %6100 = vsyncadd (%p5703_p8), %s5243_s13, 4294963200  ;;  %p14_p9 = scmp.ge.s32.totalorder %s6170_s21, 4   ;;  %s10174_s15 = smov %s6107_s16 }
0x18b9   : > { %s10175_s16 = smov %s6111_s17  ;;  %s10176_s17 = smov %s6181_s24 }
0x18ba   : > { %s10177_s18 = smov %s6170_s21  ;;  %16 = sbr.rel (!%p14_p9) target bundleno = 3 (0x3), region = 74 }
0x18bf   :  { %5249 = vsyncpa [#allocation3], 1 }
0x18c0   :  { %5251 = vsyncpa [#allocation3 + $0x1], 1 }

</bundles_post_ra>
